<compile_context>
chip_gen: v5e
topology: v5e:2x2
jax: 0.10.0
libtpu: 0.0.40
codegen_flags: <defaults>
</compile_context>

<pallas_src>
import math

import numpy as np
import jax
import jax.numpy as jnp
from jax.experimental import pallas as pl
from jax.experimental.pallas import tpu as pltpu

# ---- model hyper-parameters (small, consistent with the module) -------------
MODEL_DIM = 32            # model_dim
NUM_STREAMLINES = 16      # decoder query sequence length
NUM_HEADS = 4
HEAD_DIM = MODEL_DIM // NUM_HEADS
DIM_FF = 64               # dim_feedforward
NUM_LAYERS = 2            # num_decoder_layers
NUM_TOKENS = 8            # encoder output tokens
OUT_DIM = 32 * 3          # output_mlp final width (96)
BATCH = 2
EPS = 1e-5                # torch.nn.LayerNorm default eps

LANE = 128                # lane-tile width; every slab sub-block is LANE-aligned
BS = BATCH * NUM_STREAMLINES    # 32 batch-folded query rows
BT = BATCH * NUM_TOKENS         # 16 batch-folded context rows

# ---- 128-lane-aligned packed weight slab layout (columns, per layer) ---------
W_SA_Q = 0 * LANE        # (32, 32)  scale folded in
W_SA_K = 1 * LANE        # (32, 32)
W_SA_V = 2 * LANE        # (32, 32)
W_SA_OUT = 3 * LANE      # (32, 32)
W_CA_Q = 4 * LANE        # (32, 32)  scale folded in
W_CA_K = 5 * LANE        # (32, 32)
W_CA_V = 6 * LANE        # (32, 32)
W_CA_OUT = 7 * LANE      # (32, 32)
W_MLP1 = 8 * LANE        # (32, 64)
W_LAYER_COLS = 9 * LANE  # 1152
W_OUT1 = NUM_LAYERS * W_LAYER_COLS          # 2304  (32, 32)
W_OUT2 = W_OUT1 + LANE                       # 2432  (32, 96) zero-padded to 128
W_TOTAL = W_OUT2 + LANE                      # 2560

# ---- bias / LayerNorm slab: one vector per 128-wide row -----------------------
B_LN1_W, B_LN1_B = 0, 1
B_SA_QB, B_SA_KB, B_SA_VB, B_SA_OUTB = 2, 3, 4, 5
B_LNC_W, B_LNC_B = 6, 7
B_CA_QB, B_CA_KB, B_CA_VB, B_CA_OUTB = 8, 9, 10, 11
B_LN2_W, B_LN2_B = 12, 13
B_MLP1_B, B_MLP2_B = 14, 15
B_LAYER_ROWS = 16
B_OUT1B = NUM_LAYERS * B_LAYER_ROWS          # 32
B_OUT2B = B_OUT1B + 1                        # 33
B_TOTAL_ROWS = 40                            # padded to a multiple of 8 sublanes

LAYER_PARAM_SHAPES = [
    ("ln1_w", (1, MODEL_DIM)), ("ln1_b", (1, MODEL_DIM)),
    ("sa_qkv_w", (MODEL_DIM, 3 * MODEL_DIM)), ("sa_qkv_b", (1, 3 * MODEL_DIM)),
    ("sa_out_w", (MODEL_DIM, MODEL_DIM)), ("sa_out_b", (1, MODEL_DIM)),
    ("lnc_w", (1, MODEL_DIM)), ("lnc_b", (1, MODEL_DIM)),
    ("ca_q_w", (MODEL_DIM, MODEL_DIM)), ("ca_q_b", (1, MODEL_DIM)),
    ("ca_kv_w", (MODEL_DIM, 2 * MODEL_DIM)), ("ca_kv_b", (1, 2 * MODEL_DIM)),
    ("ca_out_w", (MODEL_DIM, MODEL_DIM)), ("ca_out_b", (1, MODEL_DIM)),
    ("ln2_w", (1, MODEL_DIM)), ("ln2_b", (1, MODEL_DIM)),
    ("mlp1_w", (MODEL_DIM, DIM_FF)), ("mlp1_b", (1, DIM_FF)),
    ("mlp2_w", (DIM_FF, MODEL_DIM)), ("mlp2_b", (1, MODEL_DIM)),
]


# ---- host-side precomputed block-diagonal attention masks ---------------------
def _build_self_mask():
    # rows/cols: h * BS + (b * S + s); attend iff same head and same batch
    r = np.arange(NUM_HEADS * BS)
    rh, rb = r // BS, (r % BS) // NUM_STREAMLINES
    ok = (rh[:, None] == rh[None, :]) & (rb[:, None] == rb[None, :])
    return np.where(ok, 0.0, -1e30).astype(np.float32)           # (128, 128)


def _build_cross_mask():
    r = np.arange(NUM_HEADS * BS)
    c = np.arange(NUM_HEADS * BT)
    rh, rb = r // BS, (r % BS) // NUM_STREAMLINES
    ch, cb = c // BT, (c % BT) // NUM_TOKENS
    ok = (rh[:, None] == ch[None, :]) & (rb[:, None] == cb[None, :])
    return np.where(ok, 0.0, -1e30).astype(np.float32)           # (128, 64)


# ---- the single fused kernel ---------------------------------------------------
def decoder_kernel(x0_ref, ctx_ref, smask_ref, cmask_ref, w_ref, b_ref, m2_ref,
                   y_ref):
    D = MODEL_DIM
    x = x0_ref[...]                    # (BS, D) pre-tiled query embeddings
    ctx = ctx_ref[...]                 # (BT, D) batch-folded encoder output
    self_bias = smask_ref[...]         # (H*BS, H*BS) additive 0 / -1e30
    cross_bias = cmask_ref[...]        # (H*BS, H*BT)

    def w_at(li, col, width):          # 128-aligned column offsets -> free views
        base = li * W_LAYER_COLS + col
        return w_ref[:, base:base + width]

    def b_at(li, row, width):          # one vector per row, lane offset 0
        r = li * B_LAYER_ROWS + row
        return b_ref[r:r + 1, :width]

    def layernorm(z, gamma, beta):
        mean = jnp.mean(z, axis=-1, keepdims=True)
        var = jnp.mean(jnp.square(z - mean), axis=-1, keepdims=True)
        return (z - mean) * jax.lax.rsqrt(var + EPS) * gamma + beta

    def stack_heads(z):                # (N, D) -> (H*N, hd), head h in rows h*N..
        return jnp.concatenate(
            [z[:, h * HEAD_DIM:(h + 1) * HEAD_DIM] for h in range(NUM_HEADS)],
            axis=0)

    def attention(q, k, v, bias, w_out, b_out):
        # q: (Nq, D) with scale pre-folded; k, v: (Nk, D).
        # Heads stacked on sublanes -> 1 QK^T matmul, 1 softmax, 1 PV matmul,
        # 1 merged output projection per attention block.
        nq = q.shape[0]
        q_st, k_st, v_st = stack_heads(q), stack_heads(k), stack_heads(v)
        s = jax.lax.dot_general(q_st, k_st, (((1,), (1,)), ((), ())),
                                preferred_element_type=jnp.float32) + bias
        m = jnp.max(s, axis=-1, keepdims=True)
        e = jnp.exp(s - m)
        p = e / jnp.sum(e, axis=-1, keepdims=True)
        o_st = jnp.dot(p, v_st, preferred_element_type=jnp.float32)   # (H*Nq, hd)
        # merge per-head outputs along lanes -> single projection matmul
        o = jnp.concatenate(
            [o_st[h * nq:(h + 1) * nq, :] for h in range(NUM_HEADS)], axis=1)
        return jnp.dot(o, w_out, preferred_element_type=jnp.float32) + b_out

    for li in range(NUM_LAYERS):                                   # static unroll
        # --- self-attention (pre-norm, residual) ---
        h = layernorm(x, b_at(li, B_LN1_W, D), b_at(li, B_LN1_B, D))
        qkv = jnp.dot(h, w_at(li, W_SA_Q, 3 * LANE),
                      preferred_element_type=jnp.float32)           # (BS, 384)
        q = qkv[:, 0:D] + b_at(li, B_SA_QB, D)          # scale already folded
        k = qkv[:, LANE:LANE + D] + b_at(li, B_SA_KB, D)
        v = qkv[:, 2 * LANE:2 * LANE + D] + b_at(li, B_SA_VB, D)
        x = x + attention(q, k, v, self_bias,
                          w_at(li, W_SA_OUT, D), b_at(li, B_SA_OUTB, D))

        # --- cross-attention against (un-normed) encoder output ---
        h = layernorm(x, b_at(li, B_LNC_W, D), b_at(li, B_LNC_B, D))
        qc = (jnp.dot(h, w_at(li, W_CA_Q, D), preferred_element_type=jnp.float32)
              + b_at(li, B_CA_QB, D))
        kv = jnp.dot(ctx, w_at(li, W_CA_K, 2 * LANE),
                     preferred_element_type=jnp.float32)            # (BT, 256)
        kc = kv[:, 0:D] + b_at(li, B_CA_KB, D)
        vc = kv[:, LANE:LANE + D] + b_at(li, B_CA_VB, D)
        x = x + attention(qc, kc, vc, cross_bias,
                          w_at(li, W_CA_OUT, D), b_at(li, B_CA_OUTB, D))

        # --- MLP (pre-norm, residual) ---
        h = layernorm(x, b_at(li, B_LN2_W, D), b_at(li, B_LN2_B, D))
        h1 = (jnp.dot(h, w_at(li, W_MLP1, DIM_FF),
                      preferred_element_type=jnp.float32)
              + b_at(li, B_MLP1_B, DIM_FF))
        # TODO(synk): MONAI MLPBlock default is exact erf-GELU; using tanh-approx GELU in-kernel.
        h1 = jax.nn.gelu(h1, approximate=True)
        m2 = m2_ref[:, li * LANE:li * LANE + D]                      # (FF, D)
        x = x + jnp.dot(h1, m2, preferred_element_type=jnp.float32) \
              + b_at(li, B_MLP2_B, D)

    # --- output MLP: Linear -> ReLU -> Linear (lane-dense 128-wide store) ---
    h = (jnp.dot(x, w_ref[:, W_OUT1:W_OUT1 + D],
                 preferred_element_type=jnp.float32)
         + b_ref[B_OUT1B:B_OUT1B + 1, :D])
    h = jnp.maximum(h, 0.0)
    y_ref[...] = (jnp.dot(h, w_ref[:, W_OUT2:W_OUT2 + LANE],
                          preferred_element_type=jnp.float32)
                  + b_ref[B_OUT2B:B_OUT2B + 1, :])


# ---- wrapper -------------------------------------------------------------------
def transformer_decoder_forward(encoder_output, packed):
    """encoder_output: [B, num_tokens, model_dim] -> [B, num_streamlines, 32, 3]."""
    B, T, D = encoder_output.shape
    assert B == BATCH and T == NUM_TOKENS and D == MODEL_DIM
    ctx2d = encoder_output.reshape(B * T, D)               # batch folded into rows
    vmem = pl.BlockSpec(memory_space=pltpu.MemorySpace.VMEM)
    y = pl.pallas_call(
        decoder_kernel,
        out_shape=jax.ShapeDtypeStruct((BS, LANE), jnp.float32),
        in_specs=[vmem] * 7,
        out_specs=vmem,
    )(packed["q_tiled"], ctx2d, packed["self_mask"], packed["cross_mask"],
      packed["w_slab"], packed["b_slab"], packed["m2_slab"])
    return y[:, :OUT_DIM].reshape(B, NUM_STREAMLINES, 32, 3)


# ---- deterministic parameter init, packing, and pure-JAX reference --------------
def init_params(key):
    keys = jax.random.split(key, NUM_LAYERS + 5)
    params = {
        "query_embeddings": jax.random.normal(
            keys[0], (NUM_STREAMLINES, MODEL_DIM), jnp.float32),
    }
    layers = []
    for li in range(NUM_LAYERS):
        wkeys = jax.random.split(keys[1 + li], len(LAYER_PARAM_SHAPES))
        lp = {}
        for (name, shape), wk in zip(LAYER_PARAM_SHAPES, wkeys):
            if name in ("ln1_w", "lnc_w", "ln2_w"):          # LayerNorm gamma ~ 1
                lp[name] = (jnp.ones(shape, jnp.float32)
                            + 0.1 * jax.random.normal(wk, shape, jnp.float32))
            elif name.endswith("_b"):                         # biases / beta
                lp[name] = 0.02 * jax.random.normal(wk, shape, jnp.float32)
            else:                                             # weights
                lp[name] = 0.02 * jax.random.normal(wk, shape, jnp.float32)
        layers.append(lp)
    params["layers"] = layers
    params["out_w1"] = 0.02 * jax.random.normal(
        keys[-4], (MODEL_DIM, MODEL_DIM), jnp.float32)
    params["out_b1"] = 0.02 * jax.random.normal(keys[-3], (1, MODEL_DIM), jnp.float32)
    params["out_w2"] = 0.02 * jax.random.normal(
        keys[-2], (MODEL_DIM, OUT_DIM), jnp.float32)
    params["out_b2"] = 0.02 * jax.random.normal(keys[-1], (1, OUT_DIM), jnp.float32)
    return params


def pack_params(params):
    """Pack params into 128-lane-aligned slabs (runs once, outside the jitted fwd)."""
    D = MODEL_DIM
    scale = 1.0 / math.sqrt(HEAD_DIM)
    w_slab = jnp.zeros((D, W_TOTAL), jnp.float32)
    b_slab = jnp.zeros((B_TOTAL_ROWS, LANE), jnp.float32)
    m2_slab = jnp.zeros((DIM_FF, NUM_LAYERS * LANE), jnp.float32)

    def put_w(slab, col, mat):
        return slab.at[:, col:col + mat.shape[1]].set(mat)

    def put_b(slab, row, vec):
        return slab.at[row, :vec.shape[1]].set(vec[0])

    for li, lp in enumerate(params["layers"]):
        wbase = li * W_LAYER_COLS
        bbase = li * B_LAYER_ROWS
        qkv_w, qkv_b = lp["sa_qkv_w"], lp["sa_qkv_b"]
        # attention scale folded into Q weights / biases at pack time
        w_slab = put_w(w_slab, wbase + W_SA_Q, qkv_w[:, :D] * scale)
        w_slab = put_w(w_slab, wbase + W_SA_K, qkv_w[:, D:2 * D])
        w_slab = put_w(w_slab, wbase + W_SA_V, qkv_w[:, 2 * D:])
        w_slab = put_w(w_slab, wbase + W_SA_OUT, lp["sa_out_w"])
        w_slab = put_w(w_slab, wbase + W_CA_Q, lp["ca_q_w"] * scale)
        w_slab = put_w(w_slab, wbase + W_CA_K, lp["ca_kv_w"][:, :D])
        w_slab = put_w(w_slab, wbase + W_CA_V, lp["ca_kv_w"][:, D:])
        w_slab = put_w(w_slab, wbase + W_CA_OUT, lp["ca_out_w"])
        w_slab = put_w(w_slab, wbase + W_MLP1, lp["mlp1_w"])

        b_slab = put_b(b_slab, bbase + B_LN1_W, lp["ln1_w"])
        b_slab = put_b(b_slab, bbase + B_LN1_B, lp["ln1_b"])
        b_slab = put_b(b_slab, bbase + B_SA_QB, qkv_b[:, :D] * scale)
        b_slab = put_b(b_slab, bbase + B_SA_KB, qkv_b[:, D:2 * D])
        b_slab = put_b(b_slab, bbase + B_SA_VB, qkv_b[:, 2 * D:])
        b_slab = put_b(b_slab, bbase + B_SA_OUTB, lp["sa_out_b"])
        b_slab = put_b(b_slab, bbase + B_LNC_W, lp["lnc_w"])
        b_slab = put_b(b_slab, bbase + B_LNC_B, lp["lnc_b"])
        b_slab = put_b(b_slab, bbase + B_CA_QB, lp["ca_q_b"] * scale)
        b_slab = put_b(b_slab, bbase + B_CA_KB, lp["ca_kv_b"][:, :D])
        b_slab = put_b(b_slab, bbase + B_CA_VB, lp["ca_kv_b"][:, D:])
        b_slab = put_b(b_slab, bbase + B_CA_OUTB, lp["ca_out_b"])
        b_slab = put_b(b_slab, bbase + B_LN2_W, lp["ln2_w"])
        b_slab = put_b(b_slab, bbase + B_LN2_B, lp["ln2_b"])
        b_slab = put_b(b_slab, bbase + B_MLP1_B, lp["mlp1_b"])
        b_slab = put_b(b_slab, bbase + B_MLP2_B, lp["mlp2_b"])

        m2_slab = m2_slab.at[:, li * LANE:li * LANE + D].set(lp["mlp2_w"])

    w_slab = put_w(w_slab, W_OUT1, params["out_w1"])
    w_slab = put_w(w_slab, W_OUT2, params["out_w2"])       # 96 cols, rest stays 0
    b_slab = put_b(b_slab, B_OUT1B, params["out_b1"])
    b_slab = put_b(b_slab, B_OUT2B, params["out_b2"])

    return {
        "q_tiled": jnp.tile(params["query_embeddings"], (BATCH, 1)),   # (B*S, D)
        "w_slab": w_slab,                                               # (32, 2560)
        "b_slab": b_slab,                                               # (40, 128)
        "m2_slab": m2_slab,                                             # (64, 256)
        "self_mask": jnp.asarray(_build_self_mask()),                   # (128, 128)
        "cross_mask": jnp.asarray(_build_cross_mask()),                 # (128, 64)
    }


def reference_forward(encoder_output, params):
    """Straightforward per-batch / per-head JAX reference (same math, unpacked)."""
    D = MODEL_DIM
    B = encoder_output.shape[0]
    scale = 1.0 / math.sqrt(HEAD_DIM)
    x = jnp.broadcast_to(params["query_embeddings"][None],
                         (B, NUM_STREAMLINES, D))

    def ln(z, w, b):
        mean = jnp.mean(z, -1, keepdims=True)
        var = jnp.mean(jnp.square(z - mean), -1, keepdims=True)
        return (z - mean) / jnp.sqrt(var + EPS) * w + b

    def mha(q, k, v, w_out, b_out):
        outs = []
        for h in range(NUM_HEADS):
            sl = slice(h * HEAD_DIM, (h + 1) * HEAD_DIM)
            s = jnp.einsum("bqd,bkd->bqk", q[..., sl], k[..., sl]) * scale
            p = jax.nn.softmax(s, axis=-1)
            outs.append(jnp.einsum("bqk,bkd->bqd", p, v[..., sl]))
        o = jnp.concatenate(outs, axis=-1)
        return o @ w_out + b_out

    for lp in params["layers"]:
        h = ln(x, lp["ln1_w"], lp["ln1_b"])
        qkv = h @ lp["sa_qkv_w"] + lp["sa_qkv_b"]
        q, k, v = qkv[..., :D], qkv[..., D:2 * D], qkv[..., 2 * D:]
        x = x + mha(q, k, v, lp["sa_out_w"], lp["sa_out_b"])

        h = ln(x, lp["lnc_w"], lp["lnc_b"])
        qc = h @ lp["ca_q_w"] + lp["ca_q_b"]
        kv = encoder_output @ lp["ca_kv_w"] + lp["ca_kv_b"]
        kc, vc = kv[..., :D], kv[..., D:]
        x = x + mha(qc, kc, vc, lp["ca_out_w"], lp["ca_out_b"])

        h = ln(x, lp["ln2_w"], lp["ln2_b"])
        h1 = jax.nn.gelu(h @ lp["mlp1_w"] + lp["mlp1_b"], approximate=True)
        x = x + h1 @ lp["mlp2_w"] + lp["mlp2_b"]

    y = jnp.maximum(x @ params["out_w1"] + params["out_b1"], 0.0)
    y = y @ params["out_w2"] + params["out_b2"]
    return y.reshape(B, NUM_STREAMLINES, 32, 3)


if __name__ == "__main__":
    key = jax.random.PRNGKey(0)
    pkey, xkey = jax.random.split(key)
    params = init_params(pkey)
    packed = pack_params(params)
    encoder_output = jax.random.normal(
        xkey, (BATCH, NUM_TOKENS, MODEL_DIM), jnp.float32)

    fwd = jax.jit(transformer_decoder_forward)
    streamlines = fwd(encoder_output, packed)
    jax.block_until_ready(streamlines)

    assert streamlines.shape == (BATCH, NUM_STREAMLINES, 32, 3), streamlines.shape
    assert streamlines.dtype == jnp.float32
    assert bool(jnp.all(jnp.isfinite(streamlines)))

    ref = reference_forward(encoder_output, params)
    max_err = float(jnp.max(jnp.abs(streamlines - ref)))
    assert bool(jnp.allclose(streamlines, ref, atol=1e-3, rtol=1e-3)), max_err

    print("KERNEL_OK")
</pallas_src>

<mosaic_0001>
module attributes {stable_mosaic.version = 11 : i64} {
  func.func @decoder_kernel(%arg0: memref<32x32xf32, #tpu.memory_space<vmem>>, %arg1: memref<16x32xf32, #tpu.memory_space<vmem>>, %arg2: memref<128x128xf32, #tpu.memory_space<vmem>>, %arg3: memref<128x64xf32, #tpu.memory_space<vmem>>, %arg4: memref<32x2560xf32, #tpu.memory_space<vmem>>, %arg5: memref<40x128xf32, #tpu.memory_space<vmem>>, %arg6: memref<64x256xf32, #tpu.memory_space<vmem>>, %arg7: memref<32x128xf32, #tpu.memory_space<vmem>>) attributes {dimension_semantics = [], scalar_prefetch = 0 : i64, scratch_operands = 0 : i64, tpu.core_type = #tpu.core_type<tc>} {
    %c0 = arith.constant 0 : index
    %c0_0 = arith.constant 0 : index
    %0 = vector.load %arg0[%c0, %c0_0] : memref<32x32xf32, #tpu.memory_space<vmem>>, vector<32x32xf32>
    %c0_1 = arith.constant 0 : index
    %c0_2 = arith.constant 0 : index
    %1 = vector.load %arg1[%c0_1, %c0_2] : memref<16x32xf32, #tpu.memory_space<vmem>>, vector<16x32xf32>
    %c0_3 = arith.constant 0 : index
    %c0_4 = arith.constant 0 : index
    %2 = vector.load %arg2[%c0_3, %c0_4] : memref<128x128xf32, #tpu.memory_space<vmem>>, vector<128x128xf32>
    %c0_5 = arith.constant 0 : index
    %c0_6 = arith.constant 0 : index
    %3 = vector.load %arg3[%c0_5, %c0_6] : memref<128x64xf32, #tpu.memory_space<vmem>>, vector<128x64xf32>
    %c0_7 = arith.constant 0 : index
    %c0_8 = arith.constant 0 : index
    %4 = vector.load %arg5[%c0_7, %c0_8] : memref<40x128xf32, #tpu.memory_space<vmem>>, vector<1x32xf32>
    %c1 = arith.constant 1 : index
    %c0_9 = arith.constant 0 : index
    %5 = vector.load %arg5[%c1, %c0_9] : memref<40x128xf32, #tpu.memory_space<vmem>>, vector<1x32xf32>
    %cst = arith.constant dense<0.000000e+00> : vector<32xf32>
    %6 = vector.multi_reduction <add>, %0, %cst [1] : vector<32x32xf32> to vector<32xf32>
    %7 = vector.shape_cast %6 : vector<32xf32> to vector<32x1xf32>
    %cst_10 = arith.constant 3.200000e+01 : f32
    %8 = vector.broadcast %cst_10 : f32 to vector<32x1xf32>
    %9 = arith.divf %7, %8 : vector<32x1xf32>
    %10 = vector.broadcast %9 : vector<32x1xf32> to vector<32x32xf32>
    %11 = arith.subf %0, %10 : vector<32x32xf32>
    %12 = arith.mulf %11, %11 : vector<32x32xf32>
    %cst_11 = arith.constant dense<0.000000e+00> : vector<32xf32>
    %13 = vector.multi_reduction <add>, %12, %cst_11 [1] : vector<32x32xf32> to vector<32xf32>
    %14 = vector.shape_cast %13 : vector<32xf32> to vector<32x1xf32>
    %cst_12 = arith.constant 3.200000e+01 : f32
    %15 = vector.broadcast %cst_12 : f32 to vector<32x1xf32>
    %16 = arith.divf %14, %15 : vector<32x1xf32>
    %17 = vector.broadcast %9 : vector<32x1xf32> to vector<32x32xf32>
    %18 = arith.subf %0, %17 : vector<32x32xf32>
    %cst_13 = arith.constant 9.99999974E-6 : f32
    %19 = vector.broadcast %cst_13 : f32 to vector<32x1xf32>
    %20 = arith.addf %16, %19 : vector<32x1xf32>
    %21 = math.rsqrt %20 : vector<32x1xf32>
    %22 = vector.broadcast %21 : vector<32x1xf32> to vector<32x32xf32>
    %23 = arith.mulf %18, %22 : vector<32x32xf32>
    %24 = vector.broadcast %4 : vector<1x32xf32> to vector<32x32xf32>
    %25 = arith.mulf %23, %24 : vector<32x32xf32>
    %26 = vector.broadcast %5 : vector<1x32xf32> to vector<32x32xf32>
    %27 = arith.addf %25, %26 : vector<32x32xf32>
    %c0_14 = arith.constant 0 : index
    %c0_15 = arith.constant 0 : index
    %28 = vector.load %arg4[%c0_14, %c0_15] : memref<32x2560xf32, #tpu.memory_space<vmem>>, vector<32x384xf32>
    %cst_16 = arith.constant dense<0.000000e+00> : vector<32x384xf32>
    %29 = tpu.matmul %27, %28, %cst_16 {dimension_numbers = #tpu.dot_dimension_numbers<[1], [0], [0], [1], [0, 0, 1, 1], [], []>} : vector<32x32xf32>, vector<32x384xf32>, vector<32x384xf32> -> vector<32x384xf32>
    %30 = vector.extract_strided_slice %29 {offsets = [0, 0], sizes = [32, 32], strides = [1, 1]} : vector<32x384xf32> to vector<32x32xf32>
    %c2 = arith.constant 2 : index
    %c0_17 = arith.constant 0 : index
    %31 = vector.load %arg5[%c2, %c0_17] : memref<40x128xf32, #tpu.memory_space<vmem>>, vector<1x32xf32>
    %32 = vector.broadcast %31 : vector<1x32xf32> to vector<32x32xf32>
    %33 = arith.addf %30, %32 : vector<32x32xf32>
    %34 = vector.extract_strided_slice %29 {offsets = [0, 128], sizes = [32, 32], strides = [1, 1]} : vector<32x384xf32> to vector<32x32xf32>
    %c3 = arith.constant 3 : index
    %c0_18 = arith.constant 0 : index
    %35 = vector.load %arg5[%c3, %c0_18] : memref<40x128xf32, #tpu.memory_space<vmem>>, vector<1x32xf32>
    %36 = vector.broadcast %35 : vector<1x32xf32> to vector<32x32xf32>
    %37 = arith.addf %34, %36 : vector<32x32xf32>
    %38 = vector.extract_strided_slice %29 {offsets = [0, 256], sizes = [32, 32], strides = [1, 1]} : vector<32x384xf32> to vector<32x32xf32>
    %c4 = arith.constant 4 : index
    %c0_19 = arith.constant 0 : index
    %39 = vector.load %arg5[%c4, %c0_19] : memref<40x128xf32, #tpu.memory_space<vmem>>, vector<1x32xf32>
    %40 = vector.broadcast %39 : vector<1x32xf32> to vector<32x32xf32>
    %41 = arith.addf %38, %40 : vector<32x32xf32>
    %c0_20 = arith.constant 0 : index
    %c384 = arith.constant 384 : index
    %42 = vector.load %arg4[%c0_20, %c384] : memref<32x2560xf32, #tpu.memory_space<vmem>>, vector<32x32xf32>
    %c5 = arith.constant 5 : index
    %c0_21 = arith.constant 0 : index
    %43 = vector.load %arg5[%c5, %c0_21] : memref<40x128xf32, #tpu.memory_space<vmem>>, vector<1x32xf32>
    %44 = vector.extract_strided_slice %33 {offsets = [0, 0], sizes = [32, 8], strides = [1, 1]} : vector<32x32xf32> to vector<32x8xf32>
    %45 = vector.extract_strided_slice %33 {offsets = [0, 8], sizes = [32, 8], strides = [1, 1]} : vector<32x32xf32> to vector<32x8xf32>
    %46 = vector.extract_strided_slice %33 {offsets = [0, 16], sizes = [32, 8], strides = [1, 1]} : vector<32x32xf32> to vector<32x8xf32>
    %47 = vector.extract_strided_slice %33 {offsets = [0, 24], sizes = [32, 8], strides = [1, 1]} : vector<32x32xf32> to vector<32x8xf32>
    %48 = tpu.concatenate %44, %45, %46, %47 in 0 : vector<32x8xf32>, vector<32x8xf32>, vector<32x8xf32>, vector<32x8xf32> -> vector<128x8xf32>
    %49 = vector.extract_strided_slice %37 {offsets = [0, 0], sizes = [32, 8], strides = [1, 1]} : vector<32x32xf32> to vector<32x8xf32>
    %50 = vector.extract_strided_slice %37 {offsets = [0, 8], sizes = [32, 8], strides = [1, 1]} : vector<32x32xf32> to vector<32x8xf32>
    %51 = vector.extract_strided_slice %37 {offsets = [0, 16], sizes = [32, 8], strides = [1, 1]} : vector<32x32xf32> to vector<32x8xf32>
    %52 = vector.extract_strided_slice %37 {offsets = [0, 24], sizes = [32, 8], strides = [1, 1]} : vector<32x32xf32> to vector<32x8xf32>
    %53 = tpu.concatenate %49, %50, %51, %52 in 0 : vector<32x8xf32>, vector<32x8xf32>, vector<32x8xf32>, vector<32x8xf32> -> vector<128x8xf32>
    %54 = vector.extract_strided_slice %41 {offsets = [0, 0], sizes = [32, 8], strides = [1, 1]} : vector<32x32xf32> to vector<32x8xf32>
    %55 = vector.extract_strided_slice %41 {offsets = [0, 8], sizes = [32, 8], strides = [1, 1]} : vector<32x32xf32> to vector<32x8xf32>
    %56 = vector.extract_strided_slice %41 {offsets = [0, 16], sizes = [32, 8], strides = [1, 1]} : vector<32x32xf32> to vector<32x8xf32>
    %57 = vector.extract_strided_slice %41 {offsets = [0, 24], sizes = [32, 8], strides = [1, 1]} : vector<32x32xf32> to vector<32x8xf32>
    %58 = tpu.concatenate %54, %55, %56, %57 in 0 : vector<32x8xf32>, vector<32x8xf32>, vector<32x8xf32>, vector<32x8xf32> -> vector<128x8xf32>
    %cst_22 = arith.constant dense<0.000000e+00> : vector<128x128xf32>
    %59 = tpu.matmul %48, %53, %cst_22 {dimension_numbers = #tpu.dot_dimension_numbers<[1], [1], [0], [0], [0, 0, 1, 0], [], []>} : vector<128x8xf32>, vector<128x8xf32>, vector<128x128xf32> -> vector<128x128xf32>
    %60 = arith.addf %59, %2 : vector<128x128xf32>
    %cst_23 = arith.constant dense<0xFF800000> : vector<128xf32>
    %61 = vector.multi_reduction <maximumf>, %60, %cst_23 [1] : vector<128x128xf32> to vector<128xf32>
    %62 = vector.shape_cast %61 : vector<128xf32> to vector<128x1xf32>
    %63 = vector.broadcast %62 : vector<128x1xf32> to vector<128x128xf32>
    %64 = arith.subf %60, %63 : vector<128x128xf32>
    %65 = math.exp %64 : vector<128x128xf32>
    %cst_24 = arith.constant dense<0.000000e+00> : vector<128xf32>
    %66 = vector.multi_reduction <add>, %65, %cst_24 [1] : vector<128x128xf32> to vector<128xf32>
    %67 = vector.shape_cast %66 : vector<128xf32> to vector<128x1xf32>
    %68 = vector.broadcast %67 : vector<128x1xf32> to vector<128x128xf32>
    %69 = arith.divf %65, %68 : vector<128x128xf32>
    %cst_25 = arith.constant dense<0.000000e+00> : vector<128x8xf32>
    %70 = tpu.matmul %69, %58, %cst_25 {dimension_numbers = #tpu.dot_dimension_numbers<[1], [0], [0], [1], [0, 0, 1, 1], [], []>} : vector<128x128xf32>, vector<128x8xf32>, vector<128x8xf32> -> vector<128x8xf32>
    %71 = vector.extract_strided_slice %70 {offsets = [0, 0], sizes = [32, 8], strides = [1, 1]} : vector<128x8xf32> to vector<32x8xf32>
    %72 = vector.extract_strided_slice %70 {offsets = [32, 0], sizes = [32, 8], strides = [1, 1]} : vector<128x8xf32> to vector<32x8xf32>
    %73 = vector.extract_strided_slice %70 {offsets = [64, 0], sizes = [32, 8], strides = [1, 1]} : vector<128x8xf32> to vector<32x8xf32>
    %74 = vector.extract_strided_slice %70 {offsets = [96, 0], sizes = [32, 8], strides = [1, 1]} : vector<128x8xf32> to vector<32x8xf32>
    %75 = tpu.concatenate %71, %72, %73, %74 in 1 : vector<32x8xf32>, vector<32x8xf32>, vector<32x8xf32>, vector<32x8xf32> -> vector<32x32xf32>
    %cst_26 = arith.constant dense<0.000000e+00> : vector<32x32xf32>
    %76 = tpu.matmul %75, %42, %cst_26 {dimension_numbers = #tpu.dot_dimension_numbers<[1], [0], [0], [1], [0, 0, 1, 1], [], []>} : vector<32x32xf32>, vector<32x32xf32>, vector<32x32xf32> -> vector<32x32xf32>
    %77 = vector.broadcast %43 : vector<1x32xf32> to vector<32x32xf32>
    %78 = arith.addf %76, %77 : vector<32x32xf32>
    %79 = arith.addf %0, %78 : vector<32x32xf32>
    %c6 = arith.constant 6 : index
    %c0_27 = arith.constant 0 : index
    %80 = vector.load %arg5[%c6, %c0_27] : memref<40x128xf32, #tpu.memory_space<vmem>>, vector<1x32xf32>
    %c7 = arith.constant 7 : index
    %c0_28 = arith.constant 0 : index
    %81 = vector.load %arg5[%c7, %c0_28] : memref<40x128xf32, #tpu.memory_space<vmem>>, vector<1x32xf32>
    %cst_29 = arith.constant dense<0.000000e+00> : vector<32xf32>
    %82 = vector.multi_reduction <add>, %79, %cst_29 [1] : vector<32x32xf32> to vector<32xf32>
    %83 = vector.shape_cast %82 : vector<32xf32> to vector<32x1xf32>
    %cst_30 = arith.constant 3.200000e+01 : f32
    %84 = vector.broadcast %cst_30 : f32 to vector<32x1xf32>
    %85 = arith.divf %83, %84 : vector<32x1xf32>
    %86 = vector.broadcast %85 : vector<32x1xf32> to vector<32x32xf32>
    %87 = arith.subf %79, %86 : vector<32x32xf32>
    %88 = arith.mulf %87, %87 : vector<32x32xf32>
    %cst_31 = arith.constant dense<0.000000e+00> : vector<32xf32>
    %89 = vector.multi_reduction <add>, %88, %cst_31 [1] : vector<32x32xf32> to vector<32xf32>
    %90 = vector.shape_cast %89 : vector<32xf32> to vector<32x1xf32>
    %cst_32 = arith.constant 3.200000e+01 : f32
    %91 = vector.broadcast %cst_32 : f32 to vector<32x1xf32>
    %92 = arith.divf %90, %91 : vector<32x1xf32>
    %93 = vector.broadcast %85 : vector<32x1xf32> to vector<32x32xf32>
    %94 = arith.subf %79, %93 : vector<32x32xf32>
    %cst_33 = arith.constant 9.99999974E-6 : f32
    %95 = vector.broadcast %cst_33 : f32 to vector<32x1xf32>
    %96 = arith.addf %92, %95 : vector<32x1xf32>
    %97 = math.rsqrt %96 : vector<32x1xf32>
    %98 = vector.broadcast %97 : vector<32x1xf32> to vector<32x32xf32>
    %99 = arith.mulf %94, %98 : vector<32x32xf32>
    %100 = vector.broadcast %80 : vector<1x32xf32> to vector<32x32xf32>
    %101 = arith.mulf %99, %100 : vector<32x32xf32>
    %102 = vector.broadcast %81 : vector<1x32xf32> to vector<32x32xf32>
    %103 = arith.addf %101, %102 : vector<32x32xf32>
    %c0_34 = arith.constant 0 : index
    %c512 = arith.constant 512 : index
    %104 = vector.load %arg4[%c0_34, %c512] : memref<32x2560xf32, #tpu.memory_space<vmem>>, vector<32x32xf32>
    %cst_35 = arith.constant dense<0.000000e+00> : vector<32x32xf32>
    %105 = tpu.matmul %103, %104, %cst_35 {dimension_numbers = #tpu.dot_dimension_numbers<[1], [0], [0], [1], [0, 0, 1, 1], [], []>} : vector<32x32xf32>, vector<32x32xf32>, vector<32x32xf32> -> vector<32x32xf32>
    %c8 = arith.constant 8 : index
    %c0_36 = arith.constant 0 : index
    %106 = vector.load %arg5[%c8, %c0_36] : memref<40x128xf32, #tpu.memory_space<vmem>>, vector<1x32xf32>
    %107 = vector.broadcast %106 : vector<1x32xf32> to vector<32x32xf32>
    %108 = arith.addf %105, %107 : vector<32x32xf32>
    %c0_37 = arith.constant 0 : index
    %c640 = arith.constant 640 : index
    %109 = vector.load %arg4[%c0_37, %c640] : memref<32x2560xf32, #tpu.memory_space<vmem>>, vector<32x256xf32>
    %cst_38 = arith.constant dense<0.000000e+00> : vector<16x256xf32>
    %110 = tpu.matmul %1, %109, %cst_38 {dimension_numbers = #tpu.dot_dimension_numbers<[1], [0], [0], [1], [0, 0, 1, 1], [], []>} : vector<16x32xf32>, vector<32x256xf32>, vector<16x256xf32> -> vector<16x256xf32>
    %111 = vector.extract_strided_slice %110 {offsets = [0, 0], sizes = [16, 32], strides = [1, 1]} : vector<16x256xf32> to vector<16x32xf32>
    %c9 = arith.constant 9 : index
    %c0_39 = arith.constant 0 : index
    %112 = vector.load %arg5[%c9, %c0_39] : memref<40x128xf32, #tpu.memory_space<vmem>>, vector<1x32xf32>
    %113 = vector.broadcast %112 : vector<1x32xf32> to vector<16x32xf32>
    %114 = arith.addf %111, %113 : vector<16x32xf32>
    %115 = vector.extract_strided_slice %110 {offsets = [0, 128], sizes = [16, 32], strides = [1, 1]} : vector<16x256xf32> to vector<16x32xf32>
    %c10 = arith.constant 10 : index
    %c0_40 = arith.constant 0 : index
    %116 = vector.load %arg5[%c10, %c0_40] : memref<40x128xf32, #tpu.memory_space<vmem>>, vector<1x32xf32>
    %117 = vector.broadcast %116 : vector<1x32xf32> to vector<16x32xf32>
    %118 = arith.addf %115, %117 : vector<16x32xf32>
    %c0_41 = arith.constant 0 : index
    %c896 = arith.constant 896 : index
    %119 = vector.load %arg4[%c0_41, %c896] : memref<32x2560xf32, #tpu.memory_space<vmem>>, vector<32x32xf32>
    %c11 = arith.constant 11 : index
    %c0_42 = arith.constant 0 : index
    %120 = vector.load %arg5[%c11, %c0_42] : memref<40x128xf32, #tpu.memory_space<vmem>>, vector<1x32xf32>
    %121 = vector.extract_strided_slice %108 {offsets = [0, 0], sizes = [32, 8], strides = [1, 1]} : vector<32x32xf32> to vector<32x8xf32>
    %122 = vector.extract_strided_slice %108 {offsets = [0, 8], sizes = [32, 8], strides = [1, 1]} : vector<32x32xf32> to vector<32x8xf32>
    %123 = vector.extract_strided_slice %108 {offsets = [0, 16], sizes = [32, 8], strides = [1, 1]} : vector<32x32xf32> to vector<32x8xf32>
    %124 = vector.extract_strided_slice %108 {offsets = [0, 24], sizes = [32, 8], strides = [1, 1]} : vector<32x32xf32> to vector<32x8xf32>
    %125 = tpu.concatenate %121, %122, %123, %124 in 0 : vector<32x8xf32>, vector<32x8xf32>, vector<32x8xf32>, vector<32x8xf32> -> vector<128x8xf32>
    %126 = vector.extract_strided_slice %114 {offsets = [0, 0], sizes = [16, 8], strides = [1, 1]} : vector<16x32xf32> to vector<16x8xf32>
    %127 = vector.extract_strided_slice %114 {offsets = [0, 8], sizes = [16, 8], strides = [1, 1]} : vector<16x32xf32> to vector<16x8xf32>
    %128 = vector.extract_strided_slice %114 {offsets = [0, 16], sizes = [16, 8], strides = [1, 1]} : vector<16x32xf32> to vector<16x8xf32>
    %129 = vector.extract_strided_slice %114 {offsets = [0, 24], sizes = [16, 8], strides = [1, 1]} : vector<16x32xf32> to vector<16x8xf32>
    %130 = tpu.concatenate %126, %127, %128, %129 in 0 : vector<16x8xf32>, vector<16x8xf32>, vector<16x8xf32>, vector<16x8xf32> -> vector<64x8xf32>
    %131 = vector.extract_strided_slice %118 {offsets = [0, 0], sizes = [16, 8], strides = [1, 1]} : vector<16x32xf32> to vector<16x8xf32>
    %132 = vector.extract_strided_slice %118 {offsets = [0, 8], sizes = [16, 8], strides = [1, 1]} : vector<16x32xf32> to vector<16x8xf32>
    %133 = vector.extract_strided_slice %118 {offsets = [0, 16], sizes = [16, 8], strides = [1, 1]} : vector<16x32xf32> to vector<16x8xf32>
    %134 = vector.extract_strided_slice %118 {offsets = [0, 24], sizes = [16, 8], strides = [1, 1]} : vector<16x32xf32> to vector<16x8xf32>
    %135 = tpu.concatenate %131, %132, %133, %134 in 0 : vector<16x8xf32>, vector<16x8xf32>, vector<16x8xf32>, vector<16x8xf32> -> vector<64x8xf32>
    %cst_43 = arith.constant dense<0.000000e+00> : vector<128x64xf32>
    %136 = tpu.matmul %125, %130, %cst_43 {dimension_numbers = #tpu.dot_dimension_numbers<[1], [1], [0], [0], [0, 0, 1, 0], [], []>} : vector<128x8xf32>, vector<64x8xf32>, vector<128x64xf32> -> vector<128x64xf32>
    %137 = arith.addf %136, %3 : vector<128x64xf32>
    %cst_44 = arith.constant dense<0xFF800000> : vector<128xf32>
    %138 = vector.multi_reduction <maximumf>, %137, %cst_44 [1] : vector<128x64xf32> to vector<128xf32>
    %139 = vector.shape_cast %138 : vector<128xf32> to vector<128x1xf32>
    %140 = vector.broadcast %139 : vector<128x1xf32> to vector<128x64xf32>
    %141 = arith.subf %137, %140 : vector<128x64xf32>
    %142 = math.exp %141 : vector<128x64xf32>
    %cst_45 = arith.constant dense<0.000000e+00> : vector<128xf32>
    %143 = vector.multi_reduction <add>, %142, %cst_45 [1] : vector<128x64xf32> to vector<128xf32>
    %144 = vector.shape_cast %143 : vector<128xf32> to vector<128x1xf32>
    %145 = vector.broadcast %144 : vector<128x1xf32> to vector<128x64xf32>
    %146 = arith.divf %142, %145 : vector<128x64xf32>
    %cst_46 = arith.constant dense<0.000000e+00> : vector<128x8xf32>
    %147 = tpu.matmul %146, %135, %cst_46 {dimension_numbers = #tpu.dot_dimension_numbers<[1], [0], [0], [1], [0, 0, 1, 1], [], []>} : vector<128x64xf32>, vector<64x8xf32>, vector<128x8xf32> -> vector<128x8xf32>
    %148 = vector.extract_strided_slice %147 {offsets = [0, 0], sizes = [32, 8], strides = [1, 1]} : vector<128x8xf32> to vector<32x8xf32>
    %149 = vector.extract_strided_slice %147 {offsets = [32, 0], sizes = [32, 8], strides = [1, 1]} : vector<128x8xf32> to vector<32x8xf32>
    %150 = vector.extract_strided_slice %147 {offsets = [64, 0], sizes = [32, 8], strides = [1, 1]} : vector<128x8xf32> to vector<32x8xf32>
    %151 = vector.extract_strided_slice %147 {offsets = [96, 0], sizes = [32, 8], strides = [1, 1]} : vector<128x8xf32> to vector<32x8xf32>
    %152 = tpu.concatenate %148, %149, %150, %151 in 1 : vector<32x8xf32>, vector<32x8xf32>, vector<32x8xf32>, vector<32x8xf32> -> vector<32x32xf32>
    %cst_47 = arith.constant dense<0.000000e+00> : vector<32x32xf32>
    %153 = tpu.matmul %152, %119, %cst_47 {dimension_numbers = #tpu.dot_dimension_numbers<[1], [0], [0], [1], [0, 0, 1, 1], [], []>} : vector<32x32xf32>, vector<32x32xf32>, vector<32x32xf32> -> vector<32x32xf32>
    %154 = vector.broadcast %120 : vector<1x32xf32> to vector<32x32xf32>
    %155 = arith.addf %153, %154 : vector<32x32xf32>
    %156 = arith.addf %79, %155 : vector<32x32xf32>
    %c12 = arith.constant 12 : index
    %c0_48 = arith.constant 0 : index
    %157 = vector.load %arg5[%c12, %c0_48] : memref<40x128xf32, #tpu.memory_space<vmem>>, vector<1x32xf32>
    %c13 = arith.constant 13 : index
    %c0_49 = arith.constant 0 : index
    %158 = vector.load %arg5[%c13, %c0_49] : memref<40x128xf32, #tpu.memory_space<vmem>>, vector<1x32xf32>
    %cst_50 = arith.constant dense<0.000000e+00> : vector<32xf32>
    %159 = vector.multi_reduction <add>, %156, %cst_50 [1] : vector<32x32xf32> to vector<32xf32>
    %160 = vector.shape_cast %159 : vector<32xf32> to vector<32x1xf32>
    %cst_51 = arith.constant 3.200000e+01 : f32
    %161 = vector.broadcast %cst_51 : f32 to vector<32x1xf32>
    %162 = arith.divf %160, %161 : vector<32x1xf32>
    %163 = vector.broadcast %162 : vector<32x1xf32> to vector<32x32xf32>
    %164 = arith.subf %156, %163 : vector<32x32xf32>
    %165 = arith.mulf %164, %164 : vector<32x32xf32>
    %cst_52 = arith.constant dense<0.000000e+00> : vector<32xf32>
    %166 = vector.multi_reduction <add>, %165, %cst_52 [1] : vector<32x32xf32> to vector<32xf32>
    %167 = vector.shape_cast %166 : vector<32xf32> to vector<32x1xf32>
    %cst_53 = arith.constant 3.200000e+01 : f32
    %168 = vector.broadcast %cst_53 : f32 to vector<32x1xf32>
    %169 = arith.divf %167, %168 : vector<32x1xf32>
    %170 = vector.broadcast %162 : vector<32x1xf32> to vector<32x32xf32>
    %171 = arith.subf %156, %170 : vector<32x32xf32>
    %cst_54 = arith.constant 9.99999974E-6 : f32
    %172 = vector.broadcast %cst_54 : f32 to vector<32x1xf32>
    %173 = arith.addf %169, %172 : vector<32x1xf32>
    %174 = math.rsqrt %173 : vector<32x1xf32>
    %175 = vector.broadcast %174 : vector<32x1xf32> to vector<32x32xf32>
    %176 = arith.mulf %171, %175 : vector<32x32xf32>
    %177 = vector.broadcast %157 : vector<1x32xf32> to vector<32x32xf32>
    %178 = arith.mulf %176, %177 : vector<32x32xf32>
    %179 = vector.broadcast %158 : vector<1x32xf32> to vector<32x32xf32>
    %180 = arith.addf %178, %179 : vector<32x32xf32>
    %c0_55 = arith.constant 0 : index
    %c1024 = arith.constant 1024 : index
    %181 = vector.load %arg4[%c0_55, %c1024] : memref<32x2560xf32, #tpu.memory_space<vmem>>, vector<32x64xf32>
    %cst_56 = arith.constant dense<0.000000e+00> : vector<32x64xf32>
    %182 = tpu.matmul %180, %181, %cst_56 {dimension_numbers = #tpu.dot_dimension_numbers<[1], [0], [0], [1], [0, 0, 1, 1], [], []>} : vector<32x32xf32>, vector<32x64xf32>, vector<32x64xf32> -> vector<32x64xf32>
    %c14 = arith.constant 14 : index
    %c0_57 = arith.constant 0 : index
    %183 = vector.load %arg5[%c14, %c0_57] : memref<40x128xf32, #tpu.memory_space<vmem>>, vector<1x64xf32>
    %184 = vector.broadcast %183 : vector<1x64xf32> to vector<32x64xf32>
    %185 = arith.addf %182, %184 : vector<32x64xf32>
    %186 = arith.mulf %185, %185 : vector<32x64xf32>
    %187 = arith.mulf %185, %186 : vector<32x64xf32>
    %cst_58 = arith.constant 4.471500e-02 : f32
    %188 = vector.broadcast %cst_58 : f32 to vector<32x64xf32>
    %189 = arith.mulf %188, %187 : vector<32x64xf32>
    %190 = arith.addf %185, %189 : vector<32x64xf32>
    %cst_59 = arith.constant 0.797884583 : f32
    %191 = vector.broadcast %cst_59 : f32 to vector<32x64xf32>
    %192 = arith.mulf %191, %190 : vector<32x64xf32>
    %193 = math.tanh %192 : vector<32x64xf32>
    %cst_60 = arith.constant 1.000000e+00 : f32
    %194 = vector.broadcast %cst_60 : f32 to vector<32x64xf32>
    %195 = arith.addf %194, %193 : vector<32x64xf32>
    %cst_61 = arith.constant 5.000000e-01 : f32
    %196 = vector.broadcast %cst_61 : f32 to vector<32x64xf32>
    %197 = arith.mulf %196, %195 : vector<32x64xf32>
    %198 = arith.mulf %185, %197 : vector<32x64xf32>
    %c0_62 = arith.constant 0 : index
    %c0_63 = arith.constant 0 : index
    %199 = vector.load %arg6[%c0_62, %c0_63] : memref<64x256xf32, #tpu.memory_space<vmem>>, vector<64x32xf32>
    %cst_64 = arith.constant dense<0.000000e+00> : vector<32x32xf32>
    %200 = tpu.matmul %198, %199, %cst_64 {dimension_numbers = #tpu.dot_dimension_numbers<[1], [0], [0], [1], [0, 0, 1, 1], [], []>} : vector<32x64xf32>, vector<64x32xf32>, vector<32x32xf32> -> vector<32x32xf32>
    %201 = arith.addf %156, %200 : vector<32x32xf32>
    %c15 = arith.constant 15 : index
    %c0_65 = arith.constant 0 : index
    %202 = vector.load %arg5[%c15, %c0_65] : memref<40x128xf32, #tpu.memory_space<vmem>>, vector<1x32xf32>
    %203 = vector.broadcast %202 : vector<1x32xf32> to vector<32x32xf32>
    %204 = arith.addf %201, %203 : vector<32x32xf32>
    %c16 = arith.constant 16 : index
    %c0_66 = arith.constant 0 : index
    %205 = vector.load %arg5[%c16, %c0_66] : memref<40x128xf32, #tpu.memory_space<vmem>>, vector<1x32xf32>
    %c17 = arith.constant 17 : index
    %c0_67 = arith.constant 0 : index
    %206 = vector.load %arg5[%c17, %c0_67] : memref<40x128xf32, #tpu.memory_space<vmem>>, vector<1x32xf32>
    %cst_68 = arith.constant dense<0.000000e+00> : vector<32xf32>
    %207 = vector.multi_reduction <add>, %204, %cst_68 [1] : vector<32x32xf32> to vector<32xf32>
    %208 = vector.shape_cast %207 : vector<32xf32> to vector<32x1xf32>
    %cst_69 = arith.constant 3.200000e+01 : f32
    %209 = vector.broadcast %cst_69 : f32 to vector<32x1xf32>
    %210 = arith.divf %208, %209 : vector<32x1xf32>
    %211 = vector.broadcast %210 : vector<32x1xf32> to vector<32x32xf32>
    %212 = arith.subf %204, %211 : vector<32x32xf32>
    %213 = arith.mulf %212, %212 : vector<32x32xf32>
    %cst_70 = arith.constant dense<0.000000e+00> : vector<32xf32>
    %214 = vector.multi_reduction <add>, %213, %cst_70 [1] : vector<32x32xf32> to vector<32xf32>
    %215 = vector.shape_cast %214 : vector<32xf32> to vector<32x1xf32>
    %cst_71 = arith.constant 3.200000e+01 : f32
    %216 = vector.broadcast %cst_71 : f32 to vector<32x1xf32>
    %217 = arith.divf %215, %216 : vector<32x1xf32>
    %218 = vector.broadcast %210 : vector<32x1xf32> to vector<32x32xf32>
    %219 = arith.subf %204, %218 : vector<32x32xf32>
    %cst_72 = arith.constant 9.99999974E-6 : f32
    %220 = vector.broadcast %cst_72 : f32 to vector<32x1xf32>
    %221 = arith.addf %217, %220 : vector<32x1xf32>
    %222 = math.rsqrt %221 : vector<32x1xf32>
    %223 = vector.broadcast %222 : vector<32x1xf32> to vector<32x32xf32>
    %224 = arith.mulf %219, %223 : vector<32x32xf32>
    %225 = vector.broadcast %205 : vector<1x32xf32> to vector<32x32xf32>
    %226 = arith.mulf %224, %225 : vector<32x32xf32>
    %227 = vector.broadcast %206 : vector<1x32xf32> to vector<32x32xf32>
    %228 = arith.addf %226, %227 : vector<32x32xf32>
    %c0_73 = arith.constant 0 : index
    %c1152 = arith.constant 1152 : index
    %229 = vector.load %arg4[%c0_73, %c1152] : memref<32x2560xf32, #tpu.memory_space<vmem>>, vector<32x384xf32>
    %cst_74 = arith.constant dense<0.000000e+00> : vector<32x384xf32>
    %230 = tpu.matmul %228, %229, %cst_74 {dimension_numbers = #tpu.dot_dimension_numbers<[1], [0], [0], [1], [0, 0, 1, 1], [], []>} : vector<32x32xf32>, vector<32x384xf32>, vector<32x384xf32> -> vector<32x384xf32>
    %231 = vector.extract_strided_slice %230 {offsets = [0, 0], sizes = [32, 32], strides = [1, 1]} : vector<32x384xf32> to vector<32x32xf32>
    %c18 = arith.constant 18 : index
    %c0_75 = arith.constant 0 : index
    %232 = vector.load %arg5[%c18, %c0_75] : memref<40x128xf32, #tpu.memory_space<vmem>>, vector<1x32xf32>
    %233 = vector.broadcast %232 : vector<1x32xf32> to vector<32x32xf32>
    %234 = arith.addf %231, %233 : vector<32x32xf32>
    %235 = vector.extract_strided_slice %230 {offsets = [0, 128], sizes = [32, 32], strides = [1, 1]} : vector<32x384xf32> to vector<32x32xf32>
    %c19 = arith.constant 19 : index
    %c0_76 = arith.constant 0 : index
    %236 = vector.load %arg5[%c19, %c0_76] : memref<40x128xf32, #tpu.memory_space<vmem>>, vector<1x32xf32>
    %237 = vector.broadcast %236 : vector<1x32xf32> to vector<32x32xf32>
    %238 = arith.addf %235, %237 : vector<32x32xf32>
    %239 = vector.extract_strided_slice %230 {offsets = [0, 256], sizes = [32, 32], strides = [1, 1]} : vector<32x384xf32> to vector<32x32xf32>
    %c20 = arith.constant 20 : index
    %c0_77 = arith.constant 0 : index
    %240 = vector.load %arg5[%c20, %c0_77] : memref<40x128xf32, #tpu.memory_space<vmem>>, vector<1x32xf32>
    %241 = vector.broadcast %240 : vector<1x32xf32> to vector<32x32xf32>
    %242 = arith.addf %239, %241 : vector<32x32xf32>
    %c0_78 = arith.constant 0 : index
    %c1536 = arith.constant 1536 : index
    %243 = vector.load %arg4[%c0_78, %c1536] : memref<32x2560xf32, #tpu.memory_space<vmem>>, vector<32x32xf32>
    %c21 = arith.constant 21 : index
    %c0_79 = arith.constant 0 : index
    %244 = vector.load %arg5[%c21, %c0_79] : memref<40x128xf32, #tpu.memory_space<vmem>>, vector<1x32xf32>
    %245 = vector.extract_strided_slice %234 {offsets = [0, 0], sizes = [32, 8], strides = [1, 1]} : vector<32x32xf32> to vector<32x8xf32>
    %246 = vector.extract_strided_slice %234 {offsets = [0, 8], sizes = [32, 8], strides = [1, 1]} : vector<32x32xf32> to vector<32x8xf32>
    %247 = vector.extract_strided_slice %234 {offsets = [0, 16], sizes = [32, 8], strides = [1, 1]} : vector<32x32xf32> to vector<32x8xf32>
    %248 = vector.extract_strided_slice %234 {offsets = [0, 24], sizes = [32, 8], strides = [1, 1]} : vector<32x32xf32> to vector<32x8xf32>
    %249 = tpu.concatenate %245, %246, %247, %248 in 0 : vector<32x8xf32>, vector<32x8xf32>, vector<32x8xf32>, vector<32x8xf32> -> vector<128x8xf32>
    %250 = vector.extract_strided_slice %238 {offsets = [0, 0], sizes = [32, 8], strides = [1, 1]} : vector<32x32xf32> to vector<32x8xf32>
    %251 = vector.extract_strided_slice %238 {offsets = [0, 8], sizes = [32, 8], strides = [1, 1]} : vector<32x32xf32> to vector<32x8xf32>
    %252 = vector.extract_strided_slice %238 {offsets = [0, 16], sizes = [32, 8], strides = [1, 1]} : vector<32x32xf32> to vector<32x8xf32>
    %253 = vector.extract_strided_slice %238 {offsets = [0, 24], sizes = [32, 8], strides = [1, 1]} : vector<32x32xf32> to vector<32x8xf32>
    %254 = tpu.concatenate %250, %251, %252, %253 in 0 : vector<32x8xf32>, vector<32x8xf32>, vector<32x8xf32>, vector<32x8xf32> -> vector<128x8xf32>
    %255 = vector.extract_strided_slice %242 {offsets = [0, 0], sizes = [32, 8], strides = [1, 1]} : vector<32x32xf32> to vector<32x8xf32>
    %256 = vector.extract_strided_slice %242 {offsets = [0, 8], sizes = [32, 8], strides = [1, 1]} : vector<32x32xf32> to vector<32x8xf32>
    %257 = vector.extract_strided_slice %242 {offsets = [0, 16], sizes = [32, 8], strides = [1, 1]} : vector<32x32xf32> to vector<32x8xf32>
    %258 = vector.extract_strided_slice %242 {offsets = [0, 24], sizes = [32, 8], strides = [1, 1]} : vector<32x32xf32> to vector<32x8xf32>
    %259 = tpu.concatenate %255, %256, %257, %258 in 0 : vector<32x8xf32>, vector<32x8xf32>, vector<32x8xf32>, vector<32x8xf32> -> vector<128x8xf32>
    %cst_80 = arith.constant dense<0.000000e+00> : vector<128x128xf32>
    %260 = tpu.matmul %249, %254, %cst_80 {dimension_numbers = #tpu.dot_dimension_numbers<[1], [1], [0], [0], [0, 0, 1, 0], [], []>} : vector<128x8xf32>, vector<128x8xf32>, vector<128x128xf32> -> vector<128x128xf32>
    %261 = arith.addf %260, %2 : vector<128x128xf32>
    %cst_81 = arith.constant dense<0xFF800000> : vector<128xf32>
    %262 = vector.multi_reduction <maximumf>, %261, %cst_81 [1] : vector<128x128xf32> to vector<128xf32>
    %263 = vector.shape_cast %262 : vector<128xf32> to vector<128x1xf32>
    %264 = vector.broadcast %263 : vector<128x1xf32> to vector<128x128xf32>
    %265 = arith.subf %261, %264 : vector<128x128xf32>
    %266 = math.exp %265 : vector<128x128xf32>
    %cst_82 = arith.constant dense<0.000000e+00> : vector<128xf32>
    %267 = vector.multi_reduction <add>, %266, %cst_82 [1] : vector<128x128xf32> to vector<128xf32>
    %268 = vector.shape_cast %267 : vector<128xf32> to vector<128x1xf32>
    %269 = vector.broadcast %268 : vector<128x1xf32> to vector<128x128xf32>
    %270 = arith.divf %266, %269 : vector<128x128xf32>
    %cst_83 = arith.constant dense<0.000000e+00> : vector<128x8xf32>
    %271 = tpu.matmul %270, %259, %cst_83 {dimension_numbers = #tpu.dot_dimension_numbers<[1], [0], [0], [1], [0, 0, 1, 1], [], []>} : vector<128x128xf32>, vector<128x8xf32>, vector<128x8xf32> -> vector<128x8xf32>
    %272 = vector.extract_strided_slice %271 {offsets = [0, 0], sizes = [32, 8], strides = [1, 1]} : vector<128x8xf32> to vector<32x8xf32>
    %273 = vector.extract_strided_slice %271 {offsets = [32, 0], sizes = [32, 8], strides = [1, 1]} : vector<128x8xf32> to vector<32x8xf32>
    %274 = vector.extract_strided_slice %271 {offsets = [64, 0], sizes = [32, 8], strides = [1, 1]} : vector<128x8xf32> to vector<32x8xf32>
    %275 = vector.extract_strided_slice %271 {offsets = [96, 0], sizes = [32, 8], strides = [1, 1]} : vector<128x8xf32> to vector<32x8xf32>
    %276 = tpu.concatenate %272, %273, %274, %275 in 1 : vector<32x8xf32>, vector<32x8xf32>, vector<32x8xf32>, vector<32x8xf32> -> vector<32x32xf32>
    %cst_84 = arith.constant dense<0.000000e+00> : vector<32x32xf32>
    %277 = tpu.matmul %276, %243, %cst_84 {dimension_numbers = #tpu.dot_dimension_numbers<[1], [0], [0], [1], [0, 0, 1, 1], [], []>} : vector<32x32xf32>, vector<32x32xf32>, vector<32x32xf32> -> vector<32x32xf32>
    %278 = vector.broadcast %244 : vector<1x32xf32> to vector<32x32xf32>
    %279 = arith.addf %277, %278 : vector<32x32xf32>
    %280 = arith.addf %204, %279 : vector<32x32xf32>
    %c22 = arith.constant 22 : index
    %c0_85 = arith.constant 0 : index
    %281 = vector.load %arg5[%c22, %c0_85] : memref<40x128xf32, #tpu.memory_space<vmem>>, vector<1x32xf32>
    %c23 = arith.constant 23 : index
    %c0_86 = arith.constant 0 : index
    %282 = vector.load %arg5[%c23, %c0_86] : memref<40x128xf32, #tpu.memory_space<vmem>>, vector<1x32xf32>
    %cst_87 = arith.constant dense<0.000000e+00> : vector<32xf32>
    %283 = vector.multi_reduction <add>, %280, %cst_87 [1] : vector<32x32xf32> to vector<32xf32>
    %284 = vector.shape_cast %283 : vector<32xf32> to vector<32x1xf32>
    %cst_88 = arith.constant 3.200000e+01 : f32
    %285 = vector.broadcast %cst_88 : f32 to vector<32x1xf32>
    %286 = arith.divf %284, %285 : vector<32x1xf32>
    %287 = vector.broadcast %286 : vector<32x1xf32> to vector<32x32xf32>
    %288 = arith.subf %280, %287 : vector<32x32xf32>
    %289 = arith.mulf %288, %288 : vector<32x32xf32>
    %cst_89 = arith.constant dense<0.000000e+00> : vector<32xf32>
    %290 = vector.multi_reduction <add>, %289, %cst_89 [1] : vector<32x32xf32> to vector<32xf32>
    %291 = vector.shape_cast %290 : vector<32xf32> to vector<32x1xf32>
    %cst_90 = arith.constant 3.200000e+01 : f32
    %292 = vector.broadcast %cst_90 : f32 to vector<32x1xf32>
    %293 = arith.divf %291, %292 : vector<32x1xf32>
    %294 = vector.broadcast %286 : vector<32x1xf32> to vector<32x32xf32>
    %295 = arith.subf %280, %294 : vector<32x32xf32>
    %cst_91 = arith.constant 9.99999974E-6 : f32
    %296 = vector.broadcast %cst_91 : f32 to vector<32x1xf32>
    %297 = arith.addf %293, %296 : vector<32x1xf32>
    %298 = math.rsqrt %297 : vector<32x1xf32>
    %299 = vector.broadcast %298 : vector<32x1xf32> to vector<32x32xf32>
    %300 = arith.mulf %295, %299 : vector<32x32xf32>
    %301 = vector.broadcast %281 : vector<1x32xf32> to vector<32x32xf32>
    %302 = arith.mulf %300, %301 : vector<32x32xf32>
    %303 = vector.broadcast %282 : vector<1x32xf32> to vector<32x32xf32>
    %304 = arith.addf %302, %303 : vector<32x32xf32>
    %c0_92 = arith.constant 0 : index
    %c1664 = arith.constant 1664 : index
    %305 = vector.load %arg4[%c0_92, %c1664] : memref<32x2560xf32, #tpu.memory_space<vmem>>, vector<32x32xf32>
    %cst_93 = arith.constant dense<0.000000e+00> : vector<32x32xf32>
    %306 = tpu.matmul %304, %305, %cst_93 {dimension_numbers = #tpu.dot_dimension_numbers<[1], [0], [0], [1], [0, 0, 1, 1], [], []>} : vector<32x32xf32>, vector<32x32xf32>, vector<32x32xf32> -> vector<32x32xf32>
    %c24 = arith.constant 24 : index
    %c0_94 = arith.constant 0 : index
    %307 = vector.load %arg5[%c24, %c0_94] : memref<40x128xf32, #tpu.memory_space<vmem>>, vector<1x32xf32>
    %308 = vector.broadcast %307 : vector<1x32xf32> to vector<32x32xf32>
    %309 = arith.addf %306, %308 : vector<32x32xf32>
    %c0_95 = arith.constant 0 : index
    %c1792 = arith.constant 1792 : index
    %310 = vector.load %arg4[%c0_95, %c1792] : memref<32x2560xf32, #tpu.memory_space<vmem>>, vector<32x256xf32>
    %cst_96 = arith.constant dense<0.000000e+00> : vector<16x256xf32>
    %311 = tpu.matmul %1, %310, %cst_96 {dimension_numbers = #tpu.dot_dimension_numbers<[1], [0], [0], [1], [0, 0, 1, 1], [], []>} : vector<16x32xf32>, vector<32x256xf32>, vector<16x256xf32> -> vector<16x256xf32>
    %312 = vector.extract_strided_slice %311 {offsets = [0, 0], sizes = [16, 32], strides = [1, 1]} : vector<16x256xf32> to vector<16x32xf32>
    %c25 = arith.constant 25 : index
    %c0_97 = arith.constant 0 : index
    %313 = vector.load %arg5[%c25, %c0_97] : memref<40x128xf32, #tpu.memory_space<vmem>>, vector<1x32xf32>
    %314 = vector.broadcast %313 : vector<1x32xf32> to vector<16x32xf32>
    %315 = arith.addf %312, %314 : vector<16x32xf32>
    %316 = vector.extract_strided_slice %311 {offsets = [0, 128], sizes = [16, 32], strides = [1, 1]} : vector<16x256xf32> to vector<16x32xf32>
    %c26 = arith.constant 26 : index
    %c0_98 = arith.constant 0 : index
    %317 = vector.load %arg5[%c26, %c0_98] : memref<40x128xf32, #tpu.memory_space<vmem>>, vector<1x32xf32>
    %318 = vector.broadcast %317 : vector<1x32xf32> to vector<16x32xf32>
    %319 = arith.addf %316, %318 : vector<16x32xf32>
    %c0_99 = arith.constant 0 : index
    %c2048 = arith.constant 2048 : index
    %320 = vector.load %arg4[%c0_99, %c2048] : memref<32x2560xf32, #tpu.memory_space<vmem>>, vector<32x32xf32>
    %c27 = arith.constant 27 : index
    %c0_100 = arith.constant 0 : index
    %321 = vector.load %arg5[%c27, %c0_100] : memref<40x128xf32, #tpu.memory_space<vmem>>, vector<1x32xf32>
    %322 = vector.extract_strided_slice %309 {offsets = [0, 0], sizes = [32, 8], strides = [1, 1]} : vector<32x32xf32> to vector<32x8xf32>
    %323 = vector.extract_strided_slice %309 {offsets = [0, 8], sizes = [32, 8], strides = [1, 1]} : vector<32x32xf32> to vector<32x8xf32>
    %324 = vector.extract_strided_slice %309 {offsets = [0, 16], sizes = [32, 8], strides = [1, 1]} : vector<32x32xf32> to vector<32x8xf32>
    %325 = vector.extract_strided_slice %309 {offsets = [0, 24], sizes = [32, 8], strides = [1, 1]} : vector<32x32xf32> to vector<32x8xf32>
    %326 = tpu.concatenate %322, %323, %324, %325 in 0 : vector<32x8xf32>, vector<32x8xf32>, vector<32x8xf32>, vector<32x8xf32> -> vector<128x8xf32>
    %327 = vector.extract_strided_slice %315 {offsets = [0, 0], sizes = [16, 8], strides = [1, 1]} : vector<16x32xf32> to vector<16x8xf32>
    %328 = vector.extract_strided_slice %315 {offsets = [0, 8], sizes = [16, 8], strides = [1, 1]} : vector<16x32xf32> to vector<16x8xf32>
    %329 = vector.extract_strided_slice %315 {offsets = [0, 16], sizes = [16, 8], strides = [1, 1]} : vector<16x32xf32> to vector<16x8xf32>
    %330 = vector.extract_strided_slice %315 {offsets = [0, 24], sizes = [16, 8], strides = [1, 1]} : vector<16x32xf32> to vector<16x8xf32>
    %331 = tpu.concatenate %327, %328, %329, %330 in 0 : vector<16x8xf32>, vector<16x8xf32>, vector<16x8xf32>, vector<16x8xf32> -> vector<64x8xf32>
    %332 = vector.extract_strided_slice %319 {offsets = [0, 0], sizes = [16, 8], strides = [1, 1]} : vector<16x32xf32> to vector<16x8xf32>
    %333 = vector.extract_strided_slice %319 {offsets = [0, 8], sizes = [16, 8], strides = [1, 1]} : vector<16x32xf32> to vector<16x8xf32>
    %334 = vector.extract_strided_slice %319 {offsets = [0, 16], sizes = [16, 8], strides = [1, 1]} : vector<16x32xf32> to vector<16x8xf32>
    %335 = vector.extract_strided_slice %319 {offsets = [0, 24], sizes = [16, 8], strides = [1, 1]} : vector<16x32xf32> to vector<16x8xf32>
    %336 = tpu.concatenate %332, %333, %334, %335 in 0 : vector<16x8xf32>, vector<16x8xf32>, vector<16x8xf32>, vector<16x8xf32> -> vector<64x8xf32>
    %cst_101 = arith.constant dense<0.000000e+00> : vector<128x64xf32>
    %337 = tpu.matmul %326, %331, %cst_101 {dimension_numbers = #tpu.dot_dimension_numbers<[1], [1], [0], [0], [0, 0, 1, 0], [], []>} : vector<128x8xf32>, vector<64x8xf32>, vector<128x64xf32> -> vector<128x64xf32>
    %338 = arith.addf %337, %3 : vector<128x64xf32>
    %cst_102 = arith.constant dense<0xFF800000> : vector<128xf32>
    %339 = vector.multi_reduction <maximumf>, %338, %cst_102 [1] : vector<128x64xf32> to vector<128xf32>
    %340 = vector.shape_cast %339 : vector<128xf32> to vector<128x1xf32>
    %341 = vector.broadcast %340 : vector<128x1xf32> to vector<128x64xf32>
    %342 = arith.subf %338, %341 : vector<128x64xf32>
    %343 = math.exp %342 : vector<128x64xf32>
    %cst_103 = arith.constant dense<0.000000e+00> : vector<128xf32>
    %344 = vector.multi_reduction <add>, %343, %cst_103 [1] : vector<128x64xf32> to vector<128xf32>
    %345 = vector.shape_cast %344 : vector<128xf32> to vector<128x1xf32>
    %346 = vector.broadcast %345 : vector<128x1xf32> to vector<128x64xf32>
    %347 = arith.divf %343, %346 : vector<128x64xf32>
    %cst_104 = arith.constant dense<0.000000e+00> : vector<128x8xf32>
    %348 = tpu.matmul %347, %336, %cst_104 {dimension_numbers = #tpu.dot_dimension_numbers<[1], [0], [0], [1], [0, 0, 1, 1], [], []>} : vector<128x64xf32>, vector<64x8xf32>, vector<128x8xf32> -> vector<128x8xf32>
    %349 = vector.extract_strided_slice %348 {offsets = [0, 0], sizes = [32, 8], strides = [1, 1]} : vector<128x8xf32> to vector<32x8xf32>
    %350 = vector.extract_strided_slice %348 {offsets = [32, 0], sizes = [32, 8], strides = [1, 1]} : vector<128x8xf32> to vector<32x8xf32>
    %351 = vector.extract_strided_slice %348 {offsets = [64, 0], sizes = [32, 8], strides = [1, 1]} : vector<128x8xf32> to vector<32x8xf32>
    %352 = vector.extract_strided_slice %348 {offsets = [96, 0], sizes = [32, 8], strides = [1, 1]} : vector<128x8xf32> to vector<32x8xf32>
    %353 = tpu.concatenate %349, %350, %351, %352 in 1 : vector<32x8xf32>, vector<32x8xf32>, vector<32x8xf32>, vector<32x8xf32> -> vector<32x32xf32>
    %cst_105 = arith.constant dense<0.000000e+00> : vector<32x32xf32>
    %354 = tpu.matmul %353, %320, %cst_105 {dimension_numbers = #tpu.dot_dimension_numbers<[1], [0], [0], [1], [0, 0, 1, 1], [], []>} : vector<32x32xf32>, vector<32x32xf32>, vector<32x32xf32> -> vector<32x32xf32>
    %355 = vector.broadcast %321 : vector<1x32xf32> to vector<32x32xf32>
    %356 = arith.addf %354, %355 : vector<32x32xf32>
    %357 = arith.addf %280, %356 : vector<32x32xf32>
    %c28 = arith.constant 28 : index
    %c0_106 = arith.constant 0 : index
    %358 = vector.load %arg5[%c28, %c0_106] : memref<40x128xf32, #tpu.memory_space<vmem>>, vector<1x32xf32>
    %c29 = arith.constant 29 : index
    %c0_107 = arith.constant 0 : index
    %359 = vector.load %arg5[%c29, %c0_107] : memref<40x128xf32, #tpu.memory_space<vmem>>, vector<1x32xf32>
    %cst_108 = arith.constant dense<0.000000e+00> : vector<32xf32>
    %360 = vector.multi_reduction <add>, %357, %cst_108 [1] : vector<32x32xf32> to vector<32xf32>
    %361 = vector.shape_cast %360 : vector<32xf32> to vector<32x1xf32>
    %cst_109 = arith.constant 3.200000e+01 : f32
    %362 = vector.broadcast %cst_109 : f32 to vector<32x1xf32>
    %363 = arith.divf %361, %362 : vector<32x1xf32>
    %364 = vector.broadcast %363 : vector<32x1xf32> to vector<32x32xf32>
    %365 = arith.subf %357, %364 : vector<32x32xf32>
    %366 = arith.mulf %365, %365 : vector<32x32xf32>
    %cst_110 = arith.constant dense<0.000000e+00> : vector<32xf32>
    %367 = vector.multi_reduction <add>, %366, %cst_110 [1] : vector<32x32xf32> to vector<32xf32>
    %368 = vector.shape_cast %367 : vector<32xf32> to vector<32x1xf32>
    %cst_111 = arith.constant 3.200000e+01 : f32
    %369 = vector.broadcast %cst_111 : f32 to vector<32x1xf32>
    %370 = arith.divf %368, %369 : vector<32x1xf32>
    %371 = vector.broadcast %363 : vector<32x1xf32> to vector<32x32xf32>
    %372 = arith.subf %357, %371 : vector<32x32xf32>
    %cst_112 = arith.constant 9.99999974E-6 : f32
    %373 = vector.broadcast %cst_112 : f32 to vector<32x1xf32>
    %374 = arith.addf %370, %373 : vector<32x1xf32>
    %375 = math.rsqrt %374 : vector<32x1xf32>
    %376 = vector.broadcast %375 : vector<32x1xf32> to vector<32x32xf32>
    %377 = arith.mulf %372, %376 : vector<32x32xf32>
    %378 = vector.broadcast %358 : vector<1x32xf32> to vector<32x32xf32>
    %379 = arith.mulf %377, %378 : vector<32x32xf32>
    %380 = vector.broadcast %359 : vector<1x32xf32> to vector<32x32xf32>
    %381 = arith.addf %379, %380 : vector<32x32xf32>
    %c0_113 = arith.constant 0 : index
    %c2176 = arith.constant 2176 : index
    %382 = vector.load %arg4[%c0_113, %c2176] : memref<32x2560xf32, #tpu.memory_space<vmem>>, vector<32x64xf32>
    %cst_114 = arith.constant dense<0.000000e+00> : vector<32x64xf32>
    %383 = tpu.matmul %381, %382, %cst_114 {dimension_numbers = #tpu.dot_dimension_numbers<[1], [0], [0], [1], [0, 0, 1, 1], [], []>} : vector<32x32xf32>, vector<32x64xf32>, vector<32x64xf32> -> vector<32x64xf32>
    %c30 = arith.constant 30 : index
    %c0_115 = arith.constant 0 : index
    %384 = vector.load %arg5[%c30, %c0_115] : memref<40x128xf32, #tpu.memory_space<vmem>>, vector<1x64xf32>
    %385 = vector.broadcast %384 : vector<1x64xf32> to vector<32x64xf32>
    %386 = arith.addf %383, %385 : vector<32x64xf32>
    %387 = arith.mulf %386, %386 : vector<32x64xf32>
    %388 = arith.mulf %386, %387 : vector<32x64xf32>
    %cst_116 = arith.constant 4.471500e-02 : f32
    %389 = vector.broadcast %cst_116 : f32 to vector<32x64xf32>
    %390 = arith.mulf %389, %388 : vector<32x64xf32>
    %391 = arith.addf %386, %390 : vector<32x64xf32>
    %cst_117 = arith.constant 0.797884583 : f32
    %392 = vector.broadcast %cst_117 : f32 to vector<32x64xf32>
    %393 = arith.mulf %392, %391 : vector<32x64xf32>
    %394 = math.tanh %393 : vector<32x64xf32>
    %cst_118 = arith.constant 1.000000e+00 : f32
    %395 = vector.broadcast %cst_118 : f32 to vector<32x64xf32>
    %396 = arith.addf %395, %394 : vector<32x64xf32>
    %cst_119 = arith.constant 5.000000e-01 : f32
    %397 = vector.broadcast %cst_119 : f32 to vector<32x64xf32>
    %398 = arith.mulf %397, %396 : vector<32x64xf32>
    %399 = arith.mulf %386, %398 : vector<32x64xf32>
    %c0_120 = arith.constant 0 : index
    %c128 = arith.constant 128 : index
    %400 = vector.load %arg6[%c0_120, %c128] : memref<64x256xf32, #tpu.memory_space<vmem>>, vector<64x32xf32>
    %cst_121 = arith.constant dense<0.000000e+00> : vector<32x32xf32>
    %401 = tpu.matmul %399, %400, %cst_121 {dimension_numbers = #tpu.dot_dimension_numbers<[1], [0], [0], [1], [0, 0, 1, 1], [], []>} : vector<32x64xf32>, vector<64x32xf32>, vector<32x32xf32> -> vector<32x32xf32>
    %402 = arith.addf %357, %401 : vector<32x32xf32>
    %c31 = arith.constant 31 : index
    %c0_122 = arith.constant 0 : index
    %403 = vector.load %arg5[%c31, %c0_122] : memref<40x128xf32, #tpu.memory_space<vmem>>, vector<1x32xf32>
    %404 = vector.broadcast %403 : vector<1x32xf32> to vector<32x32xf32>
    %405 = arith.addf %402, %404 : vector<32x32xf32>
    %c0_123 = arith.constant 0 : index
    %c2304 = arith.constant 2304 : index
    %406 = vector.load %arg4[%c0_123, %c2304] : memref<32x2560xf32, #tpu.memory_space<vmem>>, vector<32x32xf32>
    %cst_124 = arith.constant dense<0.000000e+00> : vector<32x32xf32>
    %407 = tpu.matmul %405, %406, %cst_124 {dimension_numbers = #tpu.dot_dimension_numbers<[1], [0], [0], [1], [0, 0, 1, 1], [], []>} : vector<32x32xf32>, vector<32x32xf32>, vector<32x32xf32> -> vector<32x32xf32>
    %c32 = arith.constant 32 : index
    %c0_125 = arith.constant 0 : index
    %408 = vector.load %arg5[%c32, %c0_125] : memref<40x128xf32, #tpu.memory_space<vmem>>, vector<1x32xf32>
    %409 = vector.broadcast %408 : vector<1x32xf32> to vector<32x32xf32>
    %410 = arith.addf %407, %409 : vector<32x32xf32>
    %cst_126 = arith.constant 0.000000e+00 : f32
    %411 = vector.broadcast %cst_126 : f32 to vector<32x32xf32>
    %412 = arith.maximumf %410, %411 : vector<32x32xf32>
    %c0_127 = arith.constant 0 : index
    %c2432 = arith.constant 2432 : index
    %413 = vector.load %arg4[%c0_127, %c2432] : memref<32x2560xf32, #tpu.memory_space<vmem>>, vector<32x128xf32>
    %cst_128 = arith.constant dense<0.000000e+00> : vector<32x128xf32>
    %414 = tpu.matmul %412, %413, %cst_128 {dimension_numbers = #tpu.dot_dimension_numbers<[1], [0], [0], [1], [0, 0, 1, 1], [], []>} : vector<32x32xf32>, vector<32x128xf32>, vector<32x128xf32> -> vector<32x128xf32>
    %c33 = arith.constant 33 : index
    %c0_129 = arith.constant 0 : index
    %415 = vector.load %arg5[%c33, %c0_129] : memref<40x128xf32, #tpu.memory_space<vmem>>, vector<1x128xf32>
    %416 = vector.broadcast %415 : vector<1x128xf32> to vector<32x128xf32>
    %417 = arith.addf %414, %416 : vector<32x128xf32>
    %c0_130 = arith.constant 0 : index
    %c0_131 = arith.constant 0 : index
    %418 = vector.load %arg7[%c0_130, %c0_131] : memref<32x128xf32, #tpu.memory_space<vmem>>, vector<32x128xf32>
    tpu.vector_store %arg7[%c0_130, %c0_131], %417 {strides = array<i32>} : memref<32x128xf32, #tpu.memory_space<vmem>>, vector<32x128xf32>,
    return
  }
}

</mosaic_0001>

<bundles_post_ra>
// kernel: transformer_decoder_forward.1
= control target key start
LH: loop header
LB: loop body
LE: loop exit
PB: predicated region body
PF: predicated region fallthrough
CT: control target
= control target key end

     0   :  { %12 = vsyncpa [#allocation3], 0  ;;  %s7430_s0 = inlined_call_operand.hbm [shape: f32[32,32], index: 0, kind: input, shape index: {}]   ;;  %s7431_s1 = inlined_call_operand.vmem [shape: f32[16,32], index: 1, kind: input, shape index: {}]   ;;  %s7432_s2 = inlined_call_operand.vmem [shape: f32[128,128], index: 2, kind: input, shape index: {}]   ;;  %s7433_s3 = inlined_call_operand.vmem [shape: f32[128,64], index: 3, kind: input, shape index: {}]   ;;  %s7434_s4 = inlined_call_operand.hbm [shape: f32[32,2560], index: 4, kind: input, shape index: {}]   ;;  %s7435_s5 = inlined_call_operand.vmem [shape: f32[40,128], index: 5, kind: input, shape index: {}]   ;;  %s7436_s6 = inlined_call_operand.hbm [shape: f32[64,256], index: 6, kind: input, shape index: {}]   ;;  %s7437_s7 = inlined_call_operand.vmem [shape: f32[32,128], index: 7, kind: output, shape index: {}]  }
   0x1   :  { %13 = vsyncpa [#allocation5], 0  ;;  %s37_s26 = sshll.u32 %s7434_s4, 4  ;;  %s5471_s27 = smov [#allocation4]   ;;  %s38_s26 = int_to_ptr.hbm [resolvable:$true] %s37_s26 }
   0x2   :  { %s39_s28 = sshll.u32 %s5471_s27, 4  ;;  %s18_s8 = sshll.u32 %s7430_s0, 4  ;;  %s40_s28 = int_to_ptr.vmem [resolvable:$true] %s39_s28  ;;  %s19_s8 = int_to_ptr.hbm [resolvable:$true] %s18_s8 }
   0x3   :  { %s5472_s9 = smov 2560   ;;  %s5473_s10 = smov 160  }
   0x4   :  { %45 = dma.hbm_to_vmem [thread:$0]  %s38_s26, 10240, %s40_s28, [#allocation5], %s5472_s9, %s5472_s9, %s5473_s10  }
   0x5   :  { %s5474_s11 = smov [#allocation2]   ;;  %s5475_s13 = smov 128  }
   0x6   :  { %s20_s12 = sshll.u32 %s5474_s11, 4  ;;  %s5476_s14 = smov 8   ;;  %s21_s12 = int_to_ptr.vmem [resolvable:$true] %s20_s12 }
   0x7   :  { %26 = dma.hbm_to_vmem [thread:$0]  %s19_s8, 512, %s21_s12, [#allocation3], %s5475_s13, %s5475_s13, %s5476_s14  }
   0x8   :  { %s52_s16 = sshll.u32 %s7436_s6, 4  ;;  %s5477_s17 = smov [#allocation6]   ;;  %s53_s16 = int_to_ptr.hbm [resolvable:$true] %s52_s16 }
   0x9   :  { %s54_s18 = sshll.u32 %s5477_s17, 4  ;;  %s5478_s0 = smov 256   ;;  %s55_s18 = int_to_ptr.vmem [resolvable:$true] %s54_s18 }
   0xa   :  { %s5479_s19 = smov 16  }
   0xb   :  { %60 = dma.hbm_to_vmem [thread:$0]  %s53_s16, 2048, %s55_s18, [#allocation5], %s5478_s0, %s5478_s0, %s5479_s19  }
   0xc   :  { %5467 = dma.done.wait [#allocation3], 512  }
   0xd   :  { %5468 = vsyncadd [#allocation3], 4294966784 }
   0xe   :  { %5469 = dma.done.wait [#allocation5], 12288  }
   0xf   :  { %5470 = vsyncadd [#allocation5], 4294955008  ;;  %vm113_vm0 = vcmask 261120   ;;  %v75_v0 = vld [vmem:[#allocation2 + $0x10] sm:$0xff]  ;;  %v73_v1 = vld [vmem:[#allocation2] sm:$0xff]  ;;  %v5480_v8 = vmov 32.0  }
  0x10   :  { %v76_v2 = vld [vmem:[#allocation2 + $0x18] sm:$0xff]  ;;  %v120_v3 = vsel %vm113_vm0, %v75_v0, 0.0  ;;  %v114_v4 = vsel %vm113_vm0, %v73_v1, 0.0  ;;  %v74_v5 = vld [vmem:[#allocation2 + $0x8] sm:$0xff]  ;;  %5035 = vrcp.f32 %v5480_v8  ;;  %v228_v35 = vld [vmem:[#allocation4 + $0x1e0] sm:$0xff]  ;;  %s5481_s25 = smov 104  }
  0x11   :  { %121 = vadd.xlane.f32.xlu1 %v120_v3  ;;  %115 = vadd.xlane.f32.xlu0 %v114_v4  ;;  %v123_v6 = vsel %vm113_vm0, %v76_v2, 0.0  ;;  %v117_v7 = vsel %vm113_vm0, %v74_v5, 0.0  ;;  %v229_v36 = vld [vmem:[#allocation4 + $0x1e8] sm:$0xff]  ;;  %v230_v37 = vld [vmem:[#allocation4 + $0x1f0] sm:$0xff]  ;;  %v225_v38 = vld [vmem:[#allocation4 + $0x140] sm:$0xff]  ;;  %s5482_s26 = smov 112  }
  0x12   :  { %255 = vmatpush.msra.mxu0 %v228_v35  ;;  %284 = vmatpush.msra.mxu1 %v229_v36  ;;  %v226_v39 = vld [vmem:[#allocation4 + $0x148] sm:$0xff]  ;;  %v227_v40 = vld [vmem:[#allocation4 + $0x150] sm:$0xff]  ;;  %v222_v41 = vld [vmem:[#allocation4 + $0xa0] sm:$0xff]  ;;  %s5483_s27 = smov 120   ;;  %vm449_vm14 = vcmask 64512   ;;  %s5484_s6 = smov 24  }
  0x13   :  { %313 = vmatpush.msra.mxu2 %v230_v37  ;;  %v223_v42 = vld [vmem:[#allocation4 + $0xa8] sm:$0xff]  ;;  %v224_v43 = vld [vmem:[#allocation4 + $0xb0] sm:$0xff]  ;;  %v219_v44 = vld [vmem:[#allocation4] sm:$0xff] }
  0x14   :  { %256 = vmatpush.msra.mxu0 %v225_v38  ;;  %285 = vmatpush.msra.mxu1 %v226_v39  ;;  %v220_v45 = vld [vmem:[#allocation4 + $0x8] sm:$0xff]  ;;  %v221_v46 = vld [vmem:[#allocation4 + $0x10] sm:$0xff] }
  0x15   :  { %314 = vmatpush.msra.mxu2 %v227_v40 }
  0x16   :  { %v5036_v9 = vpop.eup %5035  ;;  %257 = vmatpush.msra.mxu0 %v222_v41  ;;  %286 = vmatpush.msra.mxu1 %v223_v42  ;;  %v5004_v41 = vld [vmem:[%s7435_s5 + $0x3] ss:$0 sm:$0xff] }
  0x17   :  { %v127_v10 = vmul.f32 32.0, %v5036_v9  ;;  %vm131_vm1 = vweird.f32 %v5036_v9  ;;  %315 = vmatpush.msra.mxu2 %v224_v43 }
  0x18   :  { %258 = vmatpush.msra.mxu0 %v219_v44  ;;  %287 = vmatpush.msra.mxu1 %v220_v45 }
  0x19   :  { %124 = vadd.xlane.f32.xlu1 %v123_v6  ;;  %118 = vadd.xlane.f32.xlu0 %v117_v7  ;;  %v128_v11 = vsub.f32 1.0, %v127_v10 }
  0x1a   :  { %316 = vmatpush.msra.mxu2 %v221_v46 }
  0x1b   :  { %v129_v12 = vmul.f32 %v5036_v9, %v128_v11 }
  0x1d   :  { %v130_v13 = vadd.f32 %v5036_v9, %v129_v12 }
  0x1f   :  { %v5540_v14 = vsel %vm131_vm1, %v5036_v9, %v130_v13  ;;  %v5001_v9 = vld [vmem:[%s7435_s5] ss:$0 sm:$0xff]  ;;  %v5002_v13 = vld [vmem:[%s7435_s5 + $0x1] ss:$0 sm:$0xff] }
  0x84   :  { %v122_v15 = vpop.xlane.xlu1 %121  ;;  %v116_v16 = vpop.xlane.xlu0 %115 }
  0x85   :  { %v135_v17 = vmul.f32 %v5540_v14, %v122_v15  ;;  %v133_v18 = vmul.f32 %v5540_v14, %v116_v16 }
  0x87   :  { %v5544_v19 = vsub.f32 %v75_v0, %v135_v17  ;;  %v5546_v20 = vsub.f32 %v73_v1, %v133_v18 }
  0x89   :  { %v143_v21 = vmul.f32 %v5544_v19, %v5544_v19  ;;  %v141_v22 = vmul.f32 %v5546_v20, %v5546_v20 }
  0x8b   :  { %v151_v23 = vsel %vm113_vm0, %v143_v21, 0.0  ;;  %v145_v24 = vsel %vm113_vm0, %v141_v22, 0.0 }
  0x8c   :  { %v125_v25 = vpop.xlane.xlu1 %124  ;;  %152 = vadd.xlane.f32.xlu0 %v151_v23  ;;  %146 = vadd.xlane.f32.xlu2 %v145_v24  ;;  %v119_v26 = vpop.xlane.xlu0 %118 }
  0x8d   :  { %v136_v27 = vmul.f32 %v5540_v14, %v125_v25  ;;  %v134_v28 = vmul.f32 %v5540_v14, %v119_v26 }
  0x8f   :  { %v5556_v29 = vsub.f32 %v76_v2, %v136_v27  ;;  %v5558_v30 = vsub.f32 %v74_v5, %v134_v28 }
  0x91   :  { %v144_v31 = vmul.f32 %v5556_v29, %v5556_v29  ;;  %v142_v32 = vmul.f32 %v5558_v30, %v5558_v30 }
  0x93   :  { %v154_v33 = vsel %vm113_vm0, %v144_v31, 0.0  ;;  %v148_v34 = vsel %vm113_vm0, %v142_v32, 0.0 }
  0x94   :  { %155 = vadd.xlane.f32.xlu1 %v154_v33  ;;  %149 = vadd.xlane.f32.xlu2 %v148_v34 }
  0xff   :  { %v147_v47 = vpop.xlane.xlu2 %146  ;;  %v153_v48 = vpop.xlane.xlu0 %152 }
 0x100   :  { %v157_v49 = vmul.f32 %v147_v47, %v5540_v14  ;;  %v159_v50 = vmul.f32 %v153_v48, %v5540_v14 }
 0x102   :  { %v161_v51 = vadd.f32 1e-05, %v157_v49  ;;  %v163_v52 = vadd.f32 1e-05, %v159_v50  ;;  %v5003_v49 = vld [vmem:[%s7435_s5 + $0x2] ss:$0 sm:$0xff] }
 0x104   :  { %5037 = vrsqrt.f32 %v161_v51  ;;  %vm171_vm3 = vweird.f32 %v161_v51  ;;  %vm191_vm5 = vweird.f32 %v163_v52 }
 0x105   :  { %5039 = vrsqrt.f32 %v163_v52 }
 0x107   :  { %v156_v53 = vpop.xlane.xlu1 %155  ;;  %v150_v54 = vpop.xlane.xlu2 %149 }
 0x108   :  { %v160_v55 = vmul.f32 %v156_v53, %v5540_v14  ;;  %v158_v56 = vmul.f32 %v150_v54, %v5540_v14 }
 0x10a   :  { %v5038_v57 = vpop.eup %5037  ;;  %v164_v58 = vadd.f32 1e-05, %v160_v55  ;;  %v162_v59 = vadd.f32 1e-05, %v158_v56 }
 0x10b   :  { %v5040_v60 = vpop.eup %5039  ;;  %v166_v61 = vmul.f32 %v5038_v57, %v161_v51  ;;  %vm172_vm2 = vweird.f32 %v5038_v57 }
 0x10c   :  { %v186_v62 = vmul.f32 %v5040_v60, %v163_v52  ;;  %5041 = vrsqrt.f32 %v164_v58  ;;  %vm173_vm4 = vmor %vm171_vm3, %vm172_vm2  ;;  %vm192_vm6 = vweird.f32 %v5040_v60  ;;  %vm181_vm9 = vweird.f32 %v162_v59 }
 0x10d   :  { %v167_v63 = vmul.f32 %v5038_v57, %v166_v61  ;;  %5043 = vrsqrt.f32 %v162_v59  ;;  %vm5577_vm8 = vmor %vm191_vm5, %vm192_vm6  ;;  %vm201_vm11 = vweird.f32 %v164_v58 }
 0x10e   :  { %v187_v1 = vmul.f32 %v5040_v60, %v186_v62 }
 0x10f   :  { %v168_v0 = vmul.f32 0.5, %v167_v63 }
 0x110   :  { %v188_v6 = vmul.f32 0.5, %v187_v1 }
 0x111   :  { %v169_v2 = vsub.f32 1.5, %v168_v0 }
 0x112   :  { %v5042_v3 = vpop.eup %5041  ;;  %v189_v15 = vsub.f32 1.5, %v188_v6 }
 0x113   :  { %v5044_v4 = vpop.eup %5043  ;;  %v170_v5 = vmul.f32 %v5038_v57, %v169_v2  ;;  %v196_v7 = vmul.f32 %v5042_v3, %v164_v58  ;;  %vm202_vm12 = vweird.f32 %v5042_v3 }
 0x114   :  { %v176_v8 = vmul.f32 %v5044_v4, %v162_v59  ;;  %vm182_vm7 = vweird.f32 %v5044_v4  ;;  %v190_v23 = vmul.f32 %v5040_v60, %v189_v15  ;;  %vm203_vm13 = vmor %vm201_vm11, %vm202_vm12 }
 0x115   :  { %v174_v10 = vsel %vm173_vm4, %v5038_v57, %v170_v5  ;;  %v197_v16 = vmul.f32 %v5042_v3, %v196_v7  ;;  %vm183_vm10 = vmor %vm181_vm9, %vm182_vm7 }
 0x116   :  { %v177_v11 = vmul.f32 %v5044_v4, %v176_v8  ;;  %v205_v12 = vmul.f32 %v174_v10, %v5546_v20  ;;  %v194_v31 = vsel %vm5577_vm8, %v5040_v60, %v190_v23 }
 0x117   :  { %v198_v25 = vmul.f32 0.5, %v197_v16  ;;  %v207_v34 = vmul.f32 %v194_v31, %v5544_v19 }
 0x118   :  { %v178_v17 = vmul.f32 0.5, %v177_v11  ;;  %v210_v18 = vmul.f32 %v5001_v9, %v205_v12 }
 0x119   :  { %v199_v28 = vsub.f32 1.5, %v198_v25  ;;  %v212_v36 = vmul.f32 %v5001_v9, %v207_v34  ;;  %v80_v25 = vld [vmem:[%s7432_s2 + $0x8] sm:$0xff]  ;;  %v5005_v34 = vld [vmem:[%s7435_s5 + $0x4] ss:$0 sm:$0xff] }
 0x11a   :  { %v179_v21 = vsub.f32 1.5, %v178_v17  ;;  %v215_v22 = vadd.f32 %v5002_v13, %v210_v18 }
 0x11b   :  { %v200_v35 = vmul.f32 %v5042_v3, %v199_v28  ;;  %v217_v37 = vadd.f32 %v5002_v13, %v212_v36  ;;  %v81_v28 = vld [vmem:[%s7432_s2 + $0x10] sm:$0xff] }
 0x11c   :  { %v180_v20 = vmul.f32 %v5044_v4, %v179_v21  ;;  %4669 = vmatmul.msk.f32.vlgmr.msra.gmra.mxu0 %vm113_vm0, %v215_v22  ;;  %4673 = vmatmul.msk.f32.vlgmr.msra.gmra.mxu1 %vm113_vm0, %v215_v22  ;;  %v79_v21 = vld [vmem:[%s7432_s2] sm:$0xff] }
 0x11d   :  { %4677 = vmatmul.msk.f32.vlgmr.msra.gmra.mxu2 %vm113_vm0, %v215_v22 }
 0x11e   :  { %v184_v26 = vsel %vm183_vm10, %v5044_v4, %v180_v20 }
 0x11f   :  { %v206_v27 = vmul.f32 %v184_v26, %v5558_v30  ;;  %v204_v30 = vsel %vm203_vm13, %v5042_v3, %v200_v35 }
 0x120   :  { %v208_v38 = vmul.f32 %v204_v30, %v5556_v29 }
 0x121   :  { %v211_v32 = vmul.f32 %v5001_v9, %v206_v27 }
 0x122   :  { %v213_v19 = vmul.f32 %v5001_v9, %v208_v38 }
 0x123   :  { %v216_v33 = vadd.f32 %v5002_v13, %v211_v32 }
 0x124   :  { %v218_v39 = vadd.f32 %v5002_v13, %v213_v19 }
 0x125   :  { %4670 = vmatmul.msk.f32.gmra.mxu0 %vm113_vm0, %v216_v33  ;;  %4674 = vmatmul.msk.f32.gmra.mxu1 %vm113_vm0, %v216_v33 }
 0x126   :  { %4678 = vmatmul.msk.f32.gmra.mxu2 %vm113_vm0, %v216_v33 }
 0x12d   :  { %4671 = vmatmul.msk.f32.gmra.mxu0 %vm113_vm0, %v217_v37  ;;  %4675 = vmatmul.msk.f32.gmra.mxu1 %vm113_vm0, %v217_v37 }
 0x12e   :  { %4679 = vmatmul.msk.f32.gmra.mxu2 %vm113_vm0, %v217_v37 }
 0x135   :  { %4672 = vmatmul.msk.f32.gmra.mxu0 %vm113_vm0, %v218_v39  ;;  %4676 = vmatmul.msk.f32.gmra.mxu1 %vm113_vm0, %v218_v39 }
 0x136   :  { %4680 = vmatmul.msk.f32.gmra.mxu2 %vm113_vm0, %v218_v39 }
 0x199   :  { %v289_v40 = vpop.f32.mrf.mxu1  ;;  %v260_v45 = vpop.f32.mrf.mxu0 }
 0x19a   :  { %v332_v50 = vadd.f32 %v5003_v49, %v260_v45  ;;  %v338_v51 = vadd.f32 %v5004_v41, %v289_v40 }
 0x1a0   :  { %v318_v18 = vpop.f32.mrf.mxu2 }
 0x1a1   :  { %v5692_v38 = vadd.f32 %v5005_v34, %v318_v18  ;;  %v89_v18 = vld [vmem:[%s7432_s2 + $0x50] sm:$0xff] }
 0x1a2   :  { %v292_v29 = vpop.f32.mrf.mxu1  ;;  %v263_v48 = vpop.f32.mrf.mxu0 }
 0x1a3   :  { %v5601_v42 = vadd.f32 %v5004_v41, %v292_v29  ;;  %v333_v54 = vadd.f32 %v5003_v49, %v263_v48  ;;  %v84_v48 = vld [vmem:[%s7432_s2 + $0x28] sm:$0xff] }
 0x1a5   :  { %403 = vrot.lane.b32.xlu1 %v5601_v42, %s5481_s25 }
 0x1a9   :  { %v321_v22 = vpop.f32.mrf.mxu2 }
 0x1aa   :  { %v295_v43 = vpop.f32.mrf.mxu1  ;;  %v266_v52 = vpop.f32.mrf.mxu0  ;;  %v5688_v30 = vadd.f32 %v5005_v34, %v321_v22 }
 0x1ab   :  { %v5605_v44 = vadd.f32 %v5004_v41, %v295_v43  ;;  %v334_v53 = vadd.f32 %v5003_v49, %v266_v52  ;;  %v87_v52 = vld [vmem:[%s7432_s2 + $0x40] sm:$0xff] }
 0x1ac   :  { %v4916_v19 = vpack.i.bf16 %v5692_v38, %v5688_v30 }
 0x1ad   :  { %395 = vrot.lane.b32.xlu1 %v5601_v42, %s5482_s26  ;;  %405 = vrot.lane.b32.xlu0 %v5605_v44, %s5481_s25 }
 0x1b1   :  { %v324_v26 = vpop.f32.mrf.mxu2 }
 0x1b2   :  { %v298_v46 = vpop.f32.mrf.mxu1  ;;  %v269_v55 = vpop.f32.mrf.mxu0  ;;  %v5686_v36 = vadd.f32 %v5005_v34, %v324_v26  ;;  %v91_v26 = vld [vmem:[%s7432_s2 + $0x60] sm:$0xff] }
 0x1b3   :  { %v341_v47 = vadd.f32 %v5004_v41, %v298_v46  ;;  %v335_v56 = vadd.f32 %v5003_v49, %v269_v55 }
 0x1b5   :  { %389 = vrot.lane.b32.xlu1 %v5605_v44, %s5483_s27  ;;  %399 = vrot.lane.b32.xlu0 %v341_v47, %s5482_s26 }
 0x1b6   :  { %407 = vrot.lane.b32.xlu2 %v341_v47, %s5481_s25 }
 0x1b9   :  { %v327_v33 = vpop.f32.mrf.mxu2 }
 0x1ba   :  { %v5684_v35 = vadd.f32 %v5005_v34, %v327_v33  ;;  %v88_v33 = vld [vmem:[%s7432_s2 + $0x48] sm:$0xff] }
 0x1bc   :  { %v4921_v37 = vpack.i.bf16 %v5686_v36, %v5684_v35 }
 0x1bd   :  { %357 = vrot.lane.b32.xlu1 %v332_v50, %s5483_s27  ;;  %393 = vrot.lane.b32.xlu0 %v338_v51, %s5482_s26 }
 0x1be   :  { %401 = vrot.lane.b32.xlu2 %v338_v51, %s5481_s25 }
 0x1c5   :  { %387 = vrot.lane.b32.xlu0 %v5601_v42, %s5483_s27  ;;  %369 = vrot.lane.b32.xlu1 %v334_v53, %s5482_s26 }
 0x1c6   :  { %397 = vrot.lane.b32.xlu2 %v5605_v44, %s5482_s26 }
 0x1cd   :  { %359 = vrot.lane.b32.xlu0 %v333_v54, %s5483_s27  ;;  %375 = vrot.lane.b32.xlu1 %v333_v54, %s5481_s25 }
 0x1ce   :  { %391 = vrot.lane.b32.xlu2 %v341_v47, %s5483_s27 }
 0x1d5   :  { %365 = vrot.lane.b32.xlu0 %v332_v50, %s5482_s26  ;;  %363 = vrot.lane.b32.xlu1 %v335_v56, %s5483_s27 }
 0x1d6   :  { %385 = vrot.lane.b32.xlu2 %v338_v51, %s5483_s27 }
 0x1dd   :  { %371 = vrot.lane.b32.xlu0 %v335_v56, %s5482_s26 }
 0x1de   :  { %361 = vrot.lane.b32.xlu2 %v334_v53, %s5483_s27 }
 0x1e5   :  { %377 = vrot.lane.b32.xlu0 %v334_v53, %s5481_s25 }
 0x1e6   :  { %367 = vrot.lane.b32.xlu2 %v333_v54, %s5482_s26 }
 0x1ee   :  { %373 = vrot.lane.b32.xlu2 %v332_v50, %s5481_s25 }
 0x1f6   :  { %379 = vrot.lane.b32.xlu2 %v335_v56, %s5481_s25 }
 0x210   :  { %v408_v57 = vpop.permute.xlu2 %407 }
 0x211   :  { %4681 = vmatpush.xpose.msk.msra.mxu3 %vm449_vm14, %v408_v57 }
 0x217   :  { %v404_v59 = vpop.permute.xlu1 %403 }
 0x218   :  { %v402_v60 = vpop.permute.xlu2 %401 }
 0x21f   :  { %v406_v58 = vpop.permute.xlu0 %405  ;;  %v396_v63 = vpop.permute.xlu1 %395 }
 0x220   :  { %4682 = vmatpush.xpose.msk.msra.mxu3 %vm449_vm14, %v406_v58  ;;  %v398_v62 = vpop.permute.xlu2 %397 }
 0x224   :  { %4683 = vmatpush.xpose.msk.msra.mxu3 %vm449_vm14, %v404_v59 }
 0x227   :  { %v400_v61 = vpop.permute.xlu0 %399  ;;  %v390_v2 = vpop.permute.xlu1 %389 }
 0x228   :  { %4684 = vmatpush.xpose.msk.msra.mxu3 %vm449_vm14, %v402_v60  ;;  %v392_v1 = vpop.permute.xlu2 %391 }
 0x22c   :  { %4685 = vmatpush.xpose.msk.msra.mxu3 %vm449_vm14, %v400_v61 }
 0x22f   :  { %v394_v0 = vpop.permute.xlu0 %393  ;;  %v358_v5 = vpop.permute.xlu1 %357 }
 0x230   :  { %4686 = vmatpush.xpose.msk.msra.mxu3 %vm449_vm14, %v398_v62  ;;  %v386_v4 = vpop.permute.xlu2 %385 }
 0x234   :  { %4687 = vmatpush.xpose.msk.msra.mxu3 %vm449_vm14, %v396_v63 }
 0x237   :  { %v388_v3 = vpop.permute.xlu0 %387  ;;  %v370_v6 = vpop.permute.xlu1 %369 }
 0x238   :  { %4688 = vmatpush.xpose.msk.msra.mxu3 %vm449_vm14, %v394_v0  ;;  %v362_v9 = vpop.permute.xlu2 %361 }
 0x23c   :  { %4689 = vmatpush.xpose.msk.msra.mxu3 %vm449_vm14, %v392_v1 }
 0x23f   :  { %v360_v7 = vpop.permute.xlu0 %359  ;;  %v376_v8 = vpop.permute.xlu1 %375 }
 0x240   :  { %4690 = vmatpush.xpose.msk.msra.mxu3 %vm449_vm14, %v390_v2  ;;  %v368_v12 = vpop.permute.xlu2 %367 }
 0x244   :  { %4691 = vmatpush.xpose.msk.msra.mxu3 %vm449_vm14, %v388_v3 }
 0x247   :  { %v364_v10 = vpop.permute.xlu1 %363  ;;  %v366_v11 = vpop.permute.xlu0 %365 }
 0x248   :  { %4692 = vmatpush.xpose.msk.msra.mxu3 %vm449_vm14, %v386_v4  ;;  %v374_v15 = vpop.permute.xlu2 %373 }
 0x24c   :  { %4693 = vmatpush.xpose.msk.msra.mxu3 %vm449_vm14, %v341_v47  ;;  %v85_v47 = vld [vmem:[%s7432_s2 + $0x30] sm:$0xff] }
 0x24f   :  { %v372_v13 = vpop.permute.xlu0 %371 }
 0x250   :  { %4694 = vmatpush.xpose.msk.msra.mxu3 %vm449_vm14, %v5605_v44  ;;  %v380_v17 = vpop.permute.xlu2 %379  ;;  %v82_v44 = vld [vmem:[%s7432_s2 + $0x18] sm:$0xff] }
 0x254   :  { %4695 = vmatpush.xpose.msk.msra.mxu3 %vm449_vm14, %v5601_v42  ;;  %v83_v42 = vld [vmem:[%s7432_s2 + $0x20] sm:$0xff] }
 0x257   :  { %v378_v16 = vpop.permute.xlu0 %377 }
 0x258   :  { %4696 = vmatpush.xpose.msk.msra.mxu3 %vm449_vm14, %v338_v51 }
 0x25b   :  { %4697 = vmatmul.msk.f32.vlgmr.msra.gmra.mxu3 %vm449_vm14, %v332_v50 }
 0x263   :  { %4698 = vmatmul.msk.f32.gmra.mxu3 %vm449_vm14, %v333_v54 }
 0x26b   :  { %4699 = vmatmul.msk.f32.gmra.mxu3 %vm449_vm14, %v334_v53 }
 0x273   :  { %4700 = vmatmul.msk.f32.gmra.mxu3 %vm449_vm14, %v335_v56 }
 0x27b   :  { %4701 = vmatmul.msk.f32.gmra.mxu3 %vm449_vm14, %v358_v5 }
 0x283   :  { %4702 = vmatmul.msk.f32.gmra.mxu3 %vm449_vm14, %v360_v7 }
 0x28b   :  { %4703 = vmatmul.msk.f32.gmra.mxu3 %vm449_vm14, %v362_v9 }
 0x293   :  { %4704 = vmatmul.msk.f32.gmra.mxu3 %vm449_vm14, %v364_v10  ;;  %v86_v10 = vld [vmem:[%s7432_s2 + $0x38] sm:$0xff] }
 0x29b   :  { %4705 = vmatmul.msk.f32.gmra.mxu3 %vm449_vm14, %v366_v11 }
 0x2a3   :  { %4706 = vmatmul.msk.f32.gmra.mxu3 %vm449_vm14, %v368_v12 }
 0x2ab   :  { %4707 = vmatmul.msk.f32.gmra.mxu3 %vm449_vm14, %v370_v6 }
 0x2b3   :  { %4708 = vmatmul.msk.f32.gmra.mxu3 %vm449_vm14, %v372_v13 }
 0x2bb   :  { %4709 = vmatmul.msk.f32.gmra.mxu3 %vm449_vm14, %v374_v15 }
 0x2c3   :  { %4710 = vmatmul.msk.f32.gmra.mxu3 %vm449_vm14, %v376_v8 }
 0x2cb   :  { %4711 = vmatmul.msk.f32.gmra.mxu3 %vm449_vm14, %v378_v16 }
 0x2d3   :  { %4712 = vmatmul.msk.f32.gmra.mxu3 %vm449_vm14, %v380_v17 }
 0x2de   :  { %v531_v23 = vpop.f32.mrf.mxu3 }
 0x2df   :  { %v532_v24 = vadd.f32 %v531_v23, %v79_v21 }
 0x2e1   :  { %579 = vmax.xlane.f32.xlu1 %v532_v24 }
 0x2e6   :  { %v534_v20 = vpop.f32.mrf.mxu3 }
 0x2e7   :  { %v535_v27 = vadd.f32 %v534_v20, %v80_v25 }
 0x2e9   :  { %581 = vmax.xlane.f32.xlu0 %v535_v27 }
 0x2ee   :  { %v537_v31 = vpop.f32.mrf.mxu3 }
 0x2ef   :  { %v538_v32 = vadd.f32 %v537_v31, %v81_v28  ;;  %v92_v31 = vld [vmem:[%s7432_s2 + $0x68] sm:$0xff] }
 0x2f1   :  { %583 = vmax.xlane.f32.xlu2 %v538_v32 }
 0x2f6   :  { %v540_v39 = vpop.f32.mrf.mxu3 }
 0x2f7   :  { %v5709_v45 = vadd.f32 %v540_v39, %v82_v44 }
 0x2fa   :  { %4922 = vrot.lane.b32.xlu1 %v4921_v37, %s5482_s26 }
 0x2fd   :  { %4917 = vrot.lane.b32.xlu0 %v4916_v19, %s5481_s25 }
 0x2fe   :  { %v543_v40 = vpop.f32.mrf.mxu3 }
 0x2ff   :  { %v5703_v43 = vadd.f32 %v543_v40, %v83_v42 }
 0x302   :  { %4927 = vrot.lane.b32.xlu1 %v4916_v19, %s5482_s26 }
 0x306   :  { %v546_v41 = vpop.f32.mrf.mxu3 }
 0x307   :  { %v5721_v50 = vadd.f32 %v546_v41, %v84_v48 }
 0x309   :  { %4912 = vrot.lane.b32.xlu2 %v4921_v37, %s5481_s25 }
 0x30e   :  { %v549_v29 = vpop.f32.mrf.mxu3 }
 0x30f   :  { %v5718_v49 = vadd.f32 %v549_v29, %v85_v47 }
 0x316   :  { %v552_v46 = vpop.f32.mrf.mxu3 }
 0x317   :  { %v5744_v13 = vadd.f32 %v552_v46, %v86_v10 }
 0x31e   :  { %v555_v51 = vpop.f32.mrf.mxu3 }
 0x31f   :  { %v5727_v53 = vadd.f32 %v555_v51, %v87_v52 }
 0x326   :  { %v558_v1 = vpop.f32.mrf.mxu3 }
 0x327   :  { %587 = vmax.xlane.f32.xlu0 %v5703_v43 }
 0x32c   :  { %585 = vmax.xlane.f32.xlu1 %v5709_v45 }
 0x32e   :  { %v561_v9 = vpop.f32.mrf.mxu3 }
 0x32f   :  { %v5750_v23 = vadd.f32 %v561_v9, %v89_v18 }
 0x332   :  { %591 = vmax.xlane.f32.xlu2 %v5718_v49 }
 0x334   :  { %589 = vmax.xlane.f32.xlu1 %v5721_v50 }
 0x336   :  { %v564_v22 = vpop.f32.mrf.mxu3 }
 0x33a   :  { %595 = vmax.xlane.f32.xlu2 %v5727_v53 }
 0x33e   :  { %v567_v20 = vpop.f32.mrf.mxu3 }
 0x346   :  { %v570_v28 = vpop.f32.mrf.mxu3 }
 0x34d   :  { %4932 = vrot.lane.b32.xlu1 %v4921_v37, %s5483_s27  ;;  %v93_v37 = vld [vmem:[%s7432_s2 + $0x70] sm:$0xff] }
 0x34e   :  { %v573_v34 = vpop.f32.mrf.mxu3 }
 0x34f   :  { %v5779_v39 = vadd.f32 %v573_v34, %v93_v37 }
 0x354   :  { %v580_v54 = vpop.xlane.xlu1 %579 }
 0x355   :  { %v611_v55 = vsub.f32 %v532_v24, %v580_v54  ;;  %v90_v24 = vld [vmem:[%s7432_s2 + $0x58] sm:$0xff] }
 0x356   :  { %v5756_v25 = vadd.f32 %v564_v22, %v90_v24 }
 0x357   :  { %v627_v56 = vmul.f32 1.442695, %v611_v55 }
 0x359   :  { %5045 = vpow2.f32 %v627_v56 }
 0x35c   :  { %v582_v57 = vpop.xlane.xlu0 %581 }
 0x35d   :  { %v612_v58 = vsub.f32 %v535_v27, %v582_v57  ;;  %v5762_v27 = vadd.f32 %v567_v20, %v91_v26 }
 0x35f   :  { %v5731_v59 = vpop.eup %5045  ;;  %v629_v60 = vmul.f32 1.442695, %v612_v58 }
 0x360   :  { %659 = vadd.xlane.f32.xlu0 %v5731_v59 }
 0x361   :  { %5047 = vpow2.f32 %v629_v60 }
 0x364   :  { %v584_v61 = vpop.xlane.xlu2 %583 }
 0x365   :  { %v613_v62 = vsub.f32 %v538_v32, %v584_v61  ;;  %v5768_v32 = vadd.f32 %v570_v28, %v92_v31 }
 0x367   :  { %v5734_v63 = vpop.eup %5047  ;;  %v631_v0 = vmul.f32 1.442695, %v613_v62 }
 0x368   :  { %661 = vadd.xlane.f32.xlu2 %v5734_v63 }
 0x369   :  { %5049 = vpow2.f32 %v631_v0 }
 0x36c   :  { %v4913_v2 = vpop.permute.xlu2 %4912  ;;  %v4923_v3 = vpop.permute.xlu1 %4922 }
 0x36d   :  { %v4914_v4 = vunpack.i.l.bf16 %v4913_v2  ;;  %v4915_v7 = vunpack.i.h.bf16 %v4913_v2  ;;  %v4924_v12 = vunpack.i.l.bf16 %v4923_v3  ;;  %v4925_v16 = vunpack.i.h.bf16 %v4923_v3 }
 0x36f   :  { %v5737_v5 = vpop.eup %5049  ;;  %931 = vmatpush.msrb.mxu0 %v4914_v4  ;;  %v4918_v6 = vpop.permute.xlu0 %4917 }
 0x370   :  { %663 = vadd.xlane.f32.xlu2 %v5737_v5  ;;  %v4919_v8 = vunpack.i.l.bf16 %v4918_v6  ;;  %v4920_v11 = vunpack.i.h.bf16 %v4918_v6 }
 0x371   :  { %932 = vmatpush.msrb.mxu0 %v4915_v7 }
 0x373   :  { %933 = vmatpush.msrb.mxu0 %v4919_v8 }
 0x374   :  { %4937 = vrot.lane.b32.xlu0 %v4916_v19, %s5483_s27  ;;  %v4928_v15 = vpop.permute.xlu1 %4927  ;;  %v5777_v19 = vadd.f32 %v558_v1, %v88_v33 }
 0x375   :  { %934 = vmatpush.msrb.mxu0 %v4920_v11  ;;  %v4929_v17 = vunpack.i.l.bf16 %v4928_v15  ;;  %v4930_v21 = vunpack.i.h.bf16 %v4928_v15 }
 0x377   :  { %935 = vmatpush.msrb.mxu0 %v4924_v12  ;;  %593 = vmax.xlane.f32.xlu1 %v5744_v13 }
 0x379   :  { %936 = vmatpush.msrb.mxu0 %v4925_v16 }
 0x37b   :  { %937 = vmatpush.msrb.mxu0 %v4929_v17 }
 0x37d   :  { %938 = vmatpush.msrb.mxu0 %v4930_v21 }
 0x37f   :  { %599 = vmax.xlane.f32.xlu1 %v5750_v23 }
 0x387   :  { %601 = vmax.xlane.f32.xlu1 %v5756_v25 }
 0x38f   :  { %603 = vmax.xlane.f32.xlu1 %v5762_v27 }
 0x397   :  { %605 = vmax.xlane.f32.xlu1 %v5768_v32 }
 0x39a   :  { %v588_v29 = vpop.xlane.xlu0 %587 }
 0x39b   :  { %v615_v44 = vsub.f32 %v5703_v43, %v588_v29 }
 0x39d   :  { %v635_v47 = vmul.f32 1.442695, %v615_v44 }
 0x39e   :  { %597 = vmax.xlane.f32.xlu0 %v5777_v19 }
 0x39f   :  { %607 = vmax.xlane.f32.xlu1 %v5779_v39  ;;  %v586_v40 = vpop.xlane.xlu1 %585 }
 0x3a0   :  { %v614_v41 = vsub.f32 %v5709_v45, %v586_v40 }
 0x3a2   :  { %v633_v42 = vmul.f32 1.442695, %v614_v41 }
 0x3a4   :  { %5051 = vpow2.f32 %v633_v42 }
 0x3a5   :  { %v592_v46 = vpop.xlane.xlu2 %591  ;;  %5053 = vpow2.f32 %v635_v47 }
 0x3a6   :  { %v617_v43 = vsub.f32 %v5718_v49, %v592_v46 }
 0x3a7   :  { %v590_v48 = vpop.xlane.xlu1 %589 }
 0x3a8   :  { %v616_v52 = vsub.f32 %v5721_v50, %v590_v48  ;;  %v639_v60 = vmul.f32 1.442695, %v617_v43 }
 0x3aa   :  { %v5785_v51 = vpop.eup %5051  ;;  %v637_v56 = vmul.f32 1.442695, %v616_v52  ;;  %v576_v52 = vpop.f32.mrf.mxu3 }
 0x3ab   :  { %665 = vadd.xlane.f32.xlu2 %v5785_v51  ;;  %v5790_v57 = vpop.eup %5053 }
 0x3ad   :  { %v596_v54 = vpop.xlane.xlu2 %595 }
 0x3ae   :  { %v619_v55 = vsub.f32 %v5727_v53, %v596_v54 }
 0x3b0   :  { %v643_v45 = vmul.f32 1.442695, %v619_v55 }
 0x3b2   :  { %5055 = vpow2.f32 %v643_v45 }
 0x3b3   :  { %667 = vadd.xlane.f32.xlu2 %v5790_v57  ;;  %5057 = vpow2.f32 %v637_v56 }
 0x3b4   :  { %5059 = vpow2.f32 %v639_v60 }
 0x3b8   :  { %v5794_v58 = vpop.eup %5055 }
 0x3b9   :  { %675 = vadd.xlane.f32.xlu0 %v5794_v58  ;;  %v5797_v61 = vpop.eup %5057 }
 0x3ba   :  { %v5800_v62 = vpop.eup %5059 }
 0x3bb   :  { %669 = vadd.xlane.f32.xlu2 %v5797_v61 }
 0x3bf   :  { %v4933_v50 = vpop.permute.xlu1 %4932 }
 0x3c0   :  { %v4934_v53 = vunpack.i.l.bf16 %v4933_v50  ;;  %v4935_v0 = vunpack.i.h.bf16 %v4933_v50 }
 0x3c2   :  { %939 = vmatpush.msrb.mxu0 %v4934_v53 }
 0x3c3   :  { %671 = vadd.xlane.f32.xlu2 %v5800_v62 }
 0x3c4   :  { %940 = vmatpush.msrb.mxu0 %v4935_v0 }
 0x3d3   :  { %v660_v49 = vpop.xlane.xlu0 %659 }
 0x3d4   :  { %5061 = vrcp.f32 %v660_v49  ;;  %v702_v17 = vand.u32 2147483648, %v660_v49  ;;  %vm696_vm1 = vweird.f32 %v660_v49  ;;  %v700_v22 = vand.u32 2147483647, %v660_v49 }
 0x3d6   :  { %v703_v33 = vor.u32 1.1754944e-38, %v702_v17  ;;  %vm701_vm3 = vcmp.eq.f32.partialorder %v700_v22, 8.507059e+37 }
 0x3da   :  { %v5062_v1 = vpop.eup %5061 }
 0x3db   :  { %v662_v2 = vpop.xlane.xlu2 %661  ;;  %v692_v3 = vmul.f32 %v5062_v1, %v660_v49  ;;  %vm697_vm15 = vweird.f32 %v5062_v1 }
 0x3dc   :  { %5063 = vrcp.f32 %v662_v2  ;;  %vm698_vm2 = vmor %vm696_vm1, %vm697_vm15  ;;  %vm711_vm5 = vweird.f32 %v662_v2  ;;  %v715_v42 = vand.u32 2147483647, %v662_v2 }
 0x3dd   :  { %v693_v4 = vsub.f32 1.0, %v692_v3 }
 0x3de   :  { %vm716_vm7 = vcmp.eq.f32.partialorder %v715_v42, 8.507059e+37 }
 0x3df   :  { %v694_v9 = vmul.f32 %v5062_v1, %v693_v4 }
 0x3e1   :  { %v695_v15 = vadd.f32 %v5062_v1, %v694_v9 }
 0x3e2   :  { %v5064_v6 = vpop.eup %5063 }
 0x3e3   :  { %v5803_v7 = vpop.xlane.xlu2 %663  ;;  %v707_v8 = vmul.f32 %v5064_v6, %v662_v2  ;;  %v699_v26 = vsel %vm698_vm2, %v5062_v1, %v695_v15  ;;  %vm712_vm4 = vweird.f32 %v5064_v6 }
 0x3e4   :  { %5065 = vrcp.f32 %v5803_v7  ;;  %v704_v34 = vsel %vm701_vm3, %v703_v33, %v699_v26  ;;  %vm713_vm6 = vmor %vm711_vm5, %vm712_vm4  ;;  %vm726_vm9 = vweird.f32 %v5803_v7  ;;  %v730_v56 = vand.u32 2147483647, %v5803_v7 }
 0x3e5   :  { %v708_v12 = vsub.f32 1.0, %v707_v8  ;;  %v705_v29 = vmul.f32 %v5731_v59, %v704_v34 }
 0x3e6   :  { %v4938_v10 = vpop.permute.xlu0 %4937  ;;  %vm731_vm11 = vcmp.eq.f32.partialorder %v730_v56, 8.507059e+37 }
 0x3e7   :  { %v4939_v11 = vunpack.i.l.bf16 %v4938_v10  ;;  %v4940_v16 = vunpack.i.h.bf16 %v4938_v10  ;;  %v709_v28 = vmul.f32 %v5064_v6, %v708_v12 }
 0x3e9   :  { %941 = vmatpush.msrb.mxu0 %v4939_v11  ;;  %v710_v40 = vadd.f32 %v5064_v6, %v709_v28 }
 0x3ea   :  { %v5066_v18 = vpop.eup %5065  ;;  %v594_v21 = vpop.xlane.xlu1 %593 }
 0x3eb   :  { %v618_v24 = vsub.f32 %v5744_v13, %v594_v21  ;;  %942 = vmatpush.msrb.mxu0 %v4940_v16  ;;  %v722_v20 = vmul.f32 %v5066_v18, %v5803_v7  ;;  %v717_v13 = vand.u32 2147483648, %v662_v2  ;;  %vm727_vm8 = vweird.f32 %v5066_v18 }
 0x3ec   :  { %vm728_vm10 = vmor %vm726_vm9, %vm727_vm8 }
 0x3ed   :  { %v641_v31 = vmul.f32 1.442695, %v618_v24  ;;  %943 = vmatpush.msrb.mxu0 %v5684_v35  ;;  %v723_v37 = vsub.f32 1.0, %v722_v20  ;;  %v714_v35 = vsel %vm713_vm6, %v5064_v6, %v710_v40  ;;  %v718_v48 = vor.u32 1.1754944e-38, %v717_v13 }
 0x3ef   :  { %5067 = vpow2.f32 %v641_v31  ;;  %944 = vmatpush.msrb.mxu0 %v5686_v36  ;;  %v724_v36 = vmul.f32 %v5066_v18, %v723_v37 }
 0x3f1   :  { %945 = vmatpush.msrb.mxu0 %v5688_v30  ;;  %v719_v30 = vsel %vm716_vm7, %v718_v48, %v714_v35  ;;  %v725_v59 = vadd.f32 %v5066_v18, %v724_v36 }
 0x3f2   :  { %v600_v41 = vpop.xlane.xlu1 %599  ;;  %v720_v55 = vmul.f32 %v5734_v63, %v719_v30 }
 0x3f3   :  { %v621_v44 = vsub.f32 %v5750_v23, %v600_v41  ;;  %946 = vmatpush.msrb.mxu0 %v5692_v38  ;;  %v94_v38 = vld [vmem:[%s7432_s2 + $0x78] sm:$0xff]  ;;  %v732_v23 = vand.u32 2147483648, %v5803_v7  ;;  %v729_v60 = vsel %vm728_vm10, %v5066_v18, %v725_v59 }
 0x3f4   :  { %947 = vmatmul.f32.vlgmr.msrb.gmra.mxu0 %v705_v29  ;;  %v5825_v43 = vadd.f32 %v576_v52, %v94_v38 }
 0x3f5   :  { %v5814_v46 = vpop.eup %5067  ;;  %v647_v47 = vmul.f32 1.442695, %v621_v44  ;;  %v733_v0 = vor.u32 1.1754944e-38, %v732_v23 }
 0x3f6   :  { %673 = vadd.xlane.f32.xlu2 %v5814_v46 }
 0x3f7   :  { %5069 = vpow2.f32 %v647_v47  ;;  %v734_v63 = vsel %vm731_vm11, %v733_v0, %v729_v60 }
 0x3f8   :  { %v735_v1 = vmul.f32 %v5737_v5, %v734_v63 }
 0x3fa   :  { %v602_v54 = vpop.xlane.xlu1 %601 }
 0x3fb   :  { %v622_v45 = vsub.f32 %v5756_v25, %v602_v54 }
 0x3fc   :  { %950 = vmatmul.f32.gmra.mxu0 %v720_v55 }
 0x3fd   :  { %v5827_v50 = vpop.eup %5069  ;;  %v649_v53 = vmul.f32 1.442695, %v622_v45 }
 0x3fe   :  { %609 = vmax.xlane.f32.xlu2 %v5825_v43  ;;  %679 = vadd.xlane.f32.xlu0 %v5827_v50 }
 0x3ff   :  { %5071 = vpow2.f32 %v649_v53 }
 0x402   :  { %v604_v49 = vpop.xlane.xlu1 %603 }
 0x403   :  { %v623_v12 = vsub.f32 %v5762_v27, %v604_v49 }
 0x404   :  { %953 = vmatmul.f32.gmra.mxu0 %v735_v1 }
 0x405   :  { %v5832_v25 = vpop.eup %5071  ;;  %v651_v15 = vmul.f32 1.442695, %v623_v12 }
 0x406   :  { %681 = vadd.xlane.f32.xlu2 %v5832_v25 }
 0x40a   :  { %v606_v2 = vpop.xlane.xlu1 %605 }
 0x40b   :  { %v624_v3 = vsub.f32 %v5768_v32, %v606_v2 }
 0x40d   :  { %v653_v4 = vmul.f32 1.442695, %v624_v3 }
 0x40f   :  { %5073 = vpow2.f32 %v653_v4 }
 0x411   :  { %v598_v6 = vpop.xlane.xlu0 %597 }
 0x412   :  { %v620_v7 = vsub.f32 %v5777_v19, %v598_v6  ;;  %v608_v8 = vpop.xlane.xlu1 %607 }
 0x413   :  { %v625_v9 = vsub.f32 %v5779_v39, %v608_v8 }
 0x414   :  { %v645_v10 = vmul.f32 1.442695, %v620_v7 }
 0x415   :  { %v5838_v11 = vpop.eup %5073  ;;  %v655_v5 = vmul.f32 1.442695, %v625_v9 }
 0x416   :  { %5075 = vpow2.f32 %v645_v10  ;;  %685 = vadd.xlane.f32.xlu0 %v5838_v11 }
 0x417   :  { %5077 = vpow2.f32 %v655_v5 }
 0x418   :  { %5079 = vpow2.f32 %v651_v15 }
 0x41c   :  { %v5842_v32 = vpop.eup %5075 }
 0x41d   :  { %v5844_v16 = vpop.eup %5077  ;;  %677 = vadd.xlane.f32.xlu1 %v5842_v32 }
 0x41e   :  { %v666_v19 = vpop.xlane.xlu2 %665  ;;  %687 = vadd.xlane.f32.xlu2 %v5844_v16  ;;  %v5848_v39 = vpop.eup %5079 }
 0x41f   :  { %5081 = vrcp.f32 %v666_v19  ;;  %v747_v22 = vand.u32 2147483648, %v666_v19  ;;  %v745_v20 = vand.u32 2147483647, %v666_v19  ;;  %vm741_vm13 = vweird.f32 %v666_v19 }
 0x421   :  { %v748_v31 = vor.u32 1.1754944e-38, %v747_v22  ;;  %vm746_vm1 = vcmp.eq.f32.partialorder %v745_v20, 8.507059e+37 }
 0x425   :  { %v5082_v17 = vpop.eup %5081  ;;  %683 = vadd.xlane.f32.xlu1 %v5848_v39 }
 0x426   :  { %v737_v27 = vmul.f32 %v5082_v17, %v666_v19  ;;  %v668_v18 = vpop.xlane.xlu2 %667  ;;  %vm742_vm12 = vweird.f32 %v5082_v17 }
 0x427   :  { %5083 = vrcp.f32 %v668_v18  ;;  %vm743_vm15 = vmor %vm741_vm13, %vm742_vm12  ;;  %v762_v29 = vand.u32 2147483648, %v668_v18  ;;  %v760_v44 = vand.u32 2147483647, %v668_v18  ;;  %vm756_vm3 = vweird.f32 %v668_v18 }
 0x428   :  { %v738_v21 = vsub.f32 1.0, %v737_v27 }
 0x429   :  { %v763_v47 = vor.u32 1.1754944e-38, %v762_v29  ;;  %vm761_vm5 = vcmp.eq.f32.partialorder %v760_v44, 8.507059e+37 }
 0x42a   :  { %v739_v24 = vmul.f32 %v5082_v17, %v738_v21 }
 0x42c   :  { %v740_v26 = vadd.f32 %v5082_v17, %v739_v24  ;;  %v676_v10 = vpop.xlane.xlu0 %675 }
 0x42d   :  { %v5084_v28 = vpop.eup %5083 }
 0x42e   :  { %v752_v33 = vmul.f32 %v5084_v28, %v668_v18  ;;  %v670_v34 = vpop.xlane.xlu2 %669  ;;  %v744_v37 = vsel %vm743_vm15, %v5082_v17, %v740_v26  ;;  %vm757_vm2 = vweird.f32 %v5084_v28 }
 0x42f   :  { %5085 = vrcp.f32 %v670_v34  ;;  %v749_v40 = vsel %vm746_vm1, %v748_v31, %v744_v37  ;;  %vm758_vm4 = vmor %vm756_vm3, %vm757_vm2  ;;  %v775_v55 = vand.u32 2147483647, %v670_v34  ;;  %vm771_vm7 = vweird.f32 %v670_v34 }
 0x430   :  { %v753_v13 = vsub.f32 1.0, %v752_v33  ;;  %v750_v41 = vmul.f32 %v5785_v51, %v749_v40  ;;  %v777_v51 = vand.u32 2147483648, %v670_v34  ;;  %v822_v40 = vand.u32 2147483648, %v676_v10 }
 0x431   :  { %vm776_vm9 = vcmp.eq.f32.partialorder %v775_v55, 8.507059e+37 }
 0x432   :  { %956 = vmatmul.f32.gmra.mxu0 %v750_v41  ;;  %v754_v42 = vmul.f32 %v5084_v28, %v753_v13  ;;  %v778_v60 = vor.u32 1.1754944e-38, %v777_v51  ;;  %v820_v13 = vand.u32 2147483647, %v676_v10 }
 0x434   :  { %v755_v35 = vadd.f32 %v5084_v28, %v754_v42  ;;  %v823_v42 = vor.u32 1.1754944e-38, %v822_v40 }
 0x435   :  { %v5086_v36 = vpop.eup %5085 }
 0x436   :  { %v767_v48 = vmul.f32 %v5086_v36, %v670_v34  ;;  %v672_v30 = vpop.xlane.xlu2 %671  ;;  %v759_v59 = vsel %vm758_vm4, %v5084_v28, %v755_v35  ;;  %vm772_vm6 = vweird.f32 %v5086_v36 }
 0x437   :  { %5087 = vrcp.f32 %v672_v30  ;;  %v764_v52 = vsel %vm761_vm5, %v763_v47, %v759_v59  ;;  %vm773_vm8 = vmor %vm771_vm7, %vm772_vm6  ;;  %v792_v2 = vand.u32 2147483648, %v672_v30  ;;  %v790_v3 = vand.u32 2147483647, %v672_v30 }
 0x438   :  { %v768_v38 = vsub.f32 1.0, %v767_v48  ;;  %v765_v23 = vmul.f32 %v5790_v57, %v764_v52  ;;  %vm786_vm11 = vweird.f32 %v672_v30  ;;  %5089 = vrcp.f32 %v676_v10 }
 0x439   :  { %v793_v6 = vor.u32 1.1754944e-38, %v792_v2  ;;  %vm791_vm13 = vcmp.eq.f32.partialorder %v790_v3, 8.507059e+37  ;;  %vm816_vm5 = vweird.f32 %v676_v10  ;;  %vm821_vm7 = vcmp.eq.f32.partialorder %v820_v13, 8.507059e+37 }
 0x43a   :  { %959 = vmatmul.f32.gmra.mxu0 %v765_v23  ;;  %v769_v54 = vmul.f32 %v5086_v36, %v768_v38 }
 0x43c   :  { %v770_v56 = vadd.f32 %v5086_v36, %v769_v54 }
 0x43d   :  { %v5088_v45 = vpop.eup %5087 }
 0x43e   :  { %v782_v53 = vmul.f32 %v5088_v45, %v672_v30  ;;  %v774_v0 = vsel %vm773_vm8, %v5086_v36, %v770_v56  ;;  %vm787_vm10 = vweird.f32 %v5088_v45  ;;  %v5090_v12 = vpop.eup %5089 }
 0x43f   :  { %v779_v63 = vsel %vm776_vm9, %v778_v60, %v774_v0  ;;  %vm788_vm12 = vmor %vm786_vm11, %vm787_vm10  ;;  %vm817_vm4 = vweird.f32 %v5090_v12 }
 0x440   :  { %v783_v49 = vsub.f32 1.0, %v782_v53  ;;  %v780_v1 = vmul.f32 %v5797_v61, %v779_v63  ;;  %v812_v61 = vmul.f32 %v5090_v12, %v676_v10  ;;  %vm818_vm6 = vmor %vm816_vm5, %vm817_vm4 }
 0x442   :  { %962 = vmatmul.f32.gmra.mxu0 %v780_v1  ;;  %v784_v57 = vmul.f32 %v5088_v45, %v783_v49  ;;  %v813_v19 = vsub.f32 1.0, %v812_v61 }
 0x444   :  { %v785_v4 = vadd.f32 %v5088_v45, %v784_v57 }
 0x446   :  { %v789_v7 = vsel %vm788_vm12, %v5088_v45, %v785_v4 }
 0x447   :  { %v794_v8 = vsel %vm791_vm13, %v793_v6, %v789_v7 }
 0x448   :  { %v795_v9 = vmul.f32 %v5800_v62, %v794_v8  ;;  %v814_v62 = vmul.f32 %v5090_v12, %v813_v19 }
 0x44a   :  { %965 = vmatmul.f32.gmra.mxu0 %v795_v9  ;;  %v815_v34 = vadd.f32 %v5090_v12, %v814_v62 }
 0x44c   :  { %v819_v29 = vsel %vm818_vm6, %v5090_v12, %v815_v34 }
 0x44d   :  { %v824_v44 = vsel %vm821_vm7, %v823_v42, %v819_v29 }
 0x44e   :  { %v825_v35 = vmul.f32 %v5794_v58, %v824_v44 }
 0x469   :  { %v674_v5 = vpop.xlane.xlu2 %673 }
 0x46a   :  { %5091 = vrcp.f32 %v674_v5  ;;  %v807_v24 = vand.u32 2147483648, %v674_v5  ;;  %v805_v26 = vand.u32 2147483647, %v674_v5  ;;  %vm801_vm1 = vweird.f32 %v674_v5 }
 0x46c   :  { %v808_v31 = vor.u32 1.1754944e-38, %v807_v24  ;;  %vm806_vm3 = vcmp.eq.f32.partialorder %v805_v26, 8.507059e+37 }
 0x470   :  { %v5092_v15 = vpop.eup %5091 }
 0x471   :  { %v797_v17 = vmul.f32 %v5092_v15, %v674_v5  ;;  %v610_v27 = vpop.xlane.xlu2 %609  ;;  %vm802_vm15 = vweird.f32 %v5092_v15  ;;  %v680_v36 = vpop.xlane.xlu0 %679 }
 0x472   :  { %v626_v18 = vsub.f32 %v5825_v43, %v610_v27  ;;  %vm803_vm2 = vmor %vm801_vm1, %vm802_vm15  ;;  %v5861_v59 = vpop.f32.mrf.mxu0  ;;  %v852_v7 = vand.u32 2147483648, %v680_v36  ;;  %vm846_vm13 = vweird.f32 %v680_v36  ;;  %v850_v9 = vand.u32 2147483647, %v680_v36 }
 0x473   :  { %v798_v21 = vsub.f32 1.0, %v797_v17 }
 0x474   :  { %v657_v22 = vmul.f32 1.442695, %v626_v18  ;;  %v853_v61 = vor.u32 1.1754944e-38, %v852_v7  ;;  %vm851_vm1 = vcmp.eq.f32.partialorder %v850_v9, 8.507059e+37 }
 0x475   :  { %v799_v20 = vmul.f32 %v5092_v15, %v798_v21 }
 0x476   :  { %5093 = vpow2.f32 %v657_v22 }
 0x477   :  { %v800_v28 = vadd.f32 %v5092_v15, %v799_v20  ;;  %5095 = vrcp.f32 %v680_v36 }
 0x479   :  { %v804_v33 = vsel %vm803_vm2, %v5092_v15, %v800_v28  ;;  %v682_v48 = vpop.xlane.xlu2 %681 }
 0x47a   :  { %v809_v37 = vsel %vm806_vm3, %v808_v31, %v804_v33  ;;  %v5866_v0 = vpop.f32.mrf.mxu0  ;;  %v867_v21 = vand.u32 2147483648, %v682_v48  ;;  %vm861_vm3 = vweird.f32 %v682_v48  ;;  %v865_v24 = vand.u32 2147483647, %v682_v48 }
 0x47b   :  { %v810_v43 = vmul.f32 %v5814_v46, %v809_v37 }
 0x47c   :  { %v5857_v41 = vpop.eup %5093  ;;  %v868_v28 = vor.u32 1.1754944e-38, %v867_v21  ;;  %vm866_vm5 = vcmp.eq.f32.partialorder %v865_v24, 8.507059e+37  ;;  %v351_v21 = vld [vmem:[#allocation4 + $0x1f8] sm:$0xff] }
 0x47d   :  { %689 = vadd.xlane.f32.xlu1 %v5857_v41  ;;  %968 = vmatmul.f32.gmra.mxu0 %v810_v43  ;;  %v5096_v47 = vpop.eup %5095  ;;  %v349_v24 = vld [vmem:[#allocation4 + $0xb8] sm:$0xff] }
 0x47e   :  { %v842_v30 = vmul.f32 %v5096_v47, %v680_v36  ;;  %vm847_vm11 = vweird.f32 %v5096_v47  ;;  %1083 = vmatpush.msra.mxu0 %v351_v21  ;;  %4893 = vmatpush.msrb.mxu1 %v351_v21 }
 0x47f   :  { %vm848_vm15 = vmor %vm846_vm13, %vm847_vm11 }
 0x480   :  { %v843_v38 = vsub.f32 1.0, %v842_v30 }
 0x482   :  { %v844_v56 = vmul.f32 %v5096_v47, %v843_v38  ;;  %v5873_v15 = vpop.f32.mrf.mxu0 }
 0x484   :  { %v845_v3 = vadd.f32 %v5096_v47, %v844_v56 }
 0x485   :  { %971 = vmatmul.f32.gmra.mxu0 %v825_v35 }
 0x486   :  { %v849_v5 = vsel %vm848_vm15, %v5096_v47, %v845_v3 }
 0x487   :  { %v854_v19 = vsel %vm851_vm1, %v853_v61, %v849_v5 }
 0x488   :  { %v855_v22 = vmul.f32 %v5827_v50, %v854_v19 }
 0x489   :  { %v5868_v2 = vpop.xlane.xlu0 %685 }
 0x48a   :  { %vm891_vm11 = vweird.f32 %v5868_v2 }
 0x490   :  { %v678_v46 = vpop.xlane.xlu1 %677 }
 0x491   :  { %5097 = vrcp.f32 %v678_v46  ;;  %v837_v58 = vand.u32 2147483648, %v678_v46  ;;  %v835_v53 = vand.u32 2147483647, %v678_v46  ;;  %vm831_vm9 = vweird.f32 %v678_v46  ;;  %v5875_v17 = vpop.xlane.xlu2 %687 }
 0x492   :  { %5099 = vrcp.f32 %v682_v48  ;;  %v912_v56 = vand.u32 2147483648, %v5875_v17  ;;  %vm906_vm1 = vweird.f32 %v5875_v17 }
 0x493   :  { %v838_v49 = vor.u32 1.1754944e-38, %v837_v58  ;;  %vm836_vm12 = vcmp.eq.f32.partialorder %v835_v53, 8.507059e+37 }
 0x494   :  { %v913_v53 = vor.u32 1.1754944e-38, %v912_v56 }
 0x497   :  { %v5098_v52 = vpop.eup %5097 }
 0x498   :  { %v827_v23 = vmul.f32 %v5098_v52, %v678_v46  ;;  %v5863_v51 = vpop.xlane.xlu1 %683  ;;  %v5100_v54 = vpop.eup %5099  ;;  %vm832_vm8 = vweird.f32 %v5098_v52 }
 0x499   :  { %5101 = vrcp.f32 %v5863_v51  ;;  %v857_v45 = vmul.f32 %v5100_v54, %v682_v48  ;;  %vm833_vm10 = vmor %vm831_vm9, %vm832_vm8  ;;  %vm862_vm2 = vweird.f32 %v5100_v54  ;;  %v882_v50 = vand.u32 2147483648, %v5863_v51 }
 0x49a   :  { %v828_v55 = vsub.f32 1.0, %v827_v23  ;;  %5103 = vrcp.f32 %v5868_v2  ;;  %vm863_vm4 = vmor %vm861_vm3, %vm862_vm2  ;;  %vm876_vm7 = vweird.f32 %v5863_v51  ;;  %v880_v13 = vand.u32 2147483647, %v5863_v51 }
 0x49b   :  { %v858_v1 = vsub.f32 1.0, %v857_v45  ;;  %5105 = vrcp.f32 %v5875_v17  ;;  %v883_v35 = vor.u32 1.1754944e-38, %v882_v50  ;;  %v910_v45 = vand.u32 2147483647, %v5875_v17 }
 0x49c   :  { %v829_v60 = vmul.f32 %v5098_v52, %v828_v55  ;;  %vm881_vm9 = vcmp.eq.f32.partialorder %v880_v13, 8.507059e+37 }
 0x49d   :  { %v859_v12 = vmul.f32 %v5100_v54, %v858_v1  ;;  %vm911_vm3 = vcmp.eq.f32.partialorder %v910_v45, 8.507059e+37  ;;  %v5357_v45 = vld [vmem:[#allocation2] sm:$0xff] }
 0x49e   :  { %v830_v63 = vadd.f32 %v5098_v52, %v829_v60 }
 0x49f   :  { %v5102_v4 = vpop.eup %5101  ;;  %v860_v18 = vadd.f32 %v5100_v54, %v859_v12 }
 0x4a0   :  { %v834_v57 = vsel %vm833_vm10, %v5098_v52, %v830_v63  ;;  %v872_v10 = vmul.f32 %v5102_v4, %v5863_v51  ;;  %vm877_vm6 = vweird.f32 %v5102_v4  ;;  %v895_v52 = vand.u32 2147483647, %v5868_v2 }
 0x4a1   :  { %v839_v6 = vsel %vm836_vm12, %v838_v49, %v834_v57  ;;  %v864_v26 = vsel %vm863_vm4, %v5100_v54, %v860_v18  ;;  %vm878_vm8 = vmor %vm876_vm7, %vm877_vm6 }
 0x4a2   :  { %v840_v8 = vmul.f32 %v5842_v32, %v839_v6  ;;  %v873_v27 = vsub.f32 1.0, %v872_v10  ;;  %v5104_v32 = vpop.eup %5103  ;;  %v869_v33 = vsel %vm866_vm5, %v868_v28, %v864_v26  ;;  %vm896_vm13 = vcmp.eq.f32.partialorder %v895_v52, 8.507059e+37  ;;  %v348_v26 = vld [vmem:[#allocation4 + $0x18] sm:$0xff] }
 0x4a3   :  { %v887_v20 = vmul.f32 %v5104_v32, %v5868_v2  ;;  %v5106_v40 = vpop.eup %5105  ;;  %v870_v43 = vmul.f32 %v5832_v25, %v869_v33  ;;  %vm892_vm10 = vweird.f32 %v5104_v32  ;;  %v897_v25 = vand.u32 2147483648, %v5868_v2 }
 0x4a4   :  { %974 = vmatmul.f32.gmra.mxu0 %v840_v8  ;;  %v874_v62 = vmul.f32 %v5102_v4, %v873_v27  ;;  %v902_v29 = vmul.f32 %v5106_v40, %v5875_v17  ;;  %vm893_vm12 = vmor %vm891_vm11, %vm892_vm10  ;;  %vm907_vm15 = vweird.f32 %v5106_v40 }
 0x4a5   :  { %v888_v34 = vsub.f32 1.0, %v887_v20  ;;  %v898_v51 = vor.u32 1.1754944e-38, %v897_v25  ;;  %vm908_vm2 = vmor %vm906_vm1, %vm907_vm15 }
 0x4a6   :  { %v875_v37 = vadd.f32 %v5102_v4, %v874_v62  ;;  %v903_v48 = vsub.f32 1.0, %v902_v29 }
 0x4a7   :  { %v889_v44 = vmul.f32 %v5104_v32, %v888_v34 }
 0x4a8   :  { %v879_v42 = vsel %vm878_vm8, %v5102_v4, %v875_v37  ;;  %v904_v23 = vmul.f32 %v5106_v40, %v903_v48  ;;  %vm1048_vm8 = vcmask 130048  }
 0x4a9   :  { %v884_v47 = vsel %vm881_vm9, %v883_v35, %v879_v42  ;;  %v890_v46 = vadd.f32 %v5104_v32, %v889_v44  ;;  %vm1053_vm9 = vcmask 195584  }
 0x4aa   :  { %v885_v30 = vmul.f32 %v5848_v39, %v884_v47  ;;  %v905_v58 = vadd.f32 %v5106_v40, %v904_v23 }
 0x4ab   :  { %v894_v38 = vsel %vm893_vm12, %v5104_v32, %v890_v46 }
 0x4ac   :  { %977 = vmatmul.f32.gmra.mxu0 %v855_v22  ;;  %v899_v55 = vsel %vm896_vm13, %v898_v51, %v894_v38  ;;  %v909_v60 = vsel %vm908_vm2, %v5106_v40, %v905_v58  ;;  %v350_v22 = vld [vmem:[#allocation4 + $0x158] sm:$0xff]  ;;  %v1255_v51 = vld [vmem:[#allocation4 + $0x168] sm:$0xff]  ;;  %v5932_v58 = vld [vmem:[%s7431_s1] sm:$0xff] }
 0x4ad   :  { %v900_v39 = vmul.f32 %v5838_v11, %v899_v55  ;;  %v914_v63 = vsel %vm911_vm3, %v913_v53, %v909_v60  ;;  %1084 = vmatpush.msra.mxu0 %v350_v22  ;;  %4894 = vmatpush.msrb.mxu1 %v350_v22  ;;  %v1251_v55 = vld [vmem:[#allocation4 + $0x28] sm:$0xff] }
 0x4ae   :  { %v915_v49 = vmul.f32 %v5844_v16, %v914_v63 }
 0x4af   :  { %v5880_v31 = vpop.f32.mrf.mxu0  ;;  %1085 = vmatpush.msra.mxu0 %v349_v24  ;;  %4895 = vmatpush.msrb.mxu1 %v349_v24 }
 0x4b1   :  { %1086 = vmatpush.msra.mxu0 %v348_v26  ;;  %4896 = vmatpush.msrb.mxu1 %v348_v26 }
 0x4b4   :  { %980 = vmatmul.f32.gmra.mxu0 %v870_v43 }
 0x4b7   :  { %v960_v36 = vpop.f32.mrf.mxu0 }
 0x4b8   :  { %1000 = vrot.lane.b32.xlu0 %v960_v36, %s5476_s14 }
 0x4bc   :  { %983 = vmatmul.f32.gmra.mxu0 %v885_v30 }
 0x4bf   :  { %v963_v54 = vpop.f32.mrf.mxu0 }
 0x4c0   :  { %1002 = vrot.lane.b32.xlu0 %v963_v54, %s5476_s14  ;;  %v1253_v54 = vld [vmem:[#allocation4 + $0xc8] sm:$0xff] }
 0x4c4   :  { %986 = vmatmul.f32.gmra.mxu0 %v900_v39 }
 0x4c7   :  { %v966_v2 = vpop.f32.mrf.mxu0 }
 0x4cc   :  { %989 = vmatmul.f32.gmra.mxu0 %v915_v49 }
 0x4f0   :  { %v690_v1 = vpop.xlane.xlu1 %689 }
 0x4f1   :  { %5107 = vrcp.f32 %v690_v1  ;;  %v927_v6 = vand.u32 2147483648, %v690_v1  ;;  %v925_v8 = vand.u32 2147483647, %v690_v1  ;;  %vm921_vm5 = vweird.f32 %v690_v1 }
 0x4f3   :  { %v928_v10 = vor.u32 1.1754944e-38, %v927_v6  ;;  %vm926_vm7 = vcmp.eq.f32.partialorder %v925_v8, 8.507059e+37  ;;  %v5954_v8 = vld [vmem:[%s7431_s1 + $0x8] sm:$0xff] }
 0x4f7   :  { %v5108_v57 = vpop.eup %5107 }
 0x4f8   :  { %v917_v3 = vmul.f32 %v5108_v57, %v690_v1  ;;  %vm922_vm4 = vweird.f32 %v5108_v57  ;;  %v5358_v1 = vld [vmem:[#allocation2 + $0x8] sm:$0xff] }
 0x4f9   :  { %vm923_vm6 = vmor %vm921_vm5, %vm922_vm4 }
 0x4fa   :  { %v918_v4 = vsub.f32 1.0, %v917_v3  ;;  %v969_v11 = vpop.f32.mrf.mxu0 }
 0x4fc   :  { %v919_v7 = vmul.f32 %v5108_v57, %v918_v4 }
 0x4fe   :  { %v920_v9 = vadd.f32 %v5108_v57, %v919_v7 }
 0x500   :  { %v924_v5 = vsel %vm923_vm6, %v5108_v57, %v920_v9 }
 0x501   :  { %v929_v12 = vsel %vm926_vm7, %v928_v10, %v924_v5  ;;  %v5360_v5 = vld [vmem:[#allocation2 + $0x18] sm:$0xff] }
 0x502   :  { %v972_v16 = vpop.f32.mrf.mxu0  ;;  %v930_v61 = vmul.f32 %v5857_v41, %v929_v12 }
 0x503   :  { %1016 = vrot.lane.b32.xlu2 %v972_v16, %s5479_s19 }
 0x504   :  { %992 = vmatmul.f32.gmra.mxu0 %v930_v61 }
 0x521   :  { %v975_v19 = vpop.f32.mrf.mxu0 }
 0x522   :  { %1018 = vrot.lane.b32.xlu2 %v975_v19, %s5479_s19 }
 0x529   :  { %v978_v17 = vpop.f32.mrf.mxu0 }
 0x52a   :  { %1020 = vrot.lane.b32.xlu2 %v978_v17, %s5479_s19  ;;  %v1001_v62 = vpop.permute.xlu0 %1000 }
 0x52b   :  { %v1044_v33 = vsel %vm449_vm14, %v5861_v59, %v1001_v62 }
 0x531   :  { %v981_v27 = vpop.f32.mrf.mxu0 }
 0x532   :  { %1022 = vrot.lane.b32.xlu2 %v981_v27, %s5479_s19  ;;  %v1003_v34 = vpop.permute.xlu0 %1002 }
 0x533   :  { %v1045_v13 = vsel %vm449_vm14, %v5866_v0, %v1003_v34 }
 0x539   :  { %v984_v18 = vpop.f32.mrf.mxu0 }
 0x53a   :  { %1032 = vrot.lane.b32.xlu1 %v984_v18, %s5484_s6 }
 0x541   :  { %v987_v32 = vpop.f32.mrf.mxu0 }
 0x542   :  { %1004 = vrot.lane.b32.xlu1 %v966_v2, %s5476_s14  ;;  %1034 = vrot.lane.b32.xlu0 %v987_v32, %s5484_s6 }
 0x549   :  { %v990_v41 = vpop.f32.mrf.mxu0 }
 0x54a   :  { %1006 = vrot.lane.b32.xlu1 %v969_v11, %s5476_s14  ;;  %1036 = vrot.lane.b32.xlu0 %v990_v41, %s5484_s6  ;;  %v5359_v11 = vld [vmem:[#allocation2 + $0x10] sm:$0xff] }
 0x55d   :  { %v1017_v28 = vpop.permute.xlu2 %1016 }
 0x55e   :  { %v1049_v37 = vsel %vm1048_vm8, %v1044_v33, %v1017_v28 }
 0x57c   :  { %v1019_v43 = vpop.permute.xlu2 %1018 }
 0x57d   :  { %v1050_v29 = vsel %vm1048_vm8, %v1045_v13, %v1019_v43 }
 0x581   :  { %v993_v20 = vpop.f32.mrf.mxu0 }
 0x582   :  { %1038 = vrot.lane.b32.xlu0 %v993_v20, %s5484_s6 }
 0x584   :  { %v1021_v36 = vpop.permute.xlu2 %1020 }
 0x58c   :  { %v1023_v30 = vpop.permute.xlu2 %1022 }
 0x5ac   :  { %v1033_v40 = vpop.permute.xlu1 %1032 }
 0x5ad   :  { %v1054_v50 = vsel %vm1053_vm9, %v1049_v37, %v1033_v40  ;;  %v5007_v37 = vld [vmem:[%s7435_s5 + $0x9] ss:$0 sm:$0xff] }
 0x5ae   :  { %4713 = vmatmul.msk.f32.vlgmr.msra.gmra.mxu0 %vm113_vm0, %v1054_v50 }
 0x5b4   :  { %v1035_v42 = vpop.permute.xlu0 %1034  ;;  %v1005_v35 = vpop.permute.xlu1 %1004 }
 0x5b5   :  { %v1055_v44 = vsel %vm1053_vm9, %v1050_v29, %v1035_v42  ;;  %v1046_v59 = vsel %vm449_vm14, %v5873_v15, %v1005_v35  ;;  %v1257_v15 = vld [vmem:[#allocation4 + $0x208] sm:$0xff] }
 0x5b6   :  { %4714 = vmatmul.msk.f32.vlgmr.msrb.gmra.mxu1 %vm113_vm0, %v1055_v44  ;;  %v1051_v48 = vsel %vm1048_vm8, %v1046_v59, %v1021_v36  ;;  %v1207_v59 = vld [vmem:[#allocation4 + $0x200] sm:$0xff] }
 0x5b7   :  { %1277 = vmatpush.msra.mxu1 %v1257_v15  ;;  %1234 = vmatpush.msrb.mxu2 %v1207_v59  ;;  %v1206_v36 = vld [vmem:[#allocation4 + $0x160] sm:$0xff] }
 0x5b9   :  { %1278 = vmatpush.msra.mxu1 %v1255_v51  ;;  %1235 = vmatpush.msrb.mxu2 %v1206_v36 }
 0x5bb   :  { %1279 = vmatpush.msra.mxu1 %v1253_v54 }
 0x5bc   :  { %v1037_v47 = vpop.permute.xlu0 %1036  ;;  %v1007_v0 = vpop.permute.xlu1 %1006 }
 0x5bd   :  { %v1056_v46 = vsel %vm1053_vm9, %v1051_v48, %v1037_v47  ;;  %v1047_v25 = vsel %vm449_vm14, %v5880_v31, %v1007_v0  ;;  %v5006_v31 = vld [vmem:[%s7435_s5 + $0x5] ss:$0 sm:$0xff]  ;;  %1280 = vmatpush.msra.mxu1 %v1251_v55 }
 0x5be   :  { %4715 = vmatmul.msk.f32.gmra.mxu1 %vm113_vm0, %v1056_v46  ;;  %v1052_v38 = vsel %vm1048_vm8, %v1047_v25, %v1023_v30  ;;  %v1205_v47 = vld [vmem:[#allocation4 + $0xc0] sm:$0xff] }
 0x5bf   :  { %1236 = vmatpush.msrb.mxu2 %v1205_v47  ;;  %v1204_v48 = vld [vmem:[#allocation4 + $0x20] sm:$0xff] }
 0x5c1   :  { %1237 = vmatpush.msrb.mxu2 %v1204_v48 }
 0x5f4   :  { %v1039_v52 = vpop.permute.xlu0 %1038 }
 0x5f5   :  { %v1057_v23 = vsel %vm1053_vm9, %v1052_v38, %v1039_v52 }
 0x5f6   :  { %4716 = vmatmul.msk.f32.gmra.mxu1 %vm113_vm0, %v1057_v23 }
 0x5fe   :  { %4721 = vmatmul.msk.f32.vlgmr.msra.gmra.mxu1 %vm113_vm0, %v5932_v58 }
 0x606   :  { %4722 = vmatmul.msk.f32.gmra.mxu1 %vm113_vm0, %v5954_v8 }
 0x62b   :  { %v1088_v56 = vpop.f32.mrf.mxu0 }
 0x62c   :  { %v1089_v39 = vadd.f32 %v5006_v31, %v1088_v56 }
 0x62e   :  { %v5939_v60 = vadd.f32 %v5357_v45, %v1089_v39 }
 0x630   :  { %v1106_v53 = vsel %vm113_vm0, %v5939_v60, 0.0 }
 0x631   :  { %1107 = vadd.xlane.f32.xlu1 %v1106_v53 }
 0x633   :  { %v1091_v63 = vpop.f32.mrf.mxu1 }
 0x634   :  { %v1092_v49 = vadd.f32 %v5006_v31, %v1091_v63 }
 0x636   :  { %v5943_v2 = vadd.f32 %v5358_v1, %v1092_v49  ;;  %v5008_v49 = vld [vmem:[%s7435_s5 + $0x6] ss:$0 sm:$0xff] }
 0x638   :  { %v1109_v57 = vsel %vm113_vm0, %v5943_v2, 0.0 }
 0x639   :  { %1110 = vadd.xlane.f32.xlu2 %v1109_v57 }
 0x63b   :  { %v1094_v3 = vpop.f32.mrf.mxu1 }
 0x63c   :  { %v1095_v4 = vadd.f32 %v5006_v31, %v1094_v3 }
 0x63e   :  { %v5947_v6 = vadd.f32 %v5359_v11, %v1095_v4  ;;  %v5009_v4 = vld [vmem:[%s7435_s5 + $0x7] ss:$0 sm:$0xff] }
 0x640   :  { %v1112_v7 = vsel %vm113_vm0, %v5947_v6, 0.0 }
 0x641   :  { %1113 = vadd.xlane.f32.xlu0 %v1112_v7 }
 0x673   :  { %v1097_v9 = vpop.f32.mrf.mxu1 }
 0x674   :  { %v1098_v10 = vadd.f32 %v5006_v31, %v1097_v9 }
 0x676   :  { %v5958_v12 = vadd.f32 %v5360_v5, %v1098_v10 }
 0x678   :  { %v1115_v16 = vsel %vm113_vm0, %v5958_v12, 0.0 }
 0x679   :  { %1116 = vadd.xlane.f32.xlu1 %v1115_v16 }
 0x67b   :  { %v1282_v34 = vpop.f32.mrf.mxu1 }
 0x67c   :  { %v5986_v40 = vadd.f32 %v5007_v37, %v1282_v34 }
 0x683   :  { %v1285_v50 = vpop.f32.mrf.mxu1 }
 0x684   :  { %v5988_v43 = vadd.f32 %v5007_v37, %v1285_v50 }
 0x6a4   :  { %v1108_v61 = vpop.xlane.xlu1 %1107 }
 0x6a5   :  { %v1118_v19 = vmul.f32 %v1108_v61, %v5540_v14 }
 0x6a7   :  { %v5964_v17 = vsub.f32 %v5939_v60, %v1118_v19 }
 0x6a9   :  { %v1126_v27 = vmul.f32 %v5964_v17, %v5964_v17 }
 0x6ab   :  { %v1130_v18 = vsel %vm113_vm0, %v1126_v27, 0.0 }
 0x6ac   :  { %v1111_v32 = vpop.xlane.xlu2 %1110  ;;  %1131 = vadd.xlane.f32.xlu2 %v1130_v18 }
 0x6ad   :  { %v1119_v41 = vmul.f32 %v1111_v32, %v5540_v14 }
 0x6af   :  { %v5971_v21 = vsub.f32 %v5943_v2, %v1119_v41 }
 0x6b1   :  { %v1127_v22 = vmul.f32 %v5971_v21, %v5971_v21 }
 0x6b3   :  { %v1133_v24 = vsel %vm113_vm0, %v1127_v22, 0.0 }
 0x6b4   :  { %1134 = vadd.xlane.f32.xlu0 %v1133_v24  ;;  %v1114_v20 = vpop.xlane.xlu0 %1113 }
 0x6b5   :  { %v1120_v26 = vmul.f32 %v1114_v20, %v5540_v14 }
 0x6b7   :  { %v5978_v62 = vsub.f32 %v5947_v6, %v1120_v26 }
 0x6b9   :  { %v1128_v28 = vmul.f32 %v5978_v62, %v5978_v62 }
 0x6bb   :  { %v1136_v33 = vsel %vm113_vm0, %v1128_v28, 0.0 }
 0x6bc   :  { %1137 = vadd.xlane.f32.xlu1 %v1136_v33 }
 0x6c8   :  { %1364 = vrot.lane.b32.xlu0 %v5988_v43, %s5481_s25 }
 0x6d0   :  { %1358 = vrot.lane.b32.xlu0 %v5986_v40, %s5482_s26 }
 0x6d5   :  { %1362 = vrot.lane.b32.xlu1 %v5986_v40, %s5481_s25 }
 0x6dd   :  { %1356 = vrot.lane.b32.xlu1 %v5988_v43, %s5483_s27 }
 0x6ec   :  { %v1117_v13 = vpop.xlane.xlu1 %1116 }
 0x6ed   :  { %v1121_v29 = vmul.f32 %v1117_v13, %v5540_v14 }
 0x6ef   :  { %v6000_v42 = vsub.f32 %v5958_v12, %v1121_v29 }
 0x6f1   :  { %v1129_v44 = vmul.f32 %v6000_v42, %v6000_v42 }
 0x6f3   :  { %v1139_v35 = vsel %vm113_vm0, %v1129_v44, 0.0 }
 0x6f4   :  { %1140 = vadd.xlane.f32.xlu2 %v1139_v35 }
 0x70c   :  { %1360 = vrot.lane.b32.xlu2 %v5988_v43, %s5482_s26 }
 0x714   :  { %1354 = vrot.lane.b32.xlu2 %v5986_v40, %s5483_s27 }
 0x71f   :  { %v1132_v46 = vpop.xlane.xlu2 %1131 }
 0x720   :  { %v1142_v0 = vmul.f32 %v1132_v46, %v5540_v14 }
 0x722   :  { %v1146_v25 = vadd.f32 1e-05, %v1142_v0 }
 0x724   :  { %5109 = vrsqrt.f32 %v1146_v25  ;;  %vm1156_vm11 = vweird.f32 %v1146_v25 }
 0x727   :  { %v1135_v30 = vpop.xlane.xlu0 %1134 }
 0x728   :  { %v1143_v52 = vmul.f32 %v1135_v30, %v5540_v14 }
 0x72a   :  { %v5110_v38 = vpop.eup %5109  ;;  %v1147_v23 = vadd.f32 1e-05, %v1143_v52 }
 0x72b   :  { %v1151_v15 = vmul.f32 %v5110_v38, %v1146_v25  ;;  %vm1157_vm10 = vweird.f32 %v5110_v38 }
 0x72c   :  { %5111 = vrsqrt.f32 %v1147_v23  ;;  %vm1158_vm12 = vmor %vm1156_vm11, %vm1157_vm10  ;;  %vm1166_vm15 = vweird.f32 %v1147_v23  ;;  %vm1499_vm10 = vcmask 523264  }
 0x72d   :  { %v1152_v51 = vmul.f32 %v5110_v38, %v1151_v15  ;;  %v1256_v15 = vld [vmem:[#allocation4 + $0x170] sm:$0xff] }
 0x72f   :  { %v1153_v54 = vmul.f32 0.5, %v1152_v51  ;;  %v1138_v55 = vpop.xlane.xlu1 %1137  ;;  %v1254_v51 = vld [vmem:[#allocation4 + $0xd0] sm:$0xff] }
 0x730   :  { %v1144_v31 = vmul.f32 %v1138_v55, %v5540_v14 }
 0x731   :  { %v1154_v56 = vsub.f32 1.5, %v1153_v54  ;;  %v1252_v54 = vld [vmem:[#allocation4 + $0x30] sm:$0xff] }
 0x732   :  { %v5112_v39 = vpop.eup %5111  ;;  %v1148_v45 = vadd.f32 1e-05, %v1144_v31 }
 0x733   :  { %v1155_v53 = vmul.f32 %v5110_v38, %v1154_v56  ;;  %v1161_v63 = vmul.f32 %v5112_v39, %v1147_v23  ;;  %vm1167_vm13 = vweird.f32 %v5112_v39  ;;  %v1258_v23 = vld [vmem:[#allocation4 + $0x210] sm:$0xff] }
 0x734   :  { %5113 = vrsqrt.f32 %v1148_v45  ;;  %vm1168_vm1 = vmor %vm1166_vm15, %vm1167_vm13  ;;  %vm1176_vm3 = vweird.f32 %v1148_v45  ;;  %1300 = vmatpush.msra.mxu2 %v1258_v23 }
 0x735   :  { %v1159_v1 = vsel %vm1158_vm12, %v5110_v38, %v1155_v53  ;;  %v1162_v57 = vmul.f32 %v5112_v39, %v1161_v63  ;;  %v95_v63 = vld [vmem:[%s7433_s3] sm:$0xff] }
 0x736   :  { %v1190_v3 = vmul.f32 %v1159_v1, %v5964_v17  ;;  %1301 = vmatpush.msra.mxu2 %v1256_v15  ;;  %v101_v15 = vld [vmem:[%s7433_s3 + $0x30] sm:$0xff] }
 0x737   :  { %v1163_v11 = vmul.f32 0.5, %v1162_v57 }
 0x738   :  { %v1195_v7 = vmul.f32 %v5008_v49, %v1190_v3  ;;  %1302 = vmatpush.msra.mxu2 %v1254_v51 }
 0x739   :  { %v1164_v9 = vsub.f32 1.5, %v1163_v11  ;;  %v96_v11 = vld [vmem:[%s7433_s3 + $0x8] sm:$0xff] }
 0x73a   :  { %v5114_v10 = vpop.eup %5113  ;;  %v1200_v5 = vadd.f32 %v5009_v4, %v1195_v7  ;;  %v1365_v33 = vpop.permute.xlu0 %1364  ;;  %1303 = vmatpush.msra.mxu2 %v1252_v54 }
 0x73b   :  { %v1165_v16 = vmul.f32 %v5112_v39, %v1164_v9  ;;  %v1171_v61 = vmul.f32 %v5114_v10, %v1148_v45  ;;  %vm1177_vm2 = vweird.f32 %v5114_v10  ;;  %4725 = vmatpush.xpose.msk.msrb.mxu1 %vm449_vm14, %v1365_v33 }
 0x73c   :  { %4717 = vmatmul.msk.f32.vlgmr.msrb.gmra.mxu2 %vm113_vm0, %v1200_v5  ;;  %vm1178_vm4 = vmor %vm1176_vm3, %vm1177_vm2  ;;  %v5011_v5 = vld [vmem:[%s7435_s5 + $0xa] ss:$0 sm:$0xff] }
 0x73d   :  { %v1172_v19 = vmul.f32 %v5114_v10, %v1171_v61  ;;  %v1169_v27 = vsel %vm1168_vm1, %v5112_v39, %v1165_v16  ;;  %v97_v61 = vld [vmem:[%s7433_s3 + $0x10] sm:$0xff] }
 0x73e   :  { %v1191_v17 = vmul.f32 %v1169_v27, %v5971_v21 }
 0x73f   :  { %v1173_v18 = vmul.f32 0.5, %v1172_v19 }
 0x740   :  { %v1196_v32 = vmul.f32 %v5008_v49, %v1191_v17 }
 0x741   :  { %v1174_v41 = vsub.f32 1.5, %v1173_v18 }
 0x742   :  { %v1201_v22 = vadd.f32 %v5009_v4, %v1196_v32  ;;  %v1359_v44 = vpop.permute.xlu0 %1358 }
 0x743   :  { %v1175_v24 = vmul.f32 %v5114_v10, %v1174_v41 }
 0x744   :  { %4718 = vmatmul.msk.f32.gmra.mxu2 %vm113_vm0, %v1201_v22 }
 0x745   :  { %v1179_v20 = vsel %vm1178_vm4, %v5114_v10, %v1175_v24 }
 0x746   :  { %v1192_v26 = vmul.f32 %v1179_v20, %v5978_v62  ;;  %v98_v20 = vld [vmem:[%s7433_s3 + $0x18] sm:$0xff] }
 0x747   :  { %v1363_v21 = vpop.permute.xlu1 %1362 }
 0x748   :  { %v1197_v28 = vmul.f32 %v5008_v49, %v1192_v26  ;;  %4726 = vmatpush.xpose.msk.msrb.mxu1 %vm449_vm14, %v1363_v21 }
 0x74a   :  { %v1202_v34 = vadd.f32 %v5009_v4, %v1197_v28 }
 0x74c   :  { %4719 = vmatmul.msk.f32.gmra.mxu2 %vm113_vm0, %v1202_v34 }
 0x74f   :  { %v1357_v36 = vpop.permute.xlu1 %1356 }
 0x767   :  { %v1141_v37 = vpop.xlane.xlu2 %1140 }
 0x768   :  { %v1145_v50 = vmul.f32 %v1141_v37, %v5540_v14 }
 0x76a   :  { %v1149_v13 = vadd.f32 1e-05, %v1145_v50 }
 0x76c   :  { %5115 = vrsqrt.f32 %v1149_v13  ;;  %vm1186_vm6 = vweird.f32 %v1149_v13 }
 0x76f   :  { %v1361_v29 = vpop.permute.xlu2 %1360 }
 0x770   :  { %4727 = vmatpush.xpose.msk.msrb.mxu1 %vm449_vm14, %v1361_v29  ;;  %v99_v29 = vld [vmem:[%s7433_s3 + $0x20] sm:$0xff] }
 0x772   :  { %v5116_v62 = vpop.eup %5115 }
 0x773   :  { %v1181_v35 = vmul.f32 %v5116_v62, %v1149_v13  ;;  %vm1187_vm5 = vweird.f32 %v5116_v62 }
 0x774   :  { %4728 = vmatpush.xpose.msk.msrb.mxu1 %vm449_vm14, %v1359_v44  ;;  %vm1188_vm7 = vmor %vm1186_vm6, %vm1187_vm5 }
 0x775   :  { %v1182_v59 = vmul.f32 %v5116_v62, %v1181_v35 }
 0x777   :  { %v1183_v47 = vmul.f32 0.5, %v1182_v59  ;;  %v1355_v46 = vpop.permute.xlu2 %1354 }
 0x778   :  { %4729 = vmatpush.xpose.msk.msrb.mxu1 %vm449_vm14, %v1357_v36 }
 0x779   :  { %v1184_v48 = vsub.f32 1.5, %v1183_v47 }
 0x77b   :  { %v1185_v0 = vmul.f32 %v5116_v62, %v1184_v48  ;;  %v100_v48 = vld [vmem:[%s7433_s3 + $0x28] sm:$0xff] }
 0x77c   :  { %4730 = vmatpush.xpose.msk.msrb.mxu1 %vm449_vm14, %v1355_v46 }
 0x77d   :  { %v1189_v25 = vsel %vm1188_vm7, %v5116_v62, %v1185_v0 }
 0x77e   :  { %v1193_v30 = vmul.f32 %v1189_v25, %v6000_v42 }
 0x780   :  { %4731 = vmatpush.xpose.msk.msrb.mxu1 %vm449_vm14, %v5988_v43  ;;  %v1198_v52 = vmul.f32 %v5008_v49, %v1193_v30  ;;  %v5010_v43 = vld [vmem:[%s7435_s5 + $0x8] ss:$0 sm:$0xff] }
 0x782   :  { %v1203_v38 = vadd.f32 %v5009_v4, %v1198_v52 }
 0x784   :  { %4720 = vmatmul.msk.f32.gmra.mxu2 %vm113_vm0, %v1203_v38  ;;  %4732 = vmatpush.xpose.msk.msrb.mxu1 %vm449_vm14, %v5986_v40 }
 0x78c   :  { %4723 = vmatmul.msk.f32.vlgmr.msra.gmra.mxu2 %vm113_vm0, %v5932_v58 }
 0x794   :  { %4724 = vmatmul.msk.f32.gmra.mxu2 %vm113_vm0, %v5954_v8 }
 0x7bf   :  { %v1239_v42 = vpop.f32.mrf.mxu2 }
 0x7c0   :  { %v1240_v40 = vadd.f32 %v5010_v43, %v1239_v42 }
 0x7c2   :  { %1328 = vrot.lane.b32.xlu0 %v1240_v40, %s5483_s27  ;;  %4733 = vmatmul.msk.f32.vlgmr.msrb.gmra.mxu1 %vm449_vm14, %v1240_v40 }
 0x7c7   :  { %v1242_v55 = vpop.f32.mrf.mxu2 }
 0x7c8   :  { %v1243_v31 = vadd.f32 %v5010_v43, %v1242_v55 }
 0x7ca   :  { %1330 = vrot.lane.b32.xlu1 %v1243_v31, %s5483_s27  ;;  %4734 = vmatmul.msk.f32.gmra.mxu1 %vm449_vm14, %v1243_v31 }
 0x7cf   :  { %v1245_v58 = vpop.f32.mrf.mxu2 }
 0x7d0   :  { %v1246_v56 = vadd.f32 %v5010_v43, %v1245_v58 }
 0x7d2   :  { %1336 = vrot.lane.b32.xlu1 %v1240_v40, %s5482_s26  ;;  %1332 = vrot.lane.b32.xlu2 %v1246_v56, %s5483_s27 }
 0x7d3   :  { %4735 = vmatmul.msk.f32.gmra.mxu1 %vm449_vm14, %v1246_v56 }
 0x7da   :  { %1338 = vrot.lane.b32.xlu2 %v1243_v31, %s5482_s26 }
 0x7e2   :  { %1344 = vrot.lane.b32.xlu2 %v1240_v40, %s5481_s25 }
 0x807   :  { %v1248_v8 = vpop.f32.mrf.mxu2 }
 0x808   :  { %v1249_v39 = vadd.f32 %v5010_v43, %v1248_v8 }
 0x80a   :  { %1342 = vrot.lane.b32.xlu1 %v1249_v39, %s5482_s26  ;;  %1334 = vrot.lane.b32.xlu0 %v1249_v39, %s5483_s27 }
 0x80b   :  { %1350 = vrot.lane.b32.xlu2 %v1249_v39, %s5481_s25  ;;  %4736 = vmatmul.msk.f32.gmra.mxu1 %vm449_vm14, %v1249_v39 }
 0x80f   :  { %v1305_v3 = vpop.f32.mrf.mxu2 }
 0x810   :  { %v6077_v27 = vadd.f32 %v5011_v5, %v1305_v3 }
 0x812   :  { %1348 = vrot.lane.b32.xlu1 %v1246_v56, %s5481_s25  ;;  %1340 = vrot.lane.b32.xlu0 %v1246_v56, %s5482_s26 }
 0x817   :  { %v1308_v16 = vpop.f32.mrf.mxu2 }
 0x818   :  { %v6079_v17 = vadd.f32 %v5011_v5, %v1308_v16 }
 0x81a   :  { %1346 = vrot.lane.b32.xlu0 %v1243_v31, %s5481_s25  ;;  %v6084_v41 = vpack.i.bf16 %v6077_v27, %v6079_v17 }
 0x82c   :  { %v1333_v4 = vpop.permute.xlu2 %1332 }
 0x834   :  { %v1329_v45 = vpop.permute.xlu0 %1328  ;;  %v1339_v34 = vpop.permute.xlu2 %1338 }
 0x835   :  { %4737 = vmatmul.msk.f32.gmra.mxu1 %vm449_vm14, %v1329_v45 }
 0x83c   :  { %v1331_v53 = vpop.permute.xlu1 %1330  ;;  %v1345_v50 = vpop.permute.xlu2 %1344 }
 0x83d   :  { %4738 = vmatmul.msk.f32.gmra.mxu1 %vm449_vm14, %v1331_v53 }
 0x83f   :  { %v1451_v49 = vpop.f32.mrf.mxu1 }
 0x840   :  { %v1452_v1 = vadd.f32 %v1451_v49, %v95_v63 }
 0x842   :  { %v1500_v57 = vsel %vm1499_vm10, %v1452_v1, -inf }
 0x844   :  { %1501 = vmax.xlane.f32.xlu0 %v1500_v57  ;;  %v1337_v24 = vpop.permute.xlu1 %1336  ;;  %v102_v57 = vld [vmem:[%s7433_s3 + $0x38] sm:$0xff] }
 0x845   :  { %4739 = vmatmul.msk.f32.gmra.mxu1 %vm449_vm14, %v1333_v4 }
 0x847   :  { %v1454_v7 = vpop.f32.mrf.mxu1 }
 0x848   :  { %v1455_v9 = vadd.f32 %v1454_v7, %v96_v11 }
 0x84a   :  { %v1503_v10 = vsel %vm1499_vm10, %v1455_v9, -inf }
 0x84b   :  { %1504 = vmax.xlane.f32.xlu1 %v1503_v10  ;;  %v103_v10 = vld [vmem:[%s7433_s3 + $0x40] sm:$0xff] }
 0x850   :  { %v1457_v19 = vpop.f32.mrf.mxu1 }
 0x851   :  { %v1458_v18 = vadd.f32 %v1457_v19, %v97_v61 }
 0x853   :  { %v1506_v32 = vsel %vm1499_vm10, %v1458_v18, -inf }
 0x854   :  { %1507 = vmax.xlane.f32.xlu2 %v1506_v32 }
 0x858   :  { %4942 = vrot.lane.b32.xlu0 %v6084_v41, %s5481_s25 }
 0x865   :  { %v1351_v30 = vpop.permute.xlu2 %1350 }
 0x87c   :  { %v1335_v22 = vpop.permute.xlu0 %1334  ;;  %v1343_v37 = vpop.permute.xlu1 %1342 }
 0x87d   :  { %4740 = vmatmul.msk.f32.gmra.mxu1 %vm449_vm14, %v1335_v22 }
 0x884   :  { %v1341_v21 = vpop.permute.xlu0 %1340  ;;  %v1349_v35 = vpop.permute.xlu1 %1348 }
 0x885   :  { %4741 = vmatmul.msk.f32.gmra.mxu1 %vm449_vm14, %v1337_v24 }
 0x888   :  { %v1460_v26 = vpop.f32.mrf.mxu1 }
 0x889   :  { %v6093_v28 = vadd.f32 %v1460_v26, %v98_v20 }
 0x88b   :  { %v1509_v33 = vsel %vm1499_vm10, %v6093_v28, -inf }
 0x88c   :  { %1510 = vmax.xlane.f32.xlu0 %v1509_v33  ;;  %v1347_v13 = vpop.permute.xlu0 %1346  ;;  %v106_v33 = vld [vmem:[%s7433_s3 + $0x58] sm:$0xff] }
 0x88d   :  { %4742 = vmatmul.msk.f32.gmra.mxu1 %vm449_vm14, %v1339_v34 }
 0x895   :  { %4743 = vmatmul.msk.f32.gmra.mxu1 %vm449_vm14, %v1341_v21 }
 0x89d   :  { %4744 = vmatmul.msk.f32.gmra.mxu1 %vm449_vm14, %v1343_v37 }
 0x8a5   :  { %4745 = vmatmul.msk.f32.gmra.mxu1 %vm449_vm14, %v1345_v50 }
 0x8ad   :  { %4746 = vmatmul.msk.f32.gmra.mxu1 %vm449_vm14, %v1347_v13 }
 0x8b2   :  { %v1463_v44 = vpop.f32.mrf.mxu1 }
 0x8b3   :  { %v6105_v62 = vadd.f32 %v1463_v44, %v99_v29 }
 0x8b5   :  { %4747 = vmatmul.msk.f32.gmra.mxu1 %vm449_vm14, %v1349_v35  ;;  %v1512_v59 = vsel %vm1499_vm10, %v6105_v62, -inf }
 0x8b6   :  { %1513 = vmax.xlane.f32.xlu1 %v1512_v59 }
 0x8b7   :  { %v1502_v36 = vpop.xlane.xlu0 %1501 }
 0x8b8   :  { %v1548_v47 = vsub.f32 %v1452_v1, %v1502_v36 }
 0x8ba   :  { %v1564_v46 = vmul.f32 1.442695, %v1548_v47  ;;  %v1466_v0 = vpop.f32.mrf.mxu1 }
 0x8bb   :  { %v6113_v25 = vadd.f32 %v1466_v0, %v100_v48  ;;  %v105_v48 = vld [vmem:[%s7433_s3 + $0x50] sm:$0xff] }
 0x8bc   :  { %5117 = vpow2.f32 %v1564_v46 }
 0x8bd   :  { %4748 = vmatmul.msk.f32.gmra.mxu1 %vm449_vm14, %v1351_v30  ;;  %v1515_v52 = vsel %vm1499_vm10, %v6113_v25, -inf }
 0x8be   :  { %1516 = vmax.xlane.f32.xlu2 %v1515_v52  ;;  %v1505_v38 = vpop.xlane.xlu1 %1504 }
 0x8bf   :  { %v1549_v23 = vsub.f32 %v1455_v9, %v1505_v38 }
 0x8c1   :  { %v1566_v51 = vmul.f32 1.442695, %v1549_v23  ;;  %v107_v23 = vld [vmem:[%s7433_s3 + $0x60] sm:$0xff] }
 0x8c2   :  { %v6121_v54 = vpop.eup %5117  ;;  %v1469_v43 = vpop.f32.mrf.mxu1 }
 0x8c3   :  { %5119 = vpow2.f32 %v1566_v51  ;;  %v6123_v42 = vadd.f32 %v1469_v43, %v101_v15  ;;  %v1596_v40 = vsel %vm1499_vm10, %v6121_v54, 0.0 }
 0x8c4   :  { %1597 = vadd.xlane.f32.xlu1 %v1596_v40 }
 0x8c5   :  { %v1518_v55 = vsel %vm1499_vm10, %v6123_v42, -inf }
 0x8c6   :  { %1519 = vmax.xlane.f32.xlu0 %v1518_v55  ;;  %v108_v55 = vld [vmem:[%s7433_s3 + $0x68] sm:$0xff] }
 0x8c7   :  { %v1508_v31 = vpop.xlane.xlu2 %1507 }
 0x8c8   :  { %v1550_v58 = vsub.f32 %v1458_v18, %v1508_v31  ;;  %v104_v18 = vld [vmem:[%s7433_s3 + $0x48] sm:$0xff]  ;;  %v109_v31 = vld [vmem:[%s7433_s3 + $0x70] sm:$0xff] }
 0x8c9   :  { %v6129_v56 = vpop.eup %5119 }
 0x8ca   :  { %v1568_v8 = vmul.f32 1.442695, %v1550_v58  ;;  %v1599_v39 = vsel %vm1499_vm10, %v6129_v56, 0.0  ;;  %v4943_v45 = vpop.permute.xlu0 %4942 }
 0x8cb   :  { %v4945_v53 = vunpack.i.h.bf16 %v4943_v45  ;;  %v4944_v63 = vunpack.i.l.bf16 %v4943_v45 }
 0x8cc   :  { %5121 = vpow2.f32 %v1568_v8  ;;  %1600 = vadd.xlane.f32.xlu1 %v1599_v39 }
 0x8cd   :  { %1940 = vmatpush.msrb.mxu2 %v4944_v63 }
 0x8cf   :  { %1941 = vmatpush.msrb.mxu2 %v4945_v53 }
 0x8d2   :  { %v6133_v49 = vpop.eup %5121 }
 0x8d3   :  { %v1602_v1 = vsel %vm1499_vm10, %v6133_v49, 0.0 }
 0x8d4   :  { %1603 = vadd.xlane.f32.xlu1 %v1602_v1 }
 0x8da   :  { %4952 = vrot.lane.b32.xlu0 %v6084_v41, %s5483_s27 }
 0x8fa   :  { %v1472_v3 = vpop.f32.mrf.mxu1 }
 0x8fb   :  { %v6142_v4 = vadd.f32 %v1472_v3, %v102_v57 }
 0x8fd   :  { %v1521_v11 = vsel %vm1499_vm10, %v6142_v4, -inf }
 0x8fe   :  { %1522 = vmax.xlane.f32.xlu2 %v1521_v11 }
 0x8ff   :  { %v1511_v7 = vpop.xlane.xlu0 %1510 }
 0x900   :  { %v1551_v9 = vsub.f32 %v6093_v28, %v1511_v7 }
 0x902   :  { %v1570_v5 = vmul.f32 1.442695, %v1551_v9  ;;  %v1475_v16 = vpop.f32.mrf.mxu1 }
 0x903   :  { %v6150_v61 = vadd.f32 %v1475_v16, %v103_v10 }
 0x904   :  { %5123 = vpow2.f32 %v1570_v5 }
 0x905   :  { %v1524_v19 = vsel %vm1499_vm10, %v6150_v61, -inf }
 0x906   :  { %1525 = vmax.xlane.f32.xlu1 %v1524_v19 }
 0x90a   :  { %v6157_v32 = vpop.eup %5123  ;;  %v1478_v22 = vpop.f32.mrf.mxu1 }
 0x90b   :  { %v6159_v24 = vadd.f32 %v1478_v22, %v104_v18  ;;  %v1605_v26 = vsel %vm1499_vm10, %v6157_v32, 0.0 }
 0x90d   :  { %v1527_v20 = vsel %vm1499_vm10, %v6159_v24, -inf }
 0x90e   :  { %1528 = vmax.xlane.f32.xlu0 %v1527_v20  ;;  %1606 = vadd.xlane.f32.xlu1 %v1605_v26 }
 0x912   :  { %v1481_v28 = vpop.f32.mrf.mxu1 }
 0x916   :  { %4947 = vrot.lane.b32.xlu2 %v6084_v41, %s5482_s26 }
 0x91a   :  { %v1484_v34 = vpop.f32.mrf.mxu1 }
 0x91b   :  { %v6170_v21 = vadd.f32 %v1484_v34, %v106_v33 }
 0x91d   :  { %v1533_v37 = vsel %vm1499_vm10, %v6170_v21, -inf }
 0x91e   :  { %1534 = vmax.xlane.f32.xlu1 %v1533_v37 }
 0x922   :  { %v1487_v35 = vpop.f32.mrf.mxu1 }
 0x923   :  { %v6195_v51 = vadd.f32 %v1487_v35, %v107_v23 }
 0x925   :  { %v1536_v40 = vsel %vm1499_vm10, %v6195_v51, -inf }
 0x929   :  { %v1514_v50 = vpop.xlane.xlu1 %1513 }
 0x92a   :  { %v1552_v13 = vsub.f32 %v6105_v62, %v1514_v50  ;;  %v6183_v62 = vadd.f32 %v1481_v28, %v105_v48 }
 0x92c   :  { %v1572_v29 = vmul.f32 1.442695, %v1552_v13  ;;  %v1530_v15 = vsel %vm1499_vm10, %v6183_v62, -inf }
 0x92e   :  { %5125 = vpow2.f32 %v1572_v29 }
 0x931   :  { %v1517_v44 = vpop.xlane.xlu2 %1516 }
 0x932   :  { %v1553_v41 = vsub.f32 %v6113_v25, %v1517_v44  ;;  %v1490_v25 = vpop.f32.mrf.mxu1 }
 0x933   :  { %v6209_v8 = vadd.f32 %v1490_v25, %v108_v55 }
 0x934   :  { %v6176_v59 = vpop.eup %5125  ;;  %v1574_v36 = vmul.f32 1.442695, %v1553_v41  ;;  %v110_v41 = vld [vmem:[%s7433_s3 + $0x78] sm:$0xff] }
 0x935   :  { %v1608_v47 = vsel %vm1499_vm10, %v6176_v59, 0.0  ;;  %v1539_v53 = vsel %vm1499_vm10, %v6209_v8, -inf }
 0x936   :  { %5127 = vpow2.f32 %v1574_v36  ;;  %1609 = vadd.xlane.f32.xlu1 %v1608_v47 }
 0x937   :  { %v1598_v63 = vpop.xlane.xlu1 %1597 }
 0x938   :  { %v1655_v13 = vand.u32 2147483648, %v1598_v63  ;;  %vm1649_vm12 = vweird.f32 %v1598_v63  ;;  %v1653_v35 = vand.u32 2147483647, %v1598_v63 }
 0x939   :  { %v1520_v46 = vpop.xlane.xlu0 %1519 }
 0x93a   :  { %v1554_v0 = vsub.f32 %v6123_v42, %v1520_v46  ;;  %v1493_v58 = vpop.f32.mrf.mxu1  ;;  %vm1654_vm15 = vcmp.eq.f32.partialorder %v1653_v35, 8.507059e+37 }
 0x93b   :  { %v6211_v39 = vadd.f32 %v1493_v58, %v109_v31 }
 0x93c   :  { %v6186_v30 = vpop.eup %5127  ;;  %v1576_v52 = vmul.f32 1.442695, %v1554_v0 }
 0x93d   :  { %v1611_v38 = vsel %vm1499_vm10, %v6186_v30, 0.0  ;;  %v1542_v45 = vsel %vm1499_vm10, %v6211_v39, -inf }
 0x93e   :  { %5129 = vpow2.f32 %v1576_v52  ;;  %1612 = vadd.xlane.f32.xlu1 %v1611_v38  ;;  %v1656_v52 = vor.u32 1.1754944e-38, %v1655_v13 }
 0x93f   :  { %1531 = vmax.xlane.f32.xlu2 %v1530_v15  ;;  %5131 = vrcp.f32 %v1598_v63  ;;  %v6217_v1 = vpop.xlane.xlu1 %1600 }
 0x940   :  { %5133 = vrcp.f32 %v6217_v1  ;;  %vm1664_vm2 = vweird.f32 %v6217_v1 }
 0x942   :  { %v1496_v36 = vpop.f32.mrf.mxu1 }
 0x943   :  { %v6247_v38 = vadd.f32 %v1496_v36, %v110_v41 }
 0x944   :  { %v6197_v43 = vpop.eup %5129 }
 0x945   :  { %v1614_v42 = vsel %vm1499_vm10, %v6197_v43, 0.0  ;;  %v5132_v57 = vpop.eup %5131 }
 0x946   :  { %1615 = vadd.xlane.f32.xlu0 %v1614_v42  ;;  %1537 = vmax.xlane.f32.xlu1 %v1536_v40  ;;  %v1645_v3 = vmul.f32 %v5132_v57, %v1598_v63  ;;  %v6223_v5 = vpop.eup %5133  ;;  %vm1650_vm11 = vweird.f32 %v5132_v57  ;;  %v1545_v63 = vsel %vm1499_vm10, %v6247_v38, -inf }
 0x947   :  { %v6220_v11 = vpop.xlane.xlu1 %1603  ;;  %v1660_v18 = vmul.f32 %v6223_v5, %v6217_v1  ;;  %vm6238_vm13 = vmor %vm1649_vm12, %vm1650_vm11  ;;  %vm1665_vm1 = vweird.f32 %v6223_v5 }
 0x948   :  { %v1646_v10 = vsub.f32 1.0, %v1645_v3  ;;  %5135 = vrcp.f32 %v6220_v11  ;;  %vm1666_vm3 = vmor %vm1664_vm2, %vm1665_vm1  ;;  %vm1679_vm6 = vweird.f32 %v6220_v11 }
 0x949   :  { %v1661_v37 = vsub.f32 1.0, %v1660_v18 }
 0x94a   :  { %v1647_v19 = vmul.f32 %v5132_v57, %v1646_v10 }
 0x94b   :  { %v1662_v25 = vmul.f32 %v6223_v5, %v1661_v37 }
 0x94c   :  { %v4953_v22 = vpop.permute.xlu0 %4952 }
 0x94d   :  { %v4954_v48 = vunpack.i.l.bf16 %v4953_v22  ;;  %v4955_v23 = vunpack.i.h.bf16 %v4953_v22  ;;  %v1663_v58 = vadd.f32 %v6223_v5, %v1662_v25  ;;  %v1685_v22 = vand.u32 2147483648, %v6220_v11 }
 0x94e   :  { %1543 = vmax.xlane.f32.xlu0 %v1542_v45  ;;  %1540 = vmax.xlane.f32.xlu1 %v1539_v53  ;;  %v6229_v34 = vpop.eup %5135 }
 0x94f   :  { %v1675_v0 = vmul.f32 %v6229_v34, %v6220_v11  ;;  %vm1680_vm5 = vweird.f32 %v6229_v34 }
 0x950   :  { %vm1681_vm7 = vmor %vm1679_vm6, %vm1680_vm5 }
 0x951   :  { %v1676_v31 = vsub.f32 1.0, %v1675_v0 }
 0x971   :  { %v1523_v7 = vpop.xlane.xlu2 %1522 }
 0x972   :  { %v1555_v9 = vsub.f32 %v6142_v4, %v1523_v7  ;;  %v1648_v4 = vadd.f32 %v5132_v57, %v1647_v19  ;;  %v1668_v7 = vand.u32 2147483647, %v6217_v1 }
 0x974   :  { %v1578_v16 = vmul.f32 1.442695, %v1555_v9  ;;  %v1652_v46 = vsel %vm6238_vm13, %v5132_v57, %v1648_v4  ;;  %v1670_v57 = vand.u32 2147483648, %v6217_v1  ;;  %v1677_v9 = vmul.f32 %v6229_v34, %v1676_v31 }
 0x975   :  { %v1657_v55 = vsel %vm1654_vm15, %v1656_v52, %v1652_v46  ;;  %vm1669_vm4 = vcmp.eq.f32.partialorder %v1668_v7, 8.507059e+37  ;;  %v1686_v4 = vor.u32 1.1754944e-38, %v1685_v22 }
 0x976   :  { %5137 = vpow2.f32 %v1578_v16  ;;  %v1658_v3 = vmul.f32 %v6121_v54, %v1657_v55  ;;  %v1671_v16 = vor.u32 1.1754944e-38, %v1670_v57  ;;  %v1678_v1 = vadd.f32 %v6229_v34, %v1677_v9 }
 0x979   :  { %v4948_v20 = vpop.permute.xlu2 %4947  ;;  %v1526_v26 = vpop.xlane.xlu1 %1525 }
 0x97a   :  { %v4949_v28 = vunpack.i.l.bf16 %v4948_v20  ;;  %v1556_v33 = vsub.f32 %v6150_v61, %v1526_v26  ;;  %v4950_v29 = vunpack.i.h.bf16 %v4948_v20  ;;  %v1683_v26 = vand.u32 2147483647, %v6220_v11 }
 0x97c   :  { %v6231_v50 = vpop.eup %5137  ;;  %v1580_v44 = vmul.f32 1.442695, %v1556_v33  ;;  %1942 = vmatpush.msrb.mxu2 %v4949_v28  ;;  %v1682_v28 = vsel %vm1681_vm7, %v6229_v34, %v1678_v1  ;;  %vm1684_vm11 = vcmp.eq.f32.partialorder %v1683_v26, 8.507059e+37 }
 0x97d   :  { %v1617_v61 = vsel %vm1499_vm10, %v6231_v50, 0.0 }
 0x97e   :  { %5139 = vpow2.f32 %v1580_v44  ;;  %1943 = vmatpush.msrb.mxu2 %v4950_v29  ;;  %1618 = vadd.xlane.f32.xlu2 %v1617_v61  ;;  %v1687_v29 = vsel %vm1684_vm11, %v1686_v4, %v1682_v28 }
 0x97f   :  { %v1688_v41 = vmul.f32 %v6133_v49, %v1687_v29 }
 0x980   :  { %1944 = vmatpush.msrb.mxu2 %v4954_v48 }
 0x981   :  { %v1529_v15 = vpop.xlane.xlu0 %1528  ;;  %v1607_v42 = vpop.xlane.xlu1 %1606 }
 0x982   :  { %v1557_v40 = vsub.f32 %v6159_v24, %v1529_v15  ;;  %5141 = vrcp.f32 %v1607_v42  ;;  %1945 = vmatpush.msrb.mxu2 %v4955_v23  ;;  %v1700_v35 = vand.u32 2147483648, %v1607_v42  ;;  %vm1694_vm13 = vweird.f32 %v1607_v42 }
 0x983   :  { %v1698_v11 = vand.u32 2147483647, %v1607_v42 }
 0x984   :  { %v6252_v45 = vpop.eup %5139  ;;  %v1582_v53 = vmul.f32 1.442695, %v1557_v40  ;;  %1946 = vmatpush.msrb.mxu2 %v6079_v17  ;;  %v1667_v17 = vsel %vm1666_vm3, %v6223_v5, %v1663_v58  ;;  %v1701_v36 = vor.u32 1.1754944e-38, %v1700_v35 }
 0x985   :  { %v1620_v24 = vsel %vm1499_vm10, %v6252_v45, 0.0  ;;  %v1672_v54 = vsel %vm1669_vm4, %v1671_v16, %v1667_v17  ;;  %vm1699_vm1 = vcmp.eq.f32.partialorder %v1698_v11, 8.507059e+37 }
 0x986   :  { %5143 = vpow2.f32 %v1582_v53  ;;  %1947 = vmatpush.msrb.mxu2 %v6077_v27  ;;  %1546 = vmax.xlane.f32.xlu2 %v1545_v63  ;;  %v1673_v5 = vmul.f32 %v6129_v56, %v1672_v54 }
 0x987   :  { %1621 = vadd.xlane.f32.xlu1 %v1620_v24  ;;  %4749 = vmatmul.msk.f32.vlgmr.msrb.gmra.mxu2 %vm1499_vm10, %v1658_v3 }
 0x988   :  { %v5142_v10 = vpop.eup %5141 }
 0x989   :  { %v1690_v19 = vmul.f32 %v5142_v10, %v1607_v42  ;;  %vm1695_vm12 = vweird.f32 %v5142_v10 }
 0x98a   :  { %vm1696_vm15 = vmor %vm1694_vm13, %vm1695_vm12 }
 0x98b   :  { %v1691_v18 = vsub.f32 1.0, %v1690_v19 }
 0x98c   :  { %v6269_v27 = vpop.eup %5143 }
 0x98d   :  { %v1623_v20 = vsel %vm1499_vm10, %v6269_v27, 0.0  ;;  %v1692_v33 = vmul.f32 %v5142_v10, %v1691_v18 }
 0x98e   :  { %1624 = vadd.xlane.f32.xlu0 %v1623_v20 }
 0x98f   :  { %4750 = vmatmul.msk.f32.gmra.mxu2 %vm1499_vm10, %v1673_v5  ;;  %v1693_v44 = vadd.f32 %v5142_v10, %v1692_v33 }
 0x991   :  { %v1535_v37 = vpop.xlane.xlu1 %1534  ;;  %v1697_v34 = vsel %vm1696_vm15, %v5142_v10, %v1693_v44 }
 0x992   :  { %v1559_v13 = vsub.f32 %v6170_v21, %v1535_v37  ;;  %v1702_v61 = vsel %vm1699_vm1, %v1701_v36, %v1697_v34 }
 0x993   :  { %v1703_v48 = vmul.f32 %v6157_v32, %v1702_v61 }
 0x994   :  { %v1586_v56 = vmul.f32 1.442695, %v1559_v13 }
 0x996   :  { %5145 = vpow2.f32 %v1586_v56 }
 0x997   :  { %4751 = vmatmul.msk.f32.gmra.mxu2 %vm1499_vm10, %v1688_v41 }
 0x99c   :  { %v6282_v47 = vpop.eup %5145 }
 0x99d   :  { %v1629_v21 = vsel %vm1499_vm10, %v6282_v47, 0.0 }
 0x99e   :  { %1630 = vadd.xlane.f32.xlu2 %v1629_v21 }
 0x99f   :  { %4752 = vmatmul.msk.f32.gmra.mxu2 %vm1499_vm10, %v1703_v48 }
 0x9a9   :  { %v1610_v49 = vpop.xlane.xlu1 %1609 }
 0x9aa   :  { %5147 = vrcp.f32 %v1610_v49  ;;  %v1715_v42 = vand.u32 2147483648, %v1610_v49  ;;  %v1713_v31 = vand.u32 2147483647, %v1610_v49  ;;  %vm1709_vm3 = vweird.f32 %v1610_v49 }
 0x9ac   :  { %v1716_v53 = vor.u32 1.1754944e-38, %v1715_v42  ;;  %vm1714_vm5 = vcmp.eq.f32.partialorder %v1713_v31, 8.507059e+37 }
 0x9b0   :  { %v5148_v46 = vpop.eup %5147 }
 0x9b1   :  { %v1705_v0 = vmul.f32 %v5148_v46, %v1610_v49  ;;  %v1613_v25 = vpop.xlane.xlu1 %1612  ;;  %vm1710_vm2 = vweird.f32 %v5148_v46 }
 0x9b2   :  { %5149 = vrcp.f32 %v1613_v25  ;;  %v1532_v52 = vpop.xlane.xlu2 %1531  ;;  %vm1711_vm4 = vmor %vm1709_vm3, %vm1710_vm2  ;;  %v1730_v16 = vand.u32 2147483648, %v1613_v25  ;;  %v1728_v18 = vand.u32 2147483647, %v1613_v25  ;;  %vm1724_vm7 = vweird.f32 %v1613_v25 }
 0x9b3   :  { %v1706_v23 = vsub.f32 1.0, %v1705_v0  ;;  %v1558_v15 = vsub.f32 %v6183_v62, %v1532_v52 }
 0x9b4   :  { %v1731_v20 = vor.u32 1.1754944e-38, %v1730_v16  ;;  %vm1729_vm12 = vcmp.eq.f32.partialorder %v1728_v18, 8.507059e+37 }
 0x9b5   :  { %v1584_v40 = vmul.f32 1.442695, %v1558_v15  ;;  %v1707_v55 = vmul.f32 %v5148_v46, %v1706_v23 }
 0x9b7   :  { %5151 = vpow2.f32 %v1584_v40  ;;  %v1708_v32 = vadd.f32 %v5148_v46, %v1707_v55 }
 0x9b8   :  { %v5150_v58 = vpop.eup %5149 }
 0x9b9   :  { %v1720_v63 = vmul.f32 %v5150_v58, %v1613_v25  ;;  %v1616_v57 = vpop.xlane.xlu0 %1615  ;;  %v1538_v24 = vpop.xlane.xlu1 %1537  ;;  %v1712_v3 = vsel %vm1711_vm4, %v5148_v46, %v1708_v32  ;;  %vm1725_vm6 = vweird.f32 %v5150_v58 }
 0x9ba   :  { %5153 = vrcp.f32 %v1616_v57  ;;  %v1560_v7 = vsub.f32 %v6195_v51, %v1538_v24  ;;  %v1717_v62 = vsel %vm1714_vm5, %v1716_v53, %v1712_v3  ;;  %vm1726_vm11 = vmor %vm1724_vm7, %vm1725_vm6  ;;  %v1745_v41 = vand.u32 2147483648, %v1616_v57 }
 0x9bb   :  { %v1721_v17 = vsub.f32 1.0, %v1720_v63  ;;  %v1718_v9 = vmul.f32 %v6176_v59, %v1717_v62  ;;  %v1743_v36 = vand.u32 2147483647, %v1616_v57  ;;  %vm1739_vm15 = vweird.f32 %v1616_v57 }
 0x9bc   :  { %v1588_v10 = vmul.f32 1.442695, %v1560_v7 }
 0x9bd   :  { %v6291_v19 = vpop.eup %5151  ;;  %4753 = vmatmul.msk.f32.gmra.mxu2 %vm1499_vm10, %v1718_v9  ;;  %v1722_v54 = vmul.f32 %v5150_v58, %v1721_v17  ;;  %vm1744_vm2 = vcmp.eq.f32.partialorder %v1743_v36, 8.507059e+37 }
 0x9be   :  { %5155 = vpow2.f32 %v1588_v10  ;;  %v1626_v1 = vsel %vm1499_vm10, %v6291_v19, 0.0 }
 0x9bf   :  { %1627 = vadd.xlane.f32.xlu1 %v1626_v1  ;;  %v1723_v22 = vadd.f32 %v5150_v58, %v1722_v54 }
 0x9c0   :  { %v5154_v51 = vpop.eup %5153 }
 0x9c1   :  { %v1735_v59 = vmul.f32 %v5154_v51, %v1616_v57  ;;  %v1544_v5 = vpop.xlane.xlu0 %1543  ;;  %v1541_v26 = vpop.xlane.xlu1 %1540  ;;  %v1727_v28 = vsel %vm1726_vm11, %v5150_v58, %v1723_v22  ;;  %vm1740_vm13 = vweird.f32 %v5154_v51 }
 0x9c2   :  { %v1562_v33 = vsub.f32 %v6211_v39, %v1544_v5  ;;  %v1561_v4 = vsub.f32 %v6209_v8, %v1541_v26  ;;  %v1732_v37 = vsel %vm1729_vm12, %v1731_v20, %v1727_v28  ;;  %vm1741_vm1 = vmor %vm1739_vm15, %vm1740_vm13 }
 0x9c3   :  { %v1736_v13 = vsub.f32 1.0, %v1735_v59  ;;  %v1733_v29 = vmul.f32 %v6186_v30, %v1732_v37  ;;  %v1746_v30 = vor.u32 1.1754944e-38, %v1745_v41 }
 0x9c4   :  { %v6299_v44 = vpop.eup %5155  ;;  %v1592_v56 = vmul.f32 1.442695, %v1562_v33  ;;  %v1590_v35 = vmul.f32 1.442695, %v1561_v4 }
 0x9c5   :  { %4754 = vmatmul.msk.f32.gmra.mxu2 %vm1499_vm10, %v1733_v29  ;;  %v1632_v11 = vsel %vm1499_vm10, %v6299_v44, 0.0  ;;  %v1737_v34 = vmul.f32 %v5154_v51, %v1736_v13 }
 0x9c6   :  { %5157 = vpow2.f32 %v1592_v56  ;;  %1633 = vadd.xlane.f32.xlu0 %v1632_v11 }
 0x9c7   :  { %5159 = vpow2.f32 %v1590_v35  ;;  %v1738_v8 = vadd.f32 %v5154_v51, %v1737_v34 }
 0x9c9   :  { %v1742_v39 = vsel %vm1741_vm1, %v5154_v51, %v1738_v8 }
 0x9ca   :  { %v1747_v61 = vsel %vm1744_vm2, %v1746_v30, %v1742_v39 }
 0x9cb   :  { %v1748_v21 = vmul.f32 %v6197_v43, %v1747_v61 }
 0x9cc   :  { %v6305_v48 = vpop.eup %5157 }
 0x9cd   :  { %v6307_v49 = vpop.eup %5159  ;;  %4755 = vmatmul.msk.f32.gmra.mxu2 %vm1499_vm10, %v1748_v21  ;;  %v1638_v46 = vsel %vm1499_vm10, %v6305_v48, 0.0 }
 0x9ce   :  { %1639 = vadd.xlane.f32.xlu2 %v1638_v46  ;;  %v1635_v0 = vsel %vm1499_vm10, %v6307_v49, 0.0 }
 0x9cf   :  { %1636 = vadd.xlane.f32.xlu1 %v1635_v0 }
 0x9f1   :  { %v1619_v25 = vpop.xlane.xlu2 %1618 }
 0x9f2   :  { %5161 = vrcp.f32 %v1619_v25  ;;  %v1760_v31 = vand.u32 2147483648, %v1619_v25  ;;  %v1758_v58 = vand.u32 2147483647, %v1619_v25  ;;  %vm1754_vm4 = vweird.f32 %v1619_v25 }
 0x9f4   :  { %v1761_v63 = vor.u32 1.1754944e-38, %v1760_v31  ;;  %vm1759_vm6 = vcmp.eq.f32.partialorder %v1758_v58, 8.507059e+37 }
 0x9f8   :  { %v5162_v52 = vpop.eup %5161 }
 0x9f9   :  { %v1750_v23 = vmul.f32 %v5162_v52, %v1619_v25  ;;  %v1547_v15 = vpop.xlane.xlu2 %1546  ;;  %vm1755_vm3 = vweird.f32 %v5162_v52 }
 0x9fa   :  { %v1563_v43 = vsub.f32 %v6247_v38, %v1547_v15  ;;  %v1622_v42 = vpop.xlane.xlu1 %1621  ;;  %vm1756_vm5 = vmor %vm1754_vm4, %vm1755_vm3 }
 0x9fb   :  { %v1751_v40 = vsub.f32 1.0, %v1750_v23  ;;  %5163 = vrcp.f32 %v1622_v42  ;;  %v1775_v16 = vand.u32 2147483648, %v1622_v42  ;;  %v1773_v18 = vand.u32 2147483647, %v1622_v42 }
 0x9fc   :  { %v1594_v55 = vmul.f32 1.442695, %v1563_v43  ;;  %vm1769_vm11 = vweird.f32 %v1622_v42 }
 0x9fd   :  { %v1752_v32 = vmul.f32 %v5162_v52, %v1751_v40  ;;  %v1776_v20 = vor.u32 1.1754944e-38, %v1775_v16  ;;  %vm1774_vm13 = vcmp.eq.f32.partialorder %v1773_v18, 8.507059e+37 }
 0x9fe   :  { %5165 = vpow2.f32 %v1594_v55 }
 0x9ff   :  { %v1753_v53 = vadd.f32 %v5162_v52, %v1752_v32 }
 0xa01   :  { %v5164_v57 = vpop.eup %5163  ;;  %v1625_v24 = vpop.xlane.xlu0 %1624  ;;  %v1757_v3 = vsel %vm1756_vm5, %v5162_v52, %v1753_v53 }
 0xa02   :  { %v1765_v7 = vmul.f32 %v5164_v57, %v1622_v42  ;;  %5167 = vrcp.f32 %v1625_v24  ;;  %v1762_v38 = vsel %vm1759_vm6, %v1761_v63, %v1757_v3  ;;  %vm1770_vm7 = vweird.f32 %v5164_v57 }
 0xa03   :  { %v1763_v62 = vmul.f32 %v6231_v50, %v1762_v38  ;;  %vm1771_vm12 = vmor %vm1769_vm11, %vm1770_vm7  ;;  %v1790_v28 = vand.u32 2147483648, %v1625_v24  ;;  %v1788_v4 = vand.u32 2147483647, %v1625_v24  ;;  %vm1784_vm1 = vweird.f32 %v1625_v24 }
 0xa04   :  { %v6316_v17 = vpop.eup %5165  ;;  %v1766_v9 = vsub.f32 1.0, %v1765_v7 }
 0xa05   :  { %4756 = vmatmul.msk.f32.gmra.mxu2 %vm1499_vm10, %v1763_v62  ;;  %v1641_v10 = vsel %vm1499_vm10, %v6316_v17, 0.0  ;;  %v1791_v13 = vor.u32 1.1754944e-38, %v1790_v28  ;;  %vm1789_vm3 = vcmp.eq.f32.partialorder %v1788_v4, 8.507059e+37 }
 0xa06   :  { %1642 = vadd.xlane.f32.xlu0 %v1641_v10  ;;  %v1767_v54 = vmul.f32 %v5164_v57, %v1766_v9 }
 0xa08   :  { %v5168_v1 = vpop.eup %5167  ;;  %v1768_v22 = vadd.f32 %v5164_v57, %v1767_v54 }
 0xa09   :  { %v1780_v51 = vmul.f32 %v5168_v1, %v1625_v24  ;;  %vm1785_vm15 = vweird.f32 %v5168_v1 }
 0xa0a   :  { %v1772_v50 = vsel %vm1771_vm12, %v5164_v57, %v1768_v22  ;;  %vm1786_vm2 = vmor %vm1784_vm1, %vm1785_vm15  ;;  %v6325_v41 = vpop.f32.mrf.mxu2 }
 0xa0b   :  { %v1781_v59 = vsub.f32 1.0, %v1780_v51  ;;  %v1777_v5 = vsel %vm1774_vm13, %v1776_v20, %v1772_v50 }
 0xa0c   :  { %v1778_v26 = vmul.f32 %v6252_v45, %v1777_v5 }
 0xa0d   :  { %v1782_v33 = vmul.f32 %v5168_v1, %v1781_v59 }
 0xa0e   :  { %4757 = vmatmul.msk.f32.gmra.mxu2 %vm1499_vm10, %v1778_v26 }
 0xa0f   :  { %v1783_v37 = vadd.f32 %v5168_v1, %v1782_v33 }
 0xa11   :  { %v1787_v29 = vsel %vm1786_vm2, %v5168_v1, %v1783_v37  ;;  %v1631_v11 = vpop.xlane.xlu2 %1630 }
 0xa12   :  { %v1792_v56 = vsel %vm1789_vm3, %v1791_v13, %v1787_v29  ;;  %v6327_v45 = vpop.f32.mrf.mxu2  ;;  %5169 = vrcp.f32 %v1631_v11  ;;  %v1820_v3 = vand.u32 2147483648, %v1631_v11  ;;  %vm1814_vm12 = vweird.f32 %v1631_v11 }
 0xa13   :  { %v1793_v35 = vmul.f32 %v6269_v27, %v1792_v56  ;;  %v1818_v38 = vand.u32 2147483647, %v1631_v11 }
 0xa14   :  { %v1821_v10 = vor.u32 1.1754944e-38, %v1820_v3 }
 0xa15   :  { %vm1819_vm15 = vcmp.eq.f32.partialorder %v1818_v38, 8.507059e+37 }
 0xa16   :  { %4758 = vmatmul.msk.f32.gmra.mxu2 %vm1499_vm10, %v1793_v35 }
 0xa18   :  { %v5170_v8 = vpop.eup %5169 }
 0xa19   :  { %v1810_v30 = vmul.f32 %v5170_v8, %v1631_v11  ;;  %vm1815_vm11 = vweird.f32 %v5170_v8 }
 0xa1a   :  { %v6329_v34 = vpop.f32.mrf.mxu2  ;;  %vm1816_vm13 = vmor %vm1814_vm12, %vm1815_vm11 }
 0xa1b   :  { %v1811_v46 = vsub.f32 1.0, %v1810_v30 }
 0xa1d   :  { %v1812_v15 = vmul.f32 %v5170_v8, %v1811_v46 }
 0xa1f   :  { %v1813_v63 = vadd.f32 %v5170_v8, %v1812_v15 }
 0xa21   :  { %v1817_v62 = vsel %vm1816_vm13, %v5170_v8, %v1813_v63 }
 0xa22   :  { %v6331_v39 = vpop.f32.mrf.mxu2  ;;  %v1822_v18 = vsel %vm1819_vm15, %v1821_v10, %v1817_v62  ;;  %v1321_v10 = vld [vmem:[#allocation4 + $0x178] sm:$0xff] }
 0xa23   :  { %v1823_v50 = vmul.f32 %v6282_v47, %v1822_v18  ;;  %v1319_v18 = vld [vmem:[#allocation4 + $0x38] sm:$0xff] }
 0xa32   :  { %v1628_v36 = vpop.xlane.xlu1 %1627 }
 0xa33   :  { %5171 = vrcp.f32 %v1628_v36  ;;  %v1805_v25 = vand.u32 2147483648, %v1628_v36  ;;  %v1803_v23 = vand.u32 2147483647, %v1628_v36  ;;  %vm1799_vm5 = vweird.f32 %v1628_v36 }
 0xa35   :  { %v1806_v31 = vor.u32 1.1754944e-38, %v1805_v25  ;;  %vm1804_vm7 = vcmp.eq.f32.partialorder %v1803_v23, 8.507059e+37 }
 0xa39   :  { %v5172_v61 = vpop.eup %5171  ;;  %v1634_v21 = vpop.xlane.xlu0 %1633 }
 0xa3a   :  { %v1795_v27 = vmul.f32 %v5172_v61, %v1628_v36  ;;  %5173 = vrcp.f32 %v1634_v21  ;;  %vm1800_vm4 = vweird.f32 %v5172_v61  ;;  %v1835_v51 = vand.u32 2147483648, %v1634_v21 }
 0xa3b   :  { %vm1801_vm6 = vmor %vm1799_vm5, %vm1800_vm4  ;;  %vm1829_vm2 = vweird.f32 %v1634_v21  ;;  %v1833_v59 = vand.u32 2147483647, %v1634_v21 }
 0xa3c   :  { %v1796_v0 = vsub.f32 1.0, %v1795_v27  ;;  %v1836_v33 = vor.u32 1.1754944e-38, %v1835_v51 }
 0xa3d   :  { %vm1834_vm4 = vcmp.eq.f32.partialorder %v1833_v59, 8.507059e+37 }
 0xa3e   :  { %v1797_v52 = vmul.f32 %v5172_v61, %v1796_v0 }
 0xa40   :  { %v5174_v43 = vpop.eup %5173  ;;  %v1961_v42 = vpop.f32.mrf.mxu2  ;;  %v1798_v40 = vadd.f32 %v5172_v61, %v1797_v52 }
 0xa41   :  { %v1825_v55 = vmul.f32 %v5174_v43, %v1634_v21  ;;  %2001 = vrot.lane.b32.xlu1 %v1961_v42, %s5476_s14  ;;  %v6334_v32 = vpop.xlane.xlu2 %1639  ;;  %vm1830_vm1 = vweird.f32 %v5174_v43 }
 0xa42   :  { %v1637_v58 = vpop.xlane.xlu1 %1636  ;;  %v1802_v53 = vsel %vm1801_vm6, %v5172_v61, %v1798_v40  ;;  %vm1831_vm3 = vmor %vm1829_vm2, %vm1830_vm1  ;;  %v1865_v21 = vand.u32 2147483648, %v6334_v32  ;;  %vm1859_vm13 = vweird.f32 %v6334_v32 }
 0xa43   :  { %v1826_v57 = vsub.f32 1.0, %v1825_v55  ;;  %5175 = vrcp.f32 %v1637_v58  ;;  %v1807_v24 = vsel %vm1804_vm7, %v1806_v31, %v1802_v53  ;;  %v1850_v56 = vand.u32 2147483648, %v1637_v58 }
 0xa44   :  { %v1808_v7 = vmul.f32 %v6291_v19, %v1807_v24  ;;  %5177 = vrcp.f32 %v6334_v32  ;;  %vm1844_vm6 = vweird.f32 %v1637_v58  ;;  %v1848_v35 = vand.u32 2147483647, %v1637_v58 }
 0xa45   :  { %v1827_v9 = vmul.f32 %v5174_v43, %v1826_v57  ;;  %v1851_v8 = vor.u32 1.1754944e-38, %v1850_v56  ;;  %v1866_v0 = vor.u32 1.1754944e-38, %v1865_v21 }
 0xa46   :  { %4759 = vmatmul.msk.f32.gmra.mxu2 %vm1499_vm10, %v1808_v7  ;;  %vm1849_vm11 = vcmp.eq.f32.partialorder %v1848_v35, 8.507059e+37 }
 0xa47   :  { %v1828_v22 = vadd.f32 %v5174_v43, %v1827_v9  ;;  %v1322_v9 = vld [vmem:[#allocation4 + $0x218] sm:$0xff] }
 0xa48   :  { %v1964_v16 = vpop.f32.mrf.mxu2  ;;  %2082 = vmatpush.msrb.mxu0 %v1322_v9 }
 0xa49   :  { %v5176_v54 = vpop.eup %5175  ;;  %2003 = vrot.lane.b32.xlu1 %v1964_v16, %s5476_s14  ;;  %v1832_v26 = vsel %vm1831_vm3, %v5174_v43, %v1828_v22  ;;  %v1320_v16 = vld [vmem:[#allocation4 + $0xd8] sm:$0xff] }
 0xa4a   :  { %v1840_v1 = vmul.f32 %v5176_v54, %v1637_v58  ;;  %v5178_v19 = vpop.eup %5177  ;;  %v1837_v37 = vsel %vm1834_vm4, %v1836_v33, %v1832_v26  ;;  %vm1845_vm5 = vweird.f32 %v5176_v54  ;;  %2083 = vmatpush.msrb.mxu0 %v1321_v10 }
 0xa4b   :  { %v1855_v5 = vmul.f32 %v5178_v19, %v6334_v32  ;;  %v1838_v47 = vmul.f32 %v6299_v44, %v1837_v37  ;;  %vm1846_vm7 = vmor %vm1844_vm6, %vm1845_vm5  ;;  %vm1860_vm12 = vweird.f32 %v5178_v19  ;;  %v1863_v44 = vand.u32 2147483647, %v6334_v32 }
 0xa4c   :  { %v1841_v20 = vsub.f32 1.0, %v1840_v1  ;;  %vm1861_vm15 = vmor %vm1859_vm13, %vm1860_vm12  ;;  %2084 = vmatpush.msrb.mxu0 %v1320_v16 }
 0xa4d   :  { %v1856_v13 = vsub.f32 1.0, %v1855_v5  ;;  %vm1864_vm1 = vcmp.eq.f32.partialorder %v1863_v44, 8.507059e+37 }
 0xa4e   :  { %4760 = vmatmul.msk.f32.gmra.mxu2 %vm1499_vm10, %v1823_v50  ;;  %v1842_v28 = vmul.f32 %v5176_v54, %v1841_v20  ;;  %2085 = vmatpush.msrb.mxu0 %v1319_v18  ;;  %v2205_v18 = vld [vmem:[#allocation4 + $0x180] sm:$0xff] }
 0xa4f   :  { %v1857_v11 = vmul.f32 %v5178_v19, %v1856_v13 }
 0xa50   :  { %v1967_v4 = vpop.f32.mrf.mxu2  ;;  %v1843_v29 = vadd.f32 %v5176_v54, %v1842_v28 }
 0xa51   :  { %2005 = vrot.lane.b32.xlu1 %v1967_v4, %s5476_s14  ;;  %v1858_v61 = vadd.f32 %v5178_v19, %v1857_v11 }
 0xa52   :  { %v1847_v36 = vsel %vm1846_vm7, %v5176_v54, %v1843_v29 }
 0xa53   :  { %v1852_v30 = vsel %vm1849_vm11, %v1851_v8, %v1847_v36  ;;  %v1862_v27 = vsel %vm1861_vm15, %v5178_v19, %v1858_v61 }
 0xa54   :  { %v1853_v46 = vmul.f32 %v6307_v49, %v1852_v30  ;;  %v1867_v25 = vsel %vm1864_vm1, %v1866_v0, %v1862_v27 }
 0xa55   :  { %v1868_v52 = vmul.f32 %v6305_v48, %v1867_v25 }
 0xa56   :  { %4761 = vmatmul.msk.f32.gmra.mxu2 %vm1499_vm10, %v1838_v47 }
 0xa5e   :  { %4762 = vmatmul.msk.f32.gmra.mxu2 %vm1499_vm10, %v1853_v46 }
 0xa66   :  { %4763 = vmatmul.msk.f32.gmra.mxu2 %vm1499_vm10, %v1868_v52 }
 0xa79   :  { %v1643_v23 = vpop.xlane.xlu0 %1642 }
 0xa7a   :  { %5179 = vrcp.f32 %v1643_v23  ;;  %v1880_v40 = vand.u32 2147483648, %v1643_v23  ;;  %v1878_v55 = vand.u32 2147483647, %v1643_v23  ;;  %vm1874_vm3 = vweird.f32 %v1643_v23 }
 0xa7c   :  { %v1881_v32 = vor.u32 1.1754944e-38, %v1880_v40  ;;  %vm1879_vm5 = vcmp.eq.f32.partialorder %v1878_v55, 8.507059e+37 }
 0xa80   :  { %v5180_v15 = vpop.eup %5179 }
 0xa81   :  { %v1870_v43 = vmul.f32 %v5180_v15, %v1643_v23  ;;  %vm1875_vm2 = vweird.f32 %v5180_v15 }
 0xa82   :  { %vm1876_vm4 = vmor %vm1874_vm3, %vm1875_vm2 }
 0xa83   :  { %v1871_v42 = vsub.f32 1.0, %v1870_v43 }
 0xa85   :  { %v1872_v49 = vmul.f32 %v5180_v15, %v1871_v42 }
 0xa87   :  { %v1873_v31 = vadd.f32 %v5180_v15, %v1872_v49 }
 0xa88   :  { %v1970_v58 = vpop.f32.mrf.mxu2 }
 0xa89   :  { %2007 = vrot.lane.b32.xlu1 %v1970_v58, %s5476_s14  ;;  %v1877_v53 = vsel %vm1876_vm4, %v5180_v15, %v1873_v31 }
 0xa8a   :  { %v1882_v48 = vsel %vm1879_vm5, %v1881_v32, %v1877_v53 }
 0xa8b   :  { %v1883_v63 = vmul.f32 %v6316_v17, %v1882_v48 }
 0xa8d   :  { %4764 = vmatmul.msk.f32.gmra.mxu2 %vm1499_vm10, %v1883_v63 }
 0xa91   :  { %v1973_v57 = vpop.f32.mrf.mxu2 }
 0xa92   :  { %2017 = vrot.lane.b32.xlu2 %v1973_v57, %s5479_s19 }
 0xa99   :  { %v1976_v24 = vpop.f32.mrf.mxu2 }
 0xa9a   :  { %2019 = vrot.lane.b32.xlu2 %v1976_v24, %s5479_s19 }
 0xab3   :  { %v2002_v1 = vpop.permute.xlu1 %2001 }
 0xab4   :  { %v2045_v19 = vsel %vm449_vm14, %v6325_v41, %v2002_v1  ;;  %v2204_v1 = vld [vmem:[#allocation4 + $0xe0] sm:$0xff] }
 0xabb   :  { %v2004_v59 = vpop.permute.xlu1 %2003 }
 0xabc   :  { %v2046_v26 = vsel %vm449_vm14, %v6327_v45, %v2004_v59 }
 0xac3   :  { %v2006_v41 = vpop.permute.xlu1 %2005 }
 0xac4   :  { %v2047_v13 = vsel %vm449_vm14, %v6329_v34, %v2006_v41  ;;  %v5012_v34 = vld [vmem:[%s7435_s5 + $0xb] ss:$0 sm:$0xff] }
 0xac9   :  { %v1979_v3 = vpop.f32.mrf.mxu2 }
 0xaca   :  { %2021 = vrot.lane.b32.xlu2 %v1979_v3, %s5479_s19 }
 0xad1   :  { %v1982_v7 = vpop.f32.mrf.mxu2 }
 0xad2   :  { %2023 = vrot.lane.b32.xlu2 %v1982_v7, %s5479_s19 }
 0xad9   :  { %v1985_v38 = vpop.f32.mrf.mxu2 }
 0xada   :  { %2033 = vrot.lane.b32.xlu0 %v1985_v38, %s5484_s6 }
 0xae1   :  { %v1988_v62 = vpop.f32.mrf.mxu2 }
 0xae2   :  { %2035 = vrot.lane.b32.xlu0 %v1988_v62, %s5484_s6  ;;  %v2206_v62 = vld [vmem:[#allocation4 + $0x220] sm:$0xff] }
 0xae3   :  { %2233 = vmatpush.msrb.mxu3 %v2206_v62 }
 0xae5   :  { %2234 = vmatpush.msrb.mxu3 %v2205_v18  ;;  %v2292_v18 = vld [vmem:[#allocation6 + $0x60] sm:$0xff] }
 0xae7   :  { %2235 = vmatpush.msrb.mxu3 %v2204_v1  ;;  %v2291_v1 = vld [vmem:[#allocation6 + $0x50] sm:$0xff] }
 0xae9   :  { %v1991_v17 = vpop.f32.mrf.mxu2 }
 0xaea   :  { %2037 = vrot.lane.b32.xlu0 %v1991_v17, %s5484_s6 }
 0xaec   :  { %v2018_v22 = vpop.permute.xlu2 %2017 }
 0xaed   :  { %v2049_v51 = vsel %vm1048_vm8, %v2045_v19, %v2018_v22  ;;  %v2203_v22 = vld [vmem:[#allocation4 + $0x40] sm:$0xff] }
 0xaee   :  { %2236 = vmatpush.msrb.mxu3 %v2203_v22  ;;  %v2290_v22 = vld [vmem:[#allocation6 + $0x40] sm:$0xff] }
 0xaf4   :  { %v2020_v5 = vpop.permute.xlu2 %2019 }
 0xaf5   :  { %v2050_v28 = vsel %vm1048_vm8, %v2046_v26, %v2020_v5 }
 0xafb   :  { %v2008_v45 = vpop.permute.xlu1 %2007 }
 0xafc   :  { %v2048_v11 = vsel %vm449_vm14, %v6331_v39, %v2008_v45 }
 0xb10   :  { %v1994_v54 = vpop.f32.mrf.mxu2 }
 0xb11   :  { %2039 = vrot.lane.b32.xlu0 %v1994_v54, %s5484_s6 }
 0xb24   :  { %v2022_v37 = vpop.permute.xlu2 %2021 }
 0xb25   :  { %v2051_v29 = vsel %vm1048_vm8, %v2047_v13, %v2022_v37 }
 0xb2c   :  { %v2024_v35 = vpop.permute.xlu2 %2023 }
 0xb2d   :  { %v2052_v36 = vsel %vm1048_vm8, %v2048_v11, %v2024_v35  ;;  %v5013_v35 = vld [vmem:[%s7435_s5 + $0xc] ss:$0 sm:$0xff] }
 0xb4c   :  { %v2034_v20 = vpop.permute.xlu0 %2033 }
 0xb4d   :  { %v2053_v50 = vsel %vm1053_vm9, %v2049_v51, %v2034_v20 }
 0xb4e   :  { %4765 = vmatmul.msk.f32.vlgmr.msrb.gmra.mxu0 %vm113_vm0, %v2053_v50 }
 0xb54   :  { %v2036_v33 = vpop.permute.xlu0 %2035 }
 0xb55   :  { %v2054_v4 = vsel %vm1053_vm9, %v2050_v28, %v2036_v33 }
 0xb56   :  { %4766 = vmatmul.msk.f32.gmra.mxu0 %vm113_vm0, %v2054_v4 }
 0xb5c   :  { %v2038_v56 = vpop.permute.xlu0 %2037 }
 0xb5d   :  { %v2055_v47 = vsel %vm1053_vm9, %v2051_v29, %v2038_v56 }
 0xb5e   :  { %4767 = vmatmul.msk.f32.gmra.mxu0 %vm113_vm0, %v2055_v47 }
 0xb83   :  { %v2040_v8 = vpop.permute.xlu0 %2039 }
 0xb84   :  { %v2056_v30 = vsel %vm1053_vm9, %v2052_v36, %v2040_v8 }
 0xb85   :  { %4768 = vmatmul.msk.f32.gmra.mxu0 %vm113_vm0, %v2056_v30  ;;  %v5014_v30 = vld [vmem:[%s7435_s5 + $0xd] ss:$0 sm:$0xff] }
 0xbcb   :  { %v2087_v61 = vpop.f32.mrf.mxu0 }
 0xbcc   :  { %v2088_v21 = vadd.f32 %v5012_v34, %v2087_v61 }
 0xbce   :  { %v6388_v46 = vadd.f32 %v2088_v21, %v5939_v60 }
 0xbd0   :  { %v2105_v44 = vsel %vm113_vm0, %v6388_v46, 0.0 }
 0xbd1   :  { %2106 = vadd.xlane.f32.xlu1 %v2105_v44 }
 0xbd3   :  { %v2090_v39 = vpop.f32.mrf.mxu0 }
 0xbd4   :  { %v2091_v27 = vadd.f32 %v5012_v34, %v2090_v39 }
 0xbd6   :  { %v6393_v0 = vadd.f32 %v2091_v27, %v5943_v2 }
 0xbd8   :  { %v2108_v25 = vsel %vm113_vm0, %v6393_v0, 0.0 }
 0xbd9   :  { %2109 = vadd.xlane.f32.xlu2 %v2108_v25 }
 0xbdb   :  { %v2093_v52 = vpop.f32.mrf.mxu0 }
 0xbdc   :  { %v2094_v23 = vadd.f32 %v5012_v34, %v2093_v52 }
 0xbde   :  { %v6398_v15 = vadd.f32 %v2094_v23, %v5947_v6 }
 0xbe0   :  { %v2111_v60 = vsel %vm113_vm0, %v6398_v15, 0.0 }
 0xbe1   :  { %2112 = vadd.xlane.f32.xlu0 %v2111_v60 }
 0xc02   :  { %v2096_v43 = vpop.f32.mrf.mxu0 }
 0xc03   :  { %v2097_v42 = vadd.f32 %v5012_v34, %v2096_v43 }
 0xc05   :  { %v6403_v40 = vadd.f32 %v2097_v42, %v5958_v12 }
 0xc07   :  { %v2114_v2 = vsel %vm113_vm0, %v6403_v40, 0.0 }
 0xc08   :  { %2115 = vadd.xlane.f32.xlu2 %v2114_v2 }
 0xc44   :  { %v2107_v49 = vpop.xlane.xlu1 %2106 }
 0xc45   :  { %v2117_v55 = vmul.f32 %v2107_v49, %v5540_v14 }
 0xc47   :  { %v2121_v31 = vsub.f32 %v6388_v46, %v2117_v55 }
 0xc49   :  { %v2125_v6 = vmul.f32 %v2121_v31, %v2121_v31 }
 0xc4b   :  { %v2129_v32 = vsel %vm113_vm0, %v2125_v6, 0.0 }
 0xc4c   :  { %v2110_v58 = vpop.xlane.xlu2 %2109  ;;  %2130 = vadd.xlane.f32.xlu1 %v2129_v32 }
 0xc4d   :  { %v2118_v53 = vmul.f32 %v2110_v58, %v5540_v14 }
 0xc4f   :  { %v6412_v48 = vsub.f32 %v6393_v0, %v2118_v53 }
 0xc51   :  { %v2126_v12 = vmul.f32 %v6412_v48, %v6412_v48 }
 0xc53   :  { %v2132_v63 = vsel %vm113_vm0, %v2126_v12, 0.0 }
 0xc54   :  { %2133 = vadd.xlane.f32.xlu0 %v2132_v63  ;;  %v2113_v57 = vpop.xlane.xlu0 %2112 }
 0xc55   :  { %v2119_v24 = vmul.f32 %v2113_v57, %v5540_v14 }
 0xc57   :  { %v6419_v3 = vsub.f32 %v6398_v15, %v2119_v24 }
 0xc59   :  { %v2127_v7 = vmul.f32 %v6419_v3, %v6419_v3 }
 0xc5b   :  { %v2135_v38 = vsel %vm113_vm0, %v2127_v7, 0.0 }
 0xc5c   :  { %2136 = vadd.xlane.f32.xlu2 %v2135_v38 }
 0xc7b   :  { %v2116_v17 = vpop.xlane.xlu2 %2115 }
 0xc7c   :  { %v2120_v9 = vmul.f32 %v2116_v17, %v5540_v14 }
 0xc7e   :  { %v6426_v10 = vsub.f32 %v6403_v40, %v2120_v9 }
 0xc80   :  { %v2128_v16 = vmul.f32 %v6426_v10, %v6426_v10 }
 0xc82   :  { %v2138_v54 = vsel %vm113_vm0, %v2128_v16, 0.0 }
 0xc83   :  { %2139 = vadd.xlane.f32.xlu1 %v2138_v54  ;;  %v2293_v54 = vld [vmem:[#allocation6 + $0x70] sm:$0xff] }
 0xc84   :  { %2314 = vmatpush.msra.mxu0 %v2293_v54 }
 0xc86   :  { %2315 = vmatpush.msra.mxu0 %v2292_v18 }
 0xc88   :  { %2316 = vmatpush.msra.mxu0 %v2291_v1 }
 0xc8a   :  { %2317 = vmatpush.msra.mxu0 %v2290_v22 }
 0xcbf   :  { %v2131_v19 = vpop.xlane.xlu1 %2130 }
 0xcc0   :  { %v2141_v51 = vmul.f32 %v2131_v19, %v5540_v14  ;;  %v2289_v19 = vld [vmem:[#allocation6 + $0x30] sm:$0xff] }
 0xcc1   :  { %2318 = vmatpush.msra.mxu0 %v2289_v19 }
 0xcc2   :  { %v2145_v20 = vadd.f32 1e-05, %v2141_v51  ;;  %v2288_v51 = vld [vmem:[#allocation6 + $0x20] sm:$0xff] }
 0xcc3   :  { %2319 = vmatpush.msra.mxu0 %v2288_v51 }
 0xcc4   :  { %5181 = vrsqrt.f32 %v2145_v20  ;;  %vm2155_vm7 = vweird.f32 %v2145_v20 }
 0xcc7   :  { %v2134_v50 = vpop.xlane.xlu0 %2133 }
 0xcc8   :  { %v2142_v59 = vmul.f32 %v2134_v50, %v5540_v14  ;;  %v2286_v50 = vld [vmem:[#allocation6] sm:$0xff] }
 0xcca   :  { %v5182_v5 = vpop.eup %5181  ;;  %v2146_v26 = vadd.f32 1e-05, %v2142_v59 }
 0xccb   :  { %v2150_v28 = vmul.f32 %v5182_v5, %v2145_v20  ;;  %vm2156_vm6 = vweird.f32 %v5182_v5  ;;  %v2287_v20 = vld [vmem:[#allocation6 + $0x10] sm:$0xff] }
 0xccc   :  { %5183 = vrsqrt.f32 %v2146_v26  ;;  %vm2157_vm11 = vmor %vm2155_vm7, %vm2156_vm6  ;;  %vm2165_vm13 = vweird.f32 %v2146_v26  ;;  %2320 = vmatpush.msra.mxu0 %v2287_v20 }
 0xccd   :  { %v2151_v33 = vmul.f32 %v5182_v5, %v2150_v28 }
 0xcce   :  { %2321 = vmatpush.msra.mxu0 %v2286_v50 }
 0xccf   :  { %v2152_v4 = vmul.f32 0.5, %v2151_v33  ;;  %v2137_v41 = vpop.xlane.xlu2 %2136 }
 0xcd0   :  { %v2143_v37 = vmul.f32 %v2137_v41, %v5540_v14 }
 0xcd1   :  { %v2153_v13 = vsub.f32 1.5, %v2152_v4 }
 0xcd2   :  { %v5184_v29 = vpop.eup %5183  ;;  %v2147_v56 = vadd.f32 1e-05, %v2143_v37 }
 0xcd3   :  { %v2154_v47 = vmul.f32 %v5182_v5, %v2153_v13  ;;  %v2160_v45 = vmul.f32 %v5184_v29, %v2146_v26  ;;  %vm2166_vm12 = vweird.f32 %v5184_v29 }
 0xcd4   :  { %5185 = vrsqrt.f32 %v2147_v56  ;;  %vm2167_vm15 = vmor %vm2165_vm13, %vm2166_vm12  ;;  %vm2175_vm2 = vweird.f32 %v2147_v56 }
 0xcd5   :  { %v2158_v11 = vsel %vm2157_vm11, %v5182_v5, %v2154_v47  ;;  %v2161_v36 = vmul.f32 %v5184_v29, %v2160_v45 }
 0xcd6   :  { %v2189_v8 = vmul.f32 %v2158_v11, %v2121_v31 }
 0xcd7   :  { %v2162_v34 = vmul.f32 0.5, %v2161_v36 }
 0xcd8   :  { %v2194_v61 = vmul.f32 %v5013_v35, %v2189_v8 }
 0xcd9   :  { %v2163_v21 = vsub.f32 1.5, %v2162_v34 }
 0xcda   :  { %v5186_v44 = vpop.eup %5185  ;;  %v2199_v39 = vadd.f32 %v5014_v30, %v2194_v61 }
 0xcdb   :  { %v2164_v27 = vmul.f32 %v5184_v29, %v2163_v21  ;;  %v2170_v25 = vmul.f32 %v5186_v44, %v2147_v56  ;;  %vm2176_vm1 = vweird.f32 %v5186_v44 }
 0xcdc   :  { %4769 = vmatmul.msk.f32.vlgmr.msrb.gmra.mxu3 %vm113_vm0, %v2199_v39  ;;  %vm2177_vm3 = vmor %vm2175_vm2, %vm2176_vm1 }
 0xcdd   :  { %v2171_v52 = vmul.f32 %v5186_v44, %v2170_v25  ;;  %v2168_v23 = vsel %vm2167_vm15, %v5184_v29, %v2164_v27 }
 0xcde   :  { %v2190_v60 = vmul.f32 %v2168_v23, %v6412_v48 }
 0xcdf   :  { %v2172_v43 = vmul.f32 0.5, %v2171_v52 }
 0xce0   :  { %v2195_v42 = vmul.f32 %v5013_v35, %v2190_v60 }
 0xce1   :  { %v2173_v2 = vsub.f32 1.5, %v2172_v43 }
 0xce2   :  { %v2200_v49 = vadd.f32 %v5014_v30, %v2195_v42 }
 0xce3   :  { %v2174_v55 = vmul.f32 %v5186_v44, %v2173_v2 }
 0xce4   :  { %4770 = vmatmul.msk.f32.gmra.mxu3 %vm113_vm0, %v2200_v49 }
 0xce5   :  { %v2178_v31 = vsel %vm2177_vm3, %v5186_v44, %v2174_v55 }
 0xce6   :  { %v2191_v6 = vmul.f32 %v2178_v31, %v6419_v3 }
 0xce8   :  { %v2196_v32 = vmul.f32 %v5013_v35, %v2191_v6 }
 0xcea   :  { %v2201_v58 = vadd.f32 %v5014_v30, %v2196_v32 }
 0xcec   :  { %4771 = vmatmul.msk.f32.gmra.mxu3 %vm113_vm0, %v2201_v58 }
 0xcf6   :  { %v2140_v53 = vpop.xlane.xlu1 %2139 }
 0xcf7   :  { %v2144_v48 = vmul.f32 %v2140_v53, %v5540_v14 }
 0xcf9   :  { %v2148_v12 = vadd.f32 1e-05, %v2144_v48 }
 0xcfb   :  { %5187 = vrsqrt.f32 %v2148_v12  ;;  %vm2185_vm5 = vweird.f32 %v2148_v12 }
 0xd01   :  { %v5188_v63 = vpop.eup %5187 }
 0xd02   :  { %v2180_v57 = vmul.f32 %v5188_v63, %v2148_v12  ;;  %vm2186_vm4 = vweird.f32 %v5188_v63 }
 0xd03   :  { %vm2187_vm6 = vmor %vm2185_vm5, %vm2186_vm4 }
 0xd04   :  { %v2181_v24 = vmul.f32 %v5188_v63, %v2180_v57 }
 0xd06   :  { %v2182_v7 = vmul.f32 0.5, %v2181_v24 }
 0xd08   :  { %v2183_v38 = vsub.f32 1.5, %v2182_v7 }
 0xd0a   :  { %v2184_v62 = vmul.f32 %v5188_v63, %v2183_v38  ;;  %v5016_v38 = vld [vmem:[%s7435_s5 + $0xf] ss:$0 sm:$0xff] }
 0xd0c   :  { %v2188_v17 = vsel %vm2187_vm6, %v5188_v63, %v2184_v62 }
 0xd0d   :  { %v2192_v3 = vmul.f32 %v2188_v17, %v6426_v10  ;;  %v5015_v10 = vld [vmem:[%s7435_s5 + $0xe] ss:$0 sm:$0xff] }
 0xd0f   :  { %v2197_v9 = vmul.f32 %v5013_v35, %v2192_v3 }
 0xd11   :  { %v2202_v16 = vadd.f32 %v5014_v30, %v2197_v9 }
 0xd13   :  { %4772 = vmatmul.msk.f32.gmra.mxu3 %vm113_vm0, %v2202_v16 }
 0xd5f   :  { %v2238_v59 = vpop.f32.mrf.mxu3 }
 0xd60   :  { %v2239_v5 = vadd.f32 %v5015_v10, %v2238_v59 }
 0xd62   :  { %v2250_v26 = vmul.f32 %v2239_v5, %v2239_v5 }
 0xd64   :  { %v2254_v28 = vmul.f32 %v2250_v26, %v2239_v5 }
 0xd66   :  { %v2258_v33 = vmul.f32 0.044715, %v2254_v28 }
 0xd67   :  { %v2241_v4 = vpop.f32.mrf.mxu3 }
 0xd68   :  { %v2262_v41 = vadd.f32 %v2258_v33, %v2239_v5  ;;  %v2242_v37 = vadd.f32 %v5015_v10, %v2241_v4 }
 0xd6a   :  { %v2266_v13 = vmul.f32 0.7978846, %v2262_v41  ;;  %v2251_v29 = vmul.f32 %v2242_v37, %v2242_v37 }
 0xd6c   :  { %5189 = vtanh.f32 %v2266_v13  ;;  %v2255_v56 = vmul.f32 %v2251_v29, %v2242_v37 }
 0xd6e   :  { %v2259_v47 = vmul.f32 0.044715, %v2255_v56 }
 0xd6f   :  { %v2244_v45 = vpop.f32.mrf.mxu3 }
 0xd70   :  { %v2263_v35 = vadd.f32 %v2259_v47, %v2242_v37  ;;  %v2245_v11 = vadd.f32 %v5015_v10, %v2244_v45 }
 0xd72   :  { %v5190_v36 = vpop.eup %5189  ;;  %v2267_v8 = vmul.f32 0.7978846, %v2263_v35  ;;  %v2252_v30 = vmul.f32 %v2245_v11, %v2245_v11 }
 0xd73   :  { %v2274_v34 = vadd.f32 1.0, %v5190_v36 }
 0xd74   :  { %5191 = vtanh.f32 %v2267_v8  ;;  %v2256_v61 = vmul.f32 %v2252_v30, %v2245_v11 }
 0xd75   :  { %v2278_v21 = vmul.f32 0.5, %v2274_v34  ;;  %v2454_v34 = vld [vmem:[#allocation4 + $0x228] sm:$0xff] }
 0xd76   :  { %v2260_v44 = vmul.f32 0.044715, %v2256_v61  ;;  %v2455_v61 = vld [vmem:[#allocation4 + $0x230] sm:$0xff]  ;;  %2481 = vmatpush.msra.mxu2 %v2454_v34 }
 0xd77   :  { %v2282_v39 = vmul.f32 %v2278_v21, %v2239_v5  ;;  %v2456_v21 = vld [vmem:[#allocation4 + $0x238] sm:$0xff]  ;;  %2510 = vmatpush.msra.mxu3 %v2455_v61 }
 0xd78   :  { %v2264_v27 = vadd.f32 %v2260_v44, %v2245_v11  ;;  %2539 = vmatpush.msrb.mxu0 %v2456_v21  ;;  %v2451_v44 = vld [vmem:[#allocation4 + $0x188] sm:$0xff] }
 0xd79   :  { %4773 = vmatmul.msk.f32.vlgmr.msra.gmra.mxu0 %vm1499_vm10, %v2282_v39  ;;  %v2452_v39 = vld [vmem:[#allocation4 + $0x190] sm:$0xff]  ;;  %2482 = vmatpush.msra.mxu2 %v2451_v44 }
 0xd7a   :  { %v5192_v25 = vpop.eup %5191  ;;  %v2268_v52 = vmul.f32 0.7978846, %v2264_v27  ;;  %v2453_v27 = vld [vmem:[#allocation4 + $0x198] sm:$0xff]  ;;  %2511 = vmatpush.msra.mxu3 %v2452_v39 }
 0xd7b   :  { %v2275_v23 = vadd.f32 1.0, %v5192_v25  ;;  %2540 = vmatpush.msrb.mxu0 %v2453_v27  ;;  %v2448_v25 = vld [vmem:[#allocation4 + $0xe8] sm:$0xff] }
 0xd7c   :  { %5193 = vtanh.f32 %v2268_v52  ;;  %v2449_v52 = vld [vmem:[#allocation4 + $0xf0] sm:$0xff]  ;;  %2483 = vmatpush.msra.mxu2 %v2448_v25 }
 0xd7d   :  { %v2279_v60 = vmul.f32 0.5, %v2275_v23  ;;  %v2450_v23 = vld [vmem:[#allocation4 + $0xf8] sm:$0xff]  ;;  %2512 = vmatpush.msra.mxu3 %v2449_v52 }
 0xd7e   :  { %2541 = vmatpush.msrb.mxu0 %v2450_v23 }
 0xd7f   :  { %v2283_v43 = vmul.f32 %v2279_v60, %v2242_v37  ;;  %v2445_v60 = vld [vmem:[#allocation4 + $0x48] sm:$0xff] }
 0xd80   :  { %2484 = vmatpush.msra.mxu2 %v2445_v60  ;;  %v5021_v60 = vld [vmem:[%s7435_s5 + $0x13] ss:$0 sm:$0xff] }
 0xd81   :  { %4774 = vmatmul.msk.f32.gmra.mxu0 %vm1499_vm10, %v2283_v43  ;;  %v2446_v43 = vld [vmem:[#allocation4 + $0x50] sm:$0xff] }
 0xd82   :  { %v5194_v42 = vpop.eup %5193  ;;  %2513 = vmatpush.msra.mxu3 %v2446_v43 }
 0xd83   :  { %v2276_v2 = vadd.f32 1.0, %v5194_v42  ;;  %v2447_v42 = vld [vmem:[#allocation4 + $0x58] sm:$0xff] }
 0xd84   :  { %2542 = vmatpush.msrb.mxu0 %v2447_v42 }
 0xd85   :  { %v2280_v49 = vmul.f32 0.5, %v2276_v2 }
 0xd87   :  { %v2284_v55 = vmul.f32 %v2280_v49, %v2245_v11 }
 0xd89   :  { %4775 = vmatmul.msk.f32.gmra.mxu0 %vm1499_vm10, %v2284_v55 }
 0xd96   :  { %v2247_v31 = vpop.f32.mrf.mxu3 }
 0xd97   :  { %v2248_v6 = vadd.f32 %v5015_v10, %v2247_v31 }
 0xd99   :  { %v2253_v32 = vmul.f32 %v2248_v6, %v2248_v6 }
 0xd9b   :  { %v2257_v58 = vmul.f32 %v2253_v32, %v2248_v6 }
 0xd9d   :  { %v2261_v53 = vmul.f32 0.044715, %v2257_v58 }
 0xd9f   :  { %v2265_v48 = vadd.f32 %v2261_v53, %v2248_v6 }
 0xda1   :  { %v2269_v12 = vmul.f32 0.7978846, %v2265_v48 }
 0xda3   :  { %5195 = vtanh.f32 %v2269_v12 }
 0xda9   :  { %v5196_v63 = vpop.eup %5195 }
 0xdaa   :  { %v2277_v57 = vadd.f32 1.0, %v5196_v63 }
 0xdac   :  { %v2281_v24 = vmul.f32 0.5, %v2277_v57 }
 0xdae   :  { %v2285_v7 = vmul.f32 %v2281_v24, %v2248_v6 }
 0xdb0   :  { %4776 = vmatmul.msk.f32.gmra.mxu0 %vm1499_vm10, %v2285_v7 }
 0xdf6   :  { %v2323_v62 = vpop.f32.mrf.mxu0 }
 0xdf7   :  { %v2335_v17 = vadd.f32 %v2323_v62, %v6388_v46 }
 0xdf9   :  { %v6459_v3 = vadd.f32 %v5016_v38, %v2335_v17 }
 0xdfb   :  { %v2347_v9 = vsel %vm113_vm0, %v6459_v3, 0.0 }
 0xdfc   :  { %2348 = vadd.xlane.f32.xlu0 %v2347_v9  ;;  %v5017_v9 = vld [vmem:[%s7435_s5 + $0x10] ss:$0 sm:$0xff] }
 0xdfe   :  { %v2326_v16 = vpop.f32.mrf.mxu0 }
 0xdff   :  { %v2336_v54 = vadd.f32 %v2326_v16, %v6393_v0 }
 0xe01   :  { %v6464_v18 = vadd.f32 %v5016_v38, %v2336_v54 }
 0xe03   :  { %v2350_v1 = vsel %vm113_vm0, %v6464_v18, 0.0 }
 0xe04   :  { %2351 = vadd.xlane.f32.xlu2 %v2350_v1  ;;  %v5018_v1 = vld [vmem:[%s7435_s5 + $0x11] ss:$0 sm:$0xff] }
 0xe06   :  { %v2329_v22 = vpop.f32.mrf.mxu0 }
 0xe07   :  { %v2337_v19 = vadd.f32 %v2329_v22, %v6398_v15 }
 0xe09   :  { %v6469_v51 = vadd.f32 %v5016_v38, %v2337_v19 }
 0xe0b   :  { %v2353_v46 = vsel %vm113_vm0, %v6469_v51, 0.0 }
 0xe0c   :  { %2354 = vadd.xlane.f32.xlu1 %v2353_v46 }
 0xe2d   :  { %v2332_v20 = vpop.f32.mrf.mxu0 }
 0xe2e   :  { %v2338_v50 = vadd.f32 %v2332_v20, %v6403_v40 }
 0xe30   :  { %v6474_v10 = vadd.f32 %v5016_v38, %v2338_v50 }
 0xe32   :  { %v2356_v0 = vsel %vm113_vm0, %v6474_v10, 0.0 }
 0xe33   :  { %2357 = vadd.xlane.f32.xlu0 %v2356_v0 }
 0xe6f   :  { %v2349_v59 = vpop.xlane.xlu0 %2348 }
 0xe70   :  { %v2359_v5 = vmul.f32 %v2349_v59, %v5540_v14 }
 0xe72   :  { %v6480_v15 = vsub.f32 %v6459_v3, %v2359_v5 }
 0xe74   :  { %v2367_v26 = vmul.f32 %v6480_v15, %v6480_v15 }
 0xe76   :  { %v2371_v28 = vsel %vm113_vm0, %v2367_v26, 0.0 }
 0xe77   :  { %2372 = vadd.xlane.f32.xlu2 %v2371_v28  ;;  %v2352_v33 = vpop.xlane.xlu2 %2351 }
 0xe78   :  { %v2360_v40 = vmul.f32 %v2352_v33, %v5540_v14 }
 0xe7a   :  { %v6487_v4 = vsub.f32 %v6464_v18, %v2360_v40 }
 0xe7c   :  { %v2368_v41 = vmul.f32 %v6487_v4, %v6487_v4 }
 0xe7e   :  { %v2374_v37 = vsel %vm113_vm0, %v2368_v41, 0.0 }
 0xe7f   :  { %2375 = vadd.xlane.f32.xlu1 %v2374_v37  ;;  %v2355_v13 = vpop.xlane.xlu1 %2354 }
 0xe80   :  { %v2361_v29 = vmul.f32 %v2355_v13, %v5540_v14 }
 0xe82   :  { %v6494_v56 = vsub.f32 %v6469_v51, %v2361_v29 }
 0xe84   :  { %v2369_v47 = vmul.f32 %v6494_v56, %v6494_v56 }
 0xe86   :  { %v2377_v45 = vsel %vm113_vm0, %v2369_v47, 0.0 }
 0xe87   :  { %2378 = vadd.xlane.f32.xlu0 %v2377_v45 }
 0xea6   :  { %v2358_v35 = vpop.xlane.xlu0 %2357 }
 0xea7   :  { %v2362_v11 = vmul.f32 %v2358_v35, %v5540_v14 }
 0xea9   :  { %v6501_v36 = vsub.f32 %v6474_v10, %v2362_v11 }
 0xeab   :  { %v2370_v8 = vmul.f32 %v6501_v36, %v6501_v36 }
 0xead   :  { %v2380_v30 = vsel %vm113_vm0, %v2370_v8, 0.0 }
 0xeae   :  { %2381 = vadd.xlane.f32.xlu2 %v2380_v30 }
 0xeea   :  { %v2373_v2 = vpop.xlane.xlu2 %2372 }
 0xeeb   :  { %v2383_v49 = vmul.f32 %v2373_v2, %v5540_v14 }
 0xeed   :  { %v2387_v55 = vadd.f32 1e-05, %v2383_v49 }
 0xeef   :  { %5197 = vrsqrt.f32 %v2387_v55  ;;  %vm2397_vm11 = vweird.f32 %v2387_v55 }
 0xef2   :  { %v2376_v31 = vpop.xlane.xlu1 %2375 }
 0xef3   :  { %v2384_v6 = vmul.f32 %v2376_v31, %v5540_v14  ;;  %v5020_v31 = vld [vmem:[%s7435_s5 + $0x12] ss:$0 sm:$0xff] }
 0xef5   :  { %v5198_v32 = vpop.eup %5197  ;;  %v2388_v58 = vadd.f32 1e-05, %v2384_v6 }
 0xef6   :  { %v2392_v53 = vmul.f32 %v5198_v32, %v2387_v55  ;;  %vm2398_vm7 = vweird.f32 %v5198_v32 }
 0xef7   :  { %5199 = vrsqrt.f32 %v2388_v58  ;;  %vm2399_vm12 = vmor %vm2397_vm11, %vm2398_vm7  ;;  %vm2407_vm15 = vweird.f32 %v2388_v58 }
 0xef8   :  { %v2393_v48 = vmul.f32 %v5198_v32, %v2392_v53 }
 0xefa   :  { %v2394_v12 = vmul.f32 0.5, %v2393_v48  ;;  %v2379_v63 = vpop.xlane.xlu0 %2378 }
 0xefb   :  { %v2385_v57 = vmul.f32 %v2379_v63, %v5540_v14 }
 0xefc   :  { %v2395_v24 = vsub.f32 1.5, %v2394_v12 }
 0xefd   :  { %v5200_v7 = vpop.eup %5199  ;;  %v2389_v38 = vadd.f32 1e-05, %v2385_v57 }
 0xefe   :  { %v2396_v62 = vmul.f32 %v5198_v32, %v2395_v24  ;;  %v2402_v17 = vmul.f32 %v5200_v7, %v2388_v58  ;;  %vm2408_vm13 = vweird.f32 %v5200_v7 }
 0xeff   :  { %5201 = vrsqrt.f32 %v2389_v38  ;;  %vm2409_vm1 = vmor %vm2407_vm15, %vm2408_vm13  ;;  %vm2417_vm3 = vweird.f32 %v2389_v38 }
 0xf00   :  { %v2400_v16 = vsel %vm2399_vm12, %v5198_v32, %v2396_v62  ;;  %v2403_v54 = vmul.f32 %v5200_v7, %v2402_v17 }
 0xf01   :  { %v2431_v22 = vmul.f32 %v2400_v16, %v6480_v15 }
 0xf02   :  { %v2404_v19 = vmul.f32 0.5, %v2403_v54 }
 0xf03   :  { %v2436_v46 = vmul.f32 %v5017_v9, %v2431_v22 }
 0xf04   :  { %v2405_v20 = vsub.f32 1.5, %v2404_v19 }
 0xf05   :  { %v5202_v50 = vpop.eup %5201  ;;  %v2441_v0 = vadd.f32 %v5018_v1, %v2436_v46 }
 0xf06   :  { %v2406_v59 = vmul.f32 %v5200_v7, %v2405_v20  ;;  %v2412_v5 = vmul.f32 %v5202_v50, %v2389_v38  ;;  %vm2418_vm2 = vweird.f32 %v5202_v50 }
 0xf07   :  { %4777 = vmatmul.msk.f32.vlgmr.msra.gmra.mxu2 %vm113_vm0, %v2441_v0  ;;  %4781 = vmatmul.msk.f32.vlgmr.msra.gmra.mxu3 %vm113_vm0, %v2441_v0  ;;  %vm2419_vm4 = vmor %vm2417_vm3, %vm2418_vm2 }
 0xf08   :  { %v2410_v26 = vsel %vm2409_vm1, %v5200_v7, %v2406_v59  ;;  %v2413_v28 = vmul.f32 %v5202_v50, %v2412_v5  ;;  %4785 = vmatmul.msk.f32.vlgmr.msrb.gmra.mxu0 %vm113_vm0, %v2441_v0 }
 0xf09   :  { %v2432_v15 = vmul.f32 %v2410_v26, %v6487_v4 }
 0xf0a   :  { %v2414_v33 = vmul.f32 0.5, %v2413_v28 }
 0xf0b   :  { %v2437_v40 = vmul.f32 %v5017_v9, %v2432_v15 }
 0xf0c   :  { %v2415_v41 = vsub.f32 1.5, %v2414_v33 }
 0xf0d   :  { %v2442_v37 = vadd.f32 %v5018_v1, %v2437_v40 }
 0xf0e   :  { %v2416_v13 = vmul.f32 %v5202_v50, %v2415_v41 }
 0xf0f   :  { %4778 = vmatmul.msk.f32.gmra.mxu2 %vm113_vm0, %v2442_v37  ;;  %4782 = vmatmul.msk.f32.gmra.mxu3 %vm113_vm0, %v2442_v37 }
 0xf10   :  { %v2420_v29 = vsel %vm2419_vm4, %v5202_v50, %v2416_v13  ;;  %4786 = vmatmul.msk.f32.gmra.mxu0 %vm113_vm0, %v2442_v37 }
 0xf11   :  { %v2433_v47 = vmul.f32 %v2420_v29, %v6494_v56 }
 0xf13   :  { %v2438_v45 = vmul.f32 %v5017_v9, %v2433_v47  ;;  %v5361_v47 = vld [vmem:[%s7432_s2] sm:$0xff] }
 0xf15   :  { %v2443_v35 = vadd.f32 %v5018_v1, %v2438_v45 }
 0xf17   :  { %4779 = vmatmul.msk.f32.gmra.mxu2 %vm113_vm0, %v2443_v35  ;;  %4783 = vmatmul.msk.f32.gmra.mxu3 %vm113_vm0, %v2443_v35 }
 0xf18   :  { %4787 = vmatmul.msk.f32.gmra.mxu0 %vm113_vm0, %v2443_v35 }
 0xf21   :  { %v2382_v4 = vpop.xlane.xlu2 %2381 }
 0xf22   :  { %v2386_v11 = vmul.f32 %v2382_v4, %v5540_v14 }
 0xf24   :  { %v2390_v8 = vadd.f32 1e-05, %v2386_v11  ;;  %v5362_v11 = vld [vmem:[%s7432_s2 + $0x8] sm:$0xff] }
 0xf26   :  { %5203 = vrsqrt.f32 %v2390_v8  ;;  %vm2427_vm6 = vweird.f32 %v2390_v8 }
 0xf2c   :  { %v5204_v30 = vpop.eup %5203 }
 0xf2d   :  { %v2422_v34 = vmul.f32 %v5204_v30, %v2390_v8  ;;  %vm2428_vm5 = vweird.f32 %v5204_v30 }
 0xf2e   :  { %vm2429_vm7 = vmor %vm2427_vm6, %vm2428_vm5 }
 0xf2f   :  { %v2423_v61 = vmul.f32 %v5204_v30, %v2422_v34 }
 0xf31   :  { %v2424_v21 = vmul.f32 0.5, %v2423_v61  ;;  %v5363_v61 = vld [vmem:[%s7432_s2 + $0x10] sm:$0xff] }
 0xf33   :  { %v2425_v44 = vsub.f32 1.5, %v2424_v21 }
 0xf35   :  { %v2426_v56 = vmul.f32 %v5204_v30, %v2425_v44 }
 0xf37   :  { %v2430_v39 = vsel %vm2429_vm7, %v5204_v30, %v2426_v56 }
 0xf38   :  { %v2434_v27 = vmul.f32 %v2430_v39, %v6501_v36  ;;  %v5364_v39 = vld [vmem:[%s7432_s2 + $0x18] sm:$0xff] }
 0xf3a   :  { %v2439_v25 = vmul.f32 %v5017_v9, %v2434_v27 }
 0xf3c   :  { %v2444_v52 = vadd.f32 %v5018_v1, %v2439_v25  ;;  %v5019_v25 = vld [vmem:[%s7435_s5 + $0x14] ss:$0 sm:$0xff] }
 0xf3e   :  { %4780 = vmatmul.msk.f32.gmra.mxu2 %vm113_vm0, %v2444_v52  ;;  %4784 = vmatmul.msk.f32.gmra.mxu3 %vm113_vm0, %v2444_v52 }
 0xf3f   :  { %4788 = vmatmul.msk.f32.gmra.mxu0 %vm113_vm0, %v2444_v52 }
 0xf85   :  { %v2544_v35 = vpop.f32.mrf.mxu0 }
 0xf8a   :  { %v2515_v23 = vpop.f32.mrf.mxu3  ;;  %v2486_v55 = vpop.f32.mrf.mxu2 }
 0xf8b   :  { %v2564_v49 = vadd.f32 %v5021_v60, %v2515_v23  ;;  %v2558_v6 = vadd.f32 %v5020_v31, %v2486_v55 }
 0xf8d   :  { %v2547_v30 = vpop.f32.mrf.mxu0 }
 0xf8e   :  { %v6615_v52 = vadd.f32 %v5019_v25, %v2547_v30 }
 0xf92   :  { %v2518_v43 = vpop.f32.mrf.mxu3  ;;  %v2489_v32 = vpop.f32.mrf.mxu2 }
 0xf93   :  { %v6535_v42 = vadd.f32 %v5021_v60, %v2518_v43  ;;  %v2559_v24 = vadd.f32 %v5020_v31, %v2489_v32 }
 0xf95   :  { %2629 = vrot.lane.b32.xlu2 %v6535_v42, %s5481_s25  ;;  %v2550_v44 = vpop.f32.mrf.mxu0 }
 0xf9a   :  { %v2521_v36 = vpop.f32.mrf.mxu3  ;;  %v2492_v58 = vpop.f32.mrf.mxu2 }
 0xf9b   :  { %v2566_v2 = vadd.f32 %v5021_v60, %v2521_v36  ;;  %v2560_v57 = vadd.f32 %v5020_v31, %v2492_v58  ;;  %v6623_v36 = vadd.f32 %v5019_v25, %v2550_v44 }
 0xf9d   :  { %2621 = vrot.lane.b32.xlu2 %v6535_v42, %s5482_s26  ;;  %2631 = vrot.lane.b32.xlu0 %v2566_v2, %s5481_s25 }
 0xfa5   :  { %2615 = vrot.lane.b32.xlu2 %v2566_v2, %s5483_s27  ;;  %2627 = vrot.lane.b32.xlu0 %v2564_v49, %s5481_s25 }
 0xfad   :  { %2583 = vrot.lane.b32.xlu2 %v2558_v6, %s5483_s27  ;;  %2623 = vrot.lane.b32.xlu0 %v2566_v2, %s5482_s26 }
 0xfbc   :  { %v2553_v23 = vpop.f32.mrf.mxu0 }
 0xfbd   :  { %v6619_v43 = vadd.f32 %v5019_v25, %v2553_v23 }
 0xfc1   :  { %v2495_v53 = vpop.f32.mrf.mxu2  ;;  %v2524_v48 = vpop.f32.mrf.mxu3 }
 0xfc2   :  { %v2561_v12 = vadd.f32 %v5020_v31, %v2495_v53  ;;  %v2567_v63 = vadd.f32 %v5021_v60, %v2524_v48  ;;  %v6617_v60 = vadd.f32 %v5019_v25, %v2544_v35  ;;  %v5366_v53 = vld [vmem:[%s7432_s2 + $0x28] sm:$0xff] }
 0xfc4   :  { %2617 = vrot.lane.b32.xlu0 %v2567_v63, %s5483_s27  ;;  %2633 = vrot.lane.b32.xlu1 %v2567_v63, %s5481_s25 }
 0xfc5   :  { %2589 = vrot.lane.b32.xlu2 %v2561_v12, %s5483_s27 }
 0xfcc   :  { %2611 = vrot.lane.b32.xlu0 %v2564_v49, %s5483_s27  ;;  %2625 = vrot.lane.b32.xlu1 %v2567_v63, %s5482_s26 }
 0xfcd   :  { %2595 = vrot.lane.b32.xlu2 %v2560_v57, %s5482_s26 }
 0xfd4   :  { %2619 = vrot.lane.b32.xlu1 %v2564_v49, %s5482_s26  ;;  %2587 = vrot.lane.b32.xlu0 %v2560_v57, %s5483_s27 }
 0xfd5   :  { %2601 = vrot.lane.b32.xlu2 %v2559_v24, %s5481_s25 }
 0xfdc   :  { %2613 = vrot.lane.b32.xlu1 %v6535_v42, %s5483_s27  ;;  %2593 = vrot.lane.b32.xlu0 %v2559_v24, %s5482_s26 }
 0xfe4   :  { %2585 = vrot.lane.b32.xlu1 %v2559_v24, %s5483_s27  ;;  %2599 = vrot.lane.b32.xlu0 %v2558_v6, %s5481_s25 }
 0xfec   :  { %2591 = vrot.lane.b32.xlu1 %v2558_v6, %s5482_s26  ;;  %2605 = vrot.lane.b32.xlu0 %v2561_v12, %s5481_s25 }
 0xfef   :  { %v2630_v62 = vpop.permute.xlu2 %2629 }
 0xff4   :  { %2603 = vrot.lane.b32.xlu1 %v2560_v57, %s5481_s25 }
 0xff7   :  { %v2622_v54 = vpop.permute.xlu2 %2621 }
 0xffc   :  { %2597 = vrot.lane.b32.xlu1 %v2561_v12, %s5482_s26 }
 0xfff   :  { %v2616_v19 = vpop.permute.xlu2 %2615 }
0x1007   :  { %v2584_v50 = vpop.permute.xlu2 %2583 }
0x100f   :  { %v2632_v7 = vpop.permute.xlu0 %2631 }
0x1017   :  { %v2628_v17 = vpop.permute.xlu0 %2627 }
0x101f   :  { %v2624_v16 = vpop.permute.xlu0 %2623  ;;  %v2590_v5 = vpop.permute.xlu2 %2589 }
0x1027   :  { %v2596_v33 = vpop.permute.xlu2 %2595 }
0x102f   :  { %v2602_v37 = vpop.permute.xlu2 %2601 }
0x1036   :  { %v2634_v38 = vpop.permute.xlu1 %2633  ;;  %v2618_v22 = vpop.permute.xlu0 %2617 }
0x1037   :  { %4789 = vmatpush.xpose.msk.msra.mxu1 %vm449_vm14, %v2634_v38 }
0x103b   :  { %4790 = vmatpush.xpose.msk.msra.mxu1 %vm449_vm14, %v2632_v7 }
0x103e   :  { %v2626_v9 = vpop.permute.xlu1 %2625  ;;  %v2612_v20 = vpop.permute.xlu0 %2611 }
0x103f   :  { %4791 = vmatpush.xpose.msk.msra.mxu1 %vm449_vm14, %v2630_v62 }
0x1043   :  { %4792 = vmatpush.xpose.msk.msra.mxu1 %vm449_vm14, %v2628_v17 }
0x1046   :  { %v2620_v1 = vpop.permute.xlu1 %2619  ;;  %v2588_v59 = vpop.permute.xlu0 %2587 }
0x1047   :  { %4793 = vmatpush.xpose.msk.msra.mxu1 %vm449_vm14, %v2626_v9 }
0x104b   :  { %4794 = vmatpush.xpose.msk.msra.mxu1 %vm449_vm14, %v2624_v16 }
0x104e   :  { %v2614_v46 = vpop.permute.xlu1 %2613  ;;  %v2594_v28 = vpop.permute.xlu0 %2593 }
0x104f   :  { %4795 = vmatpush.xpose.msk.msra.mxu1 %vm449_vm14, %v2622_v54 }
0x1053   :  { %4796 = vmatpush.xpose.msk.msra.mxu1 %vm449_vm14, %v2620_v1 }
0x1056   :  { %v2586_v0 = vpop.permute.xlu1 %2585  ;;  %v2600_v41 = vpop.permute.xlu0 %2599 }
0x1057   :  { %4797 = vmatpush.xpose.msk.msra.mxu1 %vm449_vm14, %v2618_v22 }
0x105b   :  { %4798 = vmatpush.xpose.msk.msra.mxu1 %vm449_vm14, %v2616_v19 }
0x105e   :  { %v2592_v26 = vpop.permute.xlu1 %2591  ;;  %v2606_v13 = vpop.permute.xlu0 %2605 }
0x105f   :  { %4799 = vmatpush.xpose.msk.msra.mxu1 %vm449_vm14, %v2614_v46 }
0x1063   :  { %4800 = vmatpush.xpose.msk.msra.mxu1 %vm449_vm14, %v2612_v20 }
0x1066   :  { %v2604_v15 = vpop.permute.xlu1 %2603 }
0x1067   :  { %4801 = vmatpush.xpose.msk.msra.mxu1 %vm449_vm14, %v2567_v63 }
0x106b   :  { %4802 = vmatpush.xpose.msk.msra.mxu1 %vm449_vm14, %v2566_v2  ;;  %v4966_v2 = vpack.i.bf16 %v6623_v36, %v6619_v43 }
0x106e   :  { %v2598_v40 = vpop.permute.xlu1 %2597 }
0x106f   :  { %4803 = vmatpush.xpose.msk.msra.mxu1 %vm449_vm14, %v6535_v42  ;;  %v4961_v42 = vpack.i.bf16 %v6617_v60, %v6615_v52 }
0x1073   :  { %4804 = vmatpush.xpose.msk.msra.mxu1 %vm449_vm14, %v2564_v49 }
0x1076   :  { %4805 = vmatmul.msk.f32.vlgmr.msra.gmra.mxu1 %vm449_vm14, %v2558_v6  ;;  %v5365_v6 = vld [vmem:[%s7432_s2 + $0x20] sm:$0xff] }
0x107e   :  { %4806 = vmatmul.msk.f32.gmra.mxu1 %vm449_vm14, %v2559_v24  ;;  %v5368_v24 = vld [vmem:[%s7432_s2 + $0x40] sm:$0xff] }
0x1086   :  { %4807 = vmatmul.msk.f32.gmra.mxu1 %vm449_vm14, %v2560_v57 }
0x108e   :  { %4808 = vmatmul.msk.f32.gmra.mxu1 %vm449_vm14, %v2561_v12  ;;  %v5367_v12 = vld [vmem:[%s7432_s2 + $0x30] sm:$0xff] }
0x1096   :  { %4809 = vmatmul.msk.f32.gmra.mxu1 %vm449_vm14, %v2584_v50 }
0x109e   :  { %4810 = vmatmul.msk.f32.gmra.mxu1 %vm449_vm14, %v2586_v0 }
0x10a6   :  { %4811 = vmatmul.msk.f32.gmra.mxu1 %vm449_vm14, %v2588_v59 }
0x10ae   :  { %4812 = vmatmul.msk.f32.gmra.mxu1 %vm449_vm14, %v2590_v5 }
0x10b6   :  { %4813 = vmatmul.msk.f32.gmra.mxu1 %vm449_vm14, %v2592_v26 }
0x10be   :  { %4814 = vmatmul.msk.f32.gmra.mxu1 %vm449_vm14, %v2594_v28 }
0x10c6   :  { %4815 = vmatmul.msk.f32.gmra.mxu1 %vm449_vm14, %v2596_v33 }
0x10ce   :  { %4816 = vmatmul.msk.f32.gmra.mxu1 %vm449_vm14, %v2598_v40 }
0x10d6   :  { %4817 = vmatmul.msk.f32.gmra.mxu1 %vm449_vm14, %v2600_v41 }
0x10de   :  { %4818 = vmatmul.msk.f32.gmra.mxu1 %vm449_vm14, %v2602_v37 }
0x10e6   :  { %4819 = vmatmul.msk.f32.gmra.mxu1 %vm449_vm14, %v2604_v15  ;;  %v5369_v15 = vld [vmem:[%s7432_s2 + $0x38] sm:$0xff] }
0x10ee   :  { %4820 = vmatmul.msk.f32.gmra.mxu1 %vm449_vm14, %v2606_v13 }
0x10f3   :  { %v2756_v29 = vpop.f32.mrf.mxu1 }
0x10f4   :  { %v2757_v45 = vadd.f32 %v5361_v47, %v2756_v29 }
0x10f6   :  { %2804 = vmax.xlane.f32.xlu2 %v2757_v45 }
0x10fb   :  { %v2759_v4 = vpop.f32.mrf.mxu1 }
0x10fc   :  { %v2760_v8 = vadd.f32 %v5362_v11, %v2759_v4  ;;  %v5370_v4 = vld [vmem:[%s7432_s2 + $0x48] sm:$0xff] }
0x10fe   :  { %2806 = vmax.xlane.f32.xlu1 %v2760_v8 }
0x1103   :  { %v2762_v34 = vpop.f32.mrf.mxu1 }
0x1104   :  { %v2763_v21 = vadd.f32 %v5363_v61, %v2762_v34  ;;  %v5371_v61 = vld [vmem:[%s7432_s2 + $0x58] sm:$0xff] }
0x1106   :  { %2808 = vmax.xlane.f32.xlu0 %v2763_v21 }
0x110b   :  { %v2765_v56 = vpop.f32.mrf.mxu1 }
0x110c   :  { %v2766_v27 = vadd.f32 %v5364_v39, %v2765_v56 }
0x110e   :  { %2810 = vmax.xlane.f32.xlu2 %v2766_v27 }
0x1113   :  { %v2768_v49 = vpop.f32.mrf.mxu1 }
0x1114   :  { %v6634_v32 = vadd.f32 %v5365_v6, %v2768_v49 }
0x1117   :  { %4962 = vrot.lane.b32.xlu1 %v4961_v42, %s5481_s25 }
0x111a   :  { %4967 = vrot.lane.b32.xlu0 %v4966_v2, %s5482_s26 }
0x111b   :  { %v2771_v55 = vpop.f32.mrf.mxu1 }
0x111c   :  { %v6640_v48 = vadd.f32 %v5366_v53, %v2771_v55  ;;  %v5374_v55 = vld [vmem:[%s7432_s2 + $0x68] sm:$0xff] }
0x1122   :  { %4972 = vrot.lane.b32.xlu0 %v4961_v42, %s5482_s26 }
0x1123   :  { %v2774_v31 = vpop.f32.mrf.mxu1 }
0x1124   :  { %v6646_v63 = vadd.f32 %v5367_v12, %v2774_v31 }
0x1126   :  { %4957 = vrot.lane.b32.xlu2 %v4966_v2, %s5481_s25 }
0x112b   :  { %v2777_v58 = vpop.f32.mrf.mxu1 }
0x112c   :  { %v6668_v33 = vadd.f32 %v5369_v15, %v2777_v58  ;;  %v5375_v58 = vld [vmem:[%s7432_s2 + $0x70] sm:$0xff] }
0x1133   :  { %v2780_v57 = vpop.f32.mrf.mxu1 }
0x1134   :  { %v6652_v7 = vadd.f32 %v5368_v24, %v2780_v57  ;;  %v5376_v57 = vld [vmem:[%s7432_s2 + $0x78] sm:$0xff] }
0x113b   :  { %v2783_v1 = vpop.f32.mrf.mxu1 }
0x113c   :  { %v6678_v11 = vadd.f32 %v5370_v4, %v2783_v1 }
0x1141   :  { %2812 = vmax.xlane.f32.xlu1 %v6634_v32 }
0x1143   :  { %v2786_v0 = vpop.f32.mrf.mxu1 }
0x114b   :  { %v2789_v40 = vpop.f32.mrf.mxu1 }
0x114c   :  { %2814 = vmax.xlane.f32.xlu0 %v6640_v48 }
0x114f   :  { %2816 = vmax.xlane.f32.xlu2 %v6646_v63 }
0x1153   :  { %v2792_v30 = vpop.f32.mrf.mxu1 }
0x1157   :  { %2820 = vmax.xlane.f32.xlu2 %v6652_v7 }
0x115b   :  { %v2795_v49 = vpop.f32.mrf.mxu1 }
0x115c   :  { %v6702_v31 = vadd.f32 %v5374_v55, %v2795_v49 }
0x1160   :  { %4977 = vrot.lane.b32.xlu0 %v4966_v2, %s5483_s27 }
0x1163   :  { %v2798_v6 = vpop.f32.mrf.mxu1 }
0x1164   :  { %v6708_v53 = vadd.f32 %v5375_v58, %v2798_v6 }
0x1169   :  { %v2805_v38 = vpop.xlane.xlu2 %2804 }
0x116a   :  { %v2836_v62 = vsub.f32 %v2757_v45, %v2805_v38 }
0x116b   :  { %v2801_v12 = vpop.f32.mrf.mxu1 }
0x116c   :  { %v2852_v17 = vmul.f32 1.442695, %v2836_v62  ;;  %v6714_v24 = vadd.f32 %v5376_v57, %v2801_v12 }
0x116e   :  { %5205 = vpow2.f32 %v2852_v17 }
0x1171   :  { %v2807_v9 = vpop.xlane.xlu1 %2806 }
0x1172   :  { %v2837_v16 = vsub.f32 %v2760_v8, %v2807_v9 }
0x1174   :  { %v6656_v54 = vpop.eup %5205  ;;  %v2854_v22 = vmul.f32 1.442695, %v2837_v16 }
0x1175   :  { %2884 = vadd.xlane.f32.xlu1 %v6656_v54 }
0x1176   :  { %5207 = vpow2.f32 %v2854_v22 }
0x1179   :  { %v2809_v19 = vpop.xlane.xlu0 %2808 }
0x117a   :  { %v2838_v46 = vsub.f32 %v2763_v21, %v2809_v19  ;;  %v6684_v21 = vadd.f32 %v5371_v61, %v2789_v40 }
0x117c   :  { %v6659_v20 = vpop.eup %5207  ;;  %v2856_v50 = vmul.f32 1.442695, %v2838_v46 }
0x117d   :  { %2886 = vadd.xlane.f32.xlu2 %v6659_v20 }
0x117e   :  { %5209 = vpow2.f32 %v2856_v50 }
0x1181   :  { %v2811_v59 = vpop.xlane.xlu2 %2810 }
0x1182   :  { %v2839_v5 = vsub.f32 %v2766_v27, %v2811_v59  ;;  %v5372_v27 = vld [vmem:[%s7432_s2 + $0x50] sm:$0xff] }
0x1183   :  { %v6690_v25 = vadd.f32 %v5372_v27, %v2786_v0 }
0x1184   :  { %v6662_v26 = vpop.eup %5209  ;;  %v2858_v28 = vmul.f32 1.442695, %v2839_v5 }
0x1185   :  { %2888 = vadd.xlane.f32.xlu2 %v6662_v26 }
0x1186   :  { %5211 = vpow2.f32 %v2858_v28 }
0x1189   :  { %v4958_v41 = vpop.permute.xlu2 %4957  ;;  %v4963_v13 = vpop.permute.xlu1 %4962 }
0x118a   :  { %v4959_v37 = vunpack.i.l.bf16 %v4958_v41  ;;  %2818 = vmax.xlane.f32.xlu0 %v6668_v33  ;;  %v4960_v47 = vunpack.i.h.bf16 %v4958_v41  ;;  %v4964_v35 = vunpack.i.l.bf16 %v4963_v13  ;;  %v4965_v8 = vunpack.i.h.bf16 %v4963_v13 }
0x118c   :  { %v6671_v29 = vpop.eup %5211  ;;  %v4968_v45 = vpop.permute.xlu0 %4967  ;;  %3156 = vmatpush.msrb.mxu2 %v4959_v37 }
0x118d   :  { %2890 = vadd.xlane.f32.xlu2 %v6671_v29  ;;  %v4969_v34 = vunpack.i.l.bf16 %v4968_v45  ;;  %v4970_v44 = vunpack.i.h.bf16 %v4968_v45 }
0x118e   :  { %4982 = vrot.lane.b32.xlu1 %v4961_v42, %s5483_s27  ;;  %3157 = vmatpush.msrb.mxu2 %v4960_v47  ;;  %v5373_v42 = vld [vmem:[%s7432_s2 + $0x60] sm:$0xff] }
0x118f   :  { %v6696_v2 = vadd.f32 %v5373_v42, %v2792_v30 }
0x1190   :  { %3158 = vmatpush.msrb.mxu2 %v4964_v35 }
0x1192   :  { %2822 = vmax.xlane.f32.xlu0 %v6678_v11  ;;  %3159 = vmatpush.msrb.mxu2 %v4965_v8 }
0x1194   :  { %v4973_v56 = vpop.permute.xlu0 %4972  ;;  %3160 = vmatpush.msrb.mxu2 %v4969_v34 }
0x1195   :  { %v4974_v39 = vunpack.i.l.bf16 %v4973_v56  ;;  %2826 = vmax.xlane.f32.xlu2 %v6684_v21  ;;  %v4975_v23 = vunpack.i.h.bf16 %v4973_v56 }
0x1196   :  { %3161 = vmatpush.msrb.mxu2 %v4970_v44 }
0x1198   :  { %3162 = vmatpush.msrb.mxu2 %v4974_v39 }
0x119a   :  { %2824 = vmax.xlane.f32.xlu0 %v6690_v25  ;;  %3163 = vmatpush.msrb.mxu2 %v4975_v23 }
0x119d   :  { %2828 = vmax.xlane.f32.xlu2 %v6696_v2 }
0x11a5   :  { %2830 = vmax.xlane.f32.xlu2 %v6702_v31 }
0x11ad   :  { %2832 = vmax.xlane.f32.xlu2 %v6708_v53 }
0x11b4   :  { %v2813_v38 = vpop.xlane.xlu1 %2812 }
0x11b5   :  { %v2840_v62 = vsub.f32 %v6634_v32, %v2813_v38  ;;  %2834 = vmax.xlane.f32.xlu2 %v6714_v24 }
0x11b7   :  { %v2860_v17 = vmul.f32 1.442695, %v2840_v62 }
0x11b9   :  { %5213 = vpow2.f32 %v2860_v17 }
0x11bf   :  { %v6718_v9 = vpop.eup %5213  ;;  %v2815_v16 = vpop.xlane.xlu0 %2814 }
0x11c0   :  { %v2841_v1 = vsub.f32 %v6640_v48, %v2815_v16  ;;  %2892 = vadd.xlane.f32.xlu1 %v6718_v9 }
0x11c2   :  { %v2862_v22 = vmul.f32 1.442695, %v2841_v1  ;;  %v2817_v19 = vpop.xlane.xlu2 %2816 }
0x11c3   :  { %v2842_v46 = vsub.f32 %v6646_v63, %v2817_v19 }
0x11c4   :  { %5215 = vpow2.f32 %v2862_v22 }
0x11c5   :  { %v2864_v50 = vmul.f32 1.442695, %v2842_v46 }
0x11c7   :  { %5217 = vpow2.f32 %v2864_v50 }
0x11ca   :  { %v6723_v0 = vpop.eup %5215  ;;  %v2821_v28 = vpop.xlane.xlu2 %2820 }
0x11cb   :  { %2894 = vadd.xlane.f32.xlu0 %v6723_v0  ;;  %v2844_v44 = vsub.f32 %v6652_v7, %v2821_v28 }
0x11cd   :  { %v6726_v32 = vpop.eup %5217  ;;  %v2868_v6 = vmul.f32 1.442695, %v2844_v44 }
0x11d2   :  { %v4978_v59 = vpop.permute.xlu0 %4977 }
0x11d3   :  { %v4979_v5 = vunpack.i.l.bf16 %v4978_v59  ;;  %2896 = vadd.xlane.f32.xlu0 %v6726_v32  ;;  %v4980_v48 = vunpack.i.h.bf16 %v4978_v59 }
0x11d5   :  { %3164 = vmatpush.msrb.mxu2 %v4979_v5 }
0x11d7   :  { %3165 = vmatpush.msrb.mxu2 %v4980_v48 }
0x11e8   :  { %v2885_v15 = vpop.xlane.xlu1 %2884 }
0x11e9   :  { %5219 = vrcp.f32 %v2885_v15  ;;  %v2927_v42 = vand.u32 2147483648, %v2885_v15  ;;  %vm2921_vm12 = vweird.f32 %v2885_v15  ;;  %v2925_v55 = vand.u32 2147483647, %v2885_v15 }
0x11eb   :  { %v2928_v57 = vor.u32 1.1754944e-38, %v2927_v42  ;;  %vm2926_vm15 = vcmp.eq.f32.partialorder %v2925_v55, 8.507059e+37 }
0x11ef   :  { %v5220_v63 = vpop.eup %5219 }
0x11f0   :  { %v6729_v40 = vpop.xlane.xlu2 %2886  ;;  %v2917_v41 = vmul.f32 %v5220_v63, %v2885_v15  ;;  %vm2922_vm11 = vweird.f32 %v5220_v63 }
0x11f1   :  { %5221 = vrcp.f32 %v6729_v40  ;;  %vm2923_vm13 = vmor %vm2921_vm12, %vm2922_vm11  ;;  %v2942_v46 = vand.u32 2147483648, %v6729_v40  ;;  %vm2936_vm2 = vweird.f32 %v6729_v40 }
0x11f2   :  { %v2918_v13 = vsub.f32 1.0, %v2917_v41 }
0x11f3   :  { %v2943_v15 = vor.u32 1.1754944e-38, %v2942_v46 }
0x11f4   :  { %v2919_v35 = vmul.f32 %v5220_v63, %v2918_v13 }
0x11f6   :  { %v2920_v39 = vadd.f32 %v5220_v63, %v2919_v35 }
0x11f7   :  { %v6734_v47 = vpop.eup %5221 }
0x11f8   :  { %v6732_v37 = vpop.xlane.xlu2 %2888  ;;  %v2932_v4 = vmul.f32 %v6734_v47, %v6729_v40  ;;  %v2924_v58 = vsel %vm2923_vm13, %v5220_v63, %v2920_v39  ;;  %vm2937_vm1 = vweird.f32 %v6734_v47 }
0x11f9   :  { %5223 = vrcp.f32 %v6732_v37  ;;  %v2929_v17 = vsel %vm2926_vm15, %v2928_v57, %v2924_v58  ;;  %vm2938_vm3 = vmor %vm2936_vm2, %vm2937_vm1  ;;  %vm2951_vm6 = vweird.f32 %v6732_v37 }
0x11fa   :  { %v2933_v27 = vsub.f32 1.0, %v2932_v4  ;;  %v2955_v4 = vand.u32 2147483647, %v6732_v37 }
0x11fc   :  { %v2934_v7 = vmul.f32 %v6734_v47, %v2933_v27  ;;  %vm2956_vm11 = vcmp.eq.f32.partialorder %v2955_v4, 8.507059e+37 }
0x11fd   :  { %v2819_v45 = vpop.xlane.xlu0 %2818 }
0x11fe   :  { %v2843_v8 = vsub.f32 %v6668_v33, %v2819_v45  ;;  %v2935_v19 = vadd.f32 %v6734_v47, %v2934_v7 }
0x11ff   :  { %v6743_v23 = vpop.eup %5223 }
0x1200   :  { %v2866_v30 = vmul.f32 1.442695, %v2843_v8  ;;  %v4983_v34 = vpop.permute.xlu1 %4982  ;;  %v6740_v61 = vpop.xlane.xlu2 %2890  ;;  %v2947_v12 = vmul.f32 %v6743_v23, %v6732_v37  ;;  %vm2952_vm5 = vweird.f32 %v6743_v23 }
0x1201   :  { %v4984_v56 = vunpack.i.l.bf16 %v4983_v34  ;;  %v4985_v49 = vunpack.i.h.bf16 %v4983_v34  ;;  %vm2953_vm7 = vmor %vm2951_vm6, %vm2952_vm5  ;;  %vm2966_vm13 = vweird.f32 %v6740_v61  ;;  %v2970_v55 = vand.u32 2147483647, %v6740_v61 }
0x1202   :  { %5225 = vpow2.f32 %v2866_v30  ;;  %v2948_v22 = vsub.f32 1.0, %v2947_v12 }
0x1203   :  { %3166 = vmatpush.msrb.mxu2 %v4984_v56  ;;  %5227 = vrcp.f32 %v6740_v61  ;;  %vm2971_vm1 = vcmp.eq.f32.partialorder %v2970_v55, 8.507059e+37 }
0x1204   :  { %5229 = vpow2.f32 %v2868_v6  ;;  %v2949_v5 = vmul.f32 %v6743_v23, %v2948_v22 }
0x1205   :  { %v2823_v33 = vpop.xlane.xlu0 %2822  ;;  %3167 = vmatpush.msrb.mxu2 %v4985_v49 }
0x1206   :  { %v2845_v16 = vsub.f32 %v6678_v11, %v2823_v33  ;;  %v2930_v11 = vmul.f32 %v6656_v54, %v2929_v17 }
0x1207   :  { %3168 = vmatpush.msrb.mxu2 %v6619_v43 }
0x1208   :  { %v6750_v38 = vpop.eup %5225  ;;  %v2827_v62 = vpop.xlane.xlu2 %2826 }
0x1209   :  { %v2847_v1 = vsub.f32 %v6684_v21, %v2827_v62  ;;  %2898 = vadd.xlane.f32.xlu0 %v6750_v38  ;;  %3169 = vmatpush.msrb.mxu2 %v6623_v36  ;;  %v6758_v43 = vpop.eup %5227  ;;  %v2940_v21 = vand.u32 2147483647, %v6729_v40  ;;  %v2870_v36 = vmul.f32 1.442695, %v2845_v16 }
0x120a   :  { %v2962_v48 = vmul.f32 %v6758_v43, %v6740_v61  ;;  %v6771_v54 = vpop.eup %5229  ;;  %vm2967_vm12 = vweird.f32 %v6758_v43 }
0x120b   :  { %v2874_v50 = vmul.f32 1.442695, %v2847_v1  ;;  %3170 = vmatpush.msrb.mxu2 %v6615_v52  ;;  %v2939_v52 = vsel %vm2938_vm3, %v6734_v47, %v2935_v19  ;;  %vm2941_vm4 = vcmp.eq.f32.partialorder %v2940_v21, 8.507059e+37  ;;  %v2957_v47 = vand.u32 2147483648, %v6732_v37  ;;  %vm2968_vm15 = vmor %vm2966_vm13, %vm2967_vm12 }
0x120c   :  { %v2963_v41 = vsub.f32 1.0, %v2962_v48 }
0x120d   :  { %5231 = vpow2.f32 %v2874_v50  ;;  %v2825_v59 = vpop.xlane.xlu0 %2824  ;;  %3171 = vmatpush.msrb.mxu2 %v6617_v60  ;;  %v2944_v60 = vsel %vm2941_vm4, %v2943_v15, %v2939_v52  ;;  %v2958_v44 = vor.u32 1.1754944e-38, %v2957_v47 }
0x120e   :  { %v2846_v28 = vsub.f32 %v6690_v25, %v2825_v59  ;;  %3172 = vmatmul.f32.vlgmr.msrb.gmra.mxu2 %v2930_v11  ;;  %5233 = vpow2.f32 %v2870_v36  ;;  %v2950_v25 = vadd.f32 %v6743_v23, %v2949_v5  ;;  %v2945_v35 = vmul.f32 %v6659_v20, %v2944_v60 }
0x120f   :  { %v2964_v8 = vmul.f32 %v6758_v43, %v2963_v41 }
0x1210   :  { %v2872_v40 = vmul.f32 1.442695, %v2846_v28  ;;  %v2829_v63 = vpop.xlane.xlu2 %2828 }
0x1211   :  { %2900 = vadd.xlane.f32.xlu0 %v6771_v54  ;;  %v2848_v13 = vsub.f32 %v6696_v2, %v2829_v63  ;;  %v2954_v2 = vsel %vm2953_vm7, %v6743_v23, %v2950_v25  ;;  %v2965_v37 = vadd.f32 %v6758_v43, %v2964_v8  ;;  %v2972_v23 = vand.u32 2147483648, %v6740_v61 }
0x1212   :  { %5235 = vpow2.f32 %v2872_v40  ;;  %v2959_v20 = vsel %vm2956_vm11, %v2958_v44, %v2954_v2 }
0x1213   :  { %v6777_v45 = vpop.eup %5231  ;;  %v2876_v30 = vmul.f32 1.442695, %v2848_v13  ;;  %v2960_v49 = vmul.f32 %v6662_v26, %v2959_v20  ;;  %v2973_v33 = vor.u32 1.1754944e-38, %v2972_v23 }
0x1214   :  { %2906 = vadd.xlane.f32.xlu2 %v6777_v45  ;;  %v6786_v34 = vpop.eup %5233 }
0x1215   :  { %5237 = vpow2.f32 %v2876_v30 }
0x1216   :  { %3175 = vmatmul.f32.gmra.mxu2 %v2945_v35 }
0x1218   :  { %v6788_v56 = vpop.eup %5235  ;;  %v2831_v39 = vpop.xlane.xlu2 %2830 }
0x1219   :  { %v2849_v27 = vsub.f32 %v6702_v31, %v2831_v39  ;;  %2904 = vadd.xlane.f32.xlu1 %v6788_v56  ;;  %2902 = vadd.xlane.f32.xlu0 %v6786_v34  ;;  %v2969_v31 = vsel %vm2968_vm15, %v6758_v43, %v2965_v37 }
0x121a   :  { %v2974_v12 = vsel %vm2971_vm1, %v2973_v33, %v2969_v31 }
0x121b   :  { %v2878_v42 = vmul.f32 1.442695, %v2849_v27  ;;  %v6800_v6 = vpop.eup %5237  ;;  %v2975_v61 = vmul.f32 %v6671_v29, %v2974_v12 }
0x121d   :  { %5239 = vpow2.f32 %v2878_v42 }
0x121e   :  { %3178 = vmatmul.f32.gmra.mxu2 %v2960_v49 }
0x1220   :  { %v2833_v58 = vpop.xlane.xlu2 %2832 }
0x1221   :  { %v2850_v7 = vsub.f32 %v6708_v53, %v2833_v58  ;;  %2908 = vadd.xlane.f32.xlu0 %v6800_v6 }
0x1223   :  { %v6804_v57 = vpop.eup %5239  ;;  %v2880_v26 = vmul.f32 1.442695, %v2850_v7 }
0x1224   :  { %2910 = vadd.xlane.f32.xlu1 %v6804_v57 }
0x1225   :  { %5241 = vpow2.f32 %v2880_v26 }
0x1226   :  { %3181 = vmatmul.f32.gmra.mxu2 %v2975_v61 }
0x1228   :  { %v2835_v62 = vpop.xlane.xlu2 %2834 }
0x1229   :  { %v2851_v17 = vsub.f32 %v6714_v24, %v2835_v62 }
0x122b   :  { %v6809_v16 = vpop.eup %5241  ;;  %v2882_v1 = vmul.f32 1.442695, %v2851_v17 }
0x122c   :  { %2912 = vadd.xlane.f32.xlu2 %v6809_v16 }
0x122d   :  { %5243 = vpow2.f32 %v2882_v1 }
0x1233   :  { %v6812_v53 = vpop.eup %5243  ;;  %v2893_v22 = vpop.xlane.xlu1 %2892 }
0x1234   :  { %5245 = vrcp.f32 %v2893_v22  ;;  %2914 = vadd.xlane.f32.xlu0 %v6812_v53  ;;  %v2987_v46 = vand.u32 2147483648, %v2893_v22  ;;  %v2985_v24 = vand.u32 2147483647, %v2893_v22  ;;  %vm2981_vm3 = vweird.f32 %v2893_v22 }
0x1236   :  { %v2988_v36 = vor.u32 1.1754944e-38, %v2987_v46  ;;  %vm2986_vm5 = vcmp.eq.f32.partialorder %v2985_v24, 8.507059e+37 }
0x123a   :  { %v5246_v19 = vpop.eup %5245 }
0x123b   :  { %v2977_v43 = vmul.f32 %v5246_v19, %v2893_v22  ;;  %vm2982_vm2 = vweird.f32 %v5246_v19 }
0x123c   :  { %vm2983_vm4 = vmor %vm2981_vm3, %vm2982_vm2 }
0x123d   :  { %v2978_v29 = vsub.f32 1.0, %v2977_v43 }
0x123e   :  { %v2895_v50 = vpop.xlane.xlu0 %2894 }
0x123f   :  { %v2979_v11 = vmul.f32 %v5246_v19, %v2978_v29  ;;  %5247 = vrcp.f32 %v2895_v50  ;;  %v3002_v63 = vand.u32 2147483648, %v2895_v50  ;;  %v3000_v41 = vand.u32 2147483647, %v2895_v50 }
0x1240   :  { %vm2996_vm7 = vweird.f32 %v2895_v50 }
0x1241   :  { %v2980_v21 = vadd.f32 %v5246_v19, %v2979_v11  ;;  %v3003_v47 = vor.u32 1.1754944e-38, %v3002_v63  ;;  %vm3001_vm12 = vcmp.eq.f32.partialorder %v3000_v41, 8.507059e+37 }
0x1243   :  { %v2984_v59 = vsel %vm2983_vm4, %v5246_v19, %v2980_v21 }
0x1244   :  { %v2989_v5 = vsel %vm2986_vm5, %v2988_v36, %v2984_v59 }
0x1245   :  { %v5248_v48 = vpop.eup %5247  ;;  %v2990_v28 = vmul.f32 %v6718_v9, %v2989_v5 }
0x1246   :  { %v2992_v52 = vmul.f32 %v5248_v48, %v2895_v50  ;;  %v2897_v15 = vpop.xlane.xlu0 %2896  ;;  %vm2997_vm6 = vweird.f32 %v5248_v48 }
0x1247   :  { %5249 = vrcp.f32 %v2897_v15  ;;  %3184 = vmatmul.f32.gmra.mxu2 %v2990_v28  ;;  %vm2998_vm11 = vmor %vm2996_vm7, %vm2997_vm6  ;;  %v3017_v2 = vand.u32 2147483648, %v2897_v15  ;;  %v3015_v39 = vand.u32 2147483647, %v2897_v15  ;;  %vm3011_vm15 = vweird.f32 %v2897_v15 }
0x1248   :  { %v2993_v40 = vsub.f32 1.0, %v2992_v52 }
0x1249   :  { %v3018_v20 = vor.u32 1.1754944e-38, %v3017_v2  ;;  %vm3016_vm2 = vcmp.eq.f32.partialorder %v3015_v39, 8.507059e+37 }
0x124a   :  { %v2994_v60 = vmul.f32 %v5248_v48, %v2993_v40 }
0x124c   :  { %v2995_v13 = vadd.f32 %v5248_v48, %v2994_v60 }
0x124d   :  { %v5250_v25 = vpop.eup %5249 }
0x124e   :  { %v3007_v35 = vmul.f32 %v5250_v25, %v2897_v15  ;;  %v2999_v4 = vsel %vm2998_vm11, %v5248_v48, %v2995_v13  ;;  %vm3012_vm13 = vweird.f32 %v5250_v25 }
0x124f   :  { %v3004_v8 = vsel %vm3001_vm12, %v3003_v47, %v2999_v4  ;;  %vm3013_vm1 = vmor %vm3011_vm15, %vm3012_vm13 }
0x1250   :  { %v3008_v30 = vsub.f32 1.0, %v3007_v35  ;;  %v3005_v9 = vmul.f32 %v6723_v0, %v3004_v8 }
0x1252   :  { %v3009_v44 = vmul.f32 %v5250_v25, %v3008_v30  ;;  %3187 = vmatmul.f32.gmra.mxu2 %v3005_v9 }
0x1254   :  { %v3010_v27 = vadd.f32 %v5250_v25, %v3009_v44 }
0x1256   :  { %v3014_v37 = vsel %vm3013_vm1, %v5250_v25, %v3010_v27 }
0x1257   :  { %v3019_v23 = vsel %vm3016_vm2, %v3018_v20, %v3014_v37 }
0x1258   :  { %v3020_v42 = vmul.f32 %v6726_v32, %v3019_v23 }
0x125a   :  { %3190 = vmatmul.f32.gmra.mxu2 %v3020_v42 }
0x127c   :  { %v2899_v49 = vpop.xlane.xlu0 %2898 }
0x127d   :  { %5251 = vrcp.f32 %v2899_v49  ;;  %v3032_v7 = vand.u32 2147483648, %v2899_v49  ;;  %v3030_v12 = vand.u32 2147483647, %v2899_v49  ;;  %vm3026_vm4 = vweird.f32 %v2899_v49 }
0x127f   :  { %v3033_v17 = vor.u32 1.1754944e-38, %v3032_v7  ;;  %vm3031_vm6 = vcmp.eq.f32.partialorder %v3030_v12, 8.507059e+37 }
0x1283   :  { %v5252_v55 = vpop.eup %5251 }
0x1284   :  { %v3022_v31 = vmul.f32 %v5252_v55, %v2899_v49  ;;  %v2901_v0 = vpop.xlane.xlu0 %2900  ;;  %vm3027_vm3 = vweird.f32 %v5252_v55 }
0x1285   :  { %5253 = vrcp.f32 %v2901_v0  ;;  %vm3028_vm5 = vmor %vm3026_vm4, %vm3027_vm3  ;;  %v3047_v11 = vand.u32 2147483648, %v2901_v0  ;;  %v3045_v24 = vand.u32 2147483647, %v2901_v0  ;;  %vm3041_vm11 = vweird.f32 %v2901_v0 }
0x1286   :  { %v3023_v33 = vsub.f32 1.0, %v3022_v31 }
0x1287   :  { %v6818_v62 = vpop.xlane.xlu2 %2906  ;;  %v3048_v5 = vor.u32 1.1754944e-38, %v3047_v11  ;;  %vm3046_vm13 = vcmp.eq.f32.partialorder %v3045_v24, 8.507059e+37 }
0x1288   :  { %v3024_v58 = vmul.f32 %v5252_v55, %v3023_v33 }
0x128a   :  { %v3025_v26 = vadd.f32 %v5252_v55, %v3024_v58 }
0x128b   :  { %v5254_v61 = vpop.eup %5253 }
0x128c   :  { %v3037_v32 = vmul.f32 %v5254_v61, %v2901_v0  ;;  %v2905_v1 = vpop.xlane.xlu1 %2904  ;;  %v2903_v22 = vpop.xlane.xlu0 %2902  ;;  %v3029_v19 = vsel %vm3028_vm5, %v5252_v55, %v3025_v26  ;;  %vm3042_vm7 = vweird.f32 %v5254_v61  ;;  %v3092_v26 = vand.u32 2147483648, %v6818_v62 }
0x128d   :  { %5255 = vrcp.f32 %v2905_v1  ;;  %v3034_v29 = vsel %vm3031_vm6, %v3033_v17, %v3029_v19  ;;  %vm3043_vm12 = vmor %vm3041_vm11, %vm3042_vm7  ;;  %v3062_v25 = vand.u32 2147483648, %v2903_v22  ;;  %v3060_v4 = vand.u32 2147483647, %v2903_v22 }
0x128e   :  { %v3038_v43 = vsub.f32 1.0, %v3037_v32  ;;  %5257 = vrcp.f32 %v2903_v22  ;;  %v3035_v46 = vmul.f32 %v6750_v38, %v3034_v29  ;;  %vm3056_vm1 = vweird.f32 %v2903_v22 }
0x128f   :  { %5259 = vrcp.f32 %v6818_v62  ;;  %v3063_v9 = vor.u32 1.1754944e-38, %v3062_v25  ;;  %vm3061_vm3 = vcmp.eq.f32.partialorder %v3060_v4, 8.507059e+37  ;;  %v3077_v27 = vand.u32 2147483648, %v2905_v1 }
0x1290   :  { %v3039_v50 = vmul.f32 %v5254_v61, %v3038_v43  ;;  %3193 = vmatmul.f32.gmra.mxu2 %v3035_v46  ;;  %vm3071_vm5 = vweird.f32 %v2905_v1  ;;  %v3075_v23 = vand.u32 2147483647, %v2905_v1  ;;  %v3090_v17 = vand.u32 2147483647, %v6818_v62 }
0x1291   :  { %v3078_v31 = vor.u32 1.1754944e-38, %v3077_v27  ;;  %v6832_v0 = vpop.f32.mrf.mxu2  ;;  %v3093_v19 = vor.u32 1.1754944e-38, %v3092_v26 }
0x1292   :  { %v3040_v21 = vadd.f32 %v5254_v61, %v3039_v50  ;;  %vm3076_vm7 = vcmp.eq.f32.partialorder %v3075_v23, 8.507059e+37 }
0x1293   :  { %v5256_v36 = vpop.eup %5255 }
0x1294   :  { %v5258_v59 = vpop.eup %5257  ;;  %v3067_v48 = vmul.f32 %v5256_v36, %v2905_v1  ;;  %v3044_v28 = vsel %vm3043_vm12, %v5254_v61, %v3040_v21  ;;  %v6822_v40 = vpop.xlane.xlu0 %2908  ;;  %vm3072_vm4 = vweird.f32 %v5256_v36  ;;  %vm3086_vm12 = vweird.f32 %v6818_v62 }
0x1295   :  { %v5260_v52 = vpop.eup %5259  ;;  %v3052_v15 = vmul.f32 %v5258_v59, %v2903_v22  ;;  %v3049_v38 = vsel %vm3046_vm13, %v3048_v5, %v3044_v28  ;;  %5261 = vrcp.f32 %v6822_v40  ;;  %vm3057_vm15 = vweird.f32 %v5258_v59  ;;  %vm3073_vm6 = vmor %vm3071_vm5, %vm3072_vm4 }
0x1296   :  { %v3068_v63 = vsub.f32 1.0, %v3067_v48  ;;  %v3050_v41 = vmul.f32 %v6771_v54, %v3049_v38  ;;  %v3082_v13 = vmul.f32 %v5260_v52, %v6818_v62  ;;  %vm3058_vm2 = vmor %vm3056_vm1, %vm3057_vm15  ;;  %vm3087_vm11 = vweird.f32 %v5260_v52 }
0x1297   :  { %v3053_v60 = vsub.f32 1.0, %v3052_v15  ;;  %v6827_v2 = vpop.xlane.xlu1 %2910  ;;  %vm3088_vm13 = vmor %vm3086_vm12, %vm3087_vm11  ;;  %vm3091_vm15 = vcmp.eq.f32.partialorder %v3090_v17, 8.507059e+37  ;;  %v3105_v21 = vand.u32 2147483647, %v6822_v40 }
0x1298   :  { %v3069_v47 = vmul.f32 %v5256_v36, %v3068_v63  ;;  %3196 = vmatmul.f32.gmra.mxu2 %v3050_v41  ;;  %v3083_v30 = vsub.f32 1.0, %v3082_v13  ;;  %5263 = vrcp.f32 %v6827_v2  ;;  %v3122_v38 = vand.u32 2147483648, %v6827_v2 }
0x1299   :  { %v3054_v35 = vmul.f32 %v5258_v59, %v3053_v60  ;;  %v6843_v24 = vpop.f32.mrf.mxu2  ;;  %vm3106_vm4 = vcmp.eq.f32.partialorder %v3105_v21, 8.507059e+37 }
0x129a   :  { %v3070_v54 = vadd.f32 %v5256_v36, %v3069_v47  ;;  %v3084_v42 = vmul.f32 %v5260_v52, %v3083_v30  ;;  %v3123_v47 = vor.u32 1.1754944e-38, %v3122_v38 }
0x129b   :  { %v3055_v8 = vadd.f32 %v5258_v59, %v3054_v35  ;;  %v5262_v39 = vpop.eup %5261 }
0x129c   :  { %v3097_v49 = vmul.f32 %v5262_v39, %v6822_v40  ;;  %v3074_v55 = vsel %vm3073_vm6, %v5256_v36, %v3070_v54  ;;  %v3085_v12 = vadd.f32 %v5260_v52, %v3084_v42  ;;  %vm3102_vm1 = vweird.f32 %v5262_v39 }
0x129d   :  { %v3059_v44 = vsel %vm3058_vm2, %v5258_v59, %v3055_v8  ;;  %v3079_v33 = vsel %vm3076_vm7, %v3078_v31, %v3074_v55  ;;  %vm3101_vm2 = vweird.f32 %v6822_v40  ;;  %vm3116_vm6 = vweird.f32 %v6827_v2 }
0x129e   :  { %v3064_v20 = vsel %vm3061_vm3, %v3063_v9, %v3059_v44  ;;  %v3098_v58 = vsub.f32 1.0, %v3097_v49  ;;  %v3080_v61 = vmul.f32 %v6788_v56, %v3079_v33  ;;  %v3089_v22 = vsel %vm3088_vm13, %v5260_v52, %v3085_v12  ;;  %vm3103_vm3 = vmor %vm3101_vm2, %vm3102_vm1 }
0x129f   :  { %v3065_v37 = vmul.f32 %v6786_v34, %v3064_v20  ;;  %v6834_v7 = vpop.xlane.xlu2 %2912  ;;  %v5264_v34 = vpop.eup %5263  ;;  %v3094_v43 = vsel %vm3091_vm15, %v3093_v19, %v3089_v22  ;;  %v3107_v56 = vand.u32 2147483648, %v6822_v40  ;;  %v3120_v40 = vand.u32 2147483647, %v6827_v2  ;;  %v2577_v22 = vld [vmem:[#allocation4 + $0x240] sm:$0xff] }
0x12a0   :  { %5265 = vrcp.f32 %v6834_v7  ;;  %v3099_v32 = vmul.f32 %v5262_v39, %v3098_v58  ;;  %v3112_v1 = vmul.f32 %v5264_v34, %v6827_v2  ;;  %v3095_v62 = vmul.f32 %v6777_v45, %v3094_v43  ;;  %v2576_v19 = vld [vmem:[#allocation4 + $0x1a0] sm:$0xff]  ;;  %3306 = vmatpush.msrb.mxu3 %v2577_v22 }
0x12a1   :  { %3199 = vmatmul.f32.gmra.mxu2 %v3065_v37  ;;  %v3108_v48 = vor.u32 1.1754944e-38, %v3107_v56  ;;  %vm3117_vm5 = vweird.f32 %v5264_v34  ;;  %v6853_v60 = vpop.f32.mrf.mxu2  ;;  %vm3121_vm11 = vcmp.eq.f32.partialorder %v3120_v40, 8.507059e+37  ;;  %v3137_v30 = vand.u32 2147483648, %v6834_v7  ;;  %v2575_v43 = vld [vmem:[#allocation4 + $0x100] sm:$0xff] }
0x12a2   :  { %v3113_v29 = vsub.f32 1.0, %v3112_v1  ;;  %v3100_v50 = vadd.f32 %v5262_v39, %v3099_v32  ;;  %vm3118_vm7 = vmor %vm3116_vm6, %vm3117_vm5  ;;  %vm3131_vm13 = vweird.f32 %v6834_v7  ;;  %v3135_v9 = vand.u32 2147483647, %v6834_v7  ;;  %3307 = vmatpush.msrb.mxu3 %v2576_v19 }
0x12a3   :  { %v3138_v54 = vor.u32 1.1754944e-38, %v3137_v30  ;;  %v3474_v30 = vld [vmem:[#allocation4 + $0x70] sm:$0xff] }
0x12a4   :  { %v3114_v36 = vmul.f32 %v5264_v34, %v3113_v29  ;;  %v3104_v5 = vsel %vm3103_vm3, %v5262_v39, %v3100_v50  ;;  %vm3136_vm1 = vcmp.eq.f32.partialorder %v3135_v9, 8.507059e+37  ;;  %3308 = vmatpush.msrb.mxu3 %v2575_v43  ;;  %v2574_v29 = vld [vmem:[#allocation4 + $0x60] sm:$0xff] }
0x12a5   :  { %v3109_v28 = vsel %vm3106_vm4, %v3108_v48, %v3104_v5  ;;  %v6901_v9 = vld [vmem:[%s7431_s1] sm:$0xff] }
0x12a6   :  { %v5266_v11 = vpop.eup %5265  ;;  %v3115_v15 = vadd.f32 %v5264_v34, %v3114_v36  ;;  %v3110_v45 = vmul.f32 %v6800_v6, %v3109_v28  ;;  %3309 = vmatpush.msrb.mxu3 %v2574_v29 }
0x12a7   :  { %v2915_v46 = vpop.xlane.xlu0 %2914  ;;  %v3127_v59 = vmul.f32 %v5266_v11, %v6834_v7  ;;  %vm3132_vm12 = vweird.f32 %v5266_v11 }
0x12a8   :  { %5267 = vrcp.f32 %v2915_v46  ;;  %v3119_v25 = vsel %vm3118_vm7, %v5264_v34, %v3115_v15  ;;  %vm3133_vm15 = vmor %vm3131_vm13, %vm3132_vm12  ;;  %v3152_v37 = vand.u32 2147483648, %v2915_v46  ;;  %vm3146_vm3 = vweird.f32 %v2915_v46 }
0x12a9   :  { %3202 = vmatmul.f32.gmra.mxu2 %v3080_v61  ;;  %v3128_v52 = vsub.f32 1.0, %v3127_v59  ;;  %v3124_v35 = vsel %vm3121_vm11, %v3123_v47, %v3119_v25  ;;  %v6859_v39 = vpop.f32.mrf.mxu2  ;;  %v3150_v42 = vand.u32 2147483647, %v2915_v46 }
0x12aa   :  { %v3125_v6 = vmul.f32 %v6804_v57, %v3124_v35  ;;  %v3153_v49 = vor.u32 1.1754944e-38, %v3152_v37 }
0x12ab   :  { %v3129_v41 = vmul.f32 %v5266_v11, %v3128_v52  ;;  %vm3151_vm5 = vcmp.eq.f32.partialorder %v3150_v42, 8.507059e+37 }
0x12ad   :  { %v3130_v8 = vadd.f32 %v5266_v11, %v3129_v41 }
0x12ae   :  { %v5268_v63 = vpop.eup %5267 }
0x12af   :  { %v3142_v13 = vmul.f32 %v5268_v63, %v2915_v46  ;;  %v3134_v44 = vsel %vm3133_vm15, %v5266_v11, %v3130_v8  ;;  %vm3147_vm2 = vweird.f32 %v5268_v63  ;;  %v3476_v8 = vld [vmem:[#allocation4 + $0x110] sm:$0xff] }
0x12b0   :  { %v3139_v27 = vsel %vm3136_vm1, %v3138_v54, %v3134_v44  ;;  %vm3148_vm4 = vmor %vm3146_vm3, %vm3147_vm2 }
0x12b1   :  { %3205 = vmatmul.f32.gmra.mxu2 %v3095_v62  ;;  %v3143_v4 = vsub.f32 1.0, %v3142_v13  ;;  %v3140_v23 = vmul.f32 %v6809_v16, %v3139_v27  ;;  %v6913_v27 = vld [vmem:[%s7431_s1 + $0x8] sm:$0xff] }
0x12b3   :  { %v3144_v2 = vmul.f32 %v5268_v63, %v3143_v4  ;;  %v3478_v4 = vld [vmem:[#allocation4 + $0x1b0] sm:$0xff] }
0x12b5   :  { %v3145_v20 = vadd.f32 %v5268_v63, %v3144_v2 }
0x12b7   :  { %v3149_v57 = vsel %vm3148_vm4, %v5268_v63, %v3145_v20 }
0x12b8   :  { %v3154_v31 = vsel %vm3151_vm5, %v3153_v49, %v3149_v57 }
0x12b9   :  { %3208 = vmatmul.f32.gmra.mxu2 %v3110_v45  ;;  %v3155_v33 = vmul.f32 %v6812_v53, %v3154_v31 }
0x12c1   :  { %3211 = vmatmul.f32.gmra.mxu2 %v3125_v6  ;;  %v5022_v6 = vld [vmem:[%s7435_s5 + $0x15] ss:$0 sm:$0xff] }
0x12c9   :  { %3214 = vmatmul.f32.gmra.mxu2 %v3140_v23 }
0x12ca   :  { %v3185_v55 = vpop.f32.mrf.mxu2 }
0x12cb   :  { %3225 = vrot.lane.b32.xlu1 %v3185_v55, %s5476_s14 }
0x12d1   :  { %3217 = vmatmul.f32.gmra.mxu2 %v3155_v33 }
0x12d5   :  { %v3188_v58 = vpop.f32.mrf.mxu2 }
0x12dd   :  { %v3191_v7 = vpop.f32.mrf.mxu2 }
0x1313   :  { %v3194_v12 = vpop.f32.mrf.mxu2 }
0x131b   :  { %v3197_v34 = vpop.f32.mrf.mxu2 }
0x131c   :  { %3241 = vrot.lane.b32.xlu2 %v3197_v34, %s5479_s19 }
0x1324   :  { %v3200_v16 = vpop.f32.mrf.mxu2  ;;  %3227 = vrot.lane.b32.xlu2 %v3188_v58, %s5476_s14 }
0x1325   :  { %3243 = vrot.lane.b32.xlu1 %v3200_v16, %s5479_s19 }
0x132c   :  { %v3203_v26 = vpop.f32.mrf.mxu2  ;;  %3229 = vrot.lane.b32.xlu2 %v3191_v7, %s5476_s14 }
0x132d   :  { %3245 = vrot.lane.b32.xlu1 %v3203_v26, %s5479_s19 }
0x1334   :  { %v3206_v61 = vpop.f32.mrf.mxu2  ;;  %3231 = vrot.lane.b32.xlu2 %v3194_v12, %s5476_s14 }
0x1335   :  { %3247 = vrot.lane.b32.xlu1 %v3206_v61, %s5479_s19 }
0x133c   :  { %v3209_v53 = vpop.f32.mrf.mxu2 }
0x133d   :  { %3257 = vrot.lane.b32.xlu0 %v3209_v53, %s5484_s6  ;;  %v3226_v50 = vpop.permute.xlu1 %3225 }
0x133e   :  { %v3269_v11 = vsel %vm449_vm14, %v6832_v0, %v3226_v50 }
0x1344   :  { %v3212_v17 = vpop.f32.mrf.mxu2 }
0x1345   :  { %3259 = vrot.lane.b32.xlu0 %v3212_v17, %s5484_s6 }
0x134c   :  { %v3215_v32 = vpop.f32.mrf.mxu2 }
0x134d   :  { %3261 = vrot.lane.b32.xlu0 %v3215_v32, %s5484_s6 }
0x1354   :  { %v3218_v1 = vpop.f32.mrf.mxu2 }
0x1355   :  { %3263 = vrot.lane.b32.xlu0 %v3218_v1, %s5484_s6 }
0x1376   :  { %v3242_v46 = vpop.permute.xlu2 %3241 }
0x1377   :  { %v3273_v56 = vsel %vm1048_vm8, %v3269_v11, %v3242_v46 }
0x137e   :  { %v3228_v62 = vpop.permute.xlu2 %3227 }
0x137f   :  { %v3270_v5 = vsel %vm449_vm14, %v6843_v24, %v3228_v62 }
0x1386   :  { %v3230_v15 = vpop.permute.xlu2 %3229 }
0x1387   :  { %v3271_v63 = vsel %vm449_vm14, %v6853_v60, %v3230_v15  ;;  %v3480_v60 = vld [vmem:[#allocation4 + $0x250] sm:$0xff]  ;;  %v3427_v15 = vld [vmem:[#allocation4 + $0x68] sm:$0xff] }
0x1388   :  { %3494 = vmatpush.msra.mxu3 %v3480_v60 }
0x138a   :  { %3495 = vmatpush.msra.mxu3 %v3478_v4 }
0x138c   :  { %3496 = vmatpush.msra.mxu3 %v3476_v8 }
0x138e   :  { %v3232_v24 = vpop.permute.xlu2 %3231  ;;  %3497 = vmatpush.msra.mxu3 %v3474_v30 }
0x138f   :  { %v3272_v13 = vsel %vm449_vm14, %v6859_v39, %v3232_v24 }
0x1397   :  { %v3244_v36 = vpop.permute.xlu1 %3243 }
0x1398   :  { %v3274_v48 = vsel %vm1048_vm8, %v3270_v5, %v3244_v36 }
0x139f   :  { %v3246_v0 = vpop.permute.xlu1 %3245 }
0x13a0   :  { %v3275_v38 = vsel %vm1048_vm8, %v3271_v63, %v3246_v0 }
0x13a7   :  { %v3248_v41 = vpop.permute.xlu1 %3247 }
0x13a8   :  { %v3276_v25 = vsel %vm1048_vm8, %v3272_v13, %v3248_v41 }
0x13af   :  { %v3258_v21 = vpop.permute.xlu0 %3257 }
0x13b0   :  { %v3277_v59 = vsel %vm1053_vm9, %v3273_v56, %v3258_v21  ;;  %v5023_v56 = vld [vmem:[%s7435_s5 + $0x19] ss:$0 sm:$0xff] }
0x13b1   :  { %4821 = vmatmul.msk.f32.vlgmr.msrb.gmra.mxu3 %vm113_vm0, %v3277_v59 }
0x13b7   :  { %v3260_v28 = vpop.permute.xlu0 %3259 }
0x13b8   :  { %v3278_v52 = vsel %vm1053_vm9, %v3274_v48, %v3260_v28  ;;  %v3430_v48 = vld [vmem:[#allocation4 + $0x248] sm:$0xff] }
0x13b9   :  { %4822 = vmatmul.msk.f32.gmra.mxu3 %vm113_vm0, %v3278_v52  ;;  %3457 = vmatpush.msra.mxu0 %v3430_v48  ;;  %v3429_v28 = vld [vmem:[#allocation4 + $0x1a8] sm:$0xff] }
0x13ba   :  { %v3428_v52 = vld [vmem:[#allocation4 + $0x108] sm:$0xff] }
0x13bb   :  { %3458 = vmatpush.msra.mxu0 %v3429_v28 }
0x13bd   :  { %3459 = vmatpush.msra.mxu0 %v3428_v52 }
0x13bf   :  { %v3262_v45 = vpop.permute.xlu0 %3261  ;;  %3460 = vmatpush.msra.mxu0 %v3427_v15 }
0x13c0   :  { %v3279_v40 = vsel %vm1053_vm9, %v3275_v38, %v3262_v45 }
0x13c1   :  { %4823 = vmatmul.msk.f32.gmra.mxu3 %vm113_vm0, %v3279_v40 }
0x13c7   :  { %v3264_v47 = vpop.permute.xlu0 %3263 }
0x13c8   :  { %v3280_v35 = vsel %vm1053_vm9, %v3276_v25, %v3264_v47 }
0x13c9   :  { %4824 = vmatmul.msk.f32.gmra.mxu3 %vm113_vm0, %v3280_v35 }
0x13d1   :  { %4829 = vmatmul.msk.f32.vlgmr.msra.gmra.mxu3 %vm113_vm0, %v6901_v9 }
0x13d9   :  { %4830 = vmatmul.msk.f32.gmra.mxu3 %vm113_vm0, %v6913_v27 }
0x1434   :  { %v3311_v2 = vpop.f32.mrf.mxu3 }
0x1435   :  { %v3312_v44 = vadd.f32 %v5022_v6, %v3311_v2 }
0x1437   :  { %v6906_v54 = vadd.f32 %v3312_v44, %v6459_v3  ;;  %v5024_v44 = vld [vmem:[%s7435_s5 + $0x16] ss:$0 sm:$0xff] }
0x1439   :  { %v3329_v39 = vsel %vm113_vm0, %v6906_v54, 0.0 }
0x143a   :  { %3330 = vadd.xlane.f32.xlu2 %v3329_v39 }
0x143c   :  { %v3314_v20 = vpop.f32.mrf.mxu3 }
0x143d   :  { %v3315_v37 = vadd.f32 %v5022_v6, %v3314_v20 }
0x143f   :  { %v6918_v23 = vadd.f32 %v3315_v37, %v6464_v18  ;;  %v5025_v37 = vld [vmem:[%s7435_s5 + $0x17] ss:$0 sm:$0xff] }
0x1441   :  { %v3332_v3 = vsel %vm113_vm0, %v6918_v23, 0.0 }
0x1442   :  { %3333 = vadd.xlane.f32.xlu1 %v3332_v3 }
0x1444   :  { %v3317_v42 = vpop.f32.mrf.mxu3 }
0x1445   :  { %v3318_v57 = vadd.f32 %v5022_v6, %v3317_v42 }
0x1447   :  { %v6923_v49 = vadd.f32 %v3318_v57, %v6469_v51 }
0x1449   :  { %v3335_v55 = vsel %vm113_vm0, %v6923_v49, 0.0 }
0x144a   :  { %3336 = vadd.xlane.f32.xlu0 %v3335_v55 }
0x144c   :  { %v3320_v31 = vpop.f32.mrf.mxu3 }
0x144d   :  { %v3321_v33 = vadd.f32 %v5022_v6, %v3320_v31 }
0x144f   :  { %v6928_v58 = vadd.f32 %v3321_v33, %v6474_v10 }
0x1451   :  { %v3338_v18 = vsel %vm113_vm0, %v6928_v58, 0.0 }
0x1452   :  { %3339 = vadd.xlane.f32.xlu2 %v3338_v18 }
0x1454   :  { %v3499_v19 = vpop.f32.mrf.mxu3 }
0x1455   :  { %v6967_v5 = vadd.f32 %v5023_v56, %v3499_v19 }
0x145c   :  { %v3502_v21 = vpop.f32.mrf.mxu3 }
0x145d   :  { %v6963_v59 = vadd.f32 %v5023_v56, %v3502_v21 }
0x14ad   :  { %v3331_v7 = vpop.xlane.xlu2 %3330 }
0x14ae   :  { %v3341_v12 = vmul.f32 %v3331_v7, %v5540_v14 }
0x14b0   :  { %v6934_v34 = vsub.f32 %v6906_v54, %v3341_v12 }
0x14b2   :  { %v3349_v51 = vmul.f32 %v6934_v34, %v6934_v34 }
0x14b4   :  { %v3353_v16 = vsel %vm113_vm0, %v3349_v51, 0.0 }
0x14b5   :  { %3354 = vadd.xlane.f32.xlu1 %v3353_v16  ;;  %v3334_v26 = vpop.xlane.xlu1 %3333 }
0x14b6   :  { %v3342_v10 = vmul.f32 %v3334_v26, %v5540_v14 }
0x14b8   :  { %v6941_v61 = vsub.f32 %v6918_v23, %v3342_v10 }
0x14ba   :  { %v3350_v53 = vmul.f32 %v6941_v61, %v6941_v61 }
0x14bc   :  { %v3356_v17 = vsel %vm113_vm0, %v3350_v53, 0.0 }
0x14bd   :  { %3357 = vadd.xlane.f32.xlu0 %v3356_v17  ;;  %v3337_v32 = vpop.xlane.xlu0 %3336 }
0x14be   :  { %v3343_v1 = vmul.f32 %v3337_v32, %v5540_v14 }
0x14c0   :  { %v6948_v22 = vsub.f32 %v6923_v49, %v3343_v1 }
0x14c2   :  { %v3351_v43 = vmul.f32 %v6948_v22, %v6948_v22 }
0x14c4   :  { %v3359_v29 = vsel %vm113_vm0, %v3351_v43, 0.0 }
0x14c5   :  { %v3340_v46 = vpop.xlane.xlu2 %3339  ;;  %3360 = vadd.xlane.f32.xlu2 %v3359_v29 }
0x14c6   :  { %v3344_v50 = vmul.f32 %v3340_v46, %v5540_v14 }
0x14c8   :  { %v6955_v11 = vsub.f32 %v6928_v58, %v3344_v50 }
0x14ca   :  { %v3352_v62 = vmul.f32 %v6955_v11, %v6955_v11 }
0x14cc   :  { %v3362_v36 = vsel %vm113_vm0, %v3352_v62, 0.0 }
0x14cd   :  { %3363 = vadd.xlane.f32.xlu1 %v3362_v36 }
0x14d1   :  { %3581 = vrot.lane.b32.xlu0 %v6963_v59, %s5481_s25 }
0x14d9   :  { %3575 = vrot.lane.b32.xlu0 %v6967_v5, %s5482_s26 }
0x14dd   :  { %3579 = vrot.lane.b32.xlu2 %v6967_v5, %s5481_s25 }
0x14e1   :  { %3573 = vrot.lane.b32.xlu0 %v6963_v59, %s5483_s27 }
0x14e5   :  { %3571 = vrot.lane.b32.xlu2 %v6967_v5, %s5483_s27 }
0x14e6   :  { %3577 = vrot.lane.b32.xlu1 %v6963_v59, %s5482_s26 }
0x1528   :  { %v3355_v0 = vpop.xlane.xlu1 %3354 }
0x1529   :  { %v3365_v63 = vmul.f32 %v3355_v0, %v5540_v14 }
0x152b   :  { %v3369_v38 = vadd.f32 1e-05, %v3365_v63 }
0x152d   :  { %5269 = vrsqrt.f32 %v3369_v38  ;;  %vm3379_vm7 = vweird.f32 %v3369_v38 }
0x1530   :  { %v3358_v45 = vpop.xlane.xlu0 %3357 }
0x1531   :  { %v3366_v40 = vmul.f32 %v3358_v45, %v5540_v14 }
0x1533   :  { %v5270_v24 = vpop.eup %5269  ;;  %v3370_v41 = vadd.f32 1e-05, %v3366_v40 }
0x1534   :  { %v3374_v13 = vmul.f32 %v5270_v24, %v3369_v38  ;;  %vm3380_vm6 = vweird.f32 %v5270_v24 }
0x1535   :  { %5271 = vrsqrt.f32 %v3370_v41  ;;  %vm3381_vm11 = vmor %vm3379_vm7, %vm3380_vm6  ;;  %vm3389_vm13 = vweird.f32 %v3370_v41 }
0x1536   :  { %v3375_v25 = vmul.f32 %v5270_v24, %v3374_v13 }
0x1538   :  { %v3376_v47 = vmul.f32 0.5, %v3375_v25  ;;  %v3361_v35 = vpop.xlane.xlu2 %3360 }
0x1539   :  { %v3367_v60 = vmul.f32 %v3361_v35, %v5540_v14 }
0x153a   :  { %v3377_v4 = vsub.f32 1.5, %v3376_v47 }
0x153b   :  { %v5272_v8 = vpop.eup %5271  ;;  %v3371_v30 = vadd.f32 1e-05, %v3367_v60 }
0x153c   :  { %v3378_v6 = vmul.f32 %v5270_v24, %v3377_v4  ;;  %v3384_v2 = vmul.f32 %v5272_v8, %v3370_v41  ;;  %vm3390_vm12 = vweird.f32 %v5272_v8  ;;  %v3481_v4 = vld [vmem:[#allocation4 + $0x258] sm:$0xff] }
0x153d   :  { %5273 = vrsqrt.f32 %v3371_v30  ;;  %vm3391_vm15 = vmor %vm3389_vm13, %vm3390_vm12  ;;  %vm3399_vm2 = vweird.f32 %v3371_v30  ;;  %3517 = vmatpush.msrb.mxu0 %v3481_v4 }
0x153e   :  { %v3382_v39 = vsel %vm3381_vm11, %v5270_v24, %v3378_v6  ;;  %v3385_v20 = vmul.f32 %v5272_v8, %v3384_v2  ;;  %v3477_v6 = vld [vmem:[#allocation4 + $0x118] sm:$0xff] }
0x153f   :  { %v3413_v3 = vmul.f32 %v3382_v39, %v6934_v34  ;;  %v3475_v2 = vld [vmem:[#allocation4 + $0x78] sm:$0xff] }
0x1540   :  { %v3386_v42 = vmul.f32 0.5, %v3385_v20  ;;  %v3364_v57 = vpop.xlane.xlu1 %3363  ;;  %v3580_v34 = vpop.permute.xlu2 %3579 }
0x1541   :  { %v3418_v55 = vmul.f32 %v5024_v44, %v3413_v3  ;;  %v3368_v31 = vmul.f32 %v3364_v57, %v5540_v14 }
0x1542   :  { %v3387_v33 = vsub.f32 1.5, %v3386_v42 }
0x1543   :  { %v5274_v18 = vpop.eup %5273  ;;  %v3423_v7 = vadd.f32 %v5025_v37, %v3418_v55  ;;  %v3372_v12 = vadd.f32 1e-05, %v3368_v31  ;;  %v3582_v51 = vpop.permute.xlu0 %3581 }
0x1544   :  { %v3388_v16 = vmul.f32 %v5272_v8, %v3387_v33  ;;  %v3394_v26 = vmul.f32 %v5274_v18, %v3371_v30  ;;  %4833 = vmatpush.xpose.msk.msrb.mxu3 %vm449_vm14, %v3582_v51  ;;  %vm3400_vm1 = vweird.f32 %v5274_v18  ;;  %v3479_v30 = vld [vmem:[#allocation4 + $0x1b8] sm:$0xff] }
0x1545   :  { %5275 = vrsqrt.f32 %v3372_v12  ;;  %4825 = vmatmul.msk.f32.vlgmr.msra.gmra.mxu0 %vm113_vm0, %v3423_v7  ;;  %vm3401_vm3 = vmor %vm3399_vm2, %vm3400_vm1  ;;  %vm3409_vm5 = vweird.f32 %v3372_v12  ;;  %v5381_v7 = vld [vmem:[%s7433_s3 + $0x10] sm:$0xff] }
0x1546   :  { %v3392_v10 = vsel %vm3391_vm15, %v5272_v8, %v3388_v16  ;;  %v3395_v53 = vmul.f32 %v5274_v18, %v3394_v26  ;;  %3518 = vmatpush.msrb.mxu0 %v3479_v30  ;;  %v5387_v30 = vld [vmem:[%s7433_s3 + $0x40] sm:$0xff] }
0x1547   :  { %v3414_v17 = vmul.f32 %v3392_v10, %v6941_v61 }
0x1548   :  { %v3396_v32 = vmul.f32 0.5, %v3395_v53  ;;  %4834 = vmatpush.xpose.msk.msrb.mxu3 %vm449_vm14, %v3580_v34  ;;  %v3572_v24 = vpop.permute.xlu2 %3571  ;;  %3519 = vmatpush.msrb.mxu0 %v3477_v6  ;;  %v5382_v34 = vld [vmem:[%s7433_s3 + $0x18] sm:$0xff] }
0x1549   :  { %v3419_v1 = vmul.f32 %v5024_v44, %v3414_v17 }
0x154a   :  { %v3397_v19 = vsub.f32 1.5, %v3396_v32  ;;  %3520 = vmatpush.msrb.mxu0 %v3475_v2 }
0x154b   :  { %v5276_v43 = vpop.eup %5275  ;;  %v3424_v29 = vadd.f32 %v5025_v37, %v3419_v1  ;;  %v3576_v15 = vpop.permute.xlu0 %3575 }
0x154c   :  { %v3398_v46 = vmul.f32 %v5274_v18, %v3397_v19  ;;  %v3404_v50 = vmul.f32 %v5276_v43, %v3372_v12  ;;  %vm3410_vm4 = vweird.f32 %v5276_v43 }
0x154d   :  { %4826 = vmatmul.msk.f32.gmra.mxu0 %vm113_vm0, %v3424_v29  ;;  %vm3411_vm6 = vmor %vm3409_vm5, %vm3410_vm4 }
0x154e   :  { %v3402_v56 = vsel %vm3401_vm3, %v5274_v18, %v3398_v46  ;;  %v3405_v62 = vmul.f32 %v5276_v43, %v3404_v50  ;;  %v5383_v50 = vld [vmem:[%s7433_s3 + $0x20] sm:$0xff] }
0x154f   :  { %v3415_v21 = vmul.f32 %v3402_v56, %v6948_v22 }
0x1550   :  { %v3406_v36 = vmul.f32 0.5, %v3405_v62 }
0x1551   :  { %v3420_v61 = vmul.f32 %v5024_v44, %v3415_v21 }
0x1552   :  { %v3407_v48 = vsub.f32 1.5, %v3406_v36 }
0x1553   :  { %v3425_v28 = vadd.f32 %v5025_v37, %v3420_v61  ;;  %v3574_v22 = vpop.permute.xlu0 %3573 }
0x1554   :  { %v3408_v52 = vmul.f32 %v5276_v43, %v3407_v48 }
0x1555   :  { %4827 = vmatmul.msk.f32.gmra.mxu0 %vm113_vm0, %v3425_v28  ;;  %v5384_v28 = vld [vmem:[%s7433_s3 + $0x28] sm:$0xff] }
0x1556   :  { %v3412_v0 = vsel %vm3411_vm6, %v5276_v43, %v3408_v52 }
0x1557   :  { %v3416_v63 = vmul.f32 %v3412_v0, %v6955_v11  ;;  %v5026_v11 = vld [vmem:[%s7435_s5 + $0x18] ss:$0 sm:$0xff] }
0x1558   :  { %v3578_v38 = vpop.permute.xlu1 %3577 }
0x1559   :  { %v3421_v45 = vmul.f32 %v5024_v44, %v3416_v63  ;;  %4835 = vmatpush.xpose.msk.msrb.mxu3 %vm449_vm14, %v3578_v38 }
0x155b   :  { %v3426_v40 = vadd.f32 %v5025_v37, %v3421_v45  ;;  %v5379_v37 = vld [vmem:[%s7433_s3] sm:$0xff] }
0x155d   :  { %4828 = vmatmul.msk.f32.gmra.mxu0 %vm113_vm0, %v3426_v40  ;;  %4836 = vmatpush.xpose.msk.msrb.mxu3 %vm449_vm14, %v3576_v15 }
0x1561   :  { %4837 = vmatpush.xpose.msk.msrb.mxu3 %vm449_vm14, %v3574_v22 }
0x1565   :  { %4838 = vmatpush.xpose.msk.msrb.mxu3 %vm449_vm14, %v3572_v24  ;;  %4831 = vmatmul.msk.f32.vlgmr.msrb.gmra.mxu0 %vm113_vm0, %v6901_v9  ;;  %v5380_v9 = vld [vmem:[%s7433_s3 + $0x8] sm:$0xff]  ;;  %v5385_v24 = vld [vmem:[%s7433_s3 + $0x30] sm:$0xff] }
0x1569   :  { %4839 = vmatpush.xpose.msk.msrb.mxu3 %vm449_vm14, %v6963_v59 }
0x156d   :  { %4840 = vmatpush.xpose.msk.msrb.mxu3 %vm449_vm14, %v6967_v5  ;;  %4832 = vmatmul.msk.f32.gmra.mxu0 %vm113_vm0, %v6913_v27 }
0x15c2   :  { %v3462_v41 = vpop.f32.mrf.mxu0 }
0x15c3   :  { %v3463_v13 = vadd.f32 %v5026_v11, %v3462_v41 }
0x15c5   :  { %3545 = vrot.lane.b32.xlu1 %v3463_v13, %s5483_s27  ;;  %4841 = vmatmul.msk.f32.vlgmr.msrb.gmra.mxu3 %vm449_vm14, %v3463_v13 }
0x15ca   :  { %v3465_v25 = vpop.f32.mrf.mxu0 }
0x15cb   :  { %v3466_v47 = vadd.f32 %v5026_v11, %v3465_v25 }
0x15cd   :  { %3547 = vrot.lane.b32.xlu0 %v3466_v47, %s5483_s27  ;;  %4842 = vmatmul.msk.f32.gmra.mxu3 %vm449_vm14, %v3466_v47 }
0x15d2   :  { %v3468_v59 = vpop.f32.mrf.mxu0 }
0x15d3   :  { %v3469_v35 = vadd.f32 %v5026_v11, %v3468_v59 }
0x15d5   :  { %3549 = vrot.lane.b32.xlu2 %v3469_v35, %s5483_s27  ;;  %3553 = vrot.lane.b32.xlu0 %v3463_v13, %s5482_s26 }
0x15d6   :  { %4843 = vmatmul.msk.f32.gmra.mxu3 %vm449_vm14, %v3469_v35 }
0x15da   :  { %v3471_v5 = vpop.f32.mrf.mxu0 }
0x15db   :  { %v3472_v60 = vadd.f32 %v5026_v11, %v3471_v5 }
0x15dd   :  { %3551 = vrot.lane.b32.xlu1 %v3472_v60, %s5483_s27  ;;  %3555 = vrot.lane.b32.xlu2 %v3466_v47, %s5482_s26 }
0x15de   :  { %3559 = vrot.lane.b32.xlu0 %v3472_v60, %s5482_s26  ;;  %4844 = vmatmul.msk.f32.gmra.mxu3 %vm449_vm14, %v3472_v60 }
0x15e2   :  { %v3522_v59 = vpop.f32.mrf.mxu0 }
0x15e5   :  { %3557 = vrot.lane.b32.xlu1 %v3469_v35, %s5482_s26  ;;  %3561 = vrot.lane.b32.xlu2 %v3463_v13, %s5481_s25 }
0x15e6   :  { %3565 = vrot.lane.b32.xlu0 %v3469_v35, %s5481_s25  ;;  %v5386_v35 = vld [vmem:[%s7433_s3 + $0x38] sm:$0xff] }
0x15ea   :  { %v3525_v2 = vpop.f32.mrf.mxu0 }
0x15ed   :  { %3563 = vrot.lane.b32.xlu1 %v3466_v47, %s5481_s25  ;;  %3567 = vrot.lane.b32.xlu2 %v3472_v60, %s5481_s25 }
0x162f   :  { %v3550_v39 = vpop.permute.xlu2 %3549 }
0x1637   :  { %v3546_v8 = vpop.permute.xlu1 %3545  ;;  %v3556_v16 = vpop.permute.xlu2 %3555 }
0x1638   :  { %4845 = vmatmul.msk.f32.gmra.mxu3 %vm449_vm14, %v3546_v8  ;;  %v5027_v8 = vld [vmem:[%s7435_s5 + $0x1a] ss:$0 sm:$0xff] }
0x163f   :  { %v3548_v44 = vpop.permute.xlu0 %3547  ;;  %v3562_v1 = vpop.permute.xlu2 %3561 }
0x1640   :  { %4846 = vmatmul.msk.f32.gmra.mxu3 %vm449_vm14, %v3548_v44 }
0x1647   :  { %v3554_v27 = vpop.permute.xlu0 %3553  ;;  %v3568_v29 = vpop.permute.xlu2 %3567 }
0x1648   :  { %v3668_v20 = vpop.f32.mrf.mxu3  ;;  %4847 = vmatmul.msk.f32.gmra.mxu3 %vm449_vm14, %v3550_v39  ;;  %v7110_v39 = vadd.f32 %v5027_v8, %v3522_v59 }
0x1649   :  { %v3669_v3 = vadd.f32 %v5379_v37, %v3668_v20  ;;  %v7112_v20 = vadd.f32 %v5027_v8, %v3525_v2 }
0x164b   :  { %v3716_v42 = vsel %vm1499_vm10, %v3669_v3, -inf  ;;  %v4986_v37 = vpack.i.bf16 %v7110_v39, %v7112_v20 }
0x164c   :  { %3717 = vmax.xlane.f32.xlu1 %v3716_v42 }
0x164f   :  { %v3552_v57 = vpop.permute.xlu1 %3551 }
0x1650   :  { %v3671_v55 = vpop.f32.mrf.mxu3  ;;  %4848 = vmatmul.msk.f32.gmra.mxu3 %vm449_vm14, %v3552_v57  ;;  %v3560_v32 = vpop.permute.xlu0 %3559 }
0x1651   :  { %v3672_v31 = vadd.f32 %v5380_v9, %v3671_v55 }
0x1653   :  { %v3719_v33 = vsel %vm1499_vm10, %v3672_v31, -inf }
0x1654   :  { %3720 = vmax.xlane.f32.xlu0 %v3719_v33 }
0x1657   :  { %v3558_v17 = vpop.permute.xlu1 %3557 }
0x1658   :  { %4849 = vmatmul.msk.f32.gmra.mxu3 %vm449_vm14, %v3554_v27  ;;  %v3566_v43 = vpop.permute.xlu0 %3565 }
0x1659   :  { %v3674_v18 = vpop.f32.mrf.mxu3 }
0x165a   :  { %v7046_v12 = vadd.f32 %v5381_v7, %v3674_v18 }
0x165c   :  { %v3722_v51 = vsel %vm1499_vm10, %v7046_v12, -inf }
0x165d   :  { %3723 = vmax.xlane.f32.xlu2 %v3722_v51  ;;  %v5388_v51 = vld [vmem:[%s7433_s3 + $0x48] sm:$0xff] }
0x165f   :  { %v3564_v19 = vpop.permute.xlu1 %3563 }
0x1660   :  { %4850 = vmatmul.msk.f32.gmra.mxu3 %vm449_vm14, %v3556_v16 }
0x1661   :  { %v3677_v26 = vpop.f32.mrf.mxu3 }
0x1662   :  { %v7054_v10 = vadd.f32 %v5382_v34, %v3677_v26  ;;  %v5389_v26 = vld [vmem:[%s7433_s3 + $0x50] sm:$0xff] }
0x1664   :  { %v3725_v53 = vsel %vm1499_vm10, %v7054_v10, -inf }
0x1665   :  { %3726 = vmax.xlane.f32.xlu1 %v3725_v53 }
0x1668   :  { %4851 = vmatmul.msk.f32.gmra.mxu3 %vm449_vm14, %v3558_v17 }
0x1670   :  { %4852 = vmatmul.msk.f32.gmra.mxu3 %vm449_vm14, %v3560_v32 }
0x1678   :  { %4853 = vmatmul.msk.f32.gmra.mxu3 %vm449_vm14, %v3562_v1  ;;  %v5390_v1 = vld [vmem:[%s7433_s3 + $0x58] sm:$0xff] }
0x1680   :  { %4854 = vmatmul.msk.f32.gmra.mxu3 %vm449_vm14, %v3564_v19 }
0x1688   :  { %4855 = vmatmul.msk.f32.gmra.mxu3 %vm449_vm14, %v3566_v43 }
0x1690   :  { %4856 = vmatmul.msk.f32.gmra.mxu3 %vm449_vm14, %v3568_v29  ;;  %v5391_v29 = vld [vmem:[%s7433_s3 + $0x60] sm:$0xff] }
0x16bb   :  { %v3680_v46 = vpop.f32.mrf.mxu3 }
0x16bc   :  { %v7067_v56 = vadd.f32 %v5383_v50, %v3680_v46 }
0x16be   :  { %v3728_v62 = vsel %vm1499_vm10, %v7067_v56, -inf }
0x16bf   :  { %3729 = vmax.xlane.f32.xlu0 %v3728_v62  ;;  %v3718_v21 = vpop.xlane.xlu1 %3717 }
0x16c0   :  { %v3764_v36 = vsub.f32 %v3669_v3, %v3718_v21 }
0x16c2   :  { %v3780_v61 = vmul.f32 1.442695, %v3764_v36 }
0x16c3   :  { %v3683_v48 = vpop.f32.mrf.mxu3 }
0x16c4   :  { %5277 = vpow2.f32 %v3780_v61  ;;  %v7074_v52 = vadd.f32 %v5384_v28, %v3683_v48 }
0x16c6   :  { %v3731_v15 = vsel %vm1499_vm10, %v7074_v52, -inf }
0x16c7   :  { %3732 = vmax.xlane.f32.xlu2 %v3731_v15  ;;  %v3721_v0 = vpop.xlane.xlu0 %3720 }
0x16c8   :  { %v3765_v63 = vsub.f32 %v3672_v31, %v3721_v0 }
0x16ca   :  { %v7078_v38 = vpop.eup %5277  ;;  %v3782_v45 = vmul.f32 1.442695, %v3765_v63 }
0x16cb   :  { %v3686_v40 = vpop.f32.mrf.mxu3  ;;  %v3812_v22 = vsel %vm1499_vm10, %v7078_v38, 0.0 }
0x16cc   :  { %5279 = vpow2.f32 %v3782_v45  ;;  %v7085_v11 = vadd.f32 %v5385_v24, %v3686_v40  ;;  %3813 = vadd.xlane.f32.xlu0 %v3812_v22 }
0x16ce   :  { %v3734_v41 = vsel %vm1499_vm10, %v7085_v11, -inf }
0x16cf   :  { %3735 = vmax.xlane.f32.xlu1 %v3734_v41 }
0x16d0   :  { %v3724_v3 = vpop.xlane.xlu2 %3723 }
0x16d1   :  { %v3766_v57 = vsub.f32 %v7046_v12, %v3724_v3 }
0x16d2   :  { %v7089_v13 = vpop.eup %5279 }
0x16d3   :  { %v3689_v25 = vpop.f32.mrf.mxu3  ;;  %v3815_v47 = vsel %vm1499_vm10, %v7089_v13, 0.0  ;;  %v3784_v55 = vmul.f32 1.442695, %v3766_v57 }
0x16d4   :  { %v7096_v5 = vadd.f32 %v5386_v35, %v3689_v25  ;;  %3816 = vadd.xlane.f32.xlu0 %v3815_v47  ;;  %v5392_v25 = vld [vmem:[%s7433_s3 + $0x68] sm:$0xff] }
0x16d5   :  { %5281 = vpow2.f32 %v3784_v55 }
0x16d6   :  { %v3737_v60 = vsel %vm1499_vm10, %v7096_v5, -inf }
0x16d7   :  { %3738 = vmax.xlane.f32.xlu2 %v3737_v60 }
0x16d8   :  { %v3727_v9 = vpop.xlane.xlu1 %3726 }
0x16d9   :  { %v3767_v33 = vsub.f32 %v7054_v10, %v3727_v9 }
0x16db   :  { %v3692_v4 = vpop.f32.mrf.mxu3  ;;  %v7121_v27 = vpop.eup %5281  ;;  %v3786_v18 = vmul.f32 1.442695, %v3767_v33 }
0x16dc   :  { %v7106_v6 = vadd.f32 %v5387_v30, %v3692_v4  ;;  %v3818_v7 = vsel %vm1499_vm10, %v7121_v27, 0.0 }
0x16dd   :  { %5283 = vpow2.f32 %v3786_v18 }
0x16de   :  { %v3740_v44 = vsel %vm1499_vm10, %v7106_v6, -inf }
0x16df   :  { %3741 = vmax.xlane.f32.xlu0 %v3740_v44  ;;  %v5393_v44 = vld [vmem:[%s7433_s3 + $0x70] sm:$0xff] }
0x16e3   :  { %v3695_v42 = vpop.f32.mrf.mxu3  ;;  %v7137_v53 = vpop.eup %5283 }
0x16e4   :  { %v7128_v16 = vadd.f32 %v5388_v51, %v3695_v42  ;;  %v3821_v32 = vsel %vm1499_vm10, %v7137_v53, 0.0 }
0x16e6   :  { %v3743_v10 = vsel %vm1499_vm10, %v7128_v16, -inf }
0x16e8   :  { %4987 = vrot.lane.b32.xlu1 %v4986_v37, %s5481_s25 }
0x16eb   :  { %v3698_v31 = vpop.f32.mrf.mxu3 }
0x16ec   :  { %v7133_v34 = vadd.f32 %v5389_v26, %v3698_v31 }
0x16ee   :  { %v3746_v17 = vsel %vm1499_vm10, %v7133_v34, -inf }
0x16ef   :  { %4992 = vrot.lane.b32.xlu2 %v4986_v37, %s5482_s26 }
0x16f3   :  { %4997 = vrot.lane.b32.xlu0 %v4986_v37, %s5483_s27  ;;  %v3701_v12 = vpop.f32.mrf.mxu3 }
0x16f4   :  { %v7146_v19 = vadd.f32 %v5390_v1, %v3701_v12 }
0x16f6   :  { %v3749_v50 = vsel %vm1499_vm10, %v7146_v19, -inf }
0x16fb   :  { %v3704_v43 = vpop.f32.mrf.mxu3 }
0x16fc   :  { %v7151_v46 = vadd.f32 %v5391_v29, %v3704_v43 }
0x16fe   :  { %v3752_v62 = vsel %vm1499_vm10, %v7151_v46, -inf }
0x1703   :  { %v3707_v22 = vpop.f32.mrf.mxu3 }
0x1704   :  { %v7173_v47 = vadd.f32 %v5392_v25, %v3707_v22 }
0x1706   :  { %v3755_v2 = vsel %vm1499_vm10, %v7173_v47, -inf }
0x170b   :  { %v3710_v4 = vpop.f32.mrf.mxu3 }
0x1712   :  { %3819 = vadd.xlane.f32.xlu1 %v3818_v7 }
0x1713   :  { %v3713_v33 = vpop.f32.mrf.mxu3 }
0x1718   :  { %3744 = vmax.xlane.f32.xlu2 %v3743_v10 }
0x171a   :  { %3747 = vmax.xlane.f32.xlu1 %v3746_v17 }
0x171d   :  { %3822 = vadd.xlane.f32.xlu0 %v3821_v32 }
0x1722   :  { %3750 = vmax.xlane.f32.xlu1 %v3749_v50 }
0x1725   :  { %3753 = vmax.xlane.f32.xlu0 %v3752_v62 }
0x1732   :  { %v3730_v21 = vpop.xlane.xlu0 %3729 }
0x1733   :  { %v3768_v36 = vsub.f32 %v7067_v56, %v3730_v21 }
0x1735   :  { %v3788_v61 = vmul.f32 1.442695, %v3768_v36 }
0x1737   :  { %5285 = vpow2.f32 %v3788_v61 }
0x173a   :  { %v3733_v48 = vpop.xlane.xlu2 %3732 }
0x173b   :  { %v3769_v28 = vsub.f32 %v7074_v52, %v3733_v48 }
0x173d   :  { %v7159_v15 = vpop.eup %5285  ;;  %v3790_v0 = vmul.f32 1.442695, %v3769_v28 }
0x173e   :  { %v3824_v63 = vsel %vm1499_vm10, %v7159_v15, 0.0 }
0x173f   :  { %5287 = vpow2.f32 %v3790_v0  ;;  %3825 = vadd.xlane.f32.xlu2 %v3824_v63  ;;  %v7163_v45 = vpop.xlane.xlu0 %3813 }
0x1740   :  { %v3871_v28 = vand.u32 2147483648, %v7163_v45  ;;  %vm3865_vm11 = vweird.f32 %v7163_v45  ;;  %v3869_v0 = vand.u32 2147483647, %v7163_v45 }
0x1742   :  { %v3736_v40 = vpop.xlane.xlu1 %3735  ;;  %vm3870_vm13 = vcmp.eq.f32.partialorder %v3869_v0, 8.507059e+37 }
0x1743   :  { %v3770_v24 = vsub.f32 %v7085_v11, %v3736_v40 }
0x1745   :  { %v7166_v56 = vpop.eup %5287  ;;  %v3792_v41 = vmul.f32 1.442695, %v3770_v24 }
0x1746   :  { %v3827_v52 = vsel %vm1499_vm10, %v7166_v56, 0.0 }
0x1747   :  { %5289 = vpow2.f32 %v3792_v41  ;;  %3828 = vadd.xlane.f32.xlu2 %v3827_v52  ;;  %v7175_v59 = vpop.xlane.xlu0 %3816  ;;  %v3872_v52 = vor.u32 1.1754944e-38, %v3871_v28 }
0x1748   :  { %5291 = vrcp.f32 %v7163_v45  ;;  %vm3880_vm1 = vweird.f32 %v7175_v59 }
0x174a   :  { %v3739_v35 = vpop.xlane.xlu2 %3738 }
0x174b   :  { %v3771_v60 = vsub.f32 %v7096_v5, %v3739_v35  ;;  %v7188_v5 = vadd.f32 %v5393_v44, %v3710_v4 }
0x174d   :  { %v7178_v11 = vpop.eup %5289  ;;  %v3794_v8 = vmul.f32 1.442695, %v3771_v60  ;;  %v3758_v9 = vsel %vm1499_vm10, %v7188_v5, -inf  ;;  %v3886_v60 = vand.u32 2147483648, %v7175_v59 }
0x174e   :  { %v3830_v30 = vsel %vm1499_vm10, %v7178_v11, 0.0  ;;  %v5292_v42 = vpop.eup %5291 }
0x174f   :  { %5293 = vpow2.f32 %v3794_v8  ;;  %3831 = vadd.xlane.f32.xlu1 %v3830_v30  ;;  %3756 = vmax.xlane.f32.xlu2 %v3755_v2  ;;  %v3861_v18 = vmul.f32 %v5292_v42, %v7163_v45  ;;  %vm3866_vm7 = vweird.f32 %v5292_v42  ;;  %v3884_v45 = vand.u32 2147483647, %v7175_v59 }
0x1750   :  { %5295 = vrcp.f32 %v7175_v59  ;;  %vm3867_vm12 = vmor %vm3865_vm11, %vm3866_vm7  ;;  %v3887_v30 = vor.u32 1.1754944e-38, %v3886_v60 }
0x1751   :  { %v3862_v12 = vsub.f32 1.0, %v3861_v18  ;;  %vm3885_vm3 = vcmp.eq.f32.partialorder %v3884_v45, 8.507059e+37 }
0x1752   :  { %v3742_v37 = vpop.xlane.xlu0 %3741  ;;  %v4993_v1 = vpop.permute.xlu2 %4992 }
0x1753   :  { %v3772_v3 = vsub.f32 %v7106_v6, %v3742_v37  ;;  %v5394_v6 = vld [vmem:[%s7433_s3 + $0x78] sm:$0xff]  ;;  %v3863_v50 = vmul.f32 %v5292_v42, %v3862_v12  ;;  %v4994_v21 = vunpack.i.l.bf16 %v4993_v1  ;;  %v4995_v36 = vunpack.i.h.bf16 %v4993_v1 }
0x1754   :  { %v7202_v7 = vadd.f32 %v5394_v6, %v3713_v33 }
0x1755   :  { %v7191_v57 = vpop.eup %5293  ;;  %v3796_v55 = vmul.f32 1.442695, %v3772_v3  ;;  %v3864_v61 = vadd.f32 %v5292_v42, %v3863_v50 }
0x1756   :  { %v3833_v31 = vsel %vm1499_vm10, %v7191_v57, 0.0  ;;  %v5296_v10 = vpop.eup %5295  ;;  %v3761_v43 = vsel %vm1499_vm10, %v7202_v7, -inf }
0x1757   :  { %5297 = vpow2.f32 %v3796_v55  ;;  %3759 = vmax.xlane.f32.xlu1 %v3758_v9  ;;  %3834 = vadd.xlane.f32.xlu0 %v3833_v31  ;;  %v3876_v62 = vmul.f32 %v5296_v10, %v7175_v59  ;;  %v3868_v24 = vsel %vm3867_vm12, %v5292_v42, %v3864_v61  ;;  %vm3881_vm15 = vweird.f32 %v5296_v10 }
0x1758   :  { %v3873_v25 = vsel %vm3870_vm13, %v3872_v52, %v3868_v24  ;;  %vm3882_vm2 = vmor %vm3880_vm1, %vm3881_vm15 }
0x1759   :  { %v3877_v48 = vsub.f32 1.0, %v3876_v62  ;;  %v3874_v4 = vmul.f32 %v7078_v38, %v3873_v25 }
0x175a   :  { %v4988_v51 = vpop.permute.xlu1 %4987 }
0x175b   :  { %v4989_v26 = vunpack.i.l.bf16 %v4988_v51  ;;  %v4990_v17 = vunpack.i.h.bf16 %v4988_v51  ;;  %v3878_v41 = vmul.f32 %v5296_v10, %v3877_v48 }
0x175d   :  { %v7204_v32 = vpop.eup %5297  ;;  %4156 = vmatpush.msra.mxu0 %v4989_v26  ;;  %v3879_v35 = vadd.f32 %v5296_v10, %v3878_v41 }
0x175e   :  { %v3836_v29 = vsel %vm1499_vm10, %v7204_v32, 0.0 }
0x175f   :  { %3762 = vmax.xlane.f32.xlu0 %v3761_v43  ;;  %3837 = vadd.xlane.f32.xlu2 %v3836_v29  ;;  %v3883_v8 = vsel %vm3882_vm2, %v5296_v10, %v3879_v35 }
0x1760   :  { %4157 = vmatpush.msra.mxu0 %v4990_v17  ;;  %v3888_v2 = vsel %vm3885_vm3, %v3887_v30, %v3883_v8 }
0x1761   :  { %v3889_v44 = vmul.f32 %v7089_v13, %v3888_v2 }
0x1762   :  { %4158 = vmatpush.msra.mxu0 %v4994_v21 }
0x1764   :  { %4159 = vmatpush.msra.mxu0 %v4995_v36 }
0x1765   :  { %v4998_v63 = vpop.permute.xlu0 %4997 }
0x1766   :  { %v5000_v40 = vunpack.i.h.bf16 %v4998_v63  ;;  %v4999_v22 = vunpack.i.l.bf16 %v4998_v63 }
0x1768   :  { %4160 = vmatpush.msra.mxu0 %v4999_v22 }
0x176a   :  { %4161 = vmatpush.msra.mxu0 %v5000_v40 }
0x176c   :  { %4162 = vmatpush.msra.mxu0 %v7112_v20 }
0x176e   :  { %4163 = vmatpush.msra.mxu0 %v7110_v39 }
0x176f   :  { %4857 = vmatmul.msk.f32.vlgmr.msra.gmra.mxu0 %vm1499_vm10, %v3874_v4 }
0x1777   :  { %4858 = vmatmul.msk.f32.gmra.mxu0 %vm1499_vm10, %v3889_v44 }
0x1785   :  { %v3820_v20 = vpop.xlane.xlu1 %3819 }
0x1786   :  { %5299 = vrcp.f32 %v3820_v20  ;;  %v3901_v31 = vand.u32 2147483648, %v3820_v20  ;;  %v3899_v13 = vand.u32 2147483647, %v3820_v20  ;;  %vm3895_vm5 = vweird.f32 %v3820_v20 }
0x1788   :  { %v3902_v12 = vor.u32 1.1754944e-38, %v3901_v31  ;;  %vm3900_vm7 = vcmp.eq.f32.partialorder %v3899_v13, 8.507059e+37 }
0x178b   :  { %v3745_v38 = vpop.xlane.xlu2 %3744 }
0x178c   :  { %v5300_v37 = vpop.eup %5299  ;;  %v3773_v3 = vsub.f32 %v7128_v16, %v3745_v38 }
0x178d   :  { %v3891_v59 = vmul.f32 %v5300_v37, %v3820_v20  ;;  %v3748_v42 = vpop.xlane.xlu1 %3747  ;;  %vm3896_vm4 = vweird.f32 %v5300_v37 }
0x178e   :  { %v3798_v55 = vmul.f32 1.442695, %v3773_v3  ;;  %v3774_v39 = vsub.f32 %v7133_v34, %v3748_v42  ;;  %vm3897_vm6 = vmor %vm3895_vm5, %vm3896_vm4 }
0x178f   :  { %v3892_v9 = vsub.f32 1.0, %v3891_v59 }
0x1790   :  { %5301 = vpow2.f32 %v3798_v55  ;;  %v3800_v33 = vmul.f32 1.442695, %v3774_v39  ;;  %v3823_v18 = vpop.xlane.xlu0 %3822 }
0x1791   :  { %v3893_v6 = vmul.f32 %v5300_v37, %v3892_v9  ;;  %5303 = vrcp.f32 %v3823_v18  ;;  %v3916_v28 = vand.u32 2147483648, %v3823_v18  ;;  %vm3910_vm12 = vweird.f32 %v3823_v18 }
0x1792   :  { %5305 = vpow2.f32 %v3800_v33 }
0x1793   :  { %v3894_v51 = vadd.f32 %v5300_v37, %v3893_v6  ;;  %v3917_v22 = vor.u32 1.1754944e-38, %v3916_v28 }
0x1795   :  { %v3751_v16 = vpop.xlane.xlu1 %3750  ;;  %v3898_v26 = vsel %vm3897_vm6, %v5300_v37, %v3894_v51 }
0x1796   :  { %v7225_v10 = vpop.eup %5301  ;;  %v3775_v34 = vsub.f32 %v7146_v19, %v3751_v16  ;;  %v3903_v17 = vsel %vm3900_vm7, %v3902_v12, %v3898_v26 }
0x1797   :  { %v5304_v1 = vpop.eup %5303  ;;  %v3839_v43 = vsel %vm1499_vm10, %v7225_v10, 0.0  ;;  %v3904_v29 = vmul.f32 %v7121_v27, %v3903_v17  ;;  %v3914_v27 = vand.u32 2147483647, %v3823_v18 }
0x1798   :  { %v7231_v50 = vpop.eup %5305  ;;  %v3906_v62 = vmul.f32 %v5304_v1, %v3823_v18  ;;  %v3802_v21 = vmul.f32 1.442695, %v3775_v34  ;;  %3840 = vadd.xlane.f32.xlu1 %v3839_v43  ;;  %v3754_v36 = vpop.xlane.xlu0 %3753  ;;  %vm3911_vm11 = vweird.f32 %v5304_v1 }
0x1799   :  { %v3776_v61 = vsub.f32 %v7151_v46, %v3754_v36  ;;  %4859 = vmatmul.msk.f32.gmra.mxu0 %vm1499_vm10, %v3904_v29  ;;  %v3842_v19 = vsel %vm1499_vm10, %v7231_v50, 0.0  ;;  %vm3912_vm13 = vmor %vm3910_vm12, %vm3911_vm11  ;;  %vm3915_vm15 = vcmp.eq.f32.partialorder %v3914_v27, 8.507059e+37 }
0x179a   :  { %v3907_v48 = vsub.f32 1.0, %v3906_v62  ;;  %5307 = vpow2.f32 %v3802_v21  ;;  %3843 = vadd.xlane.f32.xlu2 %v3842_v19 }
0x179b   :  { %v3804_v0 = vmul.f32 1.442695, %v3776_v61 }
0x179c   :  { %v3908_v63 = vmul.f32 %v5304_v1, %v3907_v48 }
0x179d   :  { %5309 = vpow2.f32 %v3804_v0 }
0x179e   :  { %v3909_v40 = vadd.f32 %v5304_v1, %v3908_v63 }
0x17a0   :  { %v7237_v24 = vpop.eup %5307  ;;  %v3913_v46 = vsel %vm3912_vm13, %v5304_v1, %v3909_v40 }
0x17a1   :  { %v3845_v41 = vsel %vm1499_vm10, %v7237_v24, 0.0  ;;  %v3918_v52 = vsel %vm3915_vm15, %v3917_v22, %v3913_v46 }
0x17a2   :  { %3846 = vadd.xlane.f32.xlu0 %v3845_v41  ;;  %v3919_v25 = vmul.f32 %v7137_v53, %v3918_v52 }
0x17a3   :  { %v7242_v35 = vpop.eup %5309 }
0x17a4   :  { %4860 = vmatmul.msk.f32.gmra.mxu0 %vm1499_vm10, %v3919_v25  ;;  %v3848_v60 = vsel %vm1499_vm10, %v7242_v35, 0.0 }
0x17a5   :  { %3849 = vadd.xlane.f32.xlu1 %v3848_v60 }
0x17b2   :  { %v3826_v4 = vpop.xlane.xlu2 %3825 }
0x17b3   :  { %5311 = vrcp.f32 %v3826_v4  ;;  %v3931_v20 = vand.u32 2147483648, %v3826_v4  ;;  %v3929_v38 = vand.u32 2147483647, %v3826_v4  ;;  %vm3925_vm2 = vweird.f32 %v3826_v4 }
0x17b5   :  { %v3932_v3 = vor.u32 1.1754944e-38, %v3931_v20  ;;  %vm3930_vm4 = vcmp.eq.f32.partialorder %v3929_v38, 8.507059e+37 }
0x17b9   :  { %v5312_v45 = vpop.eup %5311 }
0x17ba   :  { %v3921_v8 = vmul.f32 %v5312_v45, %v3826_v4  ;;  %v3829_v30 = vpop.xlane.xlu2 %3828  ;;  %vm3926_vm1 = vweird.f32 %v5312_v45 }
0x17bb   :  { %5313 = vrcp.f32 %v3829_v30  ;;  %vm3927_vm3 = vmor %vm3925_vm2, %vm3926_vm1  ;;  %v3946_v13 = vand.u32 2147483648, %v3829_v30  ;;  %v3944_v12 = vand.u32 2147483647, %v3829_v30  ;;  %vm3940_vm6 = vweird.f32 %v3829_v30 }
0x17bc   :  { %v3922_v2 = vsub.f32 1.0, %v3921_v8 }
0x17bd   :  { %v3947_v34 = vor.u32 1.1754944e-38, %v3946_v13  ;;  %vm3945_vm11 = vcmp.eq.f32.partialorder %v3944_v12, 8.507059e+37 }
0x17be   :  { %v3923_v44 = vmul.f32 %v5312_v45, %v3922_v2 }
0x17c0   :  { %v3924_v53 = vadd.f32 %v5312_v45, %v3923_v44 }
0x17c1   :  { %v5314_v37 = vpop.eup %5313 }
0x17c2   :  { %v3936_v59 = vmul.f32 %v5314_v37, %v3829_v30  ;;  %v3832_v42 = vpop.xlane.xlu1 %3831  ;;  %v3757_v55 = vpop.xlane.xlu2 %3756  ;;  %v3928_v39 = vsel %vm3927_vm3, %v5312_v45, %v3924_v53  ;;  %vm3941_vm5 = vweird.f32 %v5314_v37 }
0x17c3   :  { %5315 = vrcp.f32 %v3832_v42  ;;  %v3777_v31 = vsub.f32 %v7173_v47, %v3757_v55  ;;  %v3933_v33 = vsel %vm3930_vm4, %v3932_v3, %v3928_v39  ;;  %vm3942_vm7 = vmor %vm3940_vm6, %vm3941_vm5  ;;  %v3961_v48 = vand.u32 2147483648, %v3832_v42 }
0x17c4   :  { %v3937_v9 = vsub.f32 1.0, %v3936_v59  ;;  %v3934_v18 = vmul.f32 %v7159_v15, %v3933_v33  ;;  %v3959_v28 = vand.u32 2147483647, %v3832_v42  ;;  %vm3955_vm13 = vweird.f32 %v3832_v42 }
0x17c5   :  { %v3806_v51 = vmul.f32 1.442695, %v3777_v31  ;;  %v3962_v27 = vor.u32 1.1754944e-38, %v3961_v48 }
0x17c6   :  { %v3938_v6 = vmul.f32 %v5314_v37, %v3937_v9  ;;  %4861 = vmatmul.msk.f32.gmra.mxu0 %vm1499_vm10, %v3934_v18  ;;  %vm3960_vm1 = vcmp.eq.f32.partialorder %v3959_v28, 8.507059e+37 }
0x17c7   :  { %5317 = vpow2.f32 %v3806_v51 }
0x17c8   :  { %v3939_v16 = vadd.f32 %v5314_v37, %v3938_v6 }
0x17c9   :  { %v5316_v26 = vpop.eup %5315 }
0x17ca   :  { %v3951_v17 = vmul.f32 %v5316_v26, %v3832_v42  ;;  %v3760_v1 = vpop.xlane.xlu1 %3759  ;;  %v3835_v43 = vpop.xlane.xlu0 %3834  ;;  %v3943_v47 = vsel %vm3942_vm7, %v5314_v37, %v3939_v16  ;;  %vm3956_vm12 = vweird.f32 %v5316_v26 }
0x17cb   :  { %v3778_v15 = vsub.f32 %v7188_v5, %v3760_v1  ;;  %5319 = vrcp.f32 %v3835_v43  ;;  %v3948_v62 = vsel %vm3945_vm11, %v3947_v34, %v3943_v47  ;;  %vm3957_vm15 = vmor %vm3955_vm13, %vm3956_vm12  ;;  %v3974_v4 = vand.u32 2147483647, %v3835_v43 }
0x17cc   :  { %v3952_v29 = vsub.f32 1.0, %v3951_v17  ;;  %v3949_v36 = vmul.f32 %v7166_v56, %v3948_v62  ;;  %v3976_v45 = vand.u32 2147483648, %v3835_v43  ;;  %vm3970_vm3 = vweird.f32 %v3835_v43 }
0x17cd   :  { %v3808_v21 = vmul.f32 1.442695, %v3778_v15  ;;  %v7252_v61 = vpop.eup %5317  ;;  %vm3975_vm5 = vcmp.eq.f32.partialorder %v3974_v4, 8.507059e+37 }
0x17ce   :  { %v3953_v19 = vmul.f32 %v5316_v26, %v3952_v29  ;;  %4862 = vmatmul.msk.f32.gmra.mxu0 %vm1499_vm10, %v3949_v36  ;;  %v3851_v0 = vsel %vm1499_vm10, %v7252_v61, 0.0  ;;  %v3977_v38 = vor.u32 1.1754944e-38, %v3976_v45 }
0x17cf   :  { %5321 = vpow2.f32 %v3808_v21  ;;  %3852 = vadd.xlane.f32.xlu2 %v3851_v0 }
0x17d0   :  { %v3954_v63 = vadd.f32 %v5316_v26, %v3953_v19 }
0x17d1   :  { %v5320_v5 = vpop.eup %5319 }
0x17d2   :  { %v3966_v40 = vmul.f32 %v5320_v5, %v3835_v43  ;;  %v3838_v56 = vpop.xlane.xlu2 %3837  ;;  %v3763_v22 = vpop.xlane.xlu0 %3762  ;;  %v3958_v46 = vsel %vm3957_vm15, %v5316_v26, %v3954_v63  ;;  %vm3971_vm2 = vweird.f32 %v5320_v5 }
0x17d3   :  { %5323 = vrcp.f32 %v3838_v56  ;;  %v3779_v52 = vsub.f32 %v7202_v7, %v3763_v22  ;;  %v3963_v25 = vsel %vm3960_vm1, %v3962_v27, %v3958_v46  ;;  %vm3972_vm4 = vmor %vm3970_vm3, %vm3971_vm2  ;;  %v3991_v42 = vand.u32 2147483648, %v3838_v56 }
0x17d4   :  { %v3967_v41 = vsub.f32 1.0, %v3966_v40  ;;  %v3964_v8 = vmul.f32 %v7178_v11, %v3963_v25  ;;  %v3989_v9 = vand.u32 2147483647, %v3838_v56  ;;  %vm3985_vm7 = vweird.f32 %v3838_v56 }
0x17d5   :  { %v7258_v60 = vpop.eup %5321  ;;  %v3810_v2 = vmul.f32 1.442695, %v3779_v52  ;;  %v3992_v18 = vor.u32 1.1754944e-38, %v3991_v42 }
0x17d6   :  { %v3968_v30 = vmul.f32 %v5320_v5, %v3967_v41  ;;  %v3854_v44 = vsel %vm1499_vm10, %v7258_v60, 0.0  ;;  %4863 = vmatmul.msk.f32.gmra.mxu0 %vm1499_vm10, %v3964_v8  ;;  %vm3990_vm12 = vcmp.eq.f32.partialorder %v3989_v9, 8.507059e+37 }
0x17d7   :  { %3855 = vadd.xlane.f32.xlu0 %v3854_v44  ;;  %5325 = vpow2.f32 %v3810_v2 }
0x17d8   :  { %v3969_v20 = vadd.f32 %v5320_v5, %v3968_v30 }
0x17d9   :  { %v5324_v7 = vpop.eup %5323 }
0x17da   :  { %v3981_v53 = vmul.f32 %v5324_v7, %v3838_v56  ;;  %v3973_v37 = vsel %vm3972_vm4, %v5320_v5, %v3969_v20  ;;  %vm3986_vm6 = vweird.f32 %v5324_v7 }
0x17db   :  { %v3978_v3 = vsel %vm3975_vm5, %v3977_v38, %v3973_v37  ;;  %vm3987_vm11 = vmor %vm3985_vm7, %vm3986_vm6 }
0x17dc   :  { %v3982_v11 = vsub.f32 1.0, %v3981_v53  ;;  %v3979_v59 = vmul.f32 %v7191_v57, %v3978_v3 }
0x17dd   :  { %v7265_v55 = vpop.eup %5325 }
0x17de   :  { %v3983_v39 = vmul.f32 %v5324_v7, %v3982_v11  ;;  %4864 = vmatmul.msk.f32.gmra.mxu0 %vm1499_vm10, %v3979_v59  ;;  %v3857_v31 = vsel %vm1499_vm10, %v7265_v55, 0.0 }
0x17df   :  { %3858 = vadd.xlane.f32.xlu1 %v3857_v31 }
0x17e0   :  { %v3984_v33 = vadd.f32 %v5324_v7, %v3983_v39 }
0x17e2   :  { %v3988_v6 = vsel %vm3987_vm11, %v5324_v7, %v3984_v33 }
0x17e3   :  { %v3993_v13 = vsel %vm3990_vm12, %v3992_v18, %v3988_v6 }
0x17e4   :  { %v3994_v57 = vmul.f32 %v7204_v32, %v3993_v13 }
0x17e6   :  { %4865 = vmatmul.msk.f32.gmra.mxu0 %vm1499_vm10, %v3994_v57 }
0x17ec   :  { %v7274_v45 = vpop.f32.mrf.mxu0 }
0x17f4   :  { %v7278_v11 = vpop.f32.mrf.mxu0 }
0x180b   :  { %v3841_v51 = vpop.xlane.xlu1 %3840 }
0x180c   :  { %5327 = vrcp.f32 %v3841_v51  ;;  %v4006_v47 = vand.u32 2147483648, %v3841_v51  ;;  %v4004_v29 = vand.u32 2147483647, %v3841_v51  ;;  %vm4000_vm15 = vweird.f32 %v3841_v51 }
0x180d   :  { %v3844_v12 = vpop.xlane.xlu2 %3843 }
0x180e   :  { %5329 = vrcp.f32 %v3844_v12  ;;  %v4007_v19 = vor.u32 1.1754944e-38, %v4006_v47  ;;  %vm4005_vm2 = vcmp.eq.f32.partialorder %v4004_v29, 8.507059e+37  ;;  %v4021_v63 = vand.u32 2147483648, %v3844_v12 }
0x180f   :  { %vm4015_vm4 = vweird.f32 %v3844_v12  ;;  %v4019_v27 = vand.u32 2147483647, %v3844_v12 }
0x1810   :  { %v4022_v52 = vor.u32 1.1754944e-38, %v4021_v63 }
0x1811   :  { %vm4020_vm6 = vcmp.eq.f32.partialorder %v4019_v27, 8.507059e+37 }
0x1812   :  { %v5328_v16 = vpop.eup %5327 }
0x1813   :  { %v3996_v26 = vmul.f32 %v5328_v16, %v3841_v51  ;;  %vm4001_vm13 = vweird.f32 %v5328_v16 }
0x1814   :  { %v5330_v34 = vpop.eup %5329  ;;  %vm4002_vm1 = vmor %vm4000_vm15, %vm4001_vm13 }
0x1815   :  { %v3997_v17 = vsub.f32 1.0, %v3996_v26  ;;  %v4011_v1 = vmul.f32 %v5330_v34, %v3844_v12  ;;  %v3847_v43 = vpop.xlane.xlu0 %3846  ;;  %vm4016_vm3 = vweird.f32 %v5330_v34 }
0x1816   :  { %5331 = vrcp.f32 %v3847_v43  ;;  %vm4017_vm5 = vmor %vm4015_vm4, %vm4016_vm3  ;;  %v4036_v44 = vand.u32 2147483648, %v3847_v43  ;;  %vm4030_vm11 = vweird.f32 %v3847_v43  ;;  %v4034_v20 = vand.u32 2147483647, %v3847_v43  ;;  %v7282_v33 = vpop.f32.mrf.mxu0 }
0x1817   :  { %v3998_v15 = vmul.f32 %v5328_v16, %v3997_v17  ;;  %v4012_v62 = vsub.f32 1.0, %v4011_v1 }
0x1818   :  { %v3850_v21 = vpop.xlane.xlu1 %3849  ;;  %v4037_v53 = vor.u32 1.1754944e-38, %v4036_v44  ;;  %vm4035_vm13 = vcmp.eq.f32.partialorder %v4034_v20, 8.507059e+37 }
0x1819   :  { %v3999_v32 = vadd.f32 %v5328_v16, %v3998_v15  ;;  %v4013_v36 = vmul.f32 %v5330_v34, %v4012_v62  ;;  %5333 = vrcp.f32 %v3850_v21  ;;  %v4051_v59 = vand.u32 2147483648, %v3850_v21 }
0x181a   :  { %v4049_v42 = vand.u32 2147483647, %v3850_v21 }
0x181b   :  { %v4014_v48 = vadd.f32 %v5330_v34, %v4013_v36  ;;  %v4003_v28 = vsel %vm4002_vm1, %v5328_v16, %v3999_v32  ;;  %vm4045_vm1 = vweird.f32 %v3850_v21  ;;  %v4052_v9 = vor.u32 1.1754944e-38, %v4051_v59 }
0x181c   :  { %v5332_v0 = vpop.eup %5331  ;;  %v4008_v5 = vsel %vm4005_vm2, %v4007_v19, %v4003_v28  ;;  %vm4050_vm3 = vcmp.eq.f32.partialorder %v4049_v42, 8.507059e+37  ;;  %v3538_v42 = vld [vmem:[#allocation4 + $0x1c0] sm:$0xff] }
0x181d   :  { %v4026_v40 = vmul.f32 %v5332_v0, %v3847_v43  ;;  %v4009_v56 = vmul.f32 %v7225_v10, %v4008_v5  ;;  %v4018_v41 = vsel %vm4017_vm5, %v5330_v34, %v4014_v48  ;;  %vm4031_vm7 = vweird.f32 %v5332_v0 }
0x181e   :  { %v4023_v8 = vsel %vm4020_vm6, %v4022_v52, %v4018_v41  ;;  %vm4032_vm12 = vmor %vm4030_vm11, %vm4031_vm7 }
0x181f   :  { %v5334_v22 = vpop.eup %5333  ;;  %v4027_v46 = vsub.f32 1.0, %v4026_v40  ;;  %4866 = vmatmul.msk.f32.gmra.mxu0 %vm1499_vm10, %v4009_v56  ;;  %v4024_v10 = vmul.f32 %v7231_v50, %v4023_v8 }
0x1820   :  { %v4041_v25 = vmul.f32 %v5334_v22, %v3850_v21  ;;  %vm4046_vm15 = vweird.f32 %v5334_v22 }
0x1821   :  { %v4028_v4 = vmul.f32 %v5332_v0, %v4027_v46  ;;  %vm4047_vm2 = vmor %vm4045_vm1, %vm4046_vm15  ;;  %v7286_v6 = vpop.f32.mrf.mxu0 }
0x1822   :  { %v4042_v2 = vsub.f32 1.0, %v4041_v25 }
0x1823   :  { %v4029_v30 = vadd.f32 %v5332_v0, %v4028_v4 }
0x1824   :  { %v4043_v7 = vmul.f32 %v5334_v22, %v4042_v2 }
0x1825   :  { %v4033_v38 = vsel %vm4032_vm12, %v5332_v0, %v4029_v30 }
0x1826   :  { %v4038_v37 = vsel %vm4035_vm13, %v4037_v53, %v4033_v38  ;;  %v4044_v3 = vadd.f32 %v5334_v22, %v4043_v7 }
0x1827   :  { %4867 = vmatmul.msk.f32.gmra.mxu0 %vm1499_vm10, %v4024_v10  ;;  %v4039_v39 = vmul.f32 %v7237_v24, %v4038_v37  ;;  %v3539_v37 = vld [vmem:[#allocation4 + $0x260] sm:$0xff] }
0x1828   :  { %v4048_v50 = vsel %vm4047_vm2, %v5334_v22, %v4044_v3  ;;  %4298 = vmatpush.msrb.mxu1 %v3539_v37 }
0x1829   :  { %v4053_v31 = vsel %vm4050_vm3, %v4052_v9, %v4048_v50  ;;  %v3536_v50 = vld [vmem:[#allocation4 + $0x80] sm:$0xff] }
0x182a   :  { %v4054_v18 = vmul.f32 %v7242_v35, %v4053_v31  ;;  %4299 = vmatpush.msrb.mxu1 %v3538_v42 }
0x182f   :  { %4868 = vmatmul.msk.f32.gmra.mxu0 %vm1499_vm10, %v4039_v39  ;;  %v3537_v39 = vld [vmem:[#allocation4 + $0x120] sm:$0xff] }
0x1830   :  { %4300 = vmatpush.msrb.mxu1 %v3537_v39 }
0x1832   :  { %4301 = vmatpush.msrb.mxu1 %v3536_v50  ;;  %v4421_v50 = vld [vmem:[#allocation4 + $0x1c8] sm:$0xff] }
0x1837   :  { %4869 = vmatmul.msk.f32.gmra.mxu0 %vm1499_vm10, %v4054_v18 }
0x1842   :  { %v3853_v13 = vpop.xlane.xlu2 %3852 }
0x1843   :  { %5335 = vrcp.f32 %v3853_v13  ;;  %v4177_v57 = vpop.f32.mrf.mxu0  ;;  %v4066_v35 = vand.u32 2147483648, %v3853_v13  ;;  %v4064_v17 = vand.u32 2147483647, %v3853_v13  ;;  %vm4060_vm5 = vweird.f32 %v3853_v13 }
0x1844   :  { %4217 = vrot.lane.b32.xlu2 %v4177_v57, %s5476_s14 }
0x1845   :  { %v4067_v15 = vor.u32 1.1754944e-38, %v4066_v35  ;;  %vm4065_vm7 = vcmp.eq.f32.partialorder %v4064_v17, 8.507059e+37 }
0x1849   :  { %v5336_v24 = vpop.eup %5335 }
0x184a   :  { %v3856_v51 = vpop.xlane.xlu0 %3855  ;;  %v4056_v12 = vmul.f32 %v5336_v24, %v3853_v13  ;;  %vm4061_vm4 = vweird.f32 %v5336_v24 }
0x184b   :  { %5337 = vrcp.f32 %v3856_v51  ;;  %v4180_v16 = vpop.f32.mrf.mxu0  ;;  %vm4062_vm6 = vmor %vm4060_vm5, %vm4061_vm4  ;;  %v4081_v36 = vand.u32 2147483648, %v3856_v51  ;;  %v4079_v28 = vand.u32 2147483647, %v3856_v51  ;;  %vm4075_vm12 = vweird.f32 %v3856_v51 }
0x184c   :  { %v4057_v26 = vsub.f32 1.0, %v4056_v12  ;;  %4219 = vrot.lane.b32.xlu2 %v4180_v16, %s5476_s14 }
0x184d   :  { %v4082_v5 = vor.u32 1.1754944e-38, %v4081_v36  ;;  %vm4080_vm15 = vcmp.eq.f32.partialorder %v4079_v28, 8.507059e+37 }
0x184e   :  { %v4058_v34 = vmul.f32 %v5336_v24, %v4057_v26 }
0x1850   :  { %v4059_v43 = vadd.f32 %v5336_v24, %v4058_v34 }
0x1851   :  { %v5338_v1 = vpop.eup %5337 }
0x1852   :  { %v4071_v47 = vmul.f32 %v5338_v1, %v3856_v51  ;;  %v3859_v29 = vpop.xlane.xlu1 %3858  ;;  %v4063_v62 = vsel %vm4062_vm6, %v5336_v24, %v4059_v43  ;;  %vm4076_vm11 = vweird.f32 %v5338_v1 }
0x1853   :  { %5339 = vrcp.f32 %v3859_v29  ;;  %v4183_v32 = vpop.f32.mrf.mxu0  ;;  %v4068_v19 = vsel %vm4065_vm7, %v4067_v15, %v4063_v62  ;;  %vm4077_vm13 = vmor %vm4075_vm12, %vm4076_vm11  ;;  %v4096_v25 = vand.u32 2147483648, %v3859_v29  ;;  %vm4090_vm2 = vweird.f32 %v3859_v29 }
0x1854   :  { %v4072_v21 = vsub.f32 1.0, %v4071_v47  ;;  %4221 = vrot.lane.b32.xlu2 %v4183_v32, %s5476_s14  ;;  %v4069_v0 = vmul.f32 %v7252_v61, %v4068_v19  ;;  %v4094_v61 = vand.u32 2147483647, %v3859_v29 }
0x1855   :  { %v4097_v30 = vor.u32 1.1754944e-38, %v4096_v25 }
0x1856   :  { %v4073_v48 = vmul.f32 %v5338_v1, %v4072_v21  ;;  %4870 = vmatmul.msk.f32.gmra.mxu0 %vm1499_vm10, %v4069_v0  ;;  %vm4095_vm4 = vcmp.eq.f32.partialorder %v4094_v61, 8.507059e+37 }
0x1858   :  { %v4074_v63 = vadd.f32 %v5338_v1, %v4073_v48 }
0x1859   :  { %v5340_v27 = vpop.eup %5339 }
0x185a   :  { %v4078_v40 = vsel %vm4077_vm13, %v5338_v1, %v4074_v63  ;;  %v4086_v56 = vmul.f32 %v5340_v27, %v3859_v29  ;;  %vm4091_vm1 = vweird.f32 %v5340_v27 }
0x185b   :  { %v4083_v22 = vsel %vm4080_vm15, %v4082_v5, %v4078_v40  ;;  %v4186_v46 = vpop.f32.mrf.mxu0  ;;  %vm4092_vm3 = vmor %vm4090_vm2, %vm4091_vm1 }
0x185c   :  { %v4084_v41 = vmul.f32 %v7258_v60, %v4083_v22  ;;  %v4087_v52 = vsub.f32 1.0, %v4086_v56  ;;  %4223 = vrot.lane.b32.xlu2 %v4186_v46, %s5476_s14 }
0x185e   :  { %v4088_v4 = vmul.f32 %v5340_v27, %v4087_v52  ;;  %4871 = vmatmul.msk.f32.gmra.mxu0 %vm1499_vm10, %v4084_v41 }
0x1860   :  { %v4089_v8 = vadd.f32 %v5340_v27, %v4088_v4 }
0x1862   :  { %v4093_v2 = vsel %vm4092_vm3, %v5340_v27, %v4089_v8 }
0x1863   :  { %v4189_v44 = vpop.f32.mrf.mxu0  ;;  %v4098_v20 = vsel %vm4095_vm4, %v4097_v30, %v4093_v2  ;;  %v4422_v30 = vld [vmem:[#allocation4 + $0x268] sm:$0xff] }
0x1864   :  { %4233 = vrot.lane.b32.xlu0 %v4189_v44, %s5479_s19  ;;  %v4099_v60 = vmul.f32 %v7265_v55, %v4098_v20  ;;  %4449 = vmatpush.msra.mxu2 %v4422_v30 }
0x1866   :  { %4872 = vmatmul.msk.f32.gmra.mxu0 %vm1499_vm10, %v4099_v60  ;;  %4450 = vmatpush.msra.mxu2 %v4421_v50  ;;  %v4507_v50 = vld [vmem:[#allocation6 + $0x58] sm:$0xff] }
0x189c   :  { %v4192_v10 = vpop.f32.mrf.mxu0 }
0x189d   :  { %4235 = vrot.lane.b32.xlu0 %v4192_v10, %s5479_s19 }
0x189e   :  { %v4218_v9 = vpop.permute.xlu2 %4217 }
0x189f   :  { %v4261_v18 = vsel %vm449_vm14, %v7274_v45, %v4218_v9  ;;  %v4420_v9 = vld [vmem:[#allocation4 + $0x128] sm:$0xff] }
0x18a0   :  { %4451 = vmatpush.msra.mxu2 %v4420_v9  ;;  %v4506_v9 = vld [vmem:[#allocation6 + $0x48] sm:$0xff] }
0x18a4   :  { %v4195_v7 = vpop.f32.mrf.mxu0 }
0x18a5   :  { %4237 = vrot.lane.b32.xlu0 %v4195_v7, %s5479_s19 }
0x18a6   :  { %v4220_v51 = vpop.permute.xlu2 %4219 }
0x18a7   :  { %v4262_v16 = vsel %vm449_vm14, %v7278_v11, %v4220_v51 }
0x18ac   :  { %v4198_v38 = vpop.f32.mrf.mxu0 }
0x18ad   :  { %4239 = vrot.lane.b32.xlu0 %v4198_v38, %s5479_s19 }
0x18ae   :  { %v4222_v17 = vpop.permute.xlu2 %4221 }
0x18af   :  { %v4263_v1 = vsel %vm449_vm14, %v7282_v33, %v4222_v17  ;;  %v5028_v33 = vld [vmem:[%s7435_s5 + $0x1b] ss:$0 sm:$0xff] }
0x18b4   :  { %v4201_v53 = vpop.f32.mrf.mxu0 }
0x18b5   :  { %4249 = vrot.lane.b32.xlu1 %v4201_v53, %s5484_s6 }
0x18b6   :  { %v4224_v11 = vpop.permute.xlu2 %4223 }
0x18b7   :  { %v4264_v62 = vsel %vm449_vm14, %v7286_v6, %v4224_v11 }
0x18d3   :  { %v4204_v3 = vpop.f32.mrf.mxu0 }
0x18d4   :  { %4251 = vrot.lane.b32.xlu1 %v4204_v3, %s5484_s6 }
0x18d6   :  { %v4234_v31 = vpop.permute.xlu0 %4233 }
0x18d7   :  { %v4265_v13 = vsel %vm1048_vm8, %v4261_v18, %v4234_v31  ;;  %v4419_v31 = vld [vmem:[#allocation4 + $0x88] sm:$0xff] }
0x18d8   :  { %4452 = vmatpush.msra.mxu2 %v4419_v31  ;;  %v4505_v31 = vld [vmem:[#allocation6 + $0x38] sm:$0xff] }
0x18db   :  { %v4207_v55 = vpop.f32.mrf.mxu0 }
0x18dc   :  { %4253 = vrot.lane.b32.xlu1 %v4207_v55, %s5484_s6 }
0x18e3   :  { %v4210_v59 = vpop.f32.mrf.mxu0 }
0x18e4   :  { %4255 = vrot.lane.b32.xlu1 %v4210_v59, %s5484_s6 }
0x190f   :  { %v4236_v12 = vpop.permute.xlu0 %4235 }
0x1910   :  { %v4266_v26 = vsel %vm1048_vm8, %v4262_v16, %v4236_v12 }
0x1917   :  { %v4238_v45 = vpop.permute.xlu0 %4237 }
0x1918   :  { %v4267_v43 = vsel %vm1048_vm8, %v4263_v1, %v4238_v45  ;;  %v5030_v45 = vld [vmem:[%s7435_s5 + $0x1d] ss:$0 sm:$0xff] }
0x191f   :  { %v4240_v29 = vpop.permute.xlu0 %4239 }
0x1920   :  { %v4268_v21 = vsel %vm1048_vm8, %v4264_v62, %v4240_v29 }
0x1927   :  { %v4250_v57 = vpop.permute.xlu1 %4249 }
0x1928   :  { %v4269_v24 = vsel %vm1053_vm9, %v4265_v13, %v4250_v57 }
0x1929   :  { %4873 = vmatmul.msk.f32.vlgmr.msrb.gmra.mxu1 %vm113_vm0, %v4269_v24 }
0x1946   :  { %v4252_v34 = vpop.permute.xlu1 %4251 }
0x1947   :  { %v4270_v35 = vsel %vm1053_vm9, %v4266_v26, %v4252_v34 }
0x1948   :  { %4874 = vmatmul.msk.f32.gmra.mxu1 %vm113_vm0, %v4270_v35  ;;  %v5029_v35 = vld [vmem:[%s7435_s5 + $0x1c] ss:$0 sm:$0xff] }
0x194e   :  { %v4254_v47 = vpop.permute.xlu1 %4253 }
0x194f   :  { %v4271_v15 = vsel %vm1053_vm9, %v4267_v43, %v4254_v47 }
0x1950   :  { %4875 = vmatmul.msk.f32.gmra.mxu1 %vm113_vm0, %v4271_v15 }
0x1956   :  { %v4256_v32 = vpop.permute.xlu1 %4255 }
0x1957   :  { %v4272_v36 = vsel %vm1053_vm9, %v4268_v21, %v4256_v32 }
0x1958   :  { %4876 = vmatmul.msk.f32.gmra.mxu1 %vm113_vm0, %v4272_v36 }
0x19a6   :  { %v4303_v19 = vpop.f32.mrf.mxu1 }
0x19a7   :  { %v4304_v48 = vadd.f32 %v5028_v33, %v4303_v19 }
0x19a9   :  { %v7330_v28 = vadd.f32 %v4304_v48, %v6906_v54 }
0x19ab   :  { %v4321_v0 = vsel %vm113_vm0, %v7330_v28, 0.0 }
0x19ac   :  { %4322 = vadd.xlane.f32.xlu2 %v4321_v0 }
0x19c5   :  { %v4306_v6 = vpop.f32.mrf.mxu1 }
0x19c6   :  { %v4307_v63 = vadd.f32 %v5028_v33, %v4306_v6 }
0x19c8   :  { %v7335_v5 = vadd.f32 %v4307_v63, %v6918_v23 }
0x19ca   :  { %v4324_v27 = vsel %vm113_vm0, %v7335_v5, 0.0 }
0x19cb   :  { %4325 = vadd.xlane.f32.xlu0 %v4324_v27 }
0x19cd   :  { %v4309_v40 = vpop.f32.mrf.mxu1 }
0x19ce   :  { %v4310_v56 = vadd.f32 %v5028_v33, %v4309_v40 }
0x19d0   :  { %v7340_v22 = vadd.f32 %v4310_v56, %v6923_v49 }
0x19d2   :  { %v4327_v54 = vsel %vm113_vm0, %v7340_v22, 0.0 }
0x19d3   :  { %4328 = vadd.xlane.f32.xlu1 %v4327_v54 }
0x19d5   :  { %v4312_v46 = vpop.f32.mrf.mxu1 }
0x19d6   :  { %v4313_v41 = vadd.f32 %v5028_v33, %v4312_v46 }
0x19d8   :  { %v7345_v52 = vadd.f32 %v4313_v41, %v6928_v58 }
0x19da   :  { %v4330_v23 = vsel %vm113_vm0, %v7345_v52, 0.0 }
0x19db   :  { %4331 = vadd.xlane.f32.xlu2 %v4330_v23 }
0x1a1f   :  { %v4323_v25 = vpop.xlane.xlu2 %4322 }
0x1a20   :  { %v4333_v4 = vmul.f32 %v4323_v25, %v5540_v14 }
0x1a22   :  { %v4337_v61 = vsub.f32 %v7330_v28, %v4333_v4 }
0x1a24   :  { %v4341_v49 = vmul.f32 %v4337_v61, %v4337_v61 }
0x1a26   :  { %v4345_v8 = vsel %vm113_vm0, %v4341_v49, 0.0 }
0x1a27   :  { %4346 = vadd.xlane.f32.xlu0 %v4345_v8 }
0x1a3e   :  { %v4326_v2 = vpop.xlane.xlu0 %4325 }
0x1a3f   :  { %v4334_v44 = vmul.f32 %v4326_v2, %v5540_v14 }
0x1a41   :  { %v7354_v58 = vsub.f32 %v7335_v5, %v4334_v44 }
0x1a43   :  { %v4342_v20 = vmul.f32 %v7354_v58, %v7354_v58 }
0x1a45   :  { %v4348_v60 = vsel %vm113_vm0, %v4342_v20, 0.0 }
0x1a46   :  { %4349 = vadd.xlane.f32.xlu1 %v4348_v60  ;;  %v4329_v10 = vpop.xlane.xlu1 %4328 }
0x1a47   :  { %v4335_v7 = vmul.f32 %v4329_v10, %v5540_v14 }
0x1a49   :  { %v7361_v38 = vsub.f32 %v7340_v22, %v4335_v7 }
0x1a4b   :  { %v4343_v53 = vmul.f32 %v7361_v38, %v7361_v38 }
0x1a4d   :  { %v4351_v37 = vsel %vm113_vm0, %v4343_v53, 0.0 }
0x1a4e   :  { %v4332_v3 = vpop.xlane.xlu2 %4331  ;;  %4352 = vadd.xlane.f32.xlu2 %v4351_v37 }
0x1a4f   :  { %v4336_v55 = vmul.f32 %v4332_v3, %v5540_v14 }
0x1a51   :  { %v7368_v59 = vsub.f32 %v7345_v52, %v4336_v55 }
0x1a53   :  { %v4344_v42 = vmul.f32 %v7368_v59, %v7368_v59 }
0x1a55   :  { %v4354_v39 = vsel %vm113_vm0, %v4344_v42, 0.0 }
0x1a56   :  { %4355 = vadd.xlane.f32.xlu0 %v4354_v39  ;;  %v4509_v39 = vld [vmem:[#allocation6 + $0x78] sm:$0xff] }
0x1a57   :  { %4530 = vmatpush.msra.mxu1 %v4509_v39 }
0x1a9a   :  { %v4347_v18 = vpop.xlane.xlu0 %4346 }
0x1a9b   :  { %v4357_v13 = vmul.f32 %v4347_v18, %v5540_v14  ;;  %v4504_v18 = vld [vmem:[#allocation6 + $0x28] sm:$0xff] }
0x1a9d   :  { %v4361_v57 = vadd.f32 1e-05, %v4357_v13  ;;  %v4503_v13 = vld [vmem:[#allocation6 + $0x18] sm:$0xff] }
0x1a9f   :  { %5341 = vrsqrt.f32 %v4361_v57  ;;  %vm4371_vm8 = vweird.f32 %v4361_v57 }
0x1aa5   :  { %v5342_v24 = vpop.eup %5341 }
0x1aa6   :  { %v4366_v51 = vmul.f32 %v5342_v24, %v4361_v57  ;;  %vm4372_vm14 = vweird.f32 %v5342_v24  ;;  %v4502_v57 = vld [vmem:[#allocation6 + $0x8] sm:$0xff] }
0x1aa7   :  { %vm4373_vm9 = vmor %vm4371_vm8, %vm4372_vm14 }
0x1aa8   :  { %v4367_v12 = vmul.f32 %v5342_v24, %v4366_v51 }
0x1aaa   :  { %v4368_v16 = vmul.f32 0.5, %v4367_v12 }
0x1aac   :  { %v4369_v26 = vsub.f32 1.5, %v4368_v16 }
0x1aae   :  { %v4370_v34 = vmul.f32 %v5342_v24, %v4369_v26 }
0x1ab0   :  { %v4374_v17 = vsel %vm4373_vm9, %v5342_v24, %v4370_v34 }
0x1ab1   :  { %v4405_v1 = vmul.f32 %v4374_v17, %v4337_v61 }
0x1ab3   :  { %v4410_v43 = vmul.f32 %v5029_v35, %v4405_v1 }
0x1ab5   :  { %v4415_v47 = vadd.f32 %v5030_v45, %v4410_v43 }
0x1ab7   :  { %4877 = vmatmul.msk.f32.vlgmr.msra.gmra.mxu2 %vm113_vm0, %v4415_v47 }
0x1ab9   :  { %v4350_v15 = vpop.xlane.xlu1 %4349 }
0x1aba   :  { %v4358_v11 = vmul.f32 %v4350_v15, %v5540_v14 }
0x1abc   :  { %v4362_v29 = vadd.f32 1e-05, %v4358_v11 }
0x1abe   :  { %5343 = vrsqrt.f32 %v4362_v29  ;;  %vm4381_vm6 = vweird.f32 %v4362_v29 }
0x1ac1   :  { %v4353_v62 = vpop.xlane.xlu2 %4352 }
0x1ac2   :  { %v4359_v21 = vmul.f32 %v4353_v62, %v5540_v14 }
0x1ac4   :  { %v5344_v32 = vpop.eup %5343  ;;  %v4363_v36 = vadd.f32 1e-05, %v4359_v21 }
0x1ac5   :  { %v4376_v33 = vmul.f32 %v5344_v32, %v4362_v29  ;;  %vm4382_vm5 = vweird.f32 %v5344_v32 }
0x1ac6   :  { %5345 = vrsqrt.f32 %v4363_v36  ;;  %vm4383_vm7 = vmor %vm4381_vm6, %vm4382_vm5  ;;  %vm4391_vm12 = vweird.f32 %v4363_v36 }
0x1ac7   :  { %v4377_v19 = vmul.f32 %v5344_v32, %v4376_v33  ;;  %v4564_v33 = vld [vmem:[#allocation4 + $0x270] sm:$0xff] }
0x1ac8   :  { %4591 = vmatpush.msrb.mxu2 %v4564_v33 }
0x1ac9   :  { %v4378_v48 = vmul.f32 0.5, %v4377_v19  ;;  %v4356_v0 = vpop.xlane.xlu0 %4355 }
0x1aca   :  { %v4360_v6 = vmul.f32 %v4356_v0, %v5540_v14 }
0x1acb   :  { %v4379_v63 = vsub.f32 1.5, %v4378_v48 }
0x1acc   :  { %v5346_v27 = vpop.eup %5345  ;;  %v4364_v40 = vadd.f32 1e-05, %v4360_v6 }
0x1acd   :  { %v4380_v56 = vmul.f32 %v5344_v32, %v4379_v63  ;;  %v4386_v54 = vmul.f32 %v5346_v27, %v4363_v36  ;;  %vm4392_vm11 = vweird.f32 %v5346_v27 }
0x1ace   :  { %5347 = vrsqrt.f32 %v4364_v40  ;;  %vm4393_vm13 = vmor %vm4391_vm12, %vm4392_vm11  ;;  %vm4401_vm1 = vweird.f32 %v4364_v40 }
0x1acf   :  { %v4384_v46 = vsel %vm4383_vm7, %v5344_v32, %v4380_v56  ;;  %v4387_v41 = vmul.f32 %v5346_v27, %v4386_v54 }
0x1ad0   :  { %v4406_v23 = vmul.f32 %v4384_v46, %v7354_v58 }
0x1ad1   :  { %v4388_v25 = vmul.f32 0.5, %v4387_v41 }
0x1ad2   :  { %v4411_v4 = vmul.f32 %v5029_v35, %v4406_v23 }
0x1ad3   :  { %v4389_v61 = vsub.f32 1.5, %v4388_v25 }
0x1ad4   :  { %v5348_v49 = vpop.eup %5347  ;;  %v4416_v8 = vadd.f32 %v5030_v45, %v4411_v4 }
0x1ad5   :  { %v4390_v14 = vmul.f32 %v5346_v27, %v4389_v61  ;;  %v4396_v30 = vmul.f32 %v5348_v49, %v4364_v40  ;;  %vm4402_vm15 = vweird.f32 %v5348_v49 }
0x1ad6   :  { %4878 = vmatmul.msk.f32.gmra.mxu2 %vm113_vm0, %v4416_v8  ;;  %vm4403_vm2 = vmor %vm4401_vm1, %vm4402_vm15 }
0x1ad7   :  { %v4394_v2 = vsel %vm4393_vm13, %v5346_v27, %v4390_v14  ;;  %v4397_v44 = vmul.f32 %v5348_v49, %v4396_v30 }
0x1ad8   :  { %v4407_v20 = vmul.f32 %v4394_v2, %v7361_v38  ;;  %v4508_v38 = vld [vmem:[#allocation6 + $0x68] sm:$0xff] }
0x1ad9   :  { %v4398_v60 = vmul.f32 0.5, %v4397_v44  ;;  %4531 = vmatpush.msra.mxu1 %v4508_v38  ;;  %v4615_v38 = vld [vmem:[#allocation4 + $0x278] sm:$0xff] }
0x1ada   :  { %v4412_v10 = vmul.f32 %v5029_v35, %v4407_v20 }
0x1adb   :  { %v4399_v7 = vsub.f32 1.5, %v4398_v60  ;;  %4532 = vmatpush.msra.mxu1 %v4507_v50 }
0x1adc   :  { %v4417_v58 = vadd.f32 %v5030_v45, %v4412_v10 }
0x1add   :  { %v4400_v53 = vmul.f32 %v5348_v49, %v4399_v7  ;;  %4533 = vmatpush.msra.mxu1 %v4506_v9 }
0x1ade   :  { %4879 = vmatmul.msk.f32.gmra.mxu2 %vm113_vm0, %v4417_v58  ;;  %v4563_v58 = vld [vmem:[#allocation4 + $0x1d0] sm:$0xff] }
0x1adf   :  { %v4404_v37 = vsel %vm4403_vm2, %v5348_v49, %v4400_v53  ;;  %4534 = vmatpush.msra.mxu1 %v4505_v31  ;;  %4592 = vmatpush.msrb.mxu2 %v4563_v58  ;;  %v4562_v53 = vld [vmem:[#allocation4 + $0x130] sm:$0xff] }
0x1ae0   :  { %v4408_v3 = vmul.f32 %v4404_v37, %v7368_v59  ;;  %v5031_v59 = vld [vmem:[%s7435_s5 + $0x1e] ss:$0 sm:$0xff]  ;;  %v4561_v37 = vld [vmem:[#allocation4 + $0x90] sm:$0xff] }
0x1ae1   :  { %4535 = vmatpush.msra.mxu1 %v4504_v18  ;;  %4593 = vmatpush.msrb.mxu2 %v4562_v53 }
0x1ae2   :  { %v4413_v55 = vmul.f32 %v5029_v35, %v4408_v3  ;;  %v5032_v3 = vld [vmem:[%s7435_s5 + $0x1f] ss:$0 sm:$0xff] }
0x1ae3   :  { %4536 = vmatpush.msra.mxu1 %v4503_v13  ;;  %4594 = vmatpush.msrb.mxu2 %v4561_v37 }
0x1ae4   :  { %v4418_v42 = vadd.f32 %v5030_v45, %v4413_v55 }
0x1ae5   :  { %4537 = vmatpush.msra.mxu1 %v4502_v57 }
0x1ae6   :  { %4880 = vmatmul.msk.f32.gmra.mxu2 %vm113_vm0, %v4418_v42 }
0x1ae7   :  { %4642 = vmatpush.msrb.mxu1 %v4615_v38 }
0x1b3a   :  { %v4454_v24 = vpop.f32.mrf.mxu2 }
0x1b3b   :  { %v4455_v51 = vadd.f32 %v5031_v59, %v4454_v24 }
0x1b3d   :  { %v4466_v12 = vmul.f32 %v4455_v51, %v4455_v51 }
0x1b3f   :  { %v4470_v16 = vmul.f32 %v4466_v12, %v4455_v51  ;;  %v4613_v12 = vld [vmem:[#allocation4 + $0x138] sm:$0xff] }
0x1b41   :  { %v4474_v26 = vmul.f32 0.044715, %v4470_v16  ;;  %v4612_v16 = vld [vmem:[#allocation4 + $0x98] sm:$0xff] }
0x1b43   :  { %v4478_v34 = vadd.f32 %v4474_v26, %v4455_v51 }
0x1b45   :  { %v4482_v35 = vmul.f32 0.7978846, %v4478_v34 }
0x1b47   :  { %5349 = vtanh.f32 %v4482_v35 }
0x1b4d   :  { %v5350_v17 = vpop.eup %5349 }
0x1b4e   :  { %v4490_v45 = vadd.f32 1.0, %v5350_v17 }
0x1b50   :  { %v4494_v1 = vmul.f32 0.5, %v4490_v45 }
0x1b52   :  { %v4498_v43 = vmul.f32 %v4494_v1, %v4455_v51  ;;  %v4614_v51 = vld [vmem:[#allocation4 + $0x1d8] sm:$0xff] }
0x1b53   :  { %4643 = vmatpush.msrb.mxu1 %v4614_v51 }
0x1b54   :  { %4881 = vmatmul.msk.f32.vlgmr.msra.gmra.mxu1 %vm1499_vm10, %v4498_v43 }
0x1b55   :  { %4644 = vmatpush.msrb.mxu1 %v4613_v12 }
0x1b57   :  { %4645 = vmatpush.msrb.mxu1 %v4612_v16 }
0x1b59   :  { %v4457_v47 = vpop.f32.mrf.mxu2 }
0x1b5a   :  { %v4458_v15 = vadd.f32 %v5031_v59, %v4457_v47 }
0x1b5c   :  { %v4467_v11 = vmul.f32 %v4458_v15, %v4458_v15 }
0x1b5e   :  { %v4471_v29 = vmul.f32 %v4467_v11, %v4458_v15 }
0x1b60   :  { %v4475_v62 = vmul.f32 0.044715, %v4471_v29  ;;  %v5034_v29 = vld [vmem:[%s7435_s5 + $0x21] ss:$0 sm:$0xff] }
0x1b61   :  { %v4460_v21 = vpop.f32.mrf.mxu2 }
0x1b62   :  { %v4479_v32 = vadd.f32 %v4475_v62, %v4458_v15  ;;  %v4461_v36 = vadd.f32 %v5031_v59, %v4460_v21 }
0x1b64   :  { %v4483_v19 = vmul.f32 0.7978846, %v4479_v32  ;;  %v4468_v48 = vmul.f32 %v4461_v36, %v4461_v36 }
0x1b66   :  { %5351 = vtanh.f32 %v4483_v19  ;;  %v4472_v0 = vmul.f32 %v4468_v48, %v4461_v36 }
0x1b68   :  { %v4476_v6 = vmul.f32 0.044715, %v4472_v0 }
0x1b69   :  { %v4463_v63 = vpop.f32.mrf.mxu2 }
0x1b6a   :  { %v4480_v27 = vadd.f32 %v4476_v6, %v4461_v36  ;;  %v4464_v40 = vadd.f32 %v5031_v59, %v4463_v63 }
0x1b6c   :  { %v5352_v56 = vpop.eup %5351  ;;  %v4484_v54 = vmul.f32 0.7978846, %v4480_v27  ;;  %v4469_v46 = vmul.f32 %v4464_v40, %v4464_v40 }
0x1b6d   :  { %v4491_v41 = vadd.f32 1.0, %v5352_v56 }
0x1b6e   :  { %5353 = vtanh.f32 %v4484_v54  ;;  %v4473_v23 = vmul.f32 %v4469_v46, %v4464_v40 }
0x1b6f   :  { %v4495_v25 = vmul.f32 0.5, %v4491_v41 }
0x1b70   :  { %v4477_v4 = vmul.f32 0.044715, %v4473_v23 }
0x1b71   :  { %v4499_v61 = vmul.f32 %v4495_v25, %v4458_v15 }
0x1b72   :  { %v4481_v49 = vadd.f32 %v4477_v4, %v4464_v40 }
0x1b73   :  { %4882 = vmatmul.msk.f32.gmra.mxu1 %vm1499_vm10, %v4499_v61 }
0x1b74   :  { %v5354_v8 = vpop.eup %5353  ;;  %v4485_v14 = vmul.f32 0.7978846, %v4481_v49 }
0x1b75   :  { %v4492_v30 = vadd.f32 1.0, %v5354_v8 }
0x1b76   :  { %5355 = vtanh.f32 %v4485_v14 }
0x1b77   :  { %v4496_v2 = vmul.f32 0.5, %v4492_v30 }
0x1b79   :  { %v4500_v44 = vmul.f32 %v4496_v2, %v4461_v36 }
0x1b7b   :  { %4883 = vmatmul.msk.f32.gmra.mxu1 %vm1499_vm10, %v4500_v44 }
0x1b7c   :  { %v5356_v20 = vpop.eup %5355 }
0x1b7d   :  { %v4493_v60 = vadd.f32 1.0, %v5356_v20 }
0x1b7f   :  { %v4497_v10 = vmul.f32 0.5, %v4493_v60 }
0x1b81   :  { %v4501_v7 = vmul.f32 %v4497_v10, %v4464_v40 }
0x1b83   :  { %4884 = vmatmul.msk.f32.gmra.mxu1 %vm1499_vm10, %v4501_v7 }
0x1bd1   :  { %v4539_v55 = vpop.f32.mrf.mxu1 }
0x1bd2   :  { %v4551_v42 = vadd.f32 %v4539_v55, %v7330_v28 }
0x1bd4   :  { %v4557_v39 = vadd.f32 %v5032_v3, %v4551_v42 }
0x1bd6   :  { %4885 = vmatmul.msk.f32.vlgmr.msrb.gmra.mxu2 %vm113_vm0, %v4557_v39 }
0x1bf0   :  { %v4542_v50 = vpop.f32.mrf.mxu1 }
0x1bf1   :  { %v4552_v9 = vadd.f32 %v4542_v50, %v7335_v5  ;;  %v5033_v5 = vld [vmem:[%s7435_s5 + $0x20] ss:$0 sm:$0xff] }
0x1bf3   :  { %v4558_v31 = vadd.f32 %v5032_v3, %v4552_v9 }
0x1bf5   :  { %4886 = vmatmul.msk.f32.gmra.mxu2 %vm113_vm0, %v4558_v31 }
0x1bf8   :  { %v4545_v18 = vpop.f32.mrf.mxu1 }
0x1bf9   :  { %v4553_v13 = vadd.f32 %v4545_v18, %v7340_v22 }
0x1bfb   :  { %v4559_v57 = vadd.f32 %v5032_v3, %v4553_v13 }
0x1bfd   :  { %4887 = vmatmul.msk.f32.gmra.mxu2 %vm113_vm0, %v4559_v57 }
0x1c00   :  { %v4548_v59 = vpop.f32.mrf.mxu1 }
0x1c01   :  { %v4554_v28 = vadd.f32 %v4548_v59, %v7345_v52 }
0x1c03   :  { %v4560_v24 = vadd.f32 %v5032_v3, %v4554_v28 }
0x1c05   :  { %4888 = vmatmul.msk.f32.gmra.mxu2 %vm113_vm0, %v4560_v24 }
0x1c59   :  { %v4596_v22 = vpop.f32.mrf.mxu2 }
0x1c5a   :  { %v4597_v26 = vadd.f32 %v5033_v5, %v4596_v22 }
0x1c5c   :  { %v4608_v34 = vmax.f32 %v4597_v26, 0.0 }
0x1c5e   :  { %4889 = vmatmul.msk.f32.vlgmr.msrb.gmra.mxu1 %vm113_vm0, %v4608_v34 }
0x1c78   :  { %v4599_v35 = vpop.f32.mrf.mxu2 }
0x1c79   :  { %v4600_v52 = vadd.f32 %v5033_v5, %v4599_v35 }
0x1c7b   :  { %v4609_v17 = vmax.f32 %v4600_v52, 0.0 }
0x1c7d   :  { %4890 = vmatmul.msk.f32.gmra.mxu1 %vm113_vm0, %v4609_v17 }
0x1c80   :  { %v4602_v45 = vpop.f32.mrf.mxu2 }
0x1c81   :  { %v4603_v1 = vadd.f32 %v5033_v5, %v4602_v45 }
0x1c83   :  { %v4610_v43 = vmax.f32 %v4603_v1, 0.0 }
0x1c85   :  { %4891 = vmatmul.msk.f32.gmra.mxu1 %vm113_vm0, %v4610_v43 }
0x1c88   :  { %v4605_v47 = vpop.f32.mrf.mxu2 }
0x1c89   :  { %v4606_v15 = vadd.f32 %v5033_v5, %v4605_v47 }
0x1c8b   :  { %v4611_v11 = vmax.f32 %v4606_v15, 0.0 }
0x1c8d   :  { %4892 = vmatmul.msk.f32.gmra.mxu1 %vm113_vm0, %v4611_v11 }
0x1cdb   :  { %v4647_v62 = vpop.f32.mrf.mxu1 }
0x1cdc   :  { %v4648_v21 = vadd.f32 %v5034_v29, %v4647_v62 }
0x1cde   :  { %4659 = vst [vmem:[%s7437_s7] sm:$0xff] %v4648_v21 }
0x1cfa   :  { %v4650_v32 = vpop.f32.mrf.mxu1 }
0x1cfb   :  { %v4651_v36 = vadd.f32 %v5034_v29, %v4650_v32 }
0x1cfd   :  { %4660 = vst [vmem:[%s7437_s7 + $0x8] sm:$0xff] %v4651_v36 }
0x1d02   :  { %v4653_v33 = vpop.f32.mrf.mxu1 }
0x1d03   :  { %v4654_v19 = vadd.f32 %v5034_v29, %v4653_v33 }
0x1d05   :  { %4661 = vst [vmem:[%s7437_s7 + $0x10] sm:$0xff] %v4654_v19 }
0x1d0a   :  { %v4656_v48 = vpop.f32.mrf.mxu1 }
0x1d0b   :  { %v4657_v0 = vadd.f32 %v5034_v29, %v4656_v48 }
0x1d0d   :  { %4662 = vst [vmem:[%s7437_s7 + $0x18] sm:$0xff] %v4657_v0 }
0x1d0e   :  { %4667 = vsyncpa [#allocation3], 1 }
0x1d0f   :  { %4668 = vsyncpa [#allocation5], 1 }

</bundles_post_ra>
